<compile_context>
chip_gen: v6e
topology: v6e:2x2x1
jax: 0.10.0
libtpu: 0.0.40
codegen_flags: <defaults>
</compile_context>

<pallas_src>
import functools

import numpy as np
import jax
import jax.numpy as jnp
from jax import lax
from jax.experimental import pallas as pl
from jax.experimental.pallas import tpu as pltpu  # noqa: F401  (TPU backend)


_NEG_BIG = -1e9
_LN_EPS = 1e-5


# ----------------------------------------------------------------------------
# In-kernel building blocks (operate on jnp values; weights come in as Refs)
# ----------------------------------------------------------------------------
def _layernorm(v, ln):
    """v: (M, d); ln: (2, d) slab = [gamma; beta]. PyTorch LayerNorm, eps=1e-5."""
    g = ln[0:1, :]
    b = ln[1:2, :]
    mu = jnp.mean(v, axis=-1, keepdims=True)
    var = jnp.mean((v - mu) ** 2, axis=-1, keepdims=True)
    return (v - mu) * lax.rsqrt(var + _LN_EPS) * g + b


def _attention_core(q2, k2, v2, neg_mask, B, num_heads):
    """q2: (B*Sq, D); k2, v2: (B*Sk, D); neg_mask broadcastable to (B, Sq, Sk).

    Returns (ctx (B*Sq, D), attention weights (B, H, Sq, Sk)).
    The 1/sqrt(depth) scale is pre-folded into the Q projection at init time.
    """
    M, D = q2.shape
    Sq = M // B
    Sk = k2.shape[0] // B
    depth = D // num_heads
    q = q2.reshape(B, Sq, D)
    k = k2.reshape(B, Sk, D)
    v = v2.reshape(B, Sk, D)

    ctxs = []
    ws = []
    for h in range(num_heads):
        sl = slice(h * depth, (h + 1) * depth)
        logits = jnp.einsum('bqd,bkd->bqk', q[:, :, sl], k[:, :, sl],
                            preferred_element_type=jnp.float32) + neg_mask
        logits = logits - jnp.max(logits, axis=-1, keepdims=True)
        e = jnp.exp(logits)
        w = e / jnp.sum(e, axis=-1, keepdims=True)          # exact softmax
        ws.append(w)
        ctxs.append(jnp.einsum('bqk,bkd->bqd', w, v[:, :, sl],
                               preferred_element_type=jnp.float32))
    # One lane-concat -> a single output-projection matmul (instead of 4 tiny pushes).
    ctx = jnp.concatenate(ctxs, axis=-1).reshape(M, D)
    # Attention weights emitted directly in final (B, H, Sq, Sk) layout.
    w_all = jnp.stack(ws, axis=1)
    return ctx, w_all


def _mha_block(xq2, xkv2, neg_mask, p, ln, B, num_heads, fused_qkv):
    """MultiHeadAttention + residual + LayerNorm.  Returns (out (B*Sq, D), weights)."""
    D = xq2.shape[-1]
    if fused_qkv:                                            # self-attention: one QKV matmul
        qkv = jnp.dot(xq2, p["wqkv"][...],
                      preferred_element_type=jnp.float32) + p["bqkv"][...]
        q2, k2, v2 = qkv[:, :D], qkv[:, D:2 * D], qkv[:, 2 * D:]
    else:                                                    # cross-attention: Q from x, KV fused
        q2 = jnp.dot(xq2, p["wq"][...],
                     preferred_element_type=jnp.float32) + p["bq"][...]
        kv = jnp.dot(xkv2, p["wkv"][...],
                     preferred_element_type=jnp.float32) + p["bkv"][...]
        k2, v2 = kv[:, :D], kv[:, D:]
    ctx, w = _attention_core(q2, k2, v2, neg_mask, B, num_heads)
    y = jnp.dot(ctx, p["wo"][...], preferred_element_type=jnp.float32) + p["bo"][...] + xq2
    return _layernorm(y, ln[...]), w


def _ffn_block(x2, p, ln):
    """Linear -> LeakyReLU(0.2) -> Linear -> residual -> LayerNorm."""
    h = jnp.dot(x2, p["w1"][...], preferred_element_type=jnp.float32) + p["b1"][...]
    h = jnp.where(h > 0.0, h, 0.2 * h)
    y = jnp.dot(h, p["w2"][...], preferred_element_type=jnp.float32) + p["b2"][...]
    return _layernorm(y + x2, ln[...])


# ----------------------------------------------------------------------------
# The single fused kernel: whole Transformer forward in one grid=() invocation
# ----------------------------------------------------------------------------
def _transformer_kernel(*refs, treedef, n_outputs, num_heads):
    n_inputs = 5
    in_refs = refs[:n_inputs]
    param_refs = refs[n_inputs:len(refs) - n_outputs]
    out_refs = refs[len(refs) - n_outputs:]
    params = jax.tree_util.tree_unflatten(treedef, list(param_refs))

    inp_ref, tar_ref, encm_ref, lam_ref, decm_ref = in_refs
    B, S_enc, F = inp_ref.shape
    S_tar = tar_ref.shape[1]
    ep, dp = params["enc"], params["dec"]
    V, d_model = dp["embedding"].shape

    # Additive masks (1.0 = masked); broadcast happens in the logits add (VPU filler).
    enc_neg = encm_ref[...] * _NEG_BIG          # (B, 1, S_enc)
    la_neg = lam_ref[...] * _NEG_BIG            # (1, S_tar, S_tar)
    dec_neg = decm_ref[...] * _NEG_BIG          # (B, 1, S_enc)

    # ---------------- Encoder: video embedding ----------------
    emb = ep["emb"]
    x2 = _layernorm(inp_ref[...].reshape(B * S_enc, F), emb["ln_in"][...])
    x2 = jnp.dot(x2, emb["w"][...], preferred_element_type=jnp.float32) + emb["b"][...]
    x2 = jnp.maximum(x2, 0.0)                   # ReLU
    x2 = _layernorm(x2, emb["ln_mid"][...])
    pos_e = emb["pos"][...][:S_enc, :]
    x2 = (x2.reshape(B, S_enc, d_model) + pos_e[None, :, :]).reshape(B * S_enc, d_model)
    x2 = _layernorm(x2, emb["ln_out"][...])

    # ---------------- Encoder layers ----------------
    for lp in ep["layers"]:
        x2, _ = _mha_block(x2, x2, enc_neg, lp["mha"], lp["ln1"], B, num_heads, True)
        x2 = _ffn_block(x2, lp["ffn"], lp["ln2"])
    enc2 = x2                                   # (B*S_enc, d_model)

    # ---------------- Decoder: token embedding as one-hot matmul ----------------
    tar_i = tar_ref[...].reshape(B * S_tar, 1)                      # int32 ids
    iota = lax.broadcasted_iota(jnp.int32, (B * S_tar, V), 1)
    onehot = (iota == tar_i).astype(jnp.float32)
    y2 = jnp.dot(onehot, dp["embedding"][...], preferred_element_type=jnp.float32)
    y2 = y2 * (float(d_model) ** 0.5)
    pos_d = dp["pos"][...][:S_tar, :]
    y2 = (y2.reshape(B, S_tar, d_model) + pos_d[None, :, :]).reshape(B * S_tar, d_model)

    # ---------------- Decoder layers ----------------
    for i, lp in enumerate(dp["layers"]):
        y2, w1 = _mha_block(y2, y2, la_neg, lp["mha1"], lp["ln1"], B, num_heads, True)
        y2, w2 = _mha_block(y2, enc2, dec_neg, lp["mha2"], lp["ln2"], B, num_heads, False)
        y2 = _ffn_block(y2, lp["ffn"], lp["ln3"])
        out_refs[1 + 2 * i][...] = w1           # (B, H, S_tar, S_tar)
        out_refs[2 + 2 * i][...] = w2           # (B, H, S_tar, S_enc)

    # ---------------- Final projection ----------------
    fin = params["final"]
    logits = jnp.dot(y2, fin["W"][...], preferred_element_type=jnp.float32) + fin["b"][...]
    out_refs[0][...] = logits.reshape(B, S_tar, V)


# ----------------------------------------------------------------------------
# Wrapper: minimal-shape mask prep (metadata only) + a single pallas_call
# ----------------------------------------------------------------------------
def _prep_pad_mask(mask, B, Sk):
    # Padding masks are independent of the query position: pass as (B, 1, Sk).
    if mask is None:
        return jnp.zeros((B, 1, Sk), jnp.float32)
    return jnp.broadcast_to(mask.astype(jnp.float32), (B, 1, 1, Sk)).reshape(B, 1, Sk)


def _prep_look_ahead_mask(mask, Sq, Sk):
    # Look-ahead masks are independent of the batch element: pass as (1, Sq, Sk).
    if mask is None:
        return jnp.zeros((1, Sq, Sk), jnp.float32)
    return jnp.broadcast_to(mask.astype(jnp.float32), (1, 1, Sq, Sk)).reshape(1, Sq, Sk)


def transformer_forward(params, inp, tar, enc_padding_mask, look_ahead_mask,
                        dec_padding_mask, *, num_heads):
    B, S_enc, _ = inp.shape
    S_tar = tar.shape[1]
    num_layers = len(params["dec"]["layers"])
    V = params["final"]["W"].shape[1]

    enc_m = _prep_pad_mask(enc_padding_mask, B, S_enc)
    la_m = _prep_look_ahead_mask(look_ahead_mask, S_tar, S_tar)
    dec_m = _prep_pad_mask(dec_padding_mask, B, S_enc)
    tar3 = tar.astype(jnp.int32).reshape(B, S_tar, 1)

    leaves, treedef = jax.tree_util.tree_flatten(params)
    n_out = 1 + 2 * num_layers
    out_shapes = [jax.ShapeDtypeStruct((B, S_tar, V), jnp.float32)]
    for _ in range(num_layers):
        out_shapes.append(jax.ShapeDtypeStruct((B, num_heads, S_tar, S_tar), jnp.float32))
        out_shapes.append(jax.ShapeDtypeStruct((B, num_heads, S_tar, S_enc), jnp.float32))

    kern = functools.partial(_transformer_kernel, treedef=treedef,
                             n_outputs=n_out, num_heads=num_heads)
    outs = pl.pallas_call(kern, out_shape=tuple(out_shapes))(
        inp.astype(jnp.float32), tar3, enc_m, la_m, dec_m, *leaves)

    attention_weights = {}
    for i in range(num_layers):
        attention_weights[f"decoder_layer{i + 1}_block1"] = outs[1 + 2 * i]
        attention_weights[f"decoder_layer{i + 1}_block2"] = outs[2 + 2 * i]
    return outs[0], attention_weights


# ----------------------------------------------------------------------------
# Deterministic parameter construction (packed / MXU-friendly layouts)
# ----------------------------------------------------------------------------
def positional_encoding(position, d_model):
    pos = np.arange(position)[:, None].astype(np.float64)
    i = np.arange(d_model)[None, :]
    angle_rates = 1.0 / np.power(10000, 2 * (i // 2) / np.float32(d_model))
    angle_rads = pos * angle_rates
    angle_rads[:, 0::2] = np.sin(angle_rads[:, 0::2])
    angle_rads[:, 1::2] = np.cos(angle_rads[:, 1::2])
    return jnp.asarray(angle_rads, dtype=jnp.float32)        # (position, d_model)


def init_linear(key, fan_in, fan_out):
    k1, k2 = jax.random.split(key)
    return (jax.random.normal(k1, (fan_in, fan_out), jnp.float32) * 0.05,
            jax.random.normal(k2, (1, fan_out), jnp.float32) * 0.01)


def init_ln(d):
    # Packed [gamma; beta] slab -> single operand per LayerNorm.
    return jnp.concatenate([jnp.ones((1, d), jnp.float32),
                            jnp.zeros((1, d), jnp.float32)], axis=0)


def init_mha(key, d_model, num_heads, fused_qkv):
    ks = jax.random.split(key, 4)
    wq, bq = init_linear(ks[0], d_model, d_model)
    wk, bk = init_linear(ks[1], d_model, d_model)
    wv, bv = init_linear(ks[2], d_model, d_model)
    wo, bo = init_linear(ks[3], d_model, d_model)
    scale = float(d_model // num_heads) ** -0.5
    wq = wq * scale                    # fold 1/sqrt(depth) into the Q projection
    bq = bq * scale
    if fused_qkv:
        return {"wqkv": jnp.concatenate([wq, wk, wv], axis=1),
                "bqkv": jnp.concatenate([bq, bk, bv], axis=1),
                "wo": wo, "bo": bo}
    return {"wq": wq, "bq": bq,
            "wkv": jnp.concatenate([wk, wv], axis=1),
            "bkv": jnp.concatenate([bk, bv], axis=1),
            "wo": wo, "bo": bo}


def init_ffn(key, d_model, dff):
    k1, k2 = jax.random.split(key)
    w1, b1 = init_linear(k1, d_model, dff)
    w2, b2 = init_linear(k2, dff, d_model)
    return {"w1": w1, "b1": b1, "w2": w2, "b2": b2}


def init_encoder_layer(key, d_model, num_heads, dff):
    k1, k2 = jax.random.split(key)
    return {"mha": init_mha(k1, d_model, num_heads, fused_qkv=True),
            "ffn": init_ffn(k2, d_model, dff),
            "ln1": init_ln(d_model), "ln2": init_ln(d_model)}


def init_decoder_layer(key, d_model, num_heads, dff):
    k1, k2, k3 = jax.random.split(key, 3)
    return {"mha1": init_mha(k1, d_model, num_heads, fused_qkv=True),
            "mha2": init_mha(k2, d_model, num_heads, fused_qkv=False),
            "ffn": init_ffn(k3, d_model, dff),
            "ln1": init_ln(d_model), "ln2": init_ln(d_model), "ln3": init_ln(d_model)}


def init_transformer(key, num_layers, d_model, num_heads, dff,
                     video_feature_size, target_vocab_size, pos_input, pos_target):
    keys = jax.random.split(key, 5)
    enc_layer_keys = jax.random.split(keys[0], num_layers)
    dec_layer_keys = jax.random.split(keys[1], num_layers)
    w_emb, b_emb = init_linear(keys[2], video_feature_size, d_model)
    w_fin, b_fin = init_linear(keys[4], d_model, target_vocab_size)
    return {
        "enc": {
            "emb": {
                "ln_in": init_ln(video_feature_size),
                "w": w_emb, "b": b_emb,
                "ln_mid": init_ln(d_model),
                "ln_out": init_ln(d_model),
                "pos": positional_encoding(pos_input, d_model),
            },
            "layers": [init_encoder_layer(k, d_model, num_heads, dff)
                       for k in enc_layer_keys],
        },
        "dec": {
            "embedding": jax.random.normal(keys[3], (target_vocab_size, d_model),
                                           jnp.float32) * 0.05,
            "pos": positional_encoding(pos_target, d_model),
            "layers": [init_decoder_layer(k, d_model, num_heads, dff)
                       for k in dec_layer_keys],
        },
        "final": {"W": w_fin, "b": b_fin},
    }


# ----------------------------------------------------------------------------
if __name__ == "__main__":
    num_layers, d_model, num_heads, dff = 2, 32, 4, 64
    video_feature_size, target_vocab_size = 48, 40
    pos_input, pos_target = 64, 64
    B, S_enc, S_tar = 2, 8, 8

    key = jax.random.PRNGKey(0)
    kp, ki, kt = jax.random.split(key, 3)
    params = init_transformer(kp, num_layers, d_model, num_heads, dff,
                              video_feature_size, target_vocab_size,
                              pos_input, pos_target)

    inp = jax.random.normal(ki, (B, S_enc, video_feature_size), jnp.float32)
    tar = jax.random.randint(kt, (B, S_tar), 0, target_vocab_size, jnp.int32)

    # masks: 1.0 = masked out (added as -1e9), 0.0 = attend
    enc_padding_mask = jnp.zeros((B, 1, 1, S_enc), jnp.float32).at[1, 0, 0, -2:].set(1.0)
    look_ahead_mask = (1.0 - jnp.tril(jnp.ones((S_tar, S_tar), jnp.float32)))[None, None, :, :]
    dec_padding_mask = enc_padding_mask

    fwd = jax.jit(functools.partial(transformer_forward, num_heads=num_heads))
    final_output, attention_weights = fwd(params, inp, tar, enc_padding_mask,
                                          look_ahead_mask, dec_padding_mask)

    jax.block_until_ready(final_output)
    for v in attention_weights.values():
        jax.block_until_ready(v)

    assert final_output.shape == (B, S_tar, target_vocab_size)
    assert attention_weights["decoder_layer1_block1"].shape == (B, num_heads, S_tar, S_tar)
    assert attention_weights["decoder_layer2_block2"].shape == (B, num_heads, S_tar, S_enc)
    assert bool(jnp.all(jnp.isfinite(final_output)))
    row_sums = jnp.sum(attention_weights["decoder_layer1_block1"], axis=-1)
    assert bool(jnp.allclose(row_sums, 1.0, atol=1e-3))      # exact softmax in-kernel
    print("KERNEL_OK")
</pallas_src>

<mosaic_0001>
module attributes {stable_mosaic.version = 11 : i64} {
  func.func @_transformer_kernel(%arg0: memref<2x8x48xf32, #tpu.memory_space<vmem>>, %arg1: memref<2x8x1xi32, #tpu.memory_space<vmem>>, %arg2: memref<2x1x8xf32, #tpu.memory_space<vmem>>, %arg3: memref<1x8x8xf32, #tpu.memory_space<vmem>>, %arg4: memref<2x1x8xf32, #tpu.memory_space<vmem>>, %arg5: memref<40x32xf32, #tpu.memory_space<vmem>>, %arg6: memref<1x64xf32, #tpu.memory_space<vmem>>, %arg7: memref<1x32xf32, #tpu.memory_space<vmem>>, %arg8: memref<32x64xf32, #tpu.memory_space<vmem>>, %arg9: memref<64x32xf32, #tpu.memory_space<vmem>>, %arg10: memref<2x32xf32, #tpu.memory_space<vmem>>, %arg11: memref<2x32xf32, #tpu.memory_space<vmem>>, %arg12: memref<2x32xf32, #tpu.memory_space<vmem>>, %arg13: memref<1x32xf32, #tpu.memory_space<vmem>>, %arg14: memref<1x96xf32, #tpu.memory_space<vmem>>, %arg15: memref<32x32xf32, #tpu.memory_space<vmem>>, %arg16: memref<32x96xf32, #tpu.memory_space<vmem>>, %arg17: memref<1x64xf32, #tpu.memory_space<vmem>>, %arg18: memref<1x32xf32, #tpu.memory_space<vmem>>, %arg19: memref<1x32xf32, #tpu.memory_space<vmem>>, %arg20: memref<32x64xf32, #tpu.memory_space<vmem>>, %arg21: memref<32x32xf32, #tpu.memory_space<vmem>>, %arg22: memref<32x32xf32, #tpu.memory_space<vmem>>, %arg23: memref<1x64xf32, #tpu.memory_space<vmem>>, %arg24: memref<1x32xf32, #tpu.memory_space<vmem>>, %arg25: memref<32x64xf32, #tpu.memory_space<vmem>>, %arg26: memref<64x32xf32, #tpu.memory_space<vmem>>, %arg27: memref<2x32xf32, #tpu.memory_space<vmem>>, %arg28: memref<2x32xf32, #tpu.memory_space<vmem>>, %arg29: memref<2x32xf32, #tpu.memory_space<vmem>>, %arg30: memref<1x32xf32, #tpu.memory_space<vmem>>, %arg31: memref<1x96xf32, #tpu.memory_space<vmem>>, %arg32: memref<32x32xf32, #tpu.memory_space<vmem>>, %arg33: memref<32x96xf32, #tpu.memory_space<vmem>>, %arg34: memref<1x64xf32, #tpu.memory_space<vmem>>, %arg35: memref<1x32xf32, #tpu.memory_space<vmem>>, %arg36: memref<1x32xf32, #tpu.memory_space<vmem>>, %arg37: memref<32x64xf32, #tpu.memory_space<vmem>>, %arg38: memref<32x32xf32, #tpu.memory_space<vmem>>, %arg39: memref<32x32xf32, #tpu.memory_space<vmem>>, %arg40: memref<64x32xf32, #tpu.memory_space<vmem>>, %arg41: memref<1x32xf32, #tpu.memory_space<vmem>>, %arg42: memref<2x48xf32, #tpu.memory_space<vmem>>, %arg43: memref<2x32xf32, #tpu.memory_space<vmem>>, %arg44: memref<2x32xf32, #tpu.memory_space<vmem>>, %arg45: memref<64x32xf32, #tpu.memory_space<vmem>>, %arg46: memref<48x32xf32, #tpu.memory_space<vmem>>, %arg47: memref<1x64xf32, #tpu.memory_space<vmem>>, %arg48: memref<1x32xf32, #tpu.memory_space<vmem>>, %arg49: memref<32x64xf32, #tpu.memory_space<vmem>>, %arg50: memref<64x32xf32, #tpu.memory_space<vmem>>, %arg51: memref<2x32xf32, #tpu.memory_space<vmem>>, %arg52: memref<2x32xf32, #tpu.memory_space<vmem>>, %arg53: memref<1x32xf32, #tpu.memory_space<vmem>>, %arg54: memref<1x96xf32, #tpu.memory_space<vmem>>, %arg55: memref<32x32xf32, #tpu.memory_space<vmem>>, %arg56: memref<32x96xf32, #tpu.memory_space<vmem>>, %arg57: memref<1x64xf32, #tpu.memory_space<vmem>>, %arg58: memref<1x32xf32, #tpu.memory_space<vmem>>, %arg59: memref<32x64xf32, #tpu.memory_space<vmem>>, %arg60: memref<64x32xf32, #tpu.memory_space<vmem>>, %arg61: memref<2x32xf32, #tpu.memory_space<vmem>>, %arg62: memref<2x32xf32, #tpu.memory_space<vmem>>, %arg63: memref<1x32xf32, #tpu.memory_space<vmem>>, %arg64: memref<1x96xf32, #tpu.memory_space<vmem>>, %arg65: memref<32x32xf32, #tpu.memory_space<vmem>>, %arg66: memref<32x96xf32, #tpu.memory_space<vmem>>, %arg67: memref<32x40xf32, #tpu.memory_space<vmem>>, %arg68: memref<1x40xf32, #tpu.memory_space<vmem>>, %arg69: memref<2x8x40xf32, #tpu.memory_space<vmem>>, %arg70: memref<2x4x8x8xf32, #tpu.memory_space<vmem>>, %arg71: memref<2x4x8x8xf32, #tpu.memory_space<vmem>>, %arg72: memref<2x4x8x8xf32, #tpu.memory_space<vmem>>, %arg73: memref<2x4x8x8xf32, #tpu.memory_space<vmem>>) attributes {dimension_semantics = [], scalar_prefetch = 0 : i64, scratch_operands = 0 : i64, tpu.core_type = #tpu.core_type<tc>} {
    %c0 = arith.constant 0 : index
    %c0_0 = arith.constant 0 : index
    %c0_1 = arith.constant 0 : index
    %0 = vector.load %arg2[%c0, %c0_0, %c0_1] : memref<2x1x8xf32, #tpu.memory_space<vmem>>, vector<2x1x8xf32>
    %cst = arith.constant -1.000000e+09 : f32
    %1 = vector.broadcast %cst : f32 to vector<2x1x8xf32>
    %2 = arith.mulf %0, %1 : vector<2x1x8xf32>
    %c0_2 = arith.constant 0 : index
    %c0_3 = arith.constant 0 : index
    %c0_4 = arith.constant 0 : index
    %3 = vector.load %arg3[%c0_2, %c0_3, %c0_4] : memref<1x8x8xf32, #tpu.memory_space<vmem>>, vector<1x8x8xf32>
    %cst_5 = arith.constant -1.000000e+09 : f32
    %4 = vector.broadcast %cst_5 : f32 to vector<1x8x8xf32>
    %5 = arith.mulf %3, %4 : vector<1x8x8xf32>
    %c0_6 = arith.constant 0 : index
    %c0_7 = arith.constant 0 : index
    %c0_8 = arith.constant 0 : index
    %6 = vector.load %arg4[%c0_6, %c0_7, %c0_8] : memref<2x1x8xf32, #tpu.memory_space<vmem>>, vector<2x1x8xf32>
    %cst_9 = arith.constant -1.000000e+09 : f32
    %7 = vector.broadcast %cst_9 : f32 to vector<2x1x8xf32>
    %8 = arith.mulf %6, %7 : vector<2x1x8xf32>
    %c0_10 = arith.constant 0 : index
    %c0_11 = arith.constant 0 : index
    %c0_12 = arith.constant 0 : index
    %9 = vector.load %arg0[%c0_10, %c0_11, %c0_12] : memref<2x8x48xf32, #tpu.memory_space<vmem>>, vector<2x8x48xf32>
    %10 = vector.shape_cast %9 : vector<2x8x48xf32> to vector<16x48xf32>
    %c0_13 = arith.constant 0 : index
    %c0_14 = arith.constant 0 : index
    %11 = vector.load %arg42[%c0_13, %c0_14] : memref<2x48xf32, #tpu.memory_space<vmem>>, vector<2x48xf32>
    %12 = vector.extract_strided_slice %11 {offsets = [0, 0], sizes = [1, 48], strides = [1, 1]} : vector<2x48xf32> to vector<1x48xf32>
    %13 = vector.extract_strided_slice %11 {offsets = [1, 0], sizes = [1, 48], strides = [1, 1]} : vector<2x48xf32> to vector<1x48xf32>
    %cst_15 = arith.constant dense<0.000000e+00> : vector<16xf32>
    %14 = vector.multi_reduction <add>, %10, %cst_15 [1] : vector<16x48xf32> to vector<16xf32>
    %15 = vector.shape_cast %14 : vector<16xf32> to vector<16x1xf32>
    %cst_16 = arith.constant 4.800000e+01 : f32
    %16 = vector.broadcast %cst_16 : f32 to vector<16x1xf32>
    %17 = arith.divf %15, %16 : vector<16x1xf32>
    %18 = vector.broadcast %17 : vector<16x1xf32> to vector<16x48xf32>
    %19 = arith.subf %10, %18 : vector<16x48xf32>
    %20 = arith.mulf %19, %19 : vector<16x48xf32>
    %cst_17 = arith.constant dense<0.000000e+00> : vector<16xf32>
    %21 = vector.multi_reduction <add>, %20, %cst_17 [1] : vector<16x48xf32> to vector<16xf32>
    %22 = vector.shape_cast %21 : vector<16xf32> to vector<16x1xf32>
    %cst_18 = arith.constant 4.800000e+01 : f32
    %23 = vector.broadcast %cst_18 : f32 to vector<16x1xf32>
    %24 = arith.divf %22, %23 : vector<16x1xf32>
    %25 = vector.broadcast %17 : vector<16x1xf32> to vector<16x48xf32>
    %26 = arith.subf %10, %25 : vector<16x48xf32>
    %cst_19 = arith.constant 9.99999974E-6 : f32
    %27 = vector.broadcast %cst_19 : f32 to vector<16x1xf32>
    %28 = arith.addf %24, %27 : vector<16x1xf32>
    %29 = math.rsqrt %28 : vector<16x1xf32>
    %30 = vector.broadcast %29 : vector<16x1xf32> to vector<16x48xf32>
    %31 = arith.mulf %26, %30 : vector<16x48xf32>
    %32 = vector.broadcast %12 : vector<1x48xf32> to vector<16x48xf32>
    %33 = arith.mulf %31, %32 : vector<16x48xf32>
    %34 = vector.broadcast %13 : vector<1x48xf32> to vector<16x48xf32>
    %35 = arith.addf %33, %34 : vector<16x48xf32>
    %c0_20 = arith.constant 0 : index
    %c0_21 = arith.constant 0 : index
    %36 = vector.load %arg46[%c0_20, %c0_21] : memref<48x32xf32, #tpu.memory_space<vmem>>, vector<48x32xf32>
    %cst_22 = arith.constant dense<0.000000e+00> : vector<16x32xf32>
    %37 = tpu.matmul %35, %36, %cst_22 {dimension_numbers = #tpu.dot_dimension_numbers<[1], [0], [0], [1], [0, 0, 1, 1], [], []>} : vector<16x48xf32>, vector<48x32xf32>, vector<16x32xf32> -> vector<16x32xf32>
    %c0_23 = arith.constant 0 : index
    %c0_24 = arith.constant 0 : index
    %38 = vector.load %arg41[%c0_23, %c0_24] : memref<1x32xf32, #tpu.memory_space<vmem>>, vector<1x32xf32>
    %39 = vector.broadcast %38 : vector<1x32xf32> to vector<16x32xf32>
    %40 = arith.addf %37, %39 : vector<16x32xf32>
    %cst_25 = arith.constant 0.000000e+00 : f32
    %41 = vector.broadcast %cst_25 : f32 to vector<16x32xf32>
    %42 = arith.maximumf %40, %41 : vector<16x32xf32>
    %c0_26 = arith.constant 0 : index
    %c0_27 = arith.constant 0 : index
    %43 = vector.load %arg43[%c0_26, %c0_27] : memref<2x32xf32, #tpu.memory_space<vmem>>, vector<2x32xf32>
    %44 = vector.extract_strided_slice %43 {offsets = [0, 0], sizes = [1, 32], strides = [1, 1]} : vector<2x32xf32> to vector<1x32xf32>
    %45 = vector.extract_strided_slice %43 {offsets = [1, 0], sizes = [1, 32], strides = [1, 1]} : vector<2x32xf32> to vector<1x32xf32>
    %cst_28 = arith.constant dense<0.000000e+00> : vector<16xf32>
    %46 = vector.multi_reduction <add>, %42, %cst_28 [1] : vector<16x32xf32> to vector<16xf32>
    %47 = vector.shape_cast %46 : vector<16xf32> to vector<16x1xf32>
    %cst_29 = arith.constant 3.200000e+01 : f32
    %48 = vector.broadcast %cst_29 : f32 to vector<16x1xf32>
    %49 = arith.divf %47, %48 : vector<16x1xf32>
    %50 = vector.broadcast %49 : vector<16x1xf32> to vector<16x32xf32>
    %51 = arith.subf %42, %50 : vector<16x32xf32>
    %52 = arith.mulf %51, %51 : vector<16x32xf32>
    %cst_30 = arith.constant dense<0.000000e+00> : vector<16xf32>
    %53 = vector.multi_reduction <add>, %52, %cst_30 [1] : vector<16x32xf32> to vector<16xf32>
    %54 = vector.shape_cast %53 : vector<16xf32> to vector<16x1xf32>
    %cst_31 = arith.constant 3.200000e+01 : f32
    %55 = vector.broadcast %cst_31 : f32 to vector<16x1xf32>
    %56 = arith.divf %54, %55 : vector<16x1xf32>
    %57 = vector.broadcast %49 : vector<16x1xf32> to vector<16x32xf32>
    %58 = arith.subf %42, %57 : vector<16x32xf32>
    %cst_32 = arith.constant 9.99999974E-6 : f32
    %59 = vector.broadcast %cst_32 : f32 to vector<16x1xf32>
    %60 = arith.addf %56, %59 : vector<16x1xf32>
    %61 = math.rsqrt %60 : vector<16x1xf32>
    %62 = vector.broadcast %61 : vector<16x1xf32> to vector<16x32xf32>
    %63 = arith.mulf %58, %62 : vector<16x32xf32>
    %64 = vector.broadcast %44 : vector<1x32xf32> to vector<16x32xf32>
    %65 = arith.mulf %63, %64 : vector<16x32xf32>
    %66 = vector.broadcast %45 : vector<1x32xf32> to vector<16x32xf32>
    %67 = arith.addf %65, %66 : vector<16x32xf32>
    %c0_33 = arith.constant 0 : index
    %c0_34 = arith.constant 0 : index
    %68 = vector.load %arg45[%c0_33, %c0_34] : memref<64x32xf32, #tpu.memory_space<vmem>>, vector<64x32xf32>
    %69 = vector.extract_strided_slice %68 {offsets = [0, 0], sizes = [8, 32], strides = [1, 1]} : vector<64x32xf32> to vector<8x32xf32>
    %70 = vector.shape_cast %67 : vector<16x32xf32> to vector<2x8x32xf32>
    %71 = vector.shape_cast %69 : vector<8x32xf32> to vector<1x8x32xf32>
    %72 = vector.broadcast %71 : vector<1x8x32xf32> to vector<2x8x32xf32>
    %73 = arith.addf %70, %72 : vector<2x8x32xf32>
    %74 = vector.shape_cast %73 : vector<2x8x32xf32> to vector<16x32xf32>
    %c0_35 = arith.constant 0 : index
    %c0_36 = arith.constant 0 : index
    %75 = vector.load %arg44[%c0_35, %c0_36] : memref<2x32xf32, #tpu.memory_space<vmem>>, vector<2x32xf32>
    %76 = vector.extract_strided_slice %75 {offsets = [0, 0], sizes = [1, 32], strides = [1, 1]} : vector<2x32xf32> to vector<1x32xf32>
    %77 = vector.extract_strided_slice %75 {offsets = [1, 0], sizes = [1, 32], strides = [1, 1]} : vector<2x32xf32> to vector<1x32xf32>
    %cst_37 = arith.constant dense<0.000000e+00> : vector<16xf32>
    %78 = vector.multi_reduction <add>, %74, %cst_37 [1] : vector<16x32xf32> to vector<16xf32>
    %79 = vector.shape_cast %78 : vector<16xf32> to vector<16x1xf32>
    %cst_38 = arith.constant 3.200000e+01 : f32
    %80 = vector.broadcast %cst_38 : f32 to vector<16x1xf32>
    %81 = arith.divf %79, %80 : vector<16x1xf32>
    %82 = vector.broadcast %81 : vector<16x1xf32> to vector<16x32xf32>
    %83 = arith.subf %74, %82 : vector<16x32xf32>
    %84 = arith.mulf %83, %83 : vector<16x32xf32>
    %cst_39 = arith.constant dense<0.000000e+00> : vector<16xf32>
    %85 = vector.multi_reduction <add>, %84, %cst_39 [1] : vector<16x32xf32> to vector<16xf32>
    %86 = vector.shape_cast %85 : vector<16xf32> to vector<16x1xf32>
    %cst_40 = arith.constant 3.200000e+01 : f32
    %87 = vector.broadcast %cst_40 : f32 to vector<16x1xf32>
    %88 = arith.divf %86, %87 : vector<16x1xf32>
    %89 = vector.broadcast %81 : vector<16x1xf32> to vector<16x32xf32>
    %90 = arith.subf %74, %89 : vector<16x32xf32>
    %cst_41 = arith.constant 9.99999974E-6 : f32
    %91 = vector.broadcast %cst_41 : f32 to vector<16x1xf32>
    %92 = arith.addf %88, %91 : vector<16x1xf32>
    %93 = math.rsqrt %92 : vector<16x1xf32>
    %94 = vector.broadcast %93 : vector<16x1xf32> to vector<16x32xf32>
    %95 = arith.mulf %90, %94 : vector<16x32xf32>
    %96 = vector.broadcast %76 : vector<1x32xf32> to vector<16x32xf32>
    %97 = arith.mulf %95, %96 : vector<16x32xf32>
    %98 = vector.broadcast %77 : vector<1x32xf32> to vector<16x32xf32>
    %99 = arith.addf %97, %98 : vector<16x32xf32>
    %c0_42 = arith.constant 0 : index
    %c0_43 = arith.constant 0 : index
    %100 = vector.load %arg56[%c0_42, %c0_43] : memref<32x96xf32, #tpu.memory_space<vmem>>, vector<32x96xf32>
    %cst_44 = arith.constant dense<0.000000e+00> : vector<16x96xf32>
    %101 = tpu.matmul %99, %100, %cst_44 {dimension_numbers = #tpu.dot_dimension_numbers<[1], [0], [0], [1], [0, 0, 1, 1], [], []>} : vector<16x32xf32>, vector<32x96xf32>, vector<16x96xf32> -> vector<16x96xf32>
    %c0_45 = arith.constant 0 : index
    %c0_46 = arith.constant 0 : index
    %102 = vector.load %arg54[%c0_45, %c0_46] : memref<1x96xf32, #tpu.memory_space<vmem>>, vector<1x96xf32>
    %103 = vector.broadcast %102 : vector<1x96xf32> to vector<16x96xf32>
    %104 = arith.addf %101, %103 : vector<16x96xf32>
    %105 = vector.extract_strided_slice %104 {offsets = [0, 0], sizes = [16, 32], strides = [1, 1]} : vector<16x96xf32> to vector<16x32xf32>
    %106 = vector.extract_strided_slice %104 {offsets = [0, 32], sizes = [16, 32], strides = [1, 1]} : vector<16x96xf32> to vector<16x32xf32>
    %107 = vector.extract_strided_slice %104 {offsets = [0, 64], sizes = [16, 32], strides = [1, 1]} : vector<16x96xf32> to vector<16x32xf32>
    %108 = vector.shape_cast %105 : vector<16x32xf32> to vector<2x8x32xf32>
    %109 = vector.shape_cast %106 : vector<16x32xf32> to vector<2x8x32xf32>
    %110 = vector.shape_cast %107 : vector<16x32xf32> to vector<2x8x32xf32>
    %111 = vector.extract_strided_slice %108 {offsets = [0, 0, 0], sizes = [2, 8, 8], strides = [1, 1, 1]} : vector<2x8x32xf32> to vector<2x8x8xf32>
    %112 = vector.extract_strided_slice %109 {offsets = [0, 0, 0], sizes = [2, 8, 8], strides = [1, 1, 1]} : vector<2x8x32xf32> to vector<2x8x8xf32>
    "tpu.trace_start"() <{level = 10 : i32, message = "bqd,bkd->bqk"}> : () -> ()
    %cst_47 = arith.constant dense<0.000000e+00> : vector<2x8x8xf32>
    %113 = tpu.matmul %111, %112, %cst_47 {dimension_numbers = #tpu.dot_dimension_numbers<[2], [2], [1], [1], [0, 0, 0, 1, 1, 1], [0], [0]>} : vector<2x8x8xf32>, vector<2x8x8xf32>, vector<2x8x8xf32> -> vector<2x8x8xf32>
    "tpu.trace_stop"() : () -> ()
    %114 = vector.broadcast %2 : vector<2x1x8xf32> to vector<2x8x8xf32>
    %115 = arith.addf %113, %114 : vector<2x8x8xf32>
    %cst_48 = arith.constant dense<0xFF800000> : vector<2x8xf32>
    %116 = vector.multi_reduction <maximumf>, %115, %cst_48 [2] : vector<2x8x8xf32> to vector<2x8xf32>
    %117 = vector.shape_cast %116 : vector<2x8xf32> to vector<2x8x1xf32>
    %118 = vector.broadcast %117 : vector<2x8x1xf32> to vector<2x8x8xf32>
    %119 = arith.subf %115, %118 : vector<2x8x8xf32>
    %120 = math.exp %119 : vector<2x8x8xf32>
    %cst_49 = arith.constant dense<0.000000e+00> : vector<2x8xf32>
    %121 = vector.multi_reduction <add>, %120, %cst_49 [2] : vector<2x8x8xf32> to vector<2x8xf32>
    %122 = vector.shape_cast %121 : vector<2x8xf32> to vector<2x8x1xf32>
    %123 = vector.broadcast %122 : vector<2x8x1xf32> to vector<2x8x8xf32>
    %124 = arith.divf %120, %123 : vector<2x8x8xf32>
    %125 = vector.extract_strided_slice %110 {offsets = [0, 0, 0], sizes = [2, 8, 8], strides = [1, 1, 1]} : vector<2x8x32xf32> to vector<2x8x8xf32>
    "tpu.trace_start"() <{level = 10 : i32, message = "bqk,bkd->bqd"}> : () -> ()
    %cst_50 = arith.constant dense<0.000000e+00> : vector<2x8x8xf32>
    %126 = tpu.matmul %124, %125, %cst_50 {dimension_numbers = #tpu.dot_dimension_numbers<[2], [1], [1], [2], [0, 0, 0, 1, 1, 2], [0], [0]>} : vector<2x8x8xf32>, vector<2x8x8xf32>, vector<2x8x8xf32> -> vector<2x8x8xf32>
    "tpu.trace_stop"() : () -> ()
    %127 = vector.extract_strided_slice %108 {offsets = [0, 0, 8], sizes = [2, 8, 8], strides = [1, 1, 1]} : vector<2x8x32xf32> to vector<2x8x8xf32>
    %128 = vector.extract_strided_slice %109 {offsets = [0, 0, 8], sizes = [2, 8, 8], strides = [1, 1, 1]} : vector<2x8x32xf32> to vector<2x8x8xf32>
    "tpu.trace_start"() <{level = 10 : i32, message = "bqd,bkd->bqk"}> : () -> ()
    %cst_51 = arith.constant dense<0.000000e+00> : vector<2x8x8xf32>
    %129 = tpu.matmul %127, %128, %cst_51 {dimension_numbers = #tpu.dot_dimension_numbers<[2], [2], [1], [1], [0, 0, 0, 1, 1, 1], [0], [0]>} : vector<2x8x8xf32>, vector<2x8x8xf32>, vector<2x8x8xf32> -> vector<2x8x8xf32>
    "tpu.trace_stop"() : () -> ()
    %130 = vector.broadcast %2 : vector<2x1x8xf32> to vector<2x8x8xf32>
    %131 = arith.addf %129, %130 : vector<2x8x8xf32>
    %cst_52 = arith.constant dense<0xFF800000> : vector<2x8xf32>
    %132 = vector.multi_reduction <maximumf>, %131, %cst_52 [2] : vector<2x8x8xf32> to vector<2x8xf32>
    %133 = vector.shape_cast %132 : vector<2x8xf32> to vector<2x8x1xf32>
    %134 = vector.broadcast %133 : vector<2x8x1xf32> to vector<2x8x8xf32>
    %135 = arith.subf %131, %134 : vector<2x8x8xf32>
    %136 = math.exp %135 : vector<2x8x8xf32>
    %cst_53 = arith.constant dense<0.000000e+00> : vector<2x8xf32>
    %137 = vector.multi_reduction <add>, %136, %cst_53 [2] : vector<2x8x8xf32> to vector<2x8xf32>
    %138 = vector.shape_cast %137 : vector<2x8xf32> to vector<2x8x1xf32>
    %139 = vector.broadcast %138 : vector<2x8x1xf32> to vector<2x8x8xf32>
    %140 = arith.divf %136, %139 : vector<2x8x8xf32>
    %141 = vector.extract_strided_slice %110 {offsets = [0, 0, 8], sizes = [2, 8, 8], strides = [1, 1, 1]} : vector<2x8x32xf32> to vector<2x8x8xf32>
    "tpu.trace_start"() <{level = 10 : i32, message = "bqk,bkd->bqd"}> : () -> ()
    %cst_54 = arith.constant dense<0.000000e+00> : vector<2x8x8xf32>
    %142 = tpu.matmul %140, %141, %cst_54 {dimension_numbers = #tpu.dot_dimension_numbers<[2], [1], [1], [2], [0, 0, 0, 1, 1, 2], [0], [0]>} : vector<2x8x8xf32>, vector<2x8x8xf32>, vector<2x8x8xf32> -> vector<2x8x8xf32>
    "tpu.trace_stop"() : () -> ()
    %143 = vector.extract_strided_slice %108 {offsets = [0, 0, 16], sizes = [2, 8, 8], strides = [1, 1, 1]} : vector<2x8x32xf32> to vector<2x8x8xf32>
    %144 = vector.extract_strided_slice %109 {offsets = [0, 0, 16], sizes = [2, 8, 8], strides = [1, 1, 1]} : vector<2x8x32xf32> to vector<2x8x8xf32>
    "tpu.trace_start"() <{level = 10 : i32, message = "bqd,bkd->bqk"}> : () -> ()
    %cst_55 = arith.constant dense<0.000000e+00> : vector<2x8x8xf32>
    %145 = tpu.matmul %143, %144, %cst_55 {dimension_numbers = #tpu.dot_dimension_numbers<[2], [2], [1], [1], [0, 0, 0, 1, 1, 1], [0], [0]>} : vector<2x8x8xf32>, vector<2x8x8xf32>, vector<2x8x8xf32> -> vector<2x8x8xf32>
    "tpu.trace_stop"() : () -> ()
    %146 = vector.broadcast %2 : vector<2x1x8xf32> to vector<2x8x8xf32>
    %147 = arith.addf %145, %146 : vector<2x8x8xf32>
    %cst_56 = arith.constant dense<0xFF800000> : vector<2x8xf32>
    %148 = vector.multi_reduction <maximumf>, %147, %cst_56 [2] : vector<2x8x8xf32> to vector<2x8xf32>
    %149 = vector.shape_cast %148 : vector<2x8xf32> to vector<2x8x1xf32>
    %150 = vector.broadcast %149 : vector<2x8x1xf32> to vector<2x8x8xf32>
    %151 = arith.subf %147, %150 : vector<2x8x8xf32>
    %152 = math.exp %151 : vector<2x8x8xf32>
    %cst_57 = arith.constant dense<0.000000e+00> : vector<2x8xf32>
    %153 = vector.multi_reduction <add>, %152, %cst_57 [2] : vector<2x8x8xf32> to vector<2x8xf32>
    %154 = vector.shape_cast %153 : vector<2x8xf32> to vector<2x8x1xf32>
    %155 = vector.broadcast %154 : vector<2x8x1xf32> to vector<2x8x8xf32>
    %156 = arith.divf %152, %155 : vector<2x8x8xf32>
    %157 = vector.extract_strided_slice %110 {offsets = [0, 0, 16], sizes = [2, 8, 8], strides = [1, 1, 1]} : vector<2x8x32xf32> to vector<2x8x8xf32>
    "tpu.trace_start"() <{level = 10 : i32, message = "bqk,bkd->bqd"}> : () -> ()
    %cst_58 = arith.constant dense<0.000000e+00> : vector<2x8x8xf32>
    %158 = tpu.matmul %156, %157, %cst_58 {dimension_numbers = #tpu.dot_dimension_numbers<[2], [1], [1], [2], [0, 0, 0, 1, 1, 2], [0], [0]>} : vector<2x8x8xf32>, vector<2x8x8xf32>, vector<2x8x8xf32> -> vector<2x8x8xf32>
    "tpu.trace_stop"() : () -> ()
    %159 = vector.extract_strided_slice %108 {offsets = [0, 0, 24], sizes = [2, 8, 8], strides = [1, 1, 1]} : vector<2x8x32xf32> to vector<2x8x8xf32>
    %160 = vector.extract_strided_slice %109 {offsets = [0, 0, 24], sizes = [2, 8, 8], strides = [1, 1, 1]} : vector<2x8x32xf32> to vector<2x8x8xf32>
    "tpu.trace_start"() <{level = 10 : i32, message = "bqd,bkd->bqk"}> : () -> ()
    %cst_59 = arith.constant dense<0.000000e+00> : vector<2x8x8xf32>
    %161 = tpu.matmul %159, %160, %cst_59 {dimension_numbers = #tpu.dot_dimension_numbers<[2], [2], [1], [1], [0, 0, 0, 1, 1, 1], [0], [0]>} : vector<2x8x8xf32>, vector<2x8x8xf32>, vector<2x8x8xf32> -> vector<2x8x8xf32>
    "tpu.trace_stop"() : () -> ()
    %162 = vector.broadcast %2 : vector<2x1x8xf32> to vector<2x8x8xf32>
    %163 = arith.addf %161, %162 : vector<2x8x8xf32>
    %cst_60 = arith.constant dense<0xFF800000> : vector<2x8xf32>
    %164 = vector.multi_reduction <maximumf>, %163, %cst_60 [2] : vector<2x8x8xf32> to vector<2x8xf32>
    %165 = vector.shape_cast %164 : vector<2x8xf32> to vector<2x8x1xf32>
    %166 = vector.broadcast %165 : vector<2x8x1xf32> to vector<2x8x8xf32>
    %167 = arith.subf %163, %166 : vector<2x8x8xf32>
    %168 = math.exp %167 : vector<2x8x8xf32>
    %cst_61 = arith.constant dense<0.000000e+00> : vector<2x8xf32>
    %169 = vector.multi_reduction <add>, %168, %cst_61 [2] : vector<2x8x8xf32> to vector<2x8xf32>
    %170 = vector.shape_cast %169 : vector<2x8xf32> to vector<2x8x1xf32>
    %171 = vector.broadcast %170 : vector<2x8x1xf32> to vector<2x8x8xf32>
    %172 = arith.divf %168, %171 : vector<2x8x8xf32>
    %173 = vector.extract_strided_slice %110 {offsets = [0, 0, 24], sizes = [2, 8, 8], strides = [1, 1, 1]} : vector<2x8x32xf32> to vector<2x8x8xf32>
    "tpu.trace_start"() <{level = 10 : i32, message = "bqk,bkd->bqd"}> : () -> ()
    %cst_62 = arith.constant dense<0.000000e+00> : vector<2x8x8xf32>
    %174 = tpu.matmul %172, %173, %cst_62 {dimension_numbers = #tpu.dot_dimension_numbers<[2], [1], [1], [2], [0, 0, 0, 1, 1, 2], [0], [0]>} : vector<2x8x8xf32>, vector<2x8x8xf32>, vector<2x8x8xf32> -> vector<2x8x8xf32>
    "tpu.trace_stop"() : () -> ()
    %175 = tpu.concatenate %126, %142, %158, %174 in 2 : vector<2x8x8xf32>, vector<2x8x8xf32>, vector<2x8x8xf32>, vector<2x8x8xf32> -> vector<2x8x32xf32>
    %176 = vector.shape_cast %175 : vector<2x8x32xf32> to vector<16x32xf32>
    %c0_63 = arith.constant 0 : index
    %c0_64 = arith.constant 0 : index
    %177 = vector.load %arg55[%c0_63, %c0_64] : memref<32x32xf32, #tpu.memory_space<vmem>>, vector<32x32xf32>
    %cst_65 = arith.constant dense<0.000000e+00> : vector<16x32xf32>
    %178 = tpu.matmul %176, %177, %cst_65 {dimension_numbers = #tpu.dot_dimension_numbers<[1], [0], [0], [1], [0, 0, 1, 1], [], []>} : vector<16x32xf32>, vector<32x32xf32>, vector<16x32xf32> -> vector<16x32xf32>
    %c0_66 = arith.constant 0 : index
    %c0_67 = arith.constant 0 : index
    %179 = vector.load %arg53[%c0_66, %c0_67] : memref<1x32xf32, #tpu.memory_space<vmem>>, vector<1x32xf32>
    %180 = vector.broadcast %179 : vector<1x32xf32> to vector<16x32xf32>
    %181 = arith.addf %178, %180 : vector<16x32xf32>
    %182 = arith.addf %181, %99 : vector<16x32xf32>
    %c0_68 = arith.constant 0 : index
    %c0_69 = arith.constant 0 : index
    %183 = vector.load %arg51[%c0_68, %c0_69] : memref<2x32xf32, #tpu.memory_space<vmem>>, vector<2x32xf32>
    %184 = vector.extract_strided_slice %183 {offsets = [0, 0], sizes = [1, 32], strides = [1, 1]} : vector<2x32xf32> to vector<1x32xf32>
    %185 = vector.extract_strided_slice %183 {offsets = [1, 0], sizes = [1, 32], strides = [1, 1]} : vector<2x32xf32> to vector<1x32xf32>
    %cst_70 = arith.constant dense<0.000000e+00> : vector<16xf32>
    %186 = vector.multi_reduction <add>, %182, %cst_70 [1] : vector<16x32xf32> to vector<16xf32>
    %187 = vector.shape_cast %186 : vector<16xf32> to vector<16x1xf32>
    %cst_71 = arith.constant 3.200000e+01 : f32
    %188 = vector.broadcast %cst_71 : f32 to vector<16x1xf32>
    %189 = arith.divf %187, %188 : vector<16x1xf32>
    %190 = vector.broadcast %189 : vector<16x1xf32> to vector<16x32xf32>
    %191 = arith.subf %182, %190 : vector<16x32xf32>
    %192 = arith.mulf %191, %191 : vector<16x32xf32>
    %cst_72 = arith.constant dense<0.000000e+00> : vector<16xf32>
    %193 = vector.multi_reduction <add>, %192, %cst_72 [1] : vector<16x32xf32> to vector<16xf32>
    %194 = vector.shape_cast %193 : vector<16xf32> to vector<16x1xf32>
    %cst_73 = arith.constant 3.200000e+01 : f32
    %195 = vector.broadcast %cst_73 : f32 to vector<16x1xf32>
    %196 = arith.divf %194, %195 : vector<16x1xf32>
    %197 = vector.broadcast %189 : vector<16x1xf32> to vector<16x32xf32>
    %198 = arith.subf %182, %197 : vector<16x32xf32>
    %cst_74 = arith.constant 9.99999974E-6 : f32
    %199 = vector.broadcast %cst_74 : f32 to vector<16x1xf32>
    %200 = arith.addf %196, %199 : vector<16x1xf32>
    %201 = math.rsqrt %200 : vector<16x1xf32>
    %202 = vector.broadcast %201 : vector<16x1xf32> to vector<16x32xf32>
    %203 = arith.mulf %198, %202 : vector<16x32xf32>
    %204 = vector.broadcast %184 : vector<1x32xf32> to vector<16x32xf32>
    %205 = arith.mulf %203, %204 : vector<16x32xf32>
    %206 = vector.broadcast %185 : vector<1x32xf32> to vector<16x32xf32>
    %207 = arith.addf %205, %206 : vector<16x32xf32>
    %c0_75 = arith.constant 0 : index
    %c0_76 = arith.constant 0 : index
    %208 = vector.load %arg49[%c0_75, %c0_76] : memref<32x64xf32, #tpu.memory_space<vmem>>, vector<32x64xf32>
    %cst_77 = arith.constant dense<0.000000e+00> : vector<16x64xf32>
    %209 = tpu.matmul %207, %208, %cst_77 {dimension_numbers = #tpu.dot_dimension_numbers<[1], [0], [0], [1], [0, 0, 1, 1], [], []>} : vector<16x32xf32>, vector<32x64xf32>, vector<16x64xf32> -> vector<16x64xf32>
    %c0_78 = arith.constant 0 : index
    %c0_79 = arith.constant 0 : index
    %210 = vector.load %arg47[%c0_78, %c0_79] : memref<1x64xf32, #tpu.memory_space<vmem>>, vector<1x64xf32>
    %211 = vector.broadcast %210 : vector<1x64xf32> to vector<16x64xf32>
    %212 = arith.addf %209, %211 : vector<16x64xf32>
    %cst_80 = arith.constant 0.000000e+00 : f32
    %213 = vector.broadcast %cst_80 : f32 to vector<16x64xf32>
    %214 = arith.cmpf ogt, %212, %213 : vector<16x64xf32>
    %cst_81 = arith.constant 2.000000e-01 : f32
    %215 = vector.broadcast %cst_81 : f32 to vector<16x64xf32>
    %216 = arith.mulf %215, %212 : vector<16x64xf32>
    %217 = arith.select %214, %212, %216 : vector<16x64xi1>, vector<16x64xf32>
    %c0_82 = arith.constant 0 : index
    %c0_83 = arith.constant 0 : index
    %218 = vector.load %arg50[%c0_82, %c0_83] : memref<64x32xf32, #tpu.memory_space<vmem>>, vector<64x32xf32>
    %cst_84 = arith.constant dense<0.000000e+00> : vector<16x32xf32>
    %219 = tpu.matmul %217, %218, %cst_84 {dimension_numbers = #tpu.dot_dimension_numbers<[1], [0], [0], [1], [0, 0, 1, 1], [], []>} : vector<16x64xf32>, vector<64x32xf32>, vector<16x32xf32> -> vector<16x32xf32>
    %c0_85 = arith.constant 0 : index
    %c0_86 = arith.constant 0 : index
    %220 = vector.load %arg48[%c0_85, %c0_86] : memref<1x32xf32, #tpu.memory_space<vmem>>, vector<1x32xf32>
    %221 = vector.broadcast %220 : vector<1x32xf32> to vector<16x32xf32>
    %222 = arith.addf %219, %221 : vector<16x32xf32>
    %223 = arith.addf %222, %207 : vector<16x32xf32>
    %c0_87 = arith.constant 0 : index
    %c0_88 = arith.constant 0 : index
    %224 = vector.load %arg52[%c0_87, %c0_88] : memref<2x32xf32, #tpu.memory_space<vmem>>, vector<2x32xf32>
    %225 = vector.extract_strided_slice %224 {offsets = [0, 0], sizes = [1, 32], strides = [1, 1]} : vector<2x32xf32> to vector<1x32xf32>
    %226 = vector.extract_strided_slice %224 {offsets = [1, 0], sizes = [1, 32], strides = [1, 1]} : vector<2x32xf32> to vector<1x32xf32>
    %cst_89 = arith.constant dense<0.000000e+00> : vector<16xf32>
    %227 = vector.multi_reduction <add>, %223, %cst_89 [1] : vector<16x32xf32> to vector<16xf32>
    %228 = vector.shape_cast %227 : vector<16xf32> to vector<16x1xf32>
    %cst_90 = arith.constant 3.200000e+01 : f32
    %229 = vector.broadcast %cst_90 : f32 to vector<16x1xf32>
    %230 = arith.divf %228, %229 : vector<16x1xf32>
    %231 = vector.broadcast %230 : vector<16x1xf32> to vector<16x32xf32>
    %232 = arith.subf %223, %231 : vector<16x32xf32>
    %233 = arith.mulf %232, %232 : vector<16x32xf32>
    %cst_91 = arith.constant dense<0.000000e+00> : vector<16xf32>
    %234 = vector.multi_reduction <add>, %233, %cst_91 [1] : vector<16x32xf32> to vector<16xf32>
    %235 = vector.shape_cast %234 : vector<16xf32> to vector<16x1xf32>
    %cst_92 = arith.constant 3.200000e+01 : f32
    %236 = vector.broadcast %cst_92 : f32 to vector<16x1xf32>
    %237 = arith.divf %235, %236 : vector<16x1xf32>
    %238 = vector.broadcast %230 : vector<16x1xf32> to vector<16x32xf32>
    %239 = arith.subf %223, %238 : vector<16x32xf32>
    %cst_93 = arith.constant 9.99999974E-6 : f32
    %240 = vector.broadcast %cst_93 : f32 to vector<16x1xf32>
    %241 = arith.addf %237, %240 : vector<16x1xf32>
    %242 = math.rsqrt %241 : vector<16x1xf32>
    %243 = vector.broadcast %242 : vector<16x1xf32> to vector<16x32xf32>
    %244 = arith.mulf %239, %243 : vector<16x32xf32>
    %245 = vector.broadcast %225 : vector<1x32xf32> to vector<16x32xf32>
    %246 = arith.mulf %244, %245 : vector<16x32xf32>
    %247 = vector.broadcast %226 : vector<1x32xf32> to vector<16x32xf32>
    %248 = arith.addf %246, %247 : vector<16x32xf32>
    %c0_94 = arith.constant 0 : index
    %c0_95 = arith.constant 0 : index
    %249 = vector.load %arg66[%c0_94, %c0_95] : memref<32x96xf32, #tpu.memory_space<vmem>>, vector<32x96xf32>
    %cst_96 = arith.constant dense<0.000000e+00> : vector<16x96xf32>
    %250 = tpu.matmul %248, %249, %cst_96 {dimension_numbers = #tpu.dot_dimension_numbers<[1], [0], [0], [1], [0, 0, 1, 1], [], []>} : vector<16x32xf32>, vector<32x96xf32>, vector<16x96xf32> -> vector<16x96xf32>
    %c0_97 = arith.constant 0 : index
    %c0_98 = arith.constant 0 : index
    %251 = vector.load %arg64[%c0_97, %c0_98] : memref<1x96xf32, #tpu.memory_space<vmem>>, vector<1x96xf32>
    %252 = vector.broadcast %251 : vector<1x96xf32> to vector<16x96xf32>
    %253 = arith.addf %250, %252 : vector<16x96xf32>
    %254 = vector.extract_strided_slice %253 {offsets = [0, 0], sizes = [16, 32], strides = [1, 1]} : vector<16x96xf32> to vector<16x32xf32>
    %255 = vector.extract_strided_slice %253 {offsets = [0, 32], sizes = [16, 32], strides = [1, 1]} : vector<16x96xf32> to vector<16x32xf32>
    %256 = vector.extract_strided_slice %253 {offsets = [0, 64], sizes = [16, 32], strides = [1, 1]} : vector<16x96xf32> to vector<16x32xf32>
    %257 = vector.shape_cast %254 : vector<16x32xf32> to vector<2x8x32xf32>
    %258 = vector.shape_cast %255 : vector<16x32xf32> to vector<2x8x32xf32>
    %259 = vector.shape_cast %256 : vector<16x32xf32> to vector<2x8x32xf32>
    %260 = vector.extract_strided_slice %257 {offsets = [0, 0, 0], sizes = [2, 8, 8], strides = [1, 1, 1]} : vector<2x8x32xf32> to vector<2x8x8xf32>
    %261 = vector.extract_strided_slice %258 {offsets = [0, 0, 0], sizes = [2, 8, 8], strides = [1, 1, 1]} : vector<2x8x32xf32> to vector<2x8x8xf32>
    "tpu.trace_start"() <{level = 10 : i32, message = "bqd,bkd->bqk"}> : () -> ()
    %cst_99 = arith.constant dense<0.000000e+00> : vector<2x8x8xf32>
    %262 = tpu.matmul %260, %261, %cst_99 {dimension_numbers = #tpu.dot_dimension_numbers<[2], [2], [1], [1], [0, 0, 0, 1, 1, 1], [0], [0]>} : vector<2x8x8xf32>, vector<2x8x8xf32>, vector<2x8x8xf32> -> vector<2x8x8xf32>
    "tpu.trace_stop"() : () -> ()
    %263 = vector.broadcast %2 : vector<2x1x8xf32> to vector<2x8x8xf32>
    %264 = arith.addf %262, %263 : vector<2x8x8xf32>
    %cst_100 = arith.constant dense<0xFF800000> : vector<2x8xf32>
    %265 = vector.multi_reduction <maximumf>, %264, %cst_100 [2] : vector<2x8x8xf32> to vector<2x8xf32>
    %266 = vector.shape_cast %265 : vector<2x8xf32> to vector<2x8x1xf32>
    %267 = vector.broadcast %266 : vector<2x8x1xf32> to vector<2x8x8xf32>
    %268 = arith.subf %264, %267 : vector<2x8x8xf32>
    %269 = math.exp %268 : vector<2x8x8xf32>
    %cst_101 = arith.constant dense<0.000000e+00> : vector<2x8xf32>
    %270 = vector.multi_reduction <add>, %269, %cst_101 [2] : vector<2x8x8xf32> to vector<2x8xf32>
    %271 = vector.shape_cast %270 : vector<2x8xf32> to vector<2x8x1xf32>
    %272 = vector.broadcast %271 : vector<2x8x1xf32> to vector<2x8x8xf32>
    %273 = arith.divf %269, %272 : vector<2x8x8xf32>
    %274 = vector.extract_strided_slice %259 {offsets = [0, 0, 0], sizes = [2, 8, 8], strides = [1, 1, 1]} : vector<2x8x32xf32> to vector<2x8x8xf32>
    "tpu.trace_start"() <{level = 10 : i32, message = "bqk,bkd->bqd"}> : () -> ()
    %cst_102 = arith.constant dense<0.000000e+00> : vector<2x8x8xf32>
    %275 = tpu.matmul %273, %274, %cst_102 {dimension_numbers = #tpu.dot_dimension_numbers<[2], [1], [1], [2], [0, 0, 0, 1, 1, 2], [0], [0]>} : vector<2x8x8xf32>, vector<2x8x8xf32>, vector<2x8x8xf32> -> vector<2x8x8xf32>
    "tpu.trace_stop"() : () -> ()
    %276 = vector.extract_strided_slice %257 {offsets = [0, 0, 8], sizes = [2, 8, 8], strides = [1, 1, 1]} : vector<2x8x32xf32> to vector<2x8x8xf32>
    %277 = vector.extract_strided_slice %258 {offsets = [0, 0, 8], sizes = [2, 8, 8], strides = [1, 1, 1]} : vector<2x8x32xf32> to vector<2x8x8xf32>
    "tpu.trace_start"() <{level = 10 : i32, message = "bqd,bkd->bqk"}> : () -> ()
    %cst_103 = arith.constant dense<0.000000e+00> : vector<2x8x8xf32>
    %278 = tpu.matmul %276, %277, %cst_103 {dimension_numbers = #tpu.dot_dimension_numbers<[2], [2], [1], [1], [0, 0, 0, 1, 1, 1], [0], [0]>} : vector<2x8x8xf32>, vector<2x8x8xf32>, vector<2x8x8xf32> -> vector<2x8x8xf32>
    "tpu.trace_stop"() : () -> ()
    %279 = vector.broadcast %2 : vector<2x1x8xf32> to vector<2x8x8xf32>
    %280 = arith.addf %278, %279 : vector<2x8x8xf32>
    %cst_104 = arith.constant dense<0xFF800000> : vector<2x8xf32>
    %281 = vector.multi_reduction <maximumf>, %280, %cst_104 [2] : vector<2x8x8xf32> to vector<2x8xf32>
    %282 = vector.shape_cast %281 : vector<2x8xf32> to vector<2x8x1xf32>
    %283 = vector.broadcast %282 : vector<2x8x1xf32> to vector<2x8x8xf32>
    %284 = arith.subf %280, %283 : vector<2x8x8xf32>
    %285 = math.exp %284 : vector<2x8x8xf32>
    %cst_105 = arith.constant dense<0.000000e+00> : vector<2x8xf32>
    %286 = vector.multi_reduction <add>, %285, %cst_105 [2] : vector<2x8x8xf32> to vector<2x8xf32>
    %287 = vector.shape_cast %286 : vector<2x8xf32> to vector<2x8x1xf32>
    %288 = vector.broadcast %287 : vector<2x8x1xf32> to vector<2x8x8xf32>
    %289 = arith.divf %285, %288 : vector<2x8x8xf32>
    %290 = vector.extract_strided_slice %259 {offsets = [0, 0, 8], sizes = [2, 8, 8], strides = [1, 1, 1]} : vector<2x8x32xf32> to vector<2x8x8xf32>
    "tpu.trace_start"() <{level = 10 : i32, message = "bqk,bkd->bqd"}> : () -> ()
    %cst_106 = arith.constant dense<0.000000e+00> : vector<2x8x8xf32>
    %291 = tpu.matmul %289, %290, %cst_106 {dimension_numbers = #tpu.dot_dimension_numbers<[2], [1], [1], [2], [0, 0, 0, 1, 1, 2], [0], [0]>} : vector<2x8x8xf32>, vector<2x8x8xf32>, vector<2x8x8xf32> -> vector<2x8x8xf32>
    "tpu.trace_stop"() : () -> ()
    %292 = vector.extract_strided_slice %257 {offsets = [0, 0, 16], sizes = [2, 8, 8], strides = [1, 1, 1]} : vector<2x8x32xf32> to vector<2x8x8xf32>
    %293 = vector.extract_strided_slice %258 {offsets = [0, 0, 16], sizes = [2, 8, 8], strides = [1, 1, 1]} : vector<2x8x32xf32> to vector<2x8x8xf32>
    "tpu.trace_start"() <{level = 10 : i32, message = "bqd,bkd->bqk"}> : () -> ()
    %cst_107 = arith.constant dense<0.000000e+00> : vector<2x8x8xf32>
    %294 = tpu.matmul %292, %293, %cst_107 {dimension_numbers = #tpu.dot_dimension_numbers<[2], [2], [1], [1], [0, 0, 0, 1, 1, 1], [0], [0]>} : vector<2x8x8xf32>, vector<2x8x8xf32>, vector<2x8x8xf32> -> vector<2x8x8xf32>
    "tpu.trace_stop"() : () -> ()
    %295 = vector.broadcast %2 : vector<2x1x8xf32> to vector<2x8x8xf32>
    %296 = arith.addf %294, %295 : vector<2x8x8xf32>
    %cst_108 = arith.constant dense<0xFF800000> : vector<2x8xf32>
    %297 = vector.multi_reduction <maximumf>, %296, %cst_108 [2] : vector<2x8x8xf32> to vector<2x8xf32>
    %298 = vector.shape_cast %297 : vector<2x8xf32> to vector<2x8x1xf32>
    %299 = vector.broadcast %298 : vector<2x8x1xf32> to vector<2x8x8xf32>
    %300 = arith.subf %296, %299 : vector<2x8x8xf32>
    %301 = math.exp %300 : vector<2x8x8xf32>
    %cst_109 = arith.constant dense<0.000000e+00> : vector<2x8xf32>
    %302 = vector.multi_reduction <add>, %301, %cst_109 [2] : vector<2x8x8xf32> to vector<2x8xf32>
    %303 = vector.shape_cast %302 : vector<2x8xf32> to vector<2x8x1xf32>
    %304 = vector.broadcast %303 : vector<2x8x1xf32> to vector<2x8x8xf32>
    %305 = arith.divf %301, %304 : vector<2x8x8xf32>
    %306 = vector.extract_strided_slice %259 {offsets = [0, 0, 16], sizes = [2, 8, 8], strides = [1, 1, 1]} : vector<2x8x32xf32> to vector<2x8x8xf32>
    "tpu.trace_start"() <{level = 10 : i32, message = "bqk,bkd->bqd"}> : () -> ()
    %cst_110 = arith.constant dense<0.000000e+00> : vector<2x8x8xf32>
    %307 = tpu.matmul %305, %306, %cst_110 {dimension_numbers = #tpu.dot_dimension_numbers<[2], [1], [1], [2], [0, 0, 0, 1, 1, 2], [0], [0]>} : vector<2x8x8xf32>, vector<2x8x8xf32>, vector<2x8x8xf32> -> vector<2x8x8xf32>
    "tpu.trace_stop"() : () -> ()
    %308 = vector.extract_strided_slice %257 {offsets = [0, 0, 24], sizes = [2, 8, 8], strides = [1, 1, 1]} : vector<2x8x32xf32> to vector<2x8x8xf32>
    %309 = vector.extract_strided_slice %258 {offsets = [0, 0, 24], sizes = [2, 8, 8], strides = [1, 1, 1]} : vector<2x8x32xf32> to vector<2x8x8xf32>
    "tpu.trace_start"() <{level = 10 : i32, message = "bqd,bkd->bqk"}> : () -> ()
    %cst_111 = arith.constant dense<0.000000e+00> : vector<2x8x8xf32>
    %310 = tpu.matmul %308, %309, %cst_111 {dimension_numbers = #tpu.dot_dimension_numbers<[2], [2], [1], [1], [0, 0, 0, 1, 1, 1], [0], [0]>} : vector<2x8x8xf32>, vector<2x8x8xf32>, vector<2x8x8xf32> -> vector<2x8x8xf32>
    "tpu.trace_stop"() : () -> ()
    %311 = vector.broadcast %2 : vector<2x1x8xf32> to vector<2x8x8xf32>
    %312 = arith.addf %310, %311 : vector<2x8x8xf32>
    %cst_112 = arith.constant dense<0xFF800000> : vector<2x8xf32>
    %313 = vector.multi_reduction <maximumf>, %312, %cst_112 [2] : vector<2x8x8xf32> to vector<2x8xf32>
    %314 = vector.shape_cast %313 : vector<2x8xf32> to vector<2x8x1xf32>
    %315 = vector.broadcast %314 : vector<2x8x1xf32> to vector<2x8x8xf32>
    %316 = arith.subf %312, %315 : vector<2x8x8xf32>
    %317 = math.exp %316 : vector<2x8x8xf32>
    %cst_113 = arith.constant dense<0.000000e+00> : vector<2x8xf32>
    %318 = vector.multi_reduction <add>, %317, %cst_113 [2] : vector<2x8x8xf32> to vector<2x8xf32>
    %319 = vector.shape_cast %318 : vector<2x8xf32> to vector<2x8x1xf32>
    %320 = vector.broadcast %319 : vector<2x8x1xf32> to vector<2x8x8xf32>
    %321 = arith.divf %317, %320 : vector<2x8x8xf32>
    %322 = vector.extract_strided_slice %259 {offsets = [0, 0, 24], sizes = [2, 8, 8], strides = [1, 1, 1]} : vector<2x8x32xf32> to vector<2x8x8xf32>
    "tpu.trace_start"() <{level = 10 : i32, message = "bqk,bkd->bqd"}> : () -> ()
    %cst_114 = arith.constant dense<0.000000e+00> : vector<2x8x8xf32>
    %323 = tpu.matmul %321, %322, %cst_114 {dimension_numbers = #tpu.dot_dimension_numbers<[2], [1], [1], [2], [0, 0, 0, 1, 1, 2], [0], [0]>} : vector<2x8x8xf32>, vector<2x8x8xf32>, vector<2x8x8xf32> -> vector<2x8x8xf32>
    "tpu.trace_stop"() : () -> ()
    %324 = tpu.concatenate %275, %291, %307, %323 in 2 : vector<2x8x8xf32>, vector<2x8x8xf32>, vector<2x8x8xf32>, vector<2x8x8xf32> -> vector<2x8x32xf32>
    %325 = vector.shape_cast %324 : vector<2x8x32xf32> to vector<16x32xf32>
    %c0_115 = arith.constant 0 : index
    %c0_116 = arith.constant 0 : index
    %326 = vector.load %arg65[%c0_115, %c0_116] : memref<32x32xf32, #tpu.memory_space<vmem>>, vector<32x32xf32>
    %cst_117 = arith.constant dense<0.000000e+00> : vector<16x32xf32>
    %327 = tpu.matmul %325, %326, %cst_117 {dimension_numbers = #tpu.dot_dimension_numbers<[1], [0], [0], [1], [0, 0, 1, 1], [], []>} : vector<16x32xf32>, vector<32x32xf32>, vector<16x32xf32> -> vector<16x32xf32>
    %c0_118 = arith.constant 0 : index
    %c0_119 = arith.constant 0 : index
    %328 = vector.load %arg63[%c0_118, %c0_119] : memref<1x32xf32, #tpu.memory_space<vmem>>, vector<1x32xf32>
    %329 = vector.broadcast %328 : vector<1x32xf32> to vector<16x32xf32>
    %330 = arith.addf %327, %329 : vector<16x32xf32>
    %331 = arith.addf %330, %248 : vector<16x32xf32>
    %c0_120 = arith.constant 0 : index
    %c0_121 = arith.constant 0 : index
    %332 = vector.load %arg61[%c0_120, %c0_121] : memref<2x32xf32, #tpu.memory_space<vmem>>, vector<2x32xf32>
    %333 = vector.extract_strided_slice %332 {offsets = [0, 0], sizes = [1, 32], strides = [1, 1]} : vector<2x32xf32> to vector<1x32xf32>
    %334 = vector.extract_strided_slice %332 {offsets = [1, 0], sizes = [1, 32], strides = [1, 1]} : vector<2x32xf32> to vector<1x32xf32>
    %cst_122 = arith.constant dense<0.000000e+00> : vector<16xf32>
    %335 = vector.multi_reduction <add>, %331, %cst_122 [1] : vector<16x32xf32> to vector<16xf32>
    %336 = vector.shape_cast %335 : vector<16xf32> to vector<16x1xf32>
    %cst_123 = arith.constant 3.200000e+01 : f32
    %337 = vector.broadcast %cst_123 : f32 to vector<16x1xf32>
    %338 = arith.divf %336, %337 : vector<16x1xf32>
    %339 = vector.broadcast %338 : vector<16x1xf32> to vector<16x32xf32>
    %340 = arith.subf %331, %339 : vector<16x32xf32>
    %341 = arith.mulf %340, %340 : vector<16x32xf32>
    %cst_124 = arith.constant dense<0.000000e+00> : vector<16xf32>
    %342 = vector.multi_reduction <add>, %341, %cst_124 [1] : vector<16x32xf32> to vector<16xf32>
    %343 = vector.shape_cast %342 : vector<16xf32> to vector<16x1xf32>
    %cst_125 = arith.constant 3.200000e+01 : f32
    %344 = vector.broadcast %cst_125 : f32 to vector<16x1xf32>
    %345 = arith.divf %343, %344 : vector<16x1xf32>
    %346 = vector.broadcast %338 : vector<16x1xf32> to vector<16x32xf32>
    %347 = arith.subf %331, %346 : vector<16x32xf32>
    %cst_126 = arith.constant 9.99999974E-6 : f32
    %348 = vector.broadcast %cst_126 : f32 to vector<16x1xf32>
    %349 = arith.addf %345, %348 : vector<16x1xf32>
    %350 = math.rsqrt %349 : vector<16x1xf32>
    %351 = vector.broadcast %350 : vector<16x1xf32> to vector<16x32xf32>
    %352 = arith.mulf %347, %351 : vector<16x32xf32>
    %353 = vector.broadcast %333 : vector<1x32xf32> to vector<16x32xf32>
    %354 = arith.mulf %352, %353 : vector<16x32xf32>
    %355 = vector.broadcast %334 : vector<1x32xf32> to vector<16x32xf32>
    %356 = arith.addf %354, %355 : vector<16x32xf32>
    %c0_127 = arith.constant 0 : index
    %c0_128 = arith.constant 0 : index
    %357 = vector.load %arg59[%c0_127, %c0_128] : memref<32x64xf32, #tpu.memory_space<vmem>>, vector<32x64xf32>
    %cst_129 = arith.constant dense<0.000000e+00> : vector<16x64xf32>
    %358 = tpu.matmul %356, %357, %cst_129 {dimension_numbers = #tpu.dot_dimension_numbers<[1], [0], [0], [1], [0, 0, 1, 1], [], []>} : vector<16x32xf32>, vector<32x64xf32>, vector<16x64xf32> -> vector<16x64xf32>
    %c0_130 = arith.constant 0 : index
    %c0_131 = arith.constant 0 : index
    %359 = vector.load %arg57[%c0_130, %c0_131] : memref<1x64xf32, #tpu.memory_space<vmem>>, vector<1x64xf32>
    %360 = vector.broadcast %359 : vector<1x64xf32> to vector<16x64xf32>
    %361 = arith.addf %358, %360 : vector<16x64xf32>
    %cst_132 = arith.constant 0.000000e+00 : f32
    %362 = vector.broadcast %cst_132 : f32 to vector<16x64xf32>
    %363 = arith.cmpf ogt, %361, %362 : vector<16x64xf32>
    %cst_133 = arith.constant 2.000000e-01 : f32
    %364 = vector.broadcast %cst_133 : f32 to vector<16x64xf32>
    %365 = arith.mulf %364, %361 : vector<16x64xf32>
    %366 = arith.select %363, %361, %365 : vector<16x64xi1>, vector<16x64xf32>
    %c0_134 = arith.constant 0 : index
    %c0_135 = arith.constant 0 : index
    %367 = vector.load %arg60[%c0_134, %c0_135] : memref<64x32xf32, #tpu.memory_space<vmem>>, vector<64x32xf32>
    %cst_136 = arith.constant dense<0.000000e+00> : vector<16x32xf32>
    %368 = tpu.matmul %366, %367, %cst_136 {dimension_numbers = #tpu.dot_dimension_numbers<[1], [0], [0], [1], [0, 0, 1, 1], [], []>} : vector<16x64xf32>, vector<64x32xf32>, vector<16x32xf32> -> vector<16x32xf32>
    %c0_137 = arith.constant 0 : index
    %c0_138 = arith.constant 0 : index
    %369 = vector.load %arg58[%c0_137, %c0_138] : memref<1x32xf32, #tpu.memory_space<vmem>>, vector<1x32xf32>
    %370 = vector.broadcast %369 : vector<1x32xf32> to vector<16x32xf32>
    %371 = arith.addf %368, %370 : vector<16x32xf32>
    %372 = arith.addf %371, %356 : vector<16x32xf32>
    %c0_139 = arith.constant 0 : index
    %c0_140 = arith.constant 0 : index
    %373 = vector.load %arg62[%c0_139, %c0_140] : memref<2x32xf32, #tpu.memory_space<vmem>>, vector<2x32xf32>
    %374 = vector.extract_strided_slice %373 {offsets = [0, 0], sizes = [1, 32], strides = [1, 1]} : vector<2x32xf32> to vector<1x32xf32>
    %375 = vector.extract_strided_slice %373 {offsets = [1, 0], sizes = [1, 32], strides = [1, 1]} : vector<2x32xf32> to vector<1x32xf32>
    %cst_141 = arith.constant dense<0.000000e+00> : vector<16xf32>
    %376 = vector.multi_reduction <add>, %372, %cst_141 [1] : vector<16x32xf32> to vector<16xf32>
    %377 = vector.shape_cast %376 : vector<16xf32> to vector<16x1xf32>
    %cst_142 = arith.constant 3.200000e+01 : f32
    %378 = vector.broadcast %cst_142 : f32 to vector<16x1xf32>
    %379 = arith.divf %377, %378 : vector<16x1xf32>
    %380 = vector.broadcast %379 : vector<16x1xf32> to vector<16x32xf32>
    %381 = arith.subf %372, %380 : vector<16x32xf32>
    %382 = arith.mulf %381, %381 : vector<16x32xf32>
    %cst_143 = arith.constant dense<0.000000e+00> : vector<16xf32>
    %383 = vector.multi_reduction <add>, %382, %cst_143 [1] : vector<16x32xf32> to vector<16xf32>
    %384 = vector.shape_cast %383 : vector<16xf32> to vector<16x1xf32>
    %cst_144 = arith.constant 3.200000e+01 : f32
    %385 = vector.broadcast %cst_144 : f32 to vector<16x1xf32>
    %386 = arith.divf %384, %385 : vector<16x1xf32>
    %387 = vector.broadcast %379 : vector<16x1xf32> to vector<16x32xf32>
    %388 = arith.subf %372, %387 : vector<16x32xf32>
    %cst_145 = arith.constant 9.99999974E-6 : f32
    %389 = vector.broadcast %cst_145 : f32 to vector<16x1xf32>
    %390 = arith.addf %386, %389 : vector<16x1xf32>
    %391 = math.rsqrt %390 : vector<16x1xf32>
    %392 = vector.broadcast %391 : vector<16x1xf32> to vector<16x32xf32>
    %393 = arith.mulf %388, %392 : vector<16x32xf32>
    %394 = vector.broadcast %374 : vector<1x32xf32> to vector<16x32xf32>
    %395 = arith.mulf %393, %394 : vector<16x32xf32>
    %396 = vector.broadcast %375 : vector<1x32xf32> to vector<16x32xf32>
    %397 = arith.addf %395, %396 : vector<16x32xf32>
    %c0_146 = arith.constant 0 : index
    %c0_147 = arith.constant 0 : index
    %c0_148 = arith.constant 0 : index
    %398 = vector.load %arg1[%c0_146, %c0_147, %c0_148] : memref<2x8x1xi32, #tpu.memory_space<vmem>>, vector<2x8x1xi32>
    %399 = vector.shape_cast %398 : vector<2x8x1xi32> to vector<16x1xi32>
    %400 = tpu.iota {dimensions = array<i32: 1>} : vector<16x40xi32>
    %401 = vector.broadcast %399 : vector<16x1xi32> to vector<16x40xi32>
    %402 = arith.cmpi eq, %400, %401 : vector<16x40xi32>
    %403 = arith.extui %402 : vector<16x40xi1> to vector<16x40xi32>
    %404 = arith.sitofp %403 : vector<16x40xi32> to vector<16x40xf32>
    %c0_149 = arith.constant 0 : index
    %c0_150 = arith.constant 0 : index
    %405 = vector.load %arg5[%c0_149, %c0_150] : memref<40x32xf32, #tpu.memory_space<vmem>>, vector<40x32xf32>
    %cst_151 = arith.constant dense<0.000000e+00> : vector<16x32xf32>
    %406 = tpu.matmul %404, %405, %cst_151 {dimension_numbers = #tpu.dot_dimension_numbers<[1], [0], [0], [1], [0, 0, 1, 1], [], []>} : vector<16x40xf32>, vector<40x32xf32>, vector<16x32xf32> -> vector<16x32xf32>
    %cst_152 = arith.constant 5.65685415 : f32
    %407 = vector.broadcast %cst_152 : f32 to vector<16x32xf32>
    %408 = arith.mulf %406, %407 : vector<16x32xf32>
    %c0_153 = arith.constant 0 : index
    %c0_154 = arith.constant 0 : index
    %409 = vector.load %arg40[%c0_153, %c0_154] : memref<64x32xf32, #tpu.memory_space<vmem>>, vector<64x32xf32>
    %410 = vector.extract_strided_slice %409 {offsets = [0, 0], sizes = [8, 32], strides = [1, 1]} : vector<64x32xf32> to vector<8x32xf32>
    %411 = vector.shape_cast %408 : vector<16x32xf32> to vector<2x8x32xf32>
    %412 = vector.shape_cast %410 : vector<8x32xf32> to vector<1x8x32xf32>
    %413 = vector.broadcast %412 : vector<1x8x32xf32> to vector<2x8x32xf32>
    %414 = arith.addf %411, %413 : vector<2x8x32xf32>
    %415 = vector.shape_cast %414 : vector<2x8x32xf32> to vector<16x32xf32>
    %c0_155 = arith.constant 0 : index
    %c0_156 = arith.constant 0 : index
    %416 = vector.load %arg16[%c0_155, %c0_156] : memref<32x96xf32, #tpu.memory_space<vmem>>, vector<32x96xf32>
    %cst_157 = arith.constant dense<0.000000e+00> : vector<16x96xf32>
    %417 = tpu.matmul %415, %416, %cst_157 {dimension_numbers = #tpu.dot_dimension_numbers<[1], [0], [0], [1], [0, 0, 1, 1], [], []>} : vector<16x32xf32>, vector<32x96xf32>, vector<16x96xf32> -> vector<16x96xf32>
    %c0_158 = arith.constant 0 : index
    %c0_159 = arith.constant 0 : index
    %418 = vector.load %arg14[%c0_158, %c0_159] : memref<1x96xf32, #tpu.memory_space<vmem>>, vector<1x96xf32>
    %419 = vector.broadcast %418 : vector<1x96xf32> to vector<16x96xf32>
    %420 = arith.addf %417, %419 : vector<16x96xf32>
    %421 = vector.extract_strided_slice %420 {offsets = [0, 0], sizes = [16, 32], strides = [1, 1]} : vector<16x96xf32> to vector<16x32xf32>
    %422 = vector.extract_strided_slice %420 {offsets = [0, 32], sizes = [16, 32], strides = [1, 1]} : vector<16x96xf32> to vector<16x32xf32>
    %423 = vector.extract_strided_slice %420 {offsets = [0, 64], sizes = [16, 32], strides = [1, 1]} : vector<16x96xf32> to vector<16x32xf32>
    %424 = vector.shape_cast %421 : vector<16x32xf32> to vector<2x8x32xf32>
    %425 = vector.shape_cast %422 : vector<16x32xf32> to vector<2x8x32xf32>
    %426 = vector.shape_cast %423 : vector<16x32xf32> to vector<2x8x32xf32>
    %427 = vector.extract_strided_slice %424 {offsets = [0, 0, 0], sizes = [2, 8, 8], strides = [1, 1, 1]} : vector<2x8x32xf32> to vector<2x8x8xf32>
    %428 = vector.extract_strided_slice %425 {offsets = [0, 0, 0], sizes = [2, 8, 8], strides = [1, 1, 1]} : vector<2x8x32xf32> to vector<2x8x8xf32>
    "tpu.trace_start"() <{level = 10 : i32, message = "bqd,bkd->bqk"}> : () -> ()
    %cst_160 = arith.constant dense<0.000000e+00> : vector<2x8x8xf32>
    %429 = tpu.matmul %427, %428, %cst_160 {dimension_numbers = #tpu.dot_dimension_numbers<[2], [2], [1], [1], [0, 0, 0, 1, 1, 1], [0], [0]>} : vector<2x8x8xf32>, vector<2x8x8xf32>, vector<2x8x8xf32> -> vector<2x8x8xf32>
    "tpu.trace_stop"() : () -> ()
    %430 = vector.broadcast %5 : vector<1x8x8xf32> to vector<2x8x8xf32>
    %431 = arith.addf %429, %430 : vector<2x8x8xf32>
    %cst_161 = arith.constant dense<0xFF800000> : vector<2x8xf32>
    %432 = vector.multi_reduction <maximumf>, %431, %cst_161 [2] : vector<2x8x8xf32> to vector<2x8xf32>
    %433 = vector.shape_cast %432 : vector<2x8xf32> to vector<2x8x1xf32>
    %434 = vector.broadcast %433 : vector<2x8x1xf32> to vector<2x8x8xf32>
    %435 = arith.subf %431, %434 : vector<2x8x8xf32>
    %436 = math.exp %435 : vector<2x8x8xf32>
    %cst_162 = arith.constant dense<0.000000e+00> : vector<2x8xf32>
    %437 = vector.multi_reduction <add>, %436, %cst_162 [2] : vector<2x8x8xf32> to vector<2x8xf32>
    %438 = vector.shape_cast %437 : vector<2x8xf32> to vector<2x8x1xf32>
    %439 = vector.broadcast %438 : vector<2x8x1xf32> to vector<2x8x8xf32>
    %440 = arith.divf %436, %439 : vector<2x8x8xf32>
    %441 = vector.extract_strided_slice %426 {offsets = [0, 0, 0], sizes = [2, 8, 8], strides = [1, 1, 1]} : vector<2x8x32xf32> to vector<2x8x8xf32>
    "tpu.trace_start"() <{level = 10 : i32, message = "bqk,bkd->bqd"}> : () -> ()
    %cst_163 = arith.constant dense<0.000000e+00> : vector<2x8x8xf32>
    %442 = tpu.matmul %440, %441, %cst_163 {dimension_numbers = #tpu.dot_dimension_numbers<[2], [1], [1], [2], [0, 0, 0, 1, 1, 2], [0], [0]>} : vector<2x8x8xf32>, vector<2x8x8xf32>, vector<2x8x8xf32> -> vector<2x8x8xf32>
    "tpu.trace_stop"() : () -> ()
    %443 = vector.extract_strided_slice %424 {offsets = [0, 0, 8], sizes = [2, 8, 8], strides = [1, 1, 1]} : vector<2x8x32xf32> to vector<2x8x8xf32>
    %444 = vector.extract_strided_slice %425 {offsets = [0, 0, 8], sizes = [2, 8, 8], strides = [1, 1, 1]} : vector<2x8x32xf32> to vector<2x8x8xf32>
    "tpu.trace_start"() <{level = 10 : i32, message = "bqd,bkd->bqk"}> : () -> ()
    %cst_164 = arith.constant dense<0.000000e+00> : vector<2x8x8xf32>
    %445 = tpu.matmul %443, %444, %cst_164 {dimension_numbers = #tpu.dot_dimension_numbers<[2], [2], [1], [1], [0, 0, 0, 1, 1, 1], [0], [0]>} : vector<2x8x8xf32>, vector<2x8x8xf32>, vector<2x8x8xf32> -> vector<2x8x8xf32>
    "tpu.trace_stop"() : () -> ()
    %446 = vector.broadcast %5 : vector<1x8x8xf32> to vector<2x8x8xf32>
    %447 = arith.addf %445, %446 : vector<2x8x8xf32>
    %cst_165 = arith.constant dense<0xFF800000> : vector<2x8xf32>
    %448 = vector.multi_reduction <maximumf>, %447, %cst_165 [2] : vector<2x8x8xf32> to vector<2x8xf32>
    %449 = vector.shape_cast %448 : vector<2x8xf32> to vector<2x8x1xf32>
    %450 = vector.broadcast %449 : vector<2x8x1xf32> to vector<2x8x8xf32>
    %451 = arith.subf %447, %450 : vector<2x8x8xf32>
    %452 = math.exp %451 : vector<2x8x8xf32>
    %cst_166 = arith.constant dense<0.000000e+00> : vector<2x8xf32>
    %453 = vector.multi_reduction <add>, %452, %cst_166 [2] : vector<2x8x8xf32> to vector<2x8xf32>
    %454 = vector.shape_cast %453 : vector<2x8xf32> to vector<2x8x1xf32>
    %455 = vector.broadcast %454 : vector<2x8x1xf32> to vector<2x8x8xf32>
    %456 = arith.divf %452, %455 : vector<2x8x8xf32>
    %457 = vector.extract_strided_slice %426 {offsets = [0, 0, 8], sizes = [2, 8, 8], strides = [1, 1, 1]} : vector<2x8x32xf32> to vector<2x8x8xf32>
    "tpu.trace_start"() <{level = 10 : i32, message = "bqk,bkd->bqd"}> : () -> ()
    %cst_167 = arith.constant dense<0.000000e+00> : vector<2x8x8xf32>
    %458 = tpu.matmul %456, %457, %cst_167 {dimension_numbers = #tpu.dot_dimension_numbers<[2], [1], [1], [2], [0, 0, 0, 1, 1, 2], [0], [0]>} : vector<2x8x8xf32>, vector<2x8x8xf32>, vector<2x8x8xf32> -> vector<2x8x8xf32>
    "tpu.trace_stop"() : () -> ()
    %459 = vector.extract_strided_slice %424 {offsets = [0, 0, 16], sizes = [2, 8, 8], strides = [1, 1, 1]} : vector<2x8x32xf32> to vector<2x8x8xf32>
    %460 = vector.extract_strided_slice %425 {offsets = [0, 0, 16], sizes = [2, 8, 8], strides = [1, 1, 1]} : vector<2x8x32xf32> to vector<2x8x8xf32>
    "tpu.trace_start"() <{level = 10 : i32, message = "bqd,bkd->bqk"}> : () -> ()
    %cst_168 = arith.constant dense<0.000000e+00> : vector<2x8x8xf32>
    %461 = tpu.matmul %459, %460, %cst_168 {dimension_numbers = #tpu.dot_dimension_numbers<[2], [2], [1], [1], [0, 0, 0, 1, 1, 1], [0], [0]>} : vector<2x8x8xf32>, vector<2x8x8xf32>, vector<2x8x8xf32> -> vector<2x8x8xf32>
    "tpu.trace_stop"() : () -> ()
    %462 = vector.broadcast %5 : vector<1x8x8xf32> to vector<2x8x8xf32>
    %463 = arith.addf %461, %462 : vector<2x8x8xf32>
    %cst_169 = arith.constant dense<0xFF800000> : vector<2x8xf32>
    %464 = vector.multi_reduction <maximumf>, %463, %cst_169 [2] : vector<2x8x8xf32> to vector<2x8xf32>
    %465 = vector.shape_cast %464 : vector<2x8xf32> to vector<2x8x1xf32>
    %466 = vector.broadcast %465 : vector<2x8x1xf32> to vector<2x8x8xf32>
    %467 = arith.subf %463, %466 : vector<2x8x8xf32>
    %468 = math.exp %467 : vector<2x8x8xf32>
    %cst_170 = arith.constant dense<0.000000e+00> : vector<2x8xf32>
    %469 = vector.multi_reduction <add>, %468, %cst_170 [2] : vector<2x8x8xf32> to vector<2x8xf32>
    %470 = vector.shape_cast %469 : vector<2x8xf32> to vector<2x8x1xf32>
    %471 = vector.broadcast %470 : vector<2x8x1xf32> to vector<2x8x8xf32>
    %472 = arith.divf %468, %471 : vector<2x8x8xf32>
    %473 = vector.extract_strided_slice %426 {offsets = [0, 0, 16], sizes = [2, 8, 8], strides = [1, 1, 1]} : vector<2x8x32xf32> to vector<2x8x8xf32>
    "tpu.trace_start"() <{level = 10 : i32, message = "bqk,bkd->bqd"}> : () -> ()
    %cst_171 = arith.constant dense<0.000000e+00> : vector<2x8x8xf32>
    %474 = tpu.matmul %472, %473, %cst_171 {dimension_numbers = #tpu.dot_dimension_numbers<[2], [1], [1], [2], [0, 0, 0, 1, 1, 2], [0], [0]>} : vector<2x8x8xf32>, vector<2x8x8xf32>, vector<2x8x8xf32> -> vector<2x8x8xf32>
    "tpu.trace_stop"() : () -> ()
    %475 = vector.extract_strided_slice %424 {offsets = [0, 0, 24], sizes = [2, 8, 8], strides = [1, 1, 1]} : vector<2x8x32xf32> to vector<2x8x8xf32>
    %476 = vector.extract_strided_slice %425 {offsets = [0, 0, 24], sizes = [2, 8, 8], strides = [1, 1, 1]} : vector<2x8x32xf32> to vector<2x8x8xf32>
    "tpu.trace_start"() <{level = 10 : i32, message = "bqd,bkd->bqk"}> : () -> ()
    %cst_172 = arith.constant dense<0.000000e+00> : vector<2x8x8xf32>
    %477 = tpu.matmul %475, %476, %cst_172 {dimension_numbers = #tpu.dot_dimension_numbers<[2], [2], [1], [1], [0, 0, 0, 1, 1, 1], [0], [0]>} : vector<2x8x8xf32>, vector<2x8x8xf32>, vector<2x8x8xf32> -> vector<2x8x8xf32>
    "tpu.trace_stop"() : () -> ()
    %478 = vector.broadcast %5 : vector<1x8x8xf32> to vector<2x8x8xf32>
    %479 = arith.addf %477, %478 : vector<2x8x8xf32>
    %cst_173 = arith.constant dense<0xFF800000> : vector<2x8xf32>
    %480 = vector.multi_reduction <maximumf>, %479, %cst_173 [2] : vector<2x8x8xf32> to vector<2x8xf32>
    %481 = vector.shape_cast %480 : vector<2x8xf32> to vector<2x8x1xf32>
    %482 = vector.broadcast %481 : vector<2x8x1xf32> to vector<2x8x8xf32>
    %483 = arith.subf %479, %482 : vector<2x8x8xf32>
    %484 = math.exp %483 : vector<2x8x8xf32>
    %cst_174 = arith.constant dense<0.000000e+00> : vector<2x8xf32>
    %485 = vector.multi_reduction <add>, %484, %cst_174 [2] : vector<2x8x8xf32> to vector<2x8xf32>
    %486 = vector.shape_cast %485 : vector<2x8xf32> to vector<2x8x1xf32>
    %487 = vector.broadcast %486 : vector<2x8x1xf32> to vector<2x8x8xf32>
    %488 = arith.divf %484, %487 : vector<2x8x8xf32>
    %489 = vector.extract_strided_slice %426 {offsets = [0, 0, 24], sizes = [2, 8, 8], strides = [1, 1, 1]} : vector<2x8x32xf32> to vector<2x8x8xf32>
    "tpu.trace_start"() <{level = 10 : i32, message = "bqk,bkd->bqd"}> : () -> ()
    %cst_175 = arith.constant dense<0.000000e+00> : vector<2x8x8xf32>
    %490 = tpu.matmul %488, %489, %cst_175 {dimension_numbers = #tpu.dot_dimension_numbers<[2], [1], [1], [2], [0, 0, 0, 1, 1, 2], [0], [0]>} : vector<2x8x8xf32>, vector<2x8x8xf32>, vector<2x8x8xf32> -> vector<2x8x8xf32>
    "tpu.trace_stop"() : () -> ()
    %491 = tpu.concatenate %442, %458, %474, %490 in 2 : vector<2x8x8xf32>, vector<2x8x8xf32>, vector<2x8x8xf32>, vector<2x8x8xf32> -> vector<2x8x32xf32>
    %492 = vector.shape_cast %491 : vector<2x8x32xf32> to vector<16x32xf32>
    %493 = vector.shape_cast %440 : vector<2x8x8xf32> to vector<2x1x8x8xf32>
    %494 = vector.shape_cast %456 : vector<2x8x8xf32> to vector<2x1x8x8xf32>
    %495 = vector.shape_cast %472 : vector<2x8x8xf32> to vector<2x1x8x8xf32>
    %496 = vector.shape_cast %488 : vector<2x8x8xf32> to vector<2x1x8x8xf32>
    %497 = tpu.concatenate %493, %494, %495, %496 in 1 : vector<2x1x8x8xf32>, vector<2x1x8x8xf32>, vector<2x1x8x8xf32>, vector<2x1x8x8xf32> -> vector<2x4x8x8xf32>
    %c0_176 = arith.constant 0 : index
    %c0_177 = arith.constant 0 : index
    %498 = vector.load %arg15[%c0_176, %c0_177] : memref<32x32xf32, #tpu.memory_space<vmem>>, vector<32x32xf32>
    %cst_178 = arith.constant dense<0.000000e+00> : vector<16x32xf32>
    %499 = tpu.matmul %492, %498, %cst_178 {dimension_numbers = #tpu.dot_dimension_numbers<[1], [0], [0], [1], [0, 0, 1, 1], [], []>} : vector<16x32xf32>, vector<32x32xf32>, vector<16x32xf32> -> vector<16x32xf32>
    %c0_179 = arith.constant 0 : index
    %c0_180 = arith.constant 0 : index
    %500 = vector.load %arg13[%c0_179, %c0_180] : memref<1x32xf32, #tpu.memory_space<vmem>>, vector<1x32xf32>
    %501 = vector.broadcast %500 : vector<1x32xf32> to vector<16x32xf32>
    %502 = arith.addf %499, %501 : vector<16x32xf32>
    %503 = arith.addf %502, %415 : vector<16x32xf32>
    %c0_181 = arith.constant 0 : index
    %c0_182 = arith.constant 0 : index
    %504 = vector.load %arg10[%c0_181, %c0_182] : memref<2x32xf32, #tpu.memory_space<vmem>>, vector<2x32xf32>
    %505 = vector.extract_strided_slice %504 {offsets = [0, 0], sizes = [1, 32], strides = [1, 1]} : vector<2x32xf32> to vector<1x32xf32>
    %506 = vector.extract_strided_slice %504 {offsets = [1, 0], sizes = [1, 32], strides = [1, 1]} : vector<2x32xf32> to vector<1x32xf32>
    %cst_183 = arith.constant dense<0.000000e+00> : vector<16xf32>
    %507 = vector.multi_reduction <add>, %503, %cst_183 [1] : vector<16x32xf32> to vector<16xf32>
    %508 = vector.shape_cast %507 : vector<16xf32> to vector<16x1xf32>
    %cst_184 = arith.constant 3.200000e+01 : f32
    %509 = vector.broadcast %cst_184 : f32 to vector<16x1xf32>
    %510 = arith.divf %508, %509 : vector<16x1xf32>
    %511 = vector.broadcast %510 : vector<16x1xf32> to vector<16x32xf32>
    %512 = arith.subf %503, %511 : vector<16x32xf32>
    %513 = arith.mulf %512, %512 : vector<16x32xf32>
    %cst_185 = arith.constant dense<0.000000e+00> : vector<16xf32>
    %514 = vector.multi_reduction <add>, %513, %cst_185 [1] : vector<16x32xf32> to vector<16xf32>
    %515 = vector.shape_cast %514 : vector<16xf32> to vector<16x1xf32>
    %cst_186 = arith.constant 3.200000e+01 : f32
    %516 = vector.broadcast %cst_186 : f32 to vector<16x1xf32>
    %517 = arith.divf %515, %516 : vector<16x1xf32>
    %518 = vector.broadcast %510 : vector<16x1xf32> to vector<16x32xf32>
    %519 = arith.subf %503, %518 : vector<16x32xf32>
    %cst_187 = arith.constant 9.99999974E-6 : f32
    %520 = vector.broadcast %cst_187 : f32 to vector<16x1xf32>
    %521 = arith.addf %517, %520 : vector<16x1xf32>
    %522 = math.rsqrt %521 : vector<16x1xf32>
    %523 = vector.broadcast %522 : vector<16x1xf32> to vector<16x32xf32>
    %524 = arith.mulf %519, %523 : vector<16x32xf32>
    %525 = vector.broadcast %505 : vector<1x32xf32> to vector<16x32xf32>
    %526 = arith.mulf %524, %525 : vector<16x32xf32>
    %527 = vector.broadcast %506 : vector<1x32xf32> to vector<16x32xf32>
    %528 = arith.addf %526, %527 : vector<16x32xf32>
    %c0_188 = arith.constant 0 : index
    %c0_189 = arith.constant 0 : index
    %529 = vector.load %arg22[%c0_188, %c0_189] : memref<32x32xf32, #tpu.memory_space<vmem>>, vector<32x32xf32>
    %cst_190 = arith.constant dense<0.000000e+00> : vector<16x32xf32>
    %530 = tpu.matmul %528, %529, %cst_190 {dimension_numbers = #tpu.dot_dimension_numbers<[1], [0], [0], [1], [0, 0, 1, 1], [], []>} : vector<16x32xf32>, vector<32x32xf32>, vector<16x32xf32> -> vector<16x32xf32>
    %c0_191 = arith.constant 0 : index
    %c0_192 = arith.constant 0 : index
    %531 = vector.load %arg19[%c0_191, %c0_192] : memref<1x32xf32, #tpu.memory_space<vmem>>, vector<1x32xf32>
    %532 = vector.broadcast %531 : vector<1x32xf32> to vector<16x32xf32>
    %533 = arith.addf %530, %532 : vector<16x32xf32>
    %c0_193 = arith.constant 0 : index
    %c0_194 = arith.constant 0 : index
    %534 = vector.load %arg20[%c0_193, %c0_194] : memref<32x64xf32, #tpu.memory_space<vmem>>, vector<32x64xf32>
    %cst_195 = arith.constant dense<0.000000e+00> : vector<16x64xf32>
    %535 = tpu.matmul %397, %534, %cst_195 {dimension_numbers = #tpu.dot_dimension_numbers<[1], [0], [0], [1], [0, 0, 1, 1], [], []>} : vector<16x32xf32>, vector<32x64xf32>, vector<16x64xf32> -> vector<16x64xf32>
    %c0_196 = arith.constant 0 : index
    %c0_197 = arith.constant 0 : index
    %536 = vector.load %arg17[%c0_196, %c0_197] : memref<1x64xf32, #tpu.memory_space<vmem>>, vector<1x64xf32>
    %537 = vector.broadcast %536 : vector<1x64xf32> to vector<16x64xf32>
    %538 = arith.addf %535, %537 : vector<16x64xf32>
    %539 = vector.extract_strided_slice %538 {offsets = [0, 0], sizes = [16, 32], strides = [1, 1]} : vector<16x64xf32> to vector<16x32xf32>
    %540 = vector.extract_strided_slice %538 {offsets = [0, 32], sizes = [16, 32], strides = [1, 1]} : vector<16x64xf32> to vector<16x32xf32>
    %541 = vector.shape_cast %533 : vector<16x32xf32> to vector<2x8x32xf32>
    %542 = vector.shape_cast %539 : vector<16x32xf32> to vector<2x8x32xf32>
    %543 = vector.shape_cast %540 : vector<16x32xf32> to vector<2x8x32xf32>
    %544 = vector.extract_strided_slice %541 {offsets = [0, 0, 0], sizes = [2, 8, 8], strides = [1, 1, 1]} : vector<2x8x32xf32> to vector<2x8x8xf32>
    %545 = vector.extract_strided_slice %542 {offsets = [0, 0, 0], sizes = [2, 8, 8], strides = [1, 1, 1]} : vector<2x8x32xf32> to vector<2x8x8xf32>
    "tpu.trace_start"() <{level = 10 : i32, message = "bqd,bkd->bqk"}> : () -> ()
    %cst_198 = arith.constant dense<0.000000e+00> : vector<2x8x8xf32>
    %546 = tpu.matmul %544, %545, %cst_198 {dimension_numbers = #tpu.dot_dimension_numbers<[2], [2], [1], [1], [0, 0, 0, 1, 1, 1], [0], [0]>} : vector<2x8x8xf32>, vector<2x8x8xf32>, vector<2x8x8xf32> -> vector<2x8x8xf32>
    "tpu.trace_stop"() : () -> ()
    %547 = vector.broadcast %8 : vector<2x1x8xf32> to vector<2x8x8xf32>
    %548 = arith.addf %546, %547 : vector<2x8x8xf32>
    %cst_199 = arith.constant dense<0xFF800000> : vector<2x8xf32>
    %549 = vector.multi_reduction <maximumf>, %548, %cst_199 [2] : vector<2x8x8xf32> to vector<2x8xf32>
    %550 = vector.shape_cast %549 : vector<2x8xf32> to vector<2x8x1xf32>
    %551 = vector.broadcast %550 : vector<2x8x1xf32> to vector<2x8x8xf32>
    %552 = arith.subf %548, %551 : vector<2x8x8xf32>
    %553 = math.exp %552 : vector<2x8x8xf32>
    %cst_200 = arith.constant dense<0.000000e+00> : vector<2x8xf32>
    %554 = vector.multi_reduction <add>, %553, %cst_200 [2] : vector<2x8x8xf32> to vector<2x8xf32>
    %555 = vector.shape_cast %554 : vector<2x8xf32> to vector<2x8x1xf32>
    %556 = vector.broadcast %555 : vector<2x8x1xf32> to vector<2x8x8xf32>
    %557 = arith.divf %553, %556 : vector<2x8x8xf32>
    %558 = vector.extract_strided_slice %543 {offsets = [0, 0, 0], sizes = [2, 8, 8], strides = [1, 1, 1]} : vector<2x8x32xf32> to vector<2x8x8xf32>
    "tpu.trace_start"() <{level = 10 : i32, message = "bqk,bkd->bqd"}> : () -> ()
    %cst_201 = arith.constant dense<0.000000e+00> : vector<2x8x8xf32>
    %559 = tpu.matmul %557, %558, %cst_201 {dimension_numbers = #tpu.dot_dimension_numbers<[2], [1], [1], [2], [0, 0, 0, 1, 1, 2], [0], [0]>} : vector<2x8x8xf32>, vector<2x8x8xf32>, vector<2x8x8xf32> -> vector<2x8x8xf32>
    "tpu.trace_stop"() : () -> ()
    %560 = vector.extract_strided_slice %541 {offsets = [0, 0, 8], sizes = [2, 8, 8], strides = [1, 1, 1]} : vector<2x8x32xf32> to vector<2x8x8xf32>
    %561 = vector.extract_strided_slice %542 {offsets = [0, 0, 8], sizes = [2, 8, 8], strides = [1, 1, 1]} : vector<2x8x32xf32> to vector<2x8x8xf32>
    "tpu.trace_start"() <{level = 10 : i32, message = "bqd,bkd->bqk"}> : () -> ()
    %cst_202 = arith.constant dense<0.000000e+00> : vector<2x8x8xf32>
    %562 = tpu.matmul %560, %561, %cst_202 {dimension_numbers = #tpu.dot_dimension_numbers<[2], [2], [1], [1], [0, 0, 0, 1, 1, 1], [0], [0]>} : vector<2x8x8xf32>, vector<2x8x8xf32>, vector<2x8x8xf32> -> vector<2x8x8xf32>
    "tpu.trace_stop"() : () -> ()
    %563 = vector.broadcast %8 : vector<2x1x8xf32> to vector<2x8x8xf32>
    %564 = arith.addf %562, %563 : vector<2x8x8xf32>
    %cst_203 = arith.constant dense<0xFF800000> : vector<2x8xf32>
    %565 = vector.multi_reduction <maximumf>, %564, %cst_203 [2] : vector<2x8x8xf32> to vector<2x8xf32>
    %566 = vector.shape_cast %565 : vector<2x8xf32> to vector<2x8x1xf32>
    %567 = vector.broadcast %566 : vector<2x8x1xf32> to vector<2x8x8xf32>
    %568 = arith.subf %564, %567 : vector<2x8x8xf32>
    %569 = math.exp %568 : vector<2x8x8xf32>
    %cst_204 = arith.constant dense<0.000000e+00> : vector<2x8xf32>
    %570 = vector.multi_reduction <add>, %569, %cst_204 [2] : vector<2x8x8xf32> to vector<2x8xf32>
    %571 = vector.shape_cast %570 : vector<2x8xf32> to vector<2x8x1xf32>
    %572 = vector.broadcast %571 : vector<2x8x1xf32> to vector<2x8x8xf32>
    %573 = arith.divf %569, %572 : vector<2x8x8xf32>
    %574 = vector.extract_strided_slice %543 {offsets = [0, 0, 8], sizes = [2, 8, 8], strides = [1, 1, 1]} : vector<2x8x32xf32> to vector<2x8x8xf32>
    "tpu.trace_start"() <{level = 10 : i32, message = "bqk,bkd->bqd"}> : () -> ()
    %cst_205 = arith.constant dense<0.000000e+00> : vector<2x8x8xf32>
    %575 = tpu.matmul %573, %574, %cst_205 {dimension_numbers = #tpu.dot_dimension_numbers<[2], [1], [1], [2], [0, 0, 0, 1, 1, 2], [0], [0]>} : vector<2x8x8xf32>, vector<2x8x8xf32>, vector<2x8x8xf32> -> vector<2x8x8xf32>
    "tpu.trace_stop"() : () -> ()
    %576 = vector.extract_strided_slice %541 {offsets = [0, 0, 16], sizes = [2, 8, 8], strides = [1, 1, 1]} : vector<2x8x32xf32> to vector<2x8x8xf32>
    %577 = vector.extract_strided_slice %542 {offsets = [0, 0, 16], sizes = [2, 8, 8], strides = [1, 1, 1]} : vector<2x8x32xf32> to vector<2x8x8xf32>
    "tpu.trace_start"() <{level = 10 : i32, message = "bqd,bkd->bqk"}> : () -> ()
    %cst_206 = arith.constant dense<0.000000e+00> : vector<2x8x8xf32>
    %578 = tpu.matmul %576, %577, %cst_206 {dimension_numbers = #tpu.dot_dimension_numbers<[2], [2], [1], [1], [0, 0, 0, 1, 1, 1], [0], [0]>} : vector<2x8x8xf32>, vector<2x8x8xf32>, vector<2x8x8xf32> -> vector<2x8x8xf32>
    "tpu.trace_stop"() : () -> ()
    %579 = vector.broadcast %8 : vector<2x1x8xf32> to vector<2x8x8xf32>
    %580 = arith.addf %578, %579 : vector<2x8x8xf32>
    %cst_207 = arith.constant dense<0xFF800000> : vector<2x8xf32>
    %581 = vector.multi_reduction <maximumf>, %580, %cst_207 [2] : vector<2x8x8xf32> to vector<2x8xf32>
    %582 = vector.shape_cast %581 : vector<2x8xf32> to vector<2x8x1xf32>
    %583 = vector.broadcast %582 : vector<2x8x1xf32> to vector<2x8x8xf32>
    %584 = arith.subf %580, %583 : vector<2x8x8xf32>
    %585 = math.exp %584 : vector<2x8x8xf32>
    %cst_208 = arith.constant dense<0.000000e+00> : vector<2x8xf32>
    %586 = vector.multi_reduction <add>, %585, %cst_208 [2] : vector<2x8x8xf32> to vector<2x8xf32>
    %587 = vector.shape_cast %586 : vector<2x8xf32> to vector<2x8x1xf32>
    %588 = vector.broadcast %587 : vector<2x8x1xf32> to vector<2x8x8xf32>
    %589 = arith.divf %585, %588 : vector<2x8x8xf32>
    %590 = vector.extract_strided_slice %543 {offsets = [0, 0, 16], sizes = [2, 8, 8], strides = [1, 1, 1]} : vector<2x8x32xf32> to vector<2x8x8xf32>
    "tpu.trace_start"() <{level = 10 : i32, message = "bqk,bkd->bqd"}> : () -> ()
    %cst_209 = arith.constant dense<0.000000e+00> : vector<2x8x8xf32>
    %591 = tpu.matmul %589, %590, %cst_209 {dimension_numbers = #tpu.dot_dimension_numbers<[2], [1], [1], [2], [0, 0, 0, 1, 1, 2], [0], [0]>} : vector<2x8x8xf32>, vector<2x8x8xf32>, vector<2x8x8xf32> -> vector<2x8x8xf32>
    "tpu.trace_stop"() : () -> ()
    %592 = vector.extract_strided_slice %541 {offsets = [0, 0, 24], sizes = [2, 8, 8], strides = [1, 1, 1]} : vector<2x8x32xf32> to vector<2x8x8xf32>
    %593 = vector.extract_strided_slice %542 {offsets = [0, 0, 24], sizes = [2, 8, 8], strides = [1, 1, 1]} : vector<2x8x32xf32> to vector<2x8x8xf32>
    "tpu.trace_start"() <{level = 10 : i32, message = "bqd,bkd->bqk"}> : () -> ()
    %cst_210 = arith.constant dense<0.000000e+00> : vector<2x8x8xf32>
    %594 = tpu.matmul %592, %593, %cst_210 {dimension_numbers = #tpu.dot_dimension_numbers<[2], [2], [1], [1], [0, 0, 0, 1, 1, 1], [0], [0]>} : vector<2x8x8xf32>, vector<2x8x8xf32>, vector<2x8x8xf32> -> vector<2x8x8xf32>
    "tpu.trace_stop"() : () -> ()
    %595 = vector.broadcast %8 : vector<2x1x8xf32> to vector<2x8x8xf32>
    %596 = arith.addf %594, %595 : vector<2x8x8xf32>
    %cst_211 = arith.constant dense<0xFF800000> : vector<2x8xf32>
    %597 = vector.multi_reduction <maximumf>, %596, %cst_211 [2] : vector<2x8x8xf32> to vector<2x8xf32>
    %598 = vector.shape_cast %597 : vector<2x8xf32> to vector<2x8x1xf32>
    %599 = vector.broadcast %598 : vector<2x8x1xf32> to vector<2x8x8xf32>
    %600 = arith.subf %596, %599 : vector<2x8x8xf32>
    %601 = math.exp %600 : vector<2x8x8xf32>
    %cst_212 = arith.constant dense<0.000000e+00> : vector<2x8xf32>
    %602 = vector.multi_reduction <add>, %601, %cst_212 [2] : vector<2x8x8xf32> to vector<2x8xf32>
    %603 = vector.shape_cast %602 : vector<2x8xf32> to vector<2x8x1xf32>
    %604 = vector.broadcast %603 : vector<2x8x1xf32> to vector<2x8x8xf32>
    %605 = arith.divf %601, %604 : vector<2x8x8xf32>
    %606 = vector.extract_strided_slice %543 {offsets = [0, 0, 24], sizes = [2, 8, 8], strides = [1, 1, 1]} : vector<2x8x32xf32> to vector<2x8x8xf32>
    "tpu.trace_start"() <{level = 10 : i32, message = "bqk,bkd->bqd"}> : () -> ()
    %cst_213 = arith.constant dense<0.000000e+00> : vector<2x8x8xf32>
    %607 = tpu.matmul %605, %606, %cst_213 {dimension_numbers = #tpu.dot_dimension_numbers<[2], [1], [1], [2], [0, 0, 0, 1, 1, 2], [0], [0]>} : vector<2x8x8xf32>, vector<2x8x8xf32>, vector<2x8x8xf32> -> vector<2x8x8xf32>
    "tpu.trace_stop"() : () -> ()
    %608 = tpu.concatenate %559, %575, %591, %607 in 2 : vector<2x8x8xf32>, vector<2x8x8xf32>, vector<2x8x8xf32>, vector<2x8x8xf32> -> vector<2x8x32xf32>
    %609 = vector.shape_cast %608 : vector<2x8x32xf32> to vector<16x32xf32>
    %610 = vector.shape_cast %557 : vector<2x8x8xf32> to vector<2x1x8x8xf32>
    %611 = vector.shape_cast %573 : vector<2x8x8xf32> to vector<2x1x8x8xf32>
    %612 = vector.shape_cast %589 : vector<2x8x8xf32> to vector<2x1x8x8xf32>
    %613 = vector.shape_cast %605 : vector<2x8x8xf32> to vector<2x1x8x8xf32>
    %614 = tpu.concatenate %610, %611, %612, %613 in 1 : vector<2x1x8x8xf32>, vector<2x1x8x8xf32>, vector<2x1x8x8xf32>, vector<2x1x8x8xf32> -> vector<2x4x8x8xf32>
    %c0_214 = arith.constant 0 : index
    %c0_215 = arith.constant 0 : index
    %615 = vector.load %arg21[%c0_214, %c0_215] : memref<32x32xf32, #tpu.memory_space<vmem>>, vector<32x32xf32>
    %cst_216 = arith.constant dense<0.000000e+00> : vector<16x32xf32>
    %616 = tpu.matmul %609, %615, %cst_216 {dimension_numbers = #tpu.dot_dimension_numbers<[1], [0], [0], [1], [0, 0, 1, 1], [], []>} : vector<16x32xf32>, vector<32x32xf32>, vector<16x32xf32> -> vector<16x32xf32>
    %c0_217 = arith.constant 0 : index
    %c0_218 = arith.constant 0 : index
    %617 = vector.load %arg18[%c0_217, %c0_218] : memref<1x32xf32, #tpu.memory_space<vmem>>, vector<1x32xf32>
    %618 = vector.broadcast %617 : vector<1x32xf32> to vector<16x32xf32>
    %619 = arith.addf %616, %618 : vector<16x32xf32>
    %620 = arith.addf %619, %528 : vector<16x32xf32>
    %c0_219 = arith.constant 0 : index
    %c0_220 = arith.constant 0 : index
    %621 = vector.load %arg11[%c0_219, %c0_220] : memref<2x32xf32, #tpu.memory_space<vmem>>, vector<2x32xf32>
    %622 = vector.extract_strided_slice %621 {offsets = [0, 0], sizes = [1, 32], strides = [1, 1]} : vector<2x32xf32> to vector<1x32xf32>
    %623 = vector.extract_strided_slice %621 {offsets = [1, 0], sizes = [1, 32], strides = [1, 1]} : vector<2x32xf32> to vector<1x32xf32>
    %cst_221 = arith.constant dense<0.000000e+00> : vector<16xf32>
    %624 = vector.multi_reduction <add>, %620, %cst_221 [1] : vector<16x32xf32> to vector<16xf32>
    %625 = vector.shape_cast %624 : vector<16xf32> to vector<16x1xf32>
    %cst_222 = arith.constant 3.200000e+01 : f32
    %626 = vector.broadcast %cst_222 : f32 to vector<16x1xf32>
    %627 = arith.divf %625, %626 : vector<16x1xf32>
    %628 = vector.broadcast %627 : vector<16x1xf32> to vector<16x32xf32>
    %629 = arith.subf %620, %628 : vector<16x32xf32>
    %630 = arith.mulf %629, %629 : vector<16x32xf32>
    %cst_223 = arith.constant dense<0.000000e+00> : vector<16xf32>
    %631 = vector.multi_reduction <add>, %630, %cst_223 [1] : vector<16x32xf32> to vector<16xf32>
    %632 = vector.shape_cast %631 : vector<16xf32> to vector<16x1xf32>
    %cst_224 = arith.constant 3.200000e+01 : f32
    %633 = vector.broadcast %cst_224 : f32 to vector<16x1xf32>
    %634 = arith.divf %632, %633 : vector<16x1xf32>
    %635 = vector.broadcast %627 : vector<16x1xf32> to vector<16x32xf32>
    %636 = arith.subf %620, %635 : vector<16x32xf32>
    %cst_225 = arith.constant 9.99999974E-6 : f32
    %637 = vector.broadcast %cst_225 : f32 to vector<16x1xf32>
    %638 = arith.addf %634, %637 : vector<16x1xf32>
    %639 = math.rsqrt %638 : vector<16x1xf32>
    %640 = vector.broadcast %639 : vector<16x1xf32> to vector<16x32xf32>
    %641 = arith.mulf %636, %640 : vector<16x32xf32>
    %642 = vector.broadcast %622 : vector<1x32xf32> to vector<16x32xf32>
    %643 = arith.mulf %641, %642 : vector<16x32xf32>
    %644 = vector.broadcast %623 : vector<1x32xf32> to vector<16x32xf32>
    %645 = arith.addf %643, %644 : vector<16x32xf32>
    %c0_226 = arith.constant 0 : index
    %c0_227 = arith.constant 0 : index
    %646 = vector.load %arg8[%c0_226, %c0_227] : memref<32x64xf32, #tpu.memory_space<vmem>>, vector<32x64xf32>
    %cst_228 = arith.constant dense<0.000000e+00> : vector<16x64xf32>
    %647 = tpu.matmul %645, %646, %cst_228 {dimension_numbers = #tpu.dot_dimension_numbers<[1], [0], [0], [1], [0, 0, 1, 1], [], []>} : vector<16x32xf32>, vector<32x64xf32>, vector<16x64xf32> -> vector<16x64xf32>
    %c0_229 = arith.constant 0 : index
    %c0_230 = arith.constant 0 : index
    %648 = vector.load %arg6[%c0_229, %c0_230] : memref<1x64xf32, #tpu.memory_space<vmem>>, vector<1x64xf32>
    %649 = vector.broadcast %648 : vector<1x64xf32> to vector<16x64xf32>
    %650 = arith.addf %647, %649 : vector<16x64xf32>
    %cst_231 = arith.constant 0.000000e+00 : f32
    %651 = vector.broadcast %cst_231 : f32 to vector<16x64xf32>
    %652 = arith.cmpf ogt, %650, %651 : vector<16x64xf32>
    %cst_232 = arith.constant 2.000000e-01 : f32
    %653 = vector.broadcast %cst_232 : f32 to vector<16x64xf32>
    %654 = arith.mulf %653, %650 : vector<16x64xf32>
    %655 = arith.select %652, %650, %654 : vector<16x64xi1>, vector<16x64xf32>
    %c0_233 = arith.constant 0 : index
    %c0_234 = arith.constant 0 : index
    %656 = vector.load %arg9[%c0_233, %c0_234] : memref<64x32xf32, #tpu.memory_space<vmem>>, vector<64x32xf32>
    %cst_235 = arith.constant dense<0.000000e+00> : vector<16x32xf32>
    %657 = tpu.matmul %655, %656, %cst_235 {dimension_numbers = #tpu.dot_dimension_numbers<[1], [0], [0], [1], [0, 0, 1, 1], [], []>} : vector<16x64xf32>, vector<64x32xf32>, vector<16x32xf32> -> vector<16x32xf32>
    %c0_236 = arith.constant 0 : index
    %c0_237 = arith.constant 0 : index
    %658 = vector.load %arg7[%c0_236, %c0_237] : memref<1x32xf32, #tpu.memory_space<vmem>>, vector<1x32xf32>
    %659 = vector.broadcast %658 : vector<1x32xf32> to vector<16x32xf32>
    %660 = arith.addf %657, %659 : vector<16x32xf32>
    %661 = arith.addf %660, %645 : vector<16x32xf32>
    %c0_238 = arith.constant 0 : index
    %c0_239 = arith.constant 0 : index
    %662 = vector.load %arg12[%c0_238, %c0_239] : memref<2x32xf32, #tpu.memory_space<vmem>>, vector<2x32xf32>
    %663 = vector.extract_strided_slice %662 {offsets = [0, 0], sizes = [1, 32], strides = [1, 1]} : vector<2x32xf32> to vector<1x32xf32>
    %664 = vector.extract_strided_slice %662 {offsets = [1, 0], sizes = [1, 32], strides = [1, 1]} : vector<2x32xf32> to vector<1x32xf32>
    %cst_240 = arith.constant dense<0.000000e+00> : vector<16xf32>
    %665 = vector.multi_reduction <add>, %661, %cst_240 [1] : vector<16x32xf32> to vector<16xf32>
    %666 = vector.shape_cast %665 : vector<16xf32> to vector<16x1xf32>
    %cst_241 = arith.constant 3.200000e+01 : f32
    %667 = vector.broadcast %cst_241 : f32 to vector<16x1xf32>
    %668 = arith.divf %666, %667 : vector<16x1xf32>
    %669 = vector.broadcast %668 : vector<16x1xf32> to vector<16x32xf32>
    %670 = arith.subf %661, %669 : vector<16x32xf32>
    %671 = arith.mulf %670, %670 : vector<16x32xf32>
    %cst_242 = arith.constant dense<0.000000e+00> : vector<16xf32>
    %672 = vector.multi_reduction <add>, %671, %cst_242 [1] : vector<16x32xf32> to vector<16xf32>
    %673 = vector.shape_cast %672 : vector<16xf32> to vector<16x1xf32>
    %cst_243 = arith.constant 3.200000e+01 : f32
    %674 = vector.broadcast %cst_243 : f32 to vector<16x1xf32>
    %675 = arith.divf %673, %674 : vector<16x1xf32>
    %676 = vector.broadcast %668 : vector<16x1xf32> to vector<16x32xf32>
    %677 = arith.subf %661, %676 : vector<16x32xf32>
    %cst_244 = arith.constant 9.99999974E-6 : f32
    %678 = vector.broadcast %cst_244 : f32 to vector<16x1xf32>
    %679 = arith.addf %675, %678 : vector<16x1xf32>
    %680 = math.rsqrt %679 : vector<16x1xf32>
    %681 = vector.broadcast %680 : vector<16x1xf32> to vector<16x32xf32>
    %682 = arith.mulf %677, %681 : vector<16x32xf32>
    %683 = vector.broadcast %663 : vector<1x32xf32> to vector<16x32xf32>
    %684 = arith.mulf %682, %683 : vector<16x32xf32>
    %685 = vector.broadcast %664 : vector<1x32xf32> to vector<16x32xf32>
    %686 = arith.addf %684, %685 : vector<16x32xf32>
    %c0_245 = arith.constant 0 : index
    %c0_246 = arith.constant 0 : index
    %c0_247 = arith.constant 0 : index
    %c0_248 = arith.constant 0 : index
    %687 = vector.load %arg70[%c0_245, %c0_246, %c0_247, %c0_248] : memref<2x4x8x8xf32, #tpu.memory_space<vmem>>, vector<2x4x8x8xf32>
    tpu.vector_store %arg70[%c0_245, %c0_246, %c0_247, %c0_248], %497 {strides = array<i32>} : memref<2x4x8x8xf32, #tpu.memory_space<vmem>>, vector<2x4x8x8xf32>,
    %c0_249 = arith.constant 0 : index
    %c0_250 = arith.constant 0 : index
    %c0_251 = arith.constant 0 : index
    %c0_252 = arith.constant 0 : index
    %688 = vector.load %arg71[%c0_249, %c0_250, %c0_251, %c0_252] : memref<2x4x8x8xf32, #tpu.memory_space<vmem>>, vector<2x4x8x8xf32>
    tpu.vector_store %arg71[%c0_249, %c0_250, %c0_251, %c0_252], %614 {strides = array<i32>} : memref<2x4x8x8xf32, #tpu.memory_space<vmem>>, vector<2x4x8x8xf32>,
    %c0_253 = arith.constant 0 : index
    %c0_254 = arith.constant 0 : index
    %689 = vector.load %arg33[%c0_253, %c0_254] : memref<32x96xf32, #tpu.memory_space<vmem>>, vector<32x96xf32>
    %cst_255 = arith.constant dense<0.000000e+00> : vector<16x96xf32>
    %690 = tpu.matmul %686, %689, %cst_255 {dimension_numbers = #tpu.dot_dimension_numbers<[1], [0], [0], [1], [0, 0, 1, 1], [], []>} : vector<16x32xf32>, vector<32x96xf32>, vector<16x96xf32> -> vector<16x96xf32>
    %c0_256 = arith.constant 0 : index
    %c0_257 = arith.constant 0 : index
    %691 = vector.load %arg31[%c0_256, %c0_257] : memref<1x96xf32, #tpu.memory_space<vmem>>, vector<1x96xf32>
    %692 = vector.broadcast %691 : vector<1x96xf32> to vector<16x96xf32>
    %693 = arith.addf %690, %692 : vector<16x96xf32>
    %694 = vector.extract_strided_slice %693 {offsets = [0, 0], sizes = [16, 32], strides = [1, 1]} : vector<16x96xf32> to vector<16x32xf32>
    %695 = vector.extract_strided_slice %693 {offsets = [0, 32], sizes = [16, 32], strides = [1, 1]} : vector<16x96xf32> to vector<16x32xf32>
    %696 = vector.extract_strided_slice %693 {offsets = [0, 64], sizes = [16, 32], strides = [1, 1]} : vector<16x96xf32> to vector<16x32xf32>
    %697 = vector.shape_cast %694 : vector<16x32xf32> to vector<2x8x32xf32>
    %698 = vector.shape_cast %695 : vector<16x32xf32> to vector<2x8x32xf32>
    %699 = vector.shape_cast %696 : vector<16x32xf32> to vector<2x8x32xf32>
    %700 = vector.extract_strided_slice %697 {offsets = [0, 0, 0], sizes = [2, 8, 8], strides = [1, 1, 1]} : vector<2x8x32xf32> to vector<2x8x8xf32>
    %701 = vector.extract_strided_slice %698 {offsets = [0, 0, 0], sizes = [2, 8, 8], strides = [1, 1, 1]} : vector<2x8x32xf32> to vector<2x8x8xf32>
    "tpu.trace_start"() <{level = 10 : i32, message = "bqd,bkd->bqk"}> : () -> ()
    %cst_258 = arith.constant dense<0.000000e+00> : vector<2x8x8xf32>
    %702 = tpu.matmul %700, %701, %cst_258 {dimension_numbers = #tpu.dot_dimension_numbers<[2], [2], [1], [1], [0, 0, 0, 1, 1, 1], [0], [0]>} : vector<2x8x8xf32>, vector<2x8x8xf32>, vector<2x8x8xf32> -> vector<2x8x8xf32>
    "tpu.trace_stop"() : () -> ()
    %703 = vector.broadcast %5 : vector<1x8x8xf32> to vector<2x8x8xf32>
    %704 = arith.addf %702, %703 : vector<2x8x8xf32>
    %cst_259 = arith.constant dense<0xFF800000> : vector<2x8xf32>
    %705 = vector.multi_reduction <maximumf>, %704, %cst_259 [2] : vector<2x8x8xf32> to vector<2x8xf32>
    %706 = vector.shape_cast %705 : vector<2x8xf32> to vector<2x8x1xf32>
    %707 = vector.broadcast %706 : vector<2x8x1xf32> to vector<2x8x8xf32>
    %708 = arith.subf %704, %707 : vector<2x8x8xf32>
    %709 = math.exp %708 : vector<2x8x8xf32>
    %cst_260 = arith.constant dense<0.000000e+00> : vector<2x8xf32>
    %710 = vector.multi_reduction <add>, %709, %cst_260 [2] : vector<2x8x8xf32> to vector<2x8xf32>
    %711 = vector.shape_cast %710 : vector<2x8xf32> to vector<2x8x1xf32>
    %712 = vector.broadcast %711 : vector<2x8x1xf32> to vector<2x8x8xf32>
    %713 = arith.divf %709, %712 : vector<2x8x8xf32>
    %714 = vector.extract_strided_slice %699 {offsets = [0, 0, 0], sizes = [2, 8, 8], strides = [1, 1, 1]} : vector<2x8x32xf32> to vector<2x8x8xf32>
    "tpu.trace_start"() <{level = 10 : i32, message = "bqk,bkd->bqd"}> : () -> ()
    %cst_261 = arith.constant dense<0.000000e+00> : vector<2x8x8xf32>
    %715 = tpu.matmul %713, %714, %cst_261 {dimension_numbers = #tpu.dot_dimension_numbers<[2], [1], [1], [2], [0, 0, 0, 1, 1, 2], [0], [0]>} : vector<2x8x8xf32>, vector<2x8x8xf32>, vector<2x8x8xf32> -> vector<2x8x8xf32>
    "tpu.trace_stop"() : () -> ()
    %716 = vector.extract_strided_slice %697 {offsets = [0, 0, 8], sizes = [2, 8, 8], strides = [1, 1, 1]} : vector<2x8x32xf32> to vector<2x8x8xf32>
    %717 = vector.extract_strided_slice %698 {offsets = [0, 0, 8], sizes = [2, 8, 8], strides = [1, 1, 1]} : vector<2x8x32xf32> to vector<2x8x8xf32>
    "tpu.trace_start"() <{level = 10 : i32, message = "bqd,bkd->bqk"}> : () -> ()
    %cst_262 = arith.constant dense<0.000000e+00> : vector<2x8x8xf32>
    %718 = tpu.matmul %716, %717, %cst_262 {dimension_numbers = #tpu.dot_dimension_numbers<[2], [2], [1], [1], [0, 0, 0, 1, 1, 1], [0], [0]>} : vector<2x8x8xf32>, vector<2x8x8xf32>, vector<2x8x8xf32> -> vector<2x8x8xf32>
    "tpu.trace_stop"() : () -> ()
    %719 = vector.broadcast %5 : vector<1x8x8xf32> to vector<2x8x8xf32>
    %720 = arith.addf %718, %719 : vector<2x8x8xf32>
    %cst_263 = arith.constant dense<0xFF800000> : vector<2x8xf32>
    %721 = vector.multi_reduction <maximumf>, %720, %cst_263 [2] : vector<2x8x8xf32> to vector<2x8xf32>
    %722 = vector.shape_cast %721 : vector<2x8xf32> to vector<2x8x1xf32>
    %723 = vector.broadcast %722 : vector<2x8x1xf32> to vector<2x8x8xf32>
    %724 = arith.subf %720, %723 : vector<2x8x8xf32>
    %725 = math.exp %724 : vector<2x8x8xf32>
    %cst_264 = arith.constant dense<0.000000e+00> : vector<2x8xf32>
    %726 = vector.multi_reduction <add>, %725, %cst_264 [2] : vector<2x8x8xf32> to vector<2x8xf32>
    %727 = vector.shape_cast %726 : vector<2x8xf32> to vector<2x8x1xf32>
    %728 = vector.broadcast %727 : vector<2x8x1xf32> to vector<2x8x8xf32>
    %729 = arith.divf %725, %728 : vector<2x8x8xf32>
    %730 = vector.extract_strided_slice %699 {offsets = [0, 0, 8], sizes = [2, 8, 8], strides = [1, 1, 1]} : vector<2x8x32xf32> to vector<2x8x8xf32>
    "tpu.trace_start"() <{level = 10 : i32, message = "bqk,bkd->bqd"}> : () -> ()
    %cst_265 = arith.constant dense<0.000000e+00> : vector<2x8x8xf32>
    %731 = tpu.matmul %729, %730, %cst_265 {dimension_numbers = #tpu.dot_dimension_numbers<[2], [1], [1], [2], [0, 0, 0, 1, 1, 2], [0], [0]>} : vector<2x8x8xf32>, vector<2x8x8xf32>, vector<2x8x8xf32> -> vector<2x8x8xf32>
    "tpu.trace_stop"() : () -> ()
    %732 = vector.extract_strided_slice %697 {offsets = [0, 0, 16], sizes = [2, 8, 8], strides = [1, 1, 1]} : vector<2x8x32xf32> to vector<2x8x8xf32>
    %733 = vector.extract_strided_slice %698 {offsets = [0, 0, 16], sizes = [2, 8, 8], strides = [1, 1, 1]} : vector<2x8x32xf32> to vector<2x8x8xf32>
    "tpu.trace_start"() <{level = 10 : i32, message = "bqd,bkd->bqk"}> : () -> ()
    %cst_266 = arith.constant dense<0.000000e+00> : vector<2x8x8xf32>
    %734 = tpu.matmul %732, %733, %cst_266 {dimension_numbers = #tpu.dot_dimension_numbers<[2], [2], [1], [1], [0, 0, 0, 1, 1, 1], [0], [0]>} : vector<2x8x8xf32>, vector<2x8x8xf32>, vector<2x8x8xf32> -> vector<2x8x8xf32>
    "tpu.trace_stop"() : () -> ()
    %735 = vector.broadcast %5 : vector<1x8x8xf32> to vector<2x8x8xf32>
    %736 = arith.addf %734, %735 : vector<2x8x8xf32>
    %cst_267 = arith.constant dense<0xFF800000> : vector<2x8xf32>
    %737 = vector.multi_reduction <maximumf>, %736, %cst_267 [2] : vector<2x8x8xf32> to vector<2x8xf32>
    %738 = vector.shape_cast %737 : vector<2x8xf32> to vector<2x8x1xf32>
    %739 = vector.broadcast %738 : vector<2x8x1xf32> to vector<2x8x8xf32>
    %740 = arith.subf %736, %739 : vector<2x8x8xf32>
    %741 = math.exp %740 : vector<2x8x8xf32>
    %cst_268 = arith.constant dense<0.000000e+00> : vector<2x8xf32>
    %742 = vector.multi_reduction <add>, %741, %cst_268 [2] : vector<2x8x8xf32> to vector<2x8xf32>
    %743 = vector.shape_cast %742 : vector<2x8xf32> to vector<2x8x1xf32>
    %744 = vector.broadcast %743 : vector<2x8x1xf32> to vector<2x8x8xf32>
    %745 = arith.divf %741, %744 : vector<2x8x8xf32>
    %746 = vector.extract_strided_slice %699 {offsets = [0, 0, 16], sizes = [2, 8, 8], strides = [1, 1, 1]} : vector<2x8x32xf32> to vector<2x8x8xf32>
    "tpu.trace_start"() <{level = 10 : i32, message = "bqk,bkd->bqd"}> : () -> ()
    %cst_269 = arith.constant dense<0.000000e+00> : vector<2x8x8xf32>
    %747 = tpu.matmul %745, %746, %cst_269 {dimension_numbers = #tpu.dot_dimension_numbers<[2], [1], [1], [2], [0, 0, 0, 1, 1, 2], [0], [0]>} : vector<2x8x8xf32>, vector<2x8x8xf32>, vector<2x8x8xf32> -> vector<2x8x8xf32>
    "tpu.trace_stop"() : () -> ()
    %748 = vector.extract_strided_slice %697 {offsets = [0, 0, 24], sizes = [2, 8, 8], strides = [1, 1, 1]} : vector<2x8x32xf32> to vector<2x8x8xf32>
    %749 = vector.extract_strided_slice %698 {offsets = [0, 0, 24], sizes = [2, 8, 8], strides = [1, 1, 1]} : vector<2x8x32xf32> to vector<2x8x8xf32>
    "tpu.trace_start"() <{level = 10 : i32, message = "bqd,bkd->bqk"}> : () -> ()
    %cst_270 = arith.constant dense<0.000000e+00> : vector<2x8x8xf32>
    %750 = tpu.matmul %748, %749, %cst_270 {dimension_numbers = #tpu.dot_dimension_numbers<[2], [2], [1], [1], [0, 0, 0, 1, 1, 1], [0], [0]>} : vector<2x8x8xf32>, vector<2x8x8xf32>, vector<2x8x8xf32> -> vector<2x8x8xf32>
    "tpu.trace_stop"() : () -> ()
    %751 = vector.broadcast %5 : vector<1x8x8xf32> to vector<2x8x8xf32>
    %752 = arith.addf %750, %751 : vector<2x8x8xf32>
    %cst_271 = arith.constant dense<0xFF800000> : vector<2x8xf32>
    %753 = vector.multi_reduction <maximumf>, %752, %cst_271 [2] : vector<2x8x8xf32> to vector<2x8xf32>
    %754 = vector.shape_cast %753 : vector<2x8xf32> to vector<2x8x1xf32>
    %755 = vector.broadcast %754 : vector<2x8x1xf32> to vector<2x8x8xf32>
    %756 = arith.subf %752, %755 : vector<2x8x8xf32>
    %757 = math.exp %756 : vector<2x8x8xf32>
    %cst_272 = arith.constant dense<0.000000e+00> : vector<2x8xf32>
    %758 = vector.multi_reduction <add>, %757, %cst_272 [2] : vector<2x8x8xf32> to vector<2x8xf32>
    %759 = vector.shape_cast %758 : vector<2x8xf32> to vector<2x8x1xf32>
    %760 = vector.broadcast %759 : vector<2x8x1xf32> to vector<2x8x8xf32>
    %761 = arith.divf %757, %760 : vector<2x8x8xf32>
    %762 = vector.extract_strided_slice %699 {offsets = [0, 0, 24], sizes = [2, 8, 8], strides = [1, 1, 1]} : vector<2x8x32xf32> to vector<2x8x8xf32>
    "tpu.trace_start"() <{level = 10 : i32, message = "bqk,bkd->bqd"}> : () -> ()
    %cst_273 = arith.constant dense<0.000000e+00> : vector<2x8x8xf32>
    %763 = tpu.matmul %761, %762, %cst_273 {dimension_numbers = #tpu.dot_dimension_numbers<[2], [1], [1], [2], [0, 0, 0, 1, 1, 2], [0], [0]>} : vector<2x8x8xf32>, vector<2x8x8xf32>, vector<2x8x8xf32> -> vector<2x8x8xf32>
    "tpu.trace_stop"() : () -> ()
    %764 = tpu.concatenate %715, %731, %747, %763 in 2 : vector<2x8x8xf32>, vector<2x8x8xf32>, vector<2x8x8xf32>, vector<2x8x8xf32> -> vector<2x8x32xf32>
    %765 = vector.shape_cast %764 : vector<2x8x32xf32> to vector<16x32xf32>
    %766 = vector.shape_cast %713 : vector<2x8x8xf32> to vector<2x1x8x8xf32>
    %767 = vector.shape_cast %729 : vector<2x8x8xf32> to vector<2x1x8x8xf32>
    %768 = vector.shape_cast %745 : vector<2x8x8xf32> to vector<2x1x8x8xf32>
    %769 = vector.shape_cast %761 : vector<2x8x8xf32> to vector<2x1x8x8xf32>
    %770 = tpu.concatenate %766, %767, %768, %769 in 1 : vector<2x1x8x8xf32>, vector<2x1x8x8xf32>, vector<2x1x8x8xf32>, vector<2x1x8x8xf32> -> vector<2x4x8x8xf32>
    %c0_274 = arith.constant 0 : index
    %c0_275 = arith.constant 0 : index
    %771 = vector.load %arg32[%c0_274, %c0_275] : memref<32x32xf32, #tpu.memory_space<vmem>>, vector<32x32xf32>
    %cst_276 = arith.constant dense<0.000000e+00> : vector<16x32xf32>
    %772 = tpu.matmul %765, %771, %cst_276 {dimension_numbers = #tpu.dot_dimension_numbers<[1], [0], [0], [1], [0, 0, 1, 1], [], []>} : vector<16x32xf32>, vector<32x32xf32>, vector<16x32xf32> -> vector<16x32xf32>
    %c0_277 = arith.constant 0 : index
    %c0_278 = arith.constant 0 : index
    %773 = vector.load %arg30[%c0_277, %c0_278] : memref<1x32xf32, #tpu.memory_space<vmem>>, vector<1x32xf32>
    %774 = vector.broadcast %773 : vector<1x32xf32> to vector<16x32xf32>
    %775 = arith.addf %772, %774 : vector<16x32xf32>
    %776 = arith.addf %775, %686 : vector<16x32xf32>
    %c0_279 = arith.constant 0 : index
    %c0_280 = arith.constant 0 : index
    %777 = vector.load %arg27[%c0_279, %c0_280] : memref<2x32xf32, #tpu.memory_space<vmem>>, vector<2x32xf32>
    %778 = vector.extract_strided_slice %777 {offsets = [0, 0], sizes = [1, 32], strides = [1, 1]} : vector<2x32xf32> to vector<1x32xf32>
    %779 = vector.extract_strided_slice %777 {offsets = [1, 0], sizes = [1, 32], strides = [1, 1]} : vector<2x32xf32> to vector<1x32xf32>
    %cst_281 = arith.constant dense<0.000000e+00> : vector<16xf32>
    %780 = vector.multi_reduction <add>, %776, %cst_281 [1] : vector<16x32xf32> to vector<16xf32>
    %781 = vector.shape_cast %780 : vector<16xf32> to vector<16x1xf32>
    %cst_282 = arith.constant 3.200000e+01 : f32
    %782 = vector.broadcast %cst_282 : f32 to vector<16x1xf32>
    %783 = arith.divf %781, %782 : vector<16x1xf32>
    %784 = vector.broadcast %783 : vector<16x1xf32> to vector<16x32xf32>
    %785 = arith.subf %776, %784 : vector<16x32xf32>
    %786 = arith.mulf %785, %785 : vector<16x32xf32>
    %cst_283 = arith.constant dense<0.000000e+00> : vector<16xf32>
    %787 = vector.multi_reduction <add>, %786, %cst_283 [1] : vector<16x32xf32> to vector<16xf32>
    %788 = vector.shape_cast %787 : vector<16xf32> to vector<16x1xf32>
    %cst_284 = arith.constant 3.200000e+01 : f32
    %789 = vector.broadcast %cst_284 : f32 to vector<16x1xf32>
    %790 = arith.divf %788, %789 : vector<16x1xf32>
    %791 = vector.broadcast %783 : vector<16x1xf32> to vector<16x32xf32>
    %792 = arith.subf %776, %791 : vector<16x32xf32>
    %cst_285 = arith.constant 9.99999974E-6 : f32
    %793 = vector.broadcast %cst_285 : f32 to vector<16x1xf32>
    %794 = arith.addf %790, %793 : vector<16x1xf32>
    %795 = math.rsqrt %794 : vector<16x1xf32>
    %796 = vector.broadcast %795 : vector<16x1xf32> to vector<16x32xf32>
    %797 = arith.mulf %792, %796 : vector<16x32xf32>
    %798 = vector.broadcast %778 : vector<1x32xf32> to vector<16x32xf32>
    %799 = arith.mulf %797, %798 : vector<16x32xf32>
    %800 = vector.broadcast %779 : vector<1x32xf32> to vector<16x32xf32>
    %801 = arith.addf %799, %800 : vector<16x32xf32>
    %c0_286 = arith.constant 0 : index
    %c0_287 = arith.constant 0 : index
    %802 = vector.load %arg39[%c0_286, %c0_287] : memref<32x32xf32, #tpu.memory_space<vmem>>, vector<32x32xf32>
    %cst_288 = arith.constant dense<0.000000e+00> : vector<16x32xf32>
    %803 = tpu.matmul %801, %802, %cst_288 {dimension_numbers = #tpu.dot_dimension_numbers<[1], [0], [0], [1], [0, 0, 1, 1], [], []>} : vector<16x32xf32>, vector<32x32xf32>, vector<16x32xf32> -> vector<16x32xf32>
    %c0_289 = arith.constant 0 : index
    %c0_290 = arith.constant 0 : index
    %804 = vector.load %arg36[%c0_289, %c0_290] : memref<1x32xf32, #tpu.memory_space<vmem>>, vector<1x32xf32>
    %805 = vector.broadcast %804 : vector<1x32xf32> to vector<16x32xf32>
    %806 = arith.addf %803, %805 : vector<16x32xf32>
    %c0_291 = arith.constant 0 : index
    %c0_292 = arith.constant 0 : index
    %807 = vector.load %arg37[%c0_291, %c0_292] : memref<32x64xf32, #tpu.memory_space<vmem>>, vector<32x64xf32>
    %cst_293 = arith.constant dense<0.000000e+00> : vector<16x64xf32>
    %808 = tpu.matmul %397, %807, %cst_293 {dimension_numbers = #tpu.dot_dimension_numbers<[1], [0], [0], [1], [0, 0, 1, 1], [], []>} : vector<16x32xf32>, vector<32x64xf32>, vector<16x64xf32> -> vector<16x64xf32>
    %c0_294 = arith.constant 0 : index
    %c0_295 = arith.constant 0 : index
    %809 = vector.load %arg34[%c0_294, %c0_295] : memref<1x64xf32, #tpu.memory_space<vmem>>, vector<1x64xf32>
    %810 = vector.broadcast %809 : vector<1x64xf32> to vector<16x64xf32>
    %811 = arith.addf %808, %810 : vector<16x64xf32>
    %812 = vector.extract_strided_slice %811 {offsets = [0, 0], sizes = [16, 32], strides = [1, 1]} : vector<16x64xf32> to vector<16x32xf32>
    %813 = vector.extract_strided_slice %811 {offsets = [0, 32], sizes = [16, 32], strides = [1, 1]} : vector<16x64xf32> to vector<16x32xf32>
    %814 = vector.shape_cast %806 : vector<16x32xf32> to vector<2x8x32xf32>
    %815 = vector.shape_cast %812 : vector<16x32xf32> to vector<2x8x32xf32>
    %816 = vector.shape_cast %813 : vector<16x32xf32> to vector<2x8x32xf32>
    %817 = vector.extract_strided_slice %814 {offsets = [0, 0, 0], sizes = [2, 8, 8], strides = [1, 1, 1]} : vector<2x8x32xf32> to vector<2x8x8xf32>
    %818 = vector.extract_strided_slice %815 {offsets = [0, 0, 0], sizes = [2, 8, 8], strides = [1, 1, 1]} : vector<2x8x32xf32> to vector<2x8x8xf32>
    "tpu.trace_start"() <{level = 10 : i32, message = "bqd,bkd->bqk"}> : () -> ()
    %cst_296 = arith.constant dense<0.000000e+00> : vector<2x8x8xf32>
    %819 = tpu.matmul %817, %818, %cst_296 {dimension_numbers = #tpu.dot_dimension_numbers<[2], [2], [1], [1], [0, 0, 0, 1, 1, 1], [0], [0]>} : vector<2x8x8xf32>, vector<2x8x8xf32>, vector<2x8x8xf32> -> vector<2x8x8xf32>
    "tpu.trace_stop"() : () -> ()
    %820 = vector.broadcast %8 : vector<2x1x8xf32> to vector<2x8x8xf32>
    %821 = arith.addf %819, %820 : vector<2x8x8xf32>
    %cst_297 = arith.constant dense<0xFF800000> : vector<2x8xf32>
    %822 = vector.multi_reduction <maximumf>, %821, %cst_297 [2] : vector<2x8x8xf32> to vector<2x8xf32>
    %823 = vector.shape_cast %822 : vector<2x8xf32> to vector<2x8x1xf32>
    %824 = vector.broadcast %823 : vector<2x8x1xf32> to vector<2x8x8xf32>
    %825 = arith.subf %821, %824 : vector<2x8x8xf32>
    %826 = math.exp %825 : vector<2x8x8xf32>
    %cst_298 = arith.constant dense<0.000000e+00> : vector<2x8xf32>
    %827 = vector.multi_reduction <add>, %826, %cst_298 [2] : vector<2x8x8xf32> to vector<2x8xf32>
    %828 = vector.shape_cast %827 : vector<2x8xf32> to vector<2x8x1xf32>
    %829 = vector.broadcast %828 : vector<2x8x1xf32> to vector<2x8x8xf32>
    %830 = arith.divf %826, %829 : vector<2x8x8xf32>
    %831 = vector.extract_strided_slice %816 {offsets = [0, 0, 0], sizes = [2, 8, 8], strides = [1, 1, 1]} : vector<2x8x32xf32> to vector<2x8x8xf32>
    "tpu.trace_start"() <{level = 10 : i32, message = "bqk,bkd->bqd"}> : () -> ()
    %cst_299 = arith.constant dense<0.000000e+00> : vector<2x8x8xf32>
    %832 = tpu.matmul %830, %831, %cst_299 {dimension_numbers = #tpu.dot_dimension_numbers<[2], [1], [1], [2], [0, 0, 0, 1, 1, 2], [0], [0]>} : vector<2x8x8xf32>, vector<2x8x8xf32>, vector<2x8x8xf32> -> vector<2x8x8xf32>
    "tpu.trace_stop"() : () -> ()
    %833 = vector.extract_strided_slice %814 {offsets = [0, 0, 8], sizes = [2, 8, 8], strides = [1, 1, 1]} : vector<2x8x32xf32> to vector<2x8x8xf32>
    %834 = vector.extract_strided_slice %815 {offsets = [0, 0, 8], sizes = [2, 8, 8], strides = [1, 1, 1]} : vector<2x8x32xf32> to vector<2x8x8xf32>
    "tpu.trace_start"() <{level = 10 : i32, message = "bqd,bkd->bqk"}> : () -> ()
    %cst_300 = arith.constant dense<0.000000e+00> : vector<2x8x8xf32>
    %835 = tpu.matmul %833, %834, %cst_300 {dimension_numbers = #tpu.dot_dimension_numbers<[2], [2], [1], [1], [0, 0, 0, 1, 1, 1], [0], [0]>} : vector<2x8x8xf32>, vector<2x8x8xf32>, vector<2x8x8xf32> -> vector<2x8x8xf32>
    "tpu.trace_stop"() : () -> ()
    %836 = vector.broadcast %8 : vector<2x1x8xf32> to vector<2x8x8xf32>
    %837 = arith.addf %835, %836 : vector<2x8x8xf32>
    %cst_301 = arith.constant dense<0xFF800000> : vector<2x8xf32>
    %838 = vector.multi_reduction <maximumf>, %837, %cst_301 [2] : vector<2x8x8xf32> to vector<2x8xf32>
    %839 = vector.shape_cast %838 : vector<2x8xf32> to vector<2x8x1xf32>
    %840 = vector.broadcast %839 : vector<2x8x1xf32> to vector<2x8x8xf32>
    %841 = arith.subf %837, %840 : vector<2x8x8xf32>
    %842 = math.exp %841 : vector<2x8x8xf32>
    %cst_302 = arith.constant dense<0.000000e+00> : vector<2x8xf32>
    %843 = vector.multi_reduction <add>, %842, %cst_302 [2] : vector<2x8x8xf32> to vector<2x8xf32>
    %844 = vector.shape_cast %843 : vector<2x8xf32> to vector<2x8x1xf32>
    %845 = vector.broadcast %844 : vector<2x8x1xf32> to vector<2x8x8xf32>
    %846 = arith.divf %842, %845 : vector<2x8x8xf32>
    %847 = vector.extract_strided_slice %816 {offsets = [0, 0, 8], sizes = [2, 8, 8], strides = [1, 1, 1]} : vector<2x8x32xf32> to vector<2x8x8xf32>
    "tpu.trace_start"() <{level = 10 : i32, message = "bqk,bkd->bqd"}> : () -> ()
    %cst_303 = arith.constant dense<0.000000e+00> : vector<2x8x8xf32>
    %848 = tpu.matmul %846, %847, %cst_303 {dimension_numbers = #tpu.dot_dimension_numbers<[2], [1], [1], [2], [0, 0, 0, 1, 1, 2], [0], [0]>} : vector<2x8x8xf32>, vector<2x8x8xf32>, vector<2x8x8xf32> -> vector<2x8x8xf32>
    "tpu.trace_stop"() : () -> ()
    %849 = vector.extract_strided_slice %814 {offsets = [0, 0, 16], sizes = [2, 8, 8], strides = [1, 1, 1]} : vector<2x8x32xf32> to vector<2x8x8xf32>
    %850 = vector.extract_strided_slice %815 {offsets = [0, 0, 16], sizes = [2, 8, 8], strides = [1, 1, 1]} : vector<2x8x32xf32> to vector<2x8x8xf32>
    "tpu.trace_start"() <{level = 10 : i32, message = "bqd,bkd->bqk"}> : () -> ()
    %cst_304 = arith.constant dense<0.000000e+00> : vector<2x8x8xf32>
    %851 = tpu.matmul %849, %850, %cst_304 {dimension_numbers = #tpu.dot_dimension_numbers<[2], [2], [1], [1], [0, 0, 0, 1, 1, 1], [0], [0]>} : vector<2x8x8xf32>, vector<2x8x8xf32>, vector<2x8x8xf32> -> vector<2x8x8xf32>
    "tpu.trace_stop"() : () -> ()
    %852 = vector.broadcast %8 : vector<2x1x8xf32> to vector<2x8x8xf32>
    %853 = arith.addf %851, %852 : vector<2x8x8xf32>
    %cst_305 = arith.constant dense<0xFF800000> : vector<2x8xf32>
    %854 = vector.multi_reduction <maximumf>, %853, %cst_305 [2] : vector<2x8x8xf32> to vector<2x8xf32>
    %855 = vector.shape_cast %854 : vector<2x8xf32> to vector<2x8x1xf32>
    %856 = vector.broadcast %855 : vector<2x8x1xf32> to vector<2x8x8xf32>
    %857 = arith.subf %853, %856 : vector<2x8x8xf32>
    %858 = math.exp %857 : vector<2x8x8xf32>
    %cst_306 = arith.constant dense<0.000000e+00> : vector<2x8xf32>
    %859 = vector.multi_reduction <add>, %858, %cst_306 [2] : vector<2x8x8xf32> to vector<2x8xf32>
    %860 = vector.shape_cast %859 : vector<2x8xf32> to vector<2x8x1xf32>
    %861 = vector.broadcast %860 : vector<2x8x1xf32> to vector<2x8x8xf32>
    %862 = arith.divf %858, %861 : vector<2x8x8xf32>
    %863 = vector.extract_strided_slice %816 {offsets = [0, 0, 16], sizes = [2, 8, 8], strides = [1, 1, 1]} : vector<2x8x32xf32> to vector<2x8x8xf32>
    "tpu.trace_start"() <{level = 10 : i32, message = "bqk,bkd->bqd"}> : () -> ()
    %cst_307 = arith.constant dense<0.000000e+00> : vector<2x8x8xf32>
    %864 = tpu.matmul %862, %863, %cst_307 {dimension_numbers = #tpu.dot_dimension_numbers<[2], [1], [1], [2], [0, 0, 0, 1, 1, 2], [0], [0]>} : vector<2x8x8xf32>, vector<2x8x8xf32>, vector<2x8x8xf32> -> vector<2x8x8xf32>
    "tpu.trace_stop"() : () -> ()
    %865 = vector.extract_strided_slice %814 {offsets = [0, 0, 24], sizes = [2, 8, 8], strides = [1, 1, 1]} : vector<2x8x32xf32> to vector<2x8x8xf32>
    %866 = vector.extract_strided_slice %815 {offsets = [0, 0, 24], sizes = [2, 8, 8], strides = [1, 1, 1]} : vector<2x8x32xf32> to vector<2x8x8xf32>
    "tpu.trace_start"() <{level = 10 : i32, message = "bqd,bkd->bqk"}> : () -> ()
    %cst_308 = arith.constant dense<0.000000e+00> : vector<2x8x8xf32>
    %867 = tpu.matmul %865, %866, %cst_308 {dimension_numbers = #tpu.dot_dimension_numbers<[2], [2], [1], [1], [0, 0, 0, 1, 1, 1], [0], [0]>} : vector<2x8x8xf32>, vector<2x8x8xf32>, vector<2x8x8xf32> -> vector<2x8x8xf32>
    "tpu.trace_stop"() : () -> ()
    %868 = vector.broadcast %8 : vector<2x1x8xf32> to vector<2x8x8xf32>
    %869 = arith.addf %867, %868 : vector<2x8x8xf32>
    %cst_309 = arith.constant dense<0xFF800000> : vector<2x8xf32>
    %870 = vector.multi_reduction <maximumf>, %869, %cst_309 [2] : vector<2x8x8xf32> to vector<2x8xf32>
    %871 = vector.shape_cast %870 : vector<2x8xf32> to vector<2x8x1xf32>
    %872 = vector.broadcast %871 : vector<2x8x1xf32> to vector<2x8x8xf32>
    %873 = arith.subf %869, %872 : vector<2x8x8xf32>
    %874 = math.exp %873 : vector<2x8x8xf32>
    %cst_310 = arith.constant dense<0.000000e+00> : vector<2x8xf32>
    %875 = vector.multi_reduction <add>, %874, %cst_310 [2] : vector<2x8x8xf32> to vector<2x8xf32>
    %876 = vector.shape_cast %875 : vector<2x8xf32> to vector<2x8x1xf32>
    %877 = vector.broadcast %876 : vector<2x8x1xf32> to vector<2x8x8xf32>
    %878 = arith.divf %874, %877 : vector<2x8x8xf32>
    %879 = vector.extract_strided_slice %816 {offsets = [0, 0, 24], sizes = [2, 8, 8], strides = [1, 1, 1]} : vector<2x8x32xf32> to vector<2x8x8xf32>
    "tpu.trace_start"() <{level = 10 : i32, message = "bqk,bkd->bqd"}> : () -> ()
    %cst_311 = arith.constant dense<0.000000e+00> : vector<2x8x8xf32>
    %880 = tpu.matmul %878, %879, %cst_311 {dimension_numbers = #tpu.dot_dimension_numbers<[2], [1], [1], [2], [0, 0, 0, 1, 1, 2], [0], [0]>} : vector<2x8x8xf32>, vector<2x8x8xf32>, vector<2x8x8xf32> -> vector<2x8x8xf32>
    "tpu.trace_stop"() : () -> ()
    %881 = tpu.concatenate %832, %848, %864, %880 in 2 : vector<2x8x8xf32>, vector<2x8x8xf32>, vector<2x8x8xf32>, vector<2x8x8xf32> -> vector<2x8x32xf32>
    %882 = vector.shape_cast %881 : vector<2x8x32xf32> to vector<16x32xf32>
    %883 = vector.shape_cast %830 : vector<2x8x8xf32> to vector<2x1x8x8xf32>
    %884 = vector.shape_cast %846 : vector<2x8x8xf32> to vector<2x1x8x8xf32>
    %885 = vector.shape_cast %862 : vector<2x8x8xf32> to vector<2x1x8x8xf32>
    %886 = vector.shape_cast %878 : vector<2x8x8xf32> to vector<2x1x8x8xf32>
    %887 = tpu.concatenate %883, %884, %885, %886 in 1 : vector<2x1x8x8xf32>, vector<2x1x8x8xf32>, vector<2x1x8x8xf32>, vector<2x1x8x8xf32> -> vector<2x4x8x8xf32>
    %c0_312 = arith.constant 0 : index
    %c0_313 = arith.constant 0 : index
    %888 = vector.load %arg38[%c0_312, %c0_313] : memref<32x32xf32, #tpu.memory_space<vmem>>, vector<32x32xf32>
    %cst_314 = arith.constant dense<0.000000e+00> : vector<16x32xf32>
    %889 = tpu.matmul %882, %888, %cst_314 {dimension_numbers = #tpu.dot_dimension_numbers<[1], [0], [0], [1], [0, 0, 1, 1], [], []>} : vector<16x32xf32>, vector<32x32xf32>, vector<16x32xf32> -> vector<16x32xf32>
    %c0_315 = arith.constant 0 : index
    %c0_316 = arith.constant 0 : index
    %890 = vector.load %arg35[%c0_315, %c0_316] : memref<1x32xf32, #tpu.memory_space<vmem>>, vector<1x32xf32>
    %891 = vector.broadcast %890 : vector<1x32xf32> to vector<16x32xf32>
    %892 = arith.addf %889, %891 : vector<16x32xf32>
    %893 = arith.addf %892, %801 : vector<16x32xf32>
    %c0_317 = arith.constant 0 : index
    %c0_318 = arith.constant 0 : index
    %894 = vector.load %arg28[%c0_317, %c0_318] : memref<2x32xf32, #tpu.memory_space<vmem>>, vector<2x32xf32>
    %895 = vector.extract_strided_slice %894 {offsets = [0, 0], sizes = [1, 32], strides = [1, 1]} : vector<2x32xf32> to vector<1x32xf32>
    %896 = vector.extract_strided_slice %894 {offsets = [1, 0], sizes = [1, 32], strides = [1, 1]} : vector<2x32xf32> to vector<1x32xf32>
    %cst_319 = arith.constant dense<0.000000e+00> : vector<16xf32>
    %897 = vector.multi_reduction <add>, %893, %cst_319 [1] : vector<16x32xf32> to vector<16xf32>
    %898 = vector.shape_cast %897 : vector<16xf32> to vector<16x1xf32>
    %cst_320 = arith.constant 3.200000e+01 : f32
    %899 = vector.broadcast %cst_320 : f32 to vector<16x1xf32>
    %900 = arith.divf %898, %899 : vector<16x1xf32>
    %901 = vector.broadcast %900 : vector<16x1xf32> to vector<16x32xf32>
    %902 = arith.subf %893, %901 : vector<16x32xf32>
    %903 = arith.mulf %902, %902 : vector<16x32xf32>
    %cst_321 = arith.constant dense<0.000000e+00> : vector<16xf32>
    %904 = vector.multi_reduction <add>, %903, %cst_321 [1] : vector<16x32xf32> to vector<16xf32>
    %905 = vector.shape_cast %904 : vector<16xf32> to vector<16x1xf32>
    %cst_322 = arith.constant 3.200000e+01 : f32
    %906 = vector.broadcast %cst_322 : f32 to vector<16x1xf32>
    %907 = arith.divf %905, %906 : vector<16x1xf32>
    %908 = vector.broadcast %900 : vector<16x1xf32> to vector<16x32xf32>
    %909 = arith.subf %893, %908 : vector<16x32xf32>
    %cst_323 = arith.constant 9.99999974E-6 : f32
    %910 = vector.broadcast %cst_323 : f32 to vector<16x1xf32>
    %911 = arith.addf %907, %910 : vector<16x1xf32>
    %912 = math.rsqrt %911 : vector<16x1xf32>
    %913 = vector.broadcast %912 : vector<16x1xf32> to vector<16x32xf32>
    %914 = arith.mulf %909, %913 : vector<16x32xf32>
    %915 = vector.broadcast %895 : vector<1x32xf32> to vector<16x32xf32>
    %916 = arith.mulf %914, %915 : vector<16x32xf32>
    %917 = vector.broadcast %896 : vector<1x32xf32> to vector<16x32xf32>
    %918 = arith.addf %916, %917 : vector<16x32xf32>
    %c0_324 = arith.constant 0 : index
    %c0_325 = arith.constant 0 : index
    %919 = vector.load %arg25[%c0_324, %c0_325] : memref<32x64xf32, #tpu.memory_space<vmem>>, vector<32x64xf32>
    %cst_326 = arith.constant dense<0.000000e+00> : vector<16x64xf32>
    %920 = tpu.matmul %918, %919, %cst_326 {dimension_numbers = #tpu.dot_dimension_numbers<[1], [0], [0], [1], [0, 0, 1, 1], [], []>} : vector<16x32xf32>, vector<32x64xf32>, vector<16x64xf32> -> vector<16x64xf32>
    %c0_327 = arith.constant 0 : index
    %c0_328 = arith.constant 0 : index
    %921 = vector.load %arg23[%c0_327, %c0_328] : memref<1x64xf32, #tpu.memory_space<vmem>>, vector<1x64xf32>
    %922 = vector.broadcast %921 : vector<1x64xf32> to vector<16x64xf32>
    %923 = arith.addf %920, %922 : vector<16x64xf32>
    %cst_329 = arith.constant 0.000000e+00 : f32
    %924 = vector.broadcast %cst_329 : f32 to vector<16x64xf32>
    %925 = arith.cmpf ogt, %923, %924 : vector<16x64xf32>
    %cst_330 = arith.constant 2.000000e-01 : f32
    %926 = vector.broadcast %cst_330 : f32 to vector<16x64xf32>
    %927 = arith.mulf %926, %923 : vector<16x64xf32>
    %928 = arith.select %925, %923, %927 : vector<16x64xi1>, vector<16x64xf32>
    %c0_331 = arith.constant 0 : index
    %c0_332 = arith.constant 0 : index
    %929 = vector.load %arg26[%c0_331, %c0_332] : memref<64x32xf32, #tpu.memory_space<vmem>>, vector<64x32xf32>
    %cst_333 = arith.constant dense<0.000000e+00> : vector<16x32xf32>
    %930 = tpu.matmul %928, %929, %cst_333 {dimension_numbers = #tpu.dot_dimension_numbers<[1], [0], [0], [1], [0, 0, 1, 1], [], []>} : vector<16x64xf32>, vector<64x32xf32>, vector<16x32xf32> -> vector<16x32xf32>
    %c0_334 = arith.constant 0 : index
    %c0_335 = arith.constant 0 : index
    %931 = vector.load %arg24[%c0_334, %c0_335] : memref<1x32xf32, #tpu.memory_space<vmem>>, vector<1x32xf32>
    %932 = vector.broadcast %931 : vector<1x32xf32> to vector<16x32xf32>
    %933 = arith.addf %930, %932 : vector<16x32xf32>
    %934 = arith.addf %933, %918 : vector<16x32xf32>
    %c0_336 = arith.constant 0 : index
    %c0_337 = arith.constant 0 : index
    %935 = vector.load %arg29[%c0_336, %c0_337] : memref<2x32xf32, #tpu.memory_space<vmem>>, vector<2x32xf32>
    %936 = vector.extract_strided_slice %935 {offsets = [0, 0], sizes = [1, 32], strides = [1, 1]} : vector<2x32xf32> to vector<1x32xf32>
    %937 = vector.extract_strided_slice %935 {offsets = [1, 0], sizes = [1, 32], strides = [1, 1]} : vector<2x32xf32> to vector<1x32xf32>
    %cst_338 = arith.constant dense<0.000000e+00> : vector<16xf32>
    %938 = vector.multi_reduction <add>, %934, %cst_338 [1] : vector<16x32xf32> to vector<16xf32>
    %939 = vector.shape_cast %938 : vector<16xf32> to vector<16x1xf32>
    %cst_339 = arith.constant 3.200000e+01 : f32
    %940 = vector.broadcast %cst_339 : f32 to vector<16x1xf32>
    %941 = arith.divf %939, %940 : vector<16x1xf32>
    %942 = vector.broadcast %941 : vector<16x1xf32> to vector<16x32xf32>
    %943 = arith.subf %934, %942 : vector<16x32xf32>
    %944 = arith.mulf %943, %943 : vector<16x32xf32>
    %cst_340 = arith.constant dense<0.000000e+00> : vector<16xf32>
    %945 = vector.multi_reduction <add>, %944, %cst_340 [1] : vector<16x32xf32> to vector<16xf32>
    %946 = vector.shape_cast %945 : vector<16xf32> to vector<16x1xf32>
    %cst_341 = arith.constant 3.200000e+01 : f32
    %947 = vector.broadcast %cst_341 : f32 to vector<16x1xf32>
    %948 = arith.divf %946, %947 : vector<16x1xf32>
    %949 = vector.broadcast %941 : vector<16x1xf32> to vector<16x32xf32>
    %950 = arith.subf %934, %949 : vector<16x32xf32>
    %cst_342 = arith.constant 9.99999974E-6 : f32
    %951 = vector.broadcast %cst_342 : f32 to vector<16x1xf32>
    %952 = arith.addf %948, %951 : vector<16x1xf32>
    %953 = math.rsqrt %952 : vector<16x1xf32>
    %954 = vector.broadcast %953 : vector<16x1xf32> to vector<16x32xf32>
    %955 = arith.mulf %950, %954 : vector<16x32xf32>
    %956 = vector.broadcast %936 : vector<1x32xf32> to vector<16x32xf32>
    %957 = arith.mulf %955, %956 : vector<16x32xf32>
    %958 = vector.broadcast %937 : vector<1x32xf32> to vector<16x32xf32>
    %959 = arith.addf %957, %958 : vector<16x32xf32>
    %c0_343 = arith.constant 0 : index
    %c0_344 = arith.constant 0 : index
    %c0_345 = arith.constant 0 : index
    %c0_346 = arith.constant 0 : index
    %960 = vector.load %arg72[%c0_343, %c0_344, %c0_345, %c0_346] : memref<2x4x8x8xf32, #tpu.memory_space<vmem>>, vector<2x4x8x8xf32>
    tpu.vector_store %arg72[%c0_343, %c0_344, %c0_345, %c0_346], %770 {strides = array<i32>} : memref<2x4x8x8xf32, #tpu.memory_space<vmem>>, vector<2x4x8x8xf32>,
    %c0_347 = arith.constant 0 : index
    %c0_348 = arith.constant 0 : index
    %c0_349 = arith.constant 0 : index
    %c0_350 = arith.constant 0 : index
    %961 = vector.load %arg73[%c0_347, %c0_348, %c0_349, %c0_350] : memref<2x4x8x8xf32, #tpu.memory_space<vmem>>, vector<2x4x8x8xf32>
    tpu.vector_store %arg73[%c0_347, %c0_348, %c0_349, %c0_350], %887 {strides = array<i32>} : memref<2x4x8x8xf32, #tpu.memory_space<vmem>>, vector<2x4x8x8xf32>,
    %c0_351 = arith.constant 0 : index
    %c0_352 = arith.constant 0 : index
    %962 = vector.load %arg67[%c0_351, %c0_352] : memref<32x40xf32, #tpu.memory_space<vmem>>, vector<32x40xf32>
    %cst_353 = arith.constant dense<0.000000e+00> : vector<16x40xf32>
    %963 = tpu.matmul %959, %962, %cst_353 {dimension_numbers = #tpu.dot_dimension_numbers<[1], [0], [0], [1], [0, 0, 1, 1], [], []>} : vector<16x32xf32>, vector<32x40xf32>, vector<16x40xf32> -> vector<16x40xf32>
    %c0_354 = arith.constant 0 : index
    %c0_355 = arith.constant 0 : index
    %964 = vector.load %arg68[%c0_354, %c0_355] : memref<1x40xf32, #tpu.memory_space<vmem>>, vector<1x40xf32>
    %965 = vector.broadcast %964 : vector<1x40xf32> to vector<16x40xf32>
    %966 = arith.addf %963, %965 : vector<16x40xf32>
    %967 = vector.shape_cast %966 : vector<16x40xf32> to vector<2x8x40xf32>
    %c0_356 = arith.constant 0 : index
    %c0_357 = arith.constant 0 : index
    %c0_358 = arith.constant 0 : index
    %968 = vector.load %arg69[%c0_356, %c0_357, %c0_358] : memref<2x8x40xf32, #tpu.memory_space<vmem>>, vector<2x8x40xf32>
    tpu.vector_store %arg69[%c0_356, %c0_357, %c0_358], %967 {strides = array<i32>} : memref<2x8x40xf32, #tpu.memory_space<vmem>>, vector<2x8x40xf32>,
    return
  }
}

</mosaic_0001>

<bundles_post_ra>
// kernel: transformer_forward.1
= control target key start
LH: loop header
LB: loop body
LE: loop exit
PB: predicated region body
PF: predicated region fallthrough
CT: control target
= control target key end

     0   :  { %s14541_s6 = smov 1   ;;  %s14542_s10 = smov 2   ;;  %s16513_s0 = inlined_call_operand.smem [shape: u32[74], index: -1, kind: input, shape index: {}] }
   0x1   :  { %s14681_s5 = sld [smem:[%s16513_s0]]   ;;  %s14543_s14 = smov 3  }
   0x2   :  { %s14686_s9 = sld [smem:[%s16513_s0 + %s14541_s6]]   ;;  %s14544_s18 = smov 4  }
   0x3   :  { %s14691_s13 = sld [smem:[%s16513_s0 + %s14542_s10]]   ;;  %s14545_s22 = smov 5  }
   0x4   :  { %s14696_s17 = sld [smem:[%s16513_s0 + %s14543_s14]]   ;;  %s14546_s26 = smov 6  }
   0x5   :  { %s14701_s21 = sld [smem:[%s16513_s0 + %s14544_s18]]   ;;  %s14547_s30 = smov 7  }
   0x6   :  { %s14706_s25 = sld [smem:[%s16513_s0 + %s14545_s22]]   ;;  %s14548_s4 = smov 8  }
   0x7   :  { %16543 = sst [smem:[#allocation87_spill]] %s14681_s5  ;;  %s14549_s10 = smov 9  }
   0x8   :  { %16544 = sst [smem:[#allocation88_spill]] %s14686_s9  ;;  %s14550_s15 = smov 10  }
   0x9   :  { %16545 = sst [smem:[#allocation89_spill]] %s14691_s13  ;;  %s14551_s20 = smov 11  }
   0xa   :  { %16546 = sst [smem:[#allocation90_spill]] %s14696_s17  ;;  %s14553_s1 = smov 13  }
   0xb   :  { %16547 = sst [smem:[#allocation91_spill]] %s14701_s21  ;;  %s14554_s7 = smov 14  }
   0xc   :  { %16548 = sst [smem:[#allocation92_spill]] %s14706_s25  ;;  %s14556_s22 = smov 16  }
   0xd   :  { %s14711_s29 = sld [smem:[%s16513_s0 + %s14546_s26]]   ;;  %s14552_s26 = smov 12  }
   0xe   :  { %s14716_s3 = sld [smem:[%s16513_s0 + %s14547_s30]]   ;;  %s14557_s28 = smov 17  }
   0xf   :  { %s14721_s8 = sld [smem:[%s16513_s0 + %s14548_s4]]  }
  0x10   :  { %s14726_s14 = sld [smem:[%s16513_s0 + %s14549_s10]]  }
  0x11   :  { %s14731_s19 = sld [smem:[%s16513_s0 + %s14550_s15]]   ;;  %s14555_s15 = smov 15  }
  0x12   :  { %s14736_s24 = sld [smem:[%s16513_s0 + %s14551_s20]]  }
  0x13   :  { %16549 = sst [smem:[#allocation93_spill]] %s14711_s29 }
  0x14   :  { %s14741_s30 = sld [smem:[%s16513_s0 + %s14552_s26]]  }
  0x15   :  { %16550 = sst [smem:[#allocation94_spill]] %s14721_s8 }
  0x16   :  { %16551 = sst [smem:[#allocation95_spill]] %s14726_s14 }
  0x17   :  { %16552 = sst [smem:[#allocation96_spill]] %s14731_s19 }
  0x18   :  { %s14746_s6 = sld [smem:[%s16513_s0 + %s14553_s1]]  }
  0x19   :  { %s14751_s12 = sld [smem:[%s16513_s0 + %s14554_s7]]   ;;  %s14558_s7 = smov 18  }
  0x1a   :  { %16553 = sst [smem:[#allocation97_spill]] %s14741_s30 }
  0x1b   :  { %s14756_s20 = sld [smem:[%s16513_s0 + %s14555_s15]]   ;;  %s14559_s15 = smov 19  }
  0x1c   :  { %s14761_s27 = sld [smem:[%s16513_s0 + %s14556_s22]]   ;;  %s14560_s22 = smov 20  }
  0x1d   :  { %s14766_s4 = sld [smem:[%s16513_s0 + %s14557_s28]]   ;;  %s14561_s28 = smov 21  }
  0x1e   :  { %s14771_s14 = sld [smem:[%s16513_s0 + %s14558_s7]]   ;;  %s14562_s7 = smov 22  }
  0x1f   :  { %16554 = sst [smem:[#allocation98_spill]] %s14751_s12 }
  0x20   :  { %s14776_s8 = sld [smem:[%s16513_s0 + %s14559_s15]]   ;;  %s14563_s15 = smov 23  }
  0x21   :  { %16555 = sst [smem:[#allocation99_spill]] %s14756_s20 }
  0x22   :  { %16556 = sst [smem:[#allocation100_spill]] %s14761_s27 }
  0x23   :  { %s14781_s21 = sld [smem:[%s16513_s0 + %s14560_s22]]   ;;  %s14564_s22 = smov 24  }
  0x24   :  { %16557 = sst [smem:[#allocation101_spill]] %s14771_s14 }
  0x25   :  { %s14786_s20 = sld [smem:[%s16513_s0 + %s14561_s28]]   ;;  %s14565_s28 = smov 25  }
  0x26   :  { %s14791_s17 = sld [smem:[%s16513_s0 + %s14562_s7]]   ;;  %s14566_s7 = smov 26  }
  0x27   :  { %s14796_s27 = sld [smem:[%s16513_s0 + %s14563_s15]]   ;;  %s14567_s15 = smov 27  }
  0x28   :  { %s14816_s25 = sld [smem:[%s16513_s0 + %s14567_s15]]   ;;  %s14571_s15 = smov 31  }
  0x29   :  { %16558 = sst [smem:[#allocation102_spill]] %s14781_s21 }
  0x2a   :  { %s14801_s21 = sld [smem:[%s16513_s0 + %s14564_s22]]   ;;  %s14568_s22 = smov 28  }
  0x2b   :  { %16559 = sst [smem:[#allocation103_spill]] %s14786_s20 }
  0x2c   :  { %16560 = sst [smem:[#allocation104_spill]] %s14791_s17 }
  0x2d   :  { %16561 = sst [smem:[#allocation105_spill]] %s14796_s27 }
  0x2e   :  { %s14806_s20 = sld [smem:[%s16513_s0 + %s14565_s28]]   ;;  %s14569_s28 = smov 29  }
  0x2f   :  { %s14811_s17 = sld [smem:[%s16513_s0 + %s14566_s7]]   ;;  %s14570_s7 = smov 30  }
  0x30   :  { %16564 = sst [smem:[#allocation108_spill]] %s14816_s25 }
  0x31   :  { %s14821_s9 = sld [smem:[%s16513_s0 + %s14568_s22]]   ;;  %s14572_s22 = smov 32  }
  0x32   :  { %s14836_s13 = sld [smem:[%s16513_s0 + %s14571_s15]]   ;;  %s14575_s15 = smov 35  }
  0x33   :  { %s14841_s5 = sld [smem:[%s16513_s0 + %s14572_s22]]   ;;  %s14576_s22 = smov 36  }
  0x34   :  { %16562 = sst [smem:[#allocation106_spill]] %s14806_s20 }
  0x35   :  { %16563 = sst [smem:[#allocation107_spill]] %s14811_s17 }
  0x36   :  { %s14826_s20 = sld [smem:[%s16513_s0 + %s14569_s28]]   ;;  %s14573_s28 = smov 33  }
  0x37   :  { %s14831_s17 = sld [smem:[%s16513_s0 + %s14570_s7]]   ;;  %s14574_s7 = smov 34  }
  0x38   :  { %16566 = sst [smem:[#allocation110_spill]] %s14836_s13 }
  0x39   :  { %16567 = sst [smem:[#allocation111_spill]] %s14841_s5 }
  0x3a   :  { %s14851_s25 = sld [smem:[%s16513_s0 + %s14574_s7]]   ;;  %s14578_s7 = smov 38  }
  0x3b   :  { %s14856_s13 = sld [smem:[%s16513_s0 + %s14575_s15]]   ;;  %s14579_s15 = smov 39  }
  0x3c   :  { %16565 = sst [smem:[#allocation109_spill]] %s14826_s20 }
  0x3d   :  { %s14846_s20 = sld [smem:[%s16513_s0 + %s14573_s28]]   ;;  %s14577_s28 = smov 37  }
  0x3e   :  { %s14861_s5 = sld [smem:[%s16513_s0 + %s14576_s22]]   ;;  %s14580_s22 = smov 40  }
  0x3f   :  { %s14871_s27 = sld [smem:[%s16513_s0 + %s14578_s7]]   ;;  %s14582_s7 = smov 42  }
  0x40   :  { %s14881_s14 = sld [smem:[%s16513_s0 + %s14580_s22]]   ;;  %s14584_s22 = smov 44  }
  0x41   :  { %16569 = sst [smem:[#allocation113_spill]] %s14856_s13 }
  0x42   :  { %s14876_s13 = sld [smem:[%s16513_s0 + %s14579_s15]]   ;;  %s14583_s15 = smov 43  }
  0x43   :  { %16568 = sst [smem:[#allocation112_spill]] %s14846_s20 }
  0x44   :  { %s14866_s20 = sld [smem:[%s16513_s0 + %s14577_s28]]   ;;  %s14581_s28 = smov 41  }
  0x45   :  { %16571 = sst [smem:[#allocation115_spill]] %s14871_s27 }
  0x46   :  { %16573 = sst [smem:[#allocation117_spill]] %s14881_s14 }
  0x47   :  { %s14891_s27 = sld [smem:[%s16513_s0 + %s14582_s7]]   ;;  %s14586_s7 = smov 46  }
  0x48   :  { %16572 = sst [smem:[#allocation116_spill]] %s14876_s13 }
  0x49   :  { %s14896_s13 = sld [smem:[%s16513_s0 + %s14583_s15]]   ;;  %s14587_s15 = smov 47  }
  0x4a   :  { %16570 = sst [smem:[#allocation114_spill]] %s14866_s20 }
  0x4b   :  { %s14886_s20 = sld [smem:[%s16513_s0 + %s14581_s28]]   ;;  %s14585_s28 = smov 45  }
  0x4c   :  { %s14901_s14 = sld [smem:[%s16513_s0 + %s14584_s22]]   ;;  %s14588_s22 = smov 48  }
  0x4d   :  { %s14911_s12 = sld [smem:[%s16513_s0 + %s14586_s7]]   ;;  %s14590_s7 = smov 50  }
  0x4e   :  { %s14921_s30 = sld [smem:[%s16513_s0 + %s14588_s22]]   ;;  %s14592_s22 = smov 52  }
  0x4f   :  { %16575 = sst [smem:[#allocation119_spill]] %s14896_s13 }
  0x50   :  { %s14916_s13 = sld [smem:[%s16513_s0 + %s14587_s15]]   ;;  %s14591_s15 = smov 51  }
  0x51   :  { %16574 = sst [smem:[#allocation118_spill]] %s14886_s20 }
  0x52   :  { %s14906_s20 = sld [smem:[%s16513_s0 + %s14585_s28]]   ;;  %s14589_s28 = smov 49  }
  0x53   :  { %16577 = sst [smem:[#allocation121_spill]] %s14911_s12 }
  0x54   :  { %s14931_s12 = sld [smem:[%s16513_s0 + %s14590_s7]]   ;;  %s14594_s7 = smov 54  }
  0x55   :  { %s14941_s19 = sld [smem:[%s16513_s0 + %s14592_s22]]   ;;  %s14596_s22 = smov 56  }
  0x56   :  { %16578 = sst [smem:[#allocation122_spill]] %s14916_s13 }
  0x57   :  { %s14936_s13 = sld [smem:[%s16513_s0 + %s14591_s15]]   ;;  %s14595_s15 = smov 55  }
  0x58   :  { %16576 = sst [smem:[#allocation120_spill]] %s14906_s20 }
  0x59   :  { %s14926_s20 = sld [smem:[%s16513_s0 + %s14589_s28]]   ;;  %s14593_s28 = smov 53  }
  0x5a   :  { %16580 = sst [smem:[#allocation124_spill]] %s14931_s12 }
  0x5b   :  { %s14951_s12 = sld [smem:[%s16513_s0 + %s14594_s7]]   ;;  %s14598_s7 = smov 58  }
  0x5c   :  { %s14961_s29 = sld [smem:[%s16513_s0 + %s14596_s22]]   ;;  %s14600_s22 = smov 60  }
  0x5d   :  { %16581 = sst [smem:[#allocation125_spill]] %s14936_s13 }
  0x5e   :  { %s14956_s13 = sld [smem:[%s16513_s0 + %s14595_s15]]   ;;  %s14599_s15 = smov 59  }
  0x5f   :  { %16579 = sst [smem:[#allocation123_spill]] %s14926_s20 }
  0x60   :  { %s14946_s20 = sld [smem:[%s16513_s0 + %s14593_s28]]   ;;  %s14597_s28 = smov 57  }
  0x61   :  { %16583 = sst [smem:[#allocation127_spill]] %s14951_s12 }
  0x62   :  { %16585 = sst [smem:[#allocation129_spill]] %s14961_s29 }
  0x63   :  { %s14971_s12 = sld [smem:[%s16513_s0 + %s14598_s7]]   ;;  %s14602_s7 = smov 62  }
  0x64   :  { %16584 = sst [smem:[#allocation128_spill]] %s14956_s13 }
  0x65   :  { %s14976_s13 = sld [smem:[%s16513_s0 + %s14599_s15]]   ;;  %s14603_s15 = smov 63  }
  0x66   :  { %16582 = sst [smem:[#allocation126_spill]] %s14946_s20 }
  0x67   :  { %s14966_s20 = sld [smem:[%s16513_s0 + %s14597_s28]]   ;;  %s14601_s28 = smov 61  }
  0x68   :  { %s14981_s29 = sld [smem:[%s16513_s0 + %s14600_s22]]   ;;  %s14604_s22 = smov 64  }
  0x69   :  { %16587 = sst [smem:[#allocation131_spill]] %s14971_s12 }
  0x6a   :  { %s14991_s12 = sld [smem:[%s16513_s0 + %s14602_s7]]   ;;  %s14606_s7 = smov 66  }
  0x6b   :  { %16588 = sst [smem:[#allocation132_spill]] %s14976_s13 }
  0x6c   :  { %s14996_s13 = sld [smem:[%s16513_s0 + %s14603_s15]]   ;;  %s14607_s15 = smov 67  }
  0x6d   :  { %16586 = sst [smem:[#allocation130_spill]] %s14966_s20 }
  0x6e   :  { %16589 = sst [smem:[#allocation133_spill]] %s14981_s29 }
  0x6f   :  { %s14986_s20 = sld [smem:[%s16513_s0 + %s14601_s28]]   ;;  %s14605_s28 = smov 65  }
  0x70   :  { %16591 = sst [smem:[#allocation135_spill]] %s14991_s12 }
  0x71   :  { %s15001_s29 = sld [smem:[%s16513_s0 + %s14604_s22]]   ;;  %s14608_s22 = smov 68  }
  0x72   :  { %16592 = sst [smem:[#allocation136_spill]] %s14996_s13 }
  0x73   :  { %s15011_s12 = sld [smem:[%s16513_s0 + %s14606_s7]]   ;;  %s14610_s7 = smov 70  }
  0x74   :  { %s15016_s13 = sld [smem:[%s16513_s0 + %s14607_s15]]   ;;  %s14611_s15 = smov 71  }
  0x75   :  { %16590 = sst [smem:[#allocation134_spill]] %s14986_s20 }
  0x76   :  { %s15006_s20 = sld [smem:[%s16513_s0 + %s14605_s28]]   ;;  %s14609_s28 = smov 69  }
  0x77   :  { %16593 = sst [smem:[#allocation137_spill]] %s15001_s29 }
  0x78   :  { %s15021_s29 = sld [smem:[%s16513_s0 + %s14608_s22]]   ;;  %s14612_s22 = smov 72  }
  0x79   :  { %16595 = sst [smem:[#allocation139_spill]] %s15011_s12 }
  0x7a   :  { %16596 = sst [smem:[#allocation140_spill]] %s15016_s13 }
  0x7b   :  { %s15031_s12 = sld [smem:[%s16513_s0 + %s14610_s7]]  }
  0x7c   :  { %16594 = sst [smem:[#allocation138_spill]] %s15006_s20 }
  0x7d   :  { %s15026_s20 = sld [smem:[%s16513_s0 + %s14609_s28]]   ;;  %s14613_s28 = smov 73  }
  0x7e   :  { %16597 = sst [smem:[#allocation141_spill]] %s15021_s29 }
  0x7f   :  { %s15036_s13 = sld [smem:[%s16513_s0 + %s14611_s15]]  }
  0x80   :  { %s15041_s29 = sld [smem:[%s16513_s0 + %s14612_s22]]  }
  0x83   :  { %16598 = sst [smem:[#allocation142_spill]] %s15026_s20 }
  0x84   :  { %s15046_s20 = sld [smem:[%s16513_s0 + %s14613_s28]]  }
  0x85   :  { %153 = vsyncpa [#allocation3], 0 }
  0x86   :  { %154 = vsyncpa [#allocation6], 0 }
  0x87   :  { %155 = vsyncpa [#allocation9], 0 }
  0x88   :  { %156 = vsyncpa [#allocation12], 0 }
  0x89   :  { %157 = vsyncpa [#allocation15], 0 }
  0x8a   :  { %158 = vsyncpa [#allocation18], 0 }
  0x8b   :  { %159 = vsyncpa [#allocation21], 0 }
  0x8c   :  { %160 = vsyncpa [#allocation24], 0 }
  0x8d   :  { %161 = vsyncpa [#allocation27], 0 }
  0x8e   :  { %162 = vsyncpa [#allocation30], 0 }
  0x8f   :  { %163 = vsyncpa [#allocation33], 0 }
  0x90   :  { %164 = vsyncpa [#allocation36], 0 }
  0x91   :  { %165 = vsyncpa [#allocation39], 0 }
  0x92   :  { %166 = vsyncpa [#allocation42], 0 }
  0x93   :  { %167 = vsyncpa [#allocation45], 0 }
  0x94   :  { %168 = vsyncpa [#allocation48], 0 }
  0x95   :  { %169 = vsyncpa [#allocation51], 0 }
  0x96   :  { %170 = vsyncpa [#allocation54], 0 }
  0x97   :  { %171 = vsyncpa [#allocation57], 0 }
  0x98   :  { %172 = vsyncpa [#allocation4], 0 }
  0x99   :  { %173 = vsyncpa [#allocation60], 0 }
  0x9a   :  { %174 = vsyncpa [#allocation63], 0  ;;  %s14614_s0 = smov [#allocation5]   ;;  %s14615_s10 = smov [#allocation8]  }
  0x9b   :  { %s203_s7 = sshll.u32 %s14614_s0, 4  ;;  %s227_s11 = sshll.u32 %s14615_s10, 4  ;;  %s204_s7 = int_to_ptr.vmem [resolvable:$true] %s203_s7  ;;  %s228_s11 = int_to_ptr.vmem [resolvable:$true] %s227_s11 }
  0x9c   :  { %s13685_s15 = scalar_lea.vmem %s204_s7, 16  ;;  %s13689_s16 = scalar_lea.vmem %s204_s7, 32 }
  0x9d   :  { %p13686_p0 = scmp.ne.s32.totalorder %s204_s7, %s13685_s15  ;;  %p13690_p1 = scmp.lt.s32.totalorder %s204_s7, %s204_s7 }
  0x9e   :  { %p13691_p2 = scmp.lt.s32.totalorder %s13689_s16, %s13685_s15 }
  0xa0   :  { %p13692_p3 = por %p13691_p2, %p13690_p1 }
  0xa2   :  { %p13693_p4 = pnand %p13692_p3, %p13686_p0 }
  0xa4   :  { %13696 = shalt.err (!%p13693_p4)
}
  0xa5   :  { %206 = dma.hbm_to_vmem [thread:$0]  %s14716_s3, 16, %s204_s7, [#allocation6]  }
  0xa6   :  { %s13705_s18 = scalar_lea.vmem %s228_s11, 32  ;;  %p13710_p6 = scmp.lt.s32.totalorder %s228_s11, %s228_s11 }
  0xa7   :  { %p13706_p5 = scmp.ne.s32.totalorder %s228_s11, %s13705_s18  ;;  %p13711_p7 = scmp.lt.s32.totalorder %s13705_s18, %s13705_s18 }
  0xa9   :  { %p13712_p8 = por %p13711_p7, %p13710_p6 }
  0xab   :  { %p13713_p9 = pnand %p13712_p8, %p13706_p5 }
  0xad   :  { %13716 = shalt.err (!%p13713_p9)
}
  0xae   :  { %230 = dma.hbm_to_vmem [thread:$0]  %s14736_s24, 32, %s228_s11, [#allocation9]  }
  0xaf   :  { %s14616_s22 = smov [#allocation11]   ;;  %s14617_s26 = smov [#allocation14]  }
  0xb0   :  { %s247_s23 = sshll.u32 %s14616_s22, 4  ;;  %s271_s28 = sshll.u32 %s14617_s26, 4  ;;  %s248_s23 = int_to_ptr.vmem [resolvable:$true] %s247_s23  ;;  %s272_s28 = int_to_ptr.vmem [resolvable:$true] %s271_s28 }
  0xb1   :  { %s13725_s1 = scalar_lea.vmem %s248_s23, 16  ;;  %s13729_s2 = scalar_lea.vmem %s248_s23, 32 }
  0xb2   :  { %p13726_p10 = scmp.ne.s32.totalorder %s248_s23, %s13725_s1  ;;  %p13730_p11 = scmp.lt.s32.totalorder %s248_s23, %s248_s23 }
  0xb3   :  { %p13731_p12 = scmp.lt.s32.totalorder %s13729_s2, %s13725_s1 }
  0xb5   :  { %p13732_p13 = por %p13731_p12, %p13730_p11 }
  0xb7   :  { %p13733_p0 = pnand %p13732_p13, %p13726_p10 }
  0xb9   :  { %13736 = shalt.err (!%p13733_p0)
}
  0xba   :  { %250 = dma.hbm_to_vmem [thread:$0]  %s14746_s6, 16, %s248_s23, [#allocation12]  }
  0xbb   :  { %s13745_s3 = scalar_lea.vmem %s272_s28, 16  ;;  %s13749_s0 = scalar_lea.vmem %s272_s28, 32 }
  0xbc   :  { %p13746_p1 = scmp.ne.s32.totalorder %s272_s28, %s13745_s3  ;;  %p13750_p2 = scmp.lt.s32.totalorder %s272_s28, %s272_s28 }
  0xbd   :  { %p13751_p3 = scmp.lt.s32.totalorder %s13749_s0, %s13745_s3 }
  0xbf   :  { %p13752_p4 = por %p13751_p3, %p13750_p2 }
  0xc1   :  { %p13753_p5 = pnand %p13752_p4, %p13746_p1 }
  0xc3   :  { %13756 = shalt.err (!%p13753_p5)
}
  0xc4   :  { %274 = dma.hbm_to_vmem [thread:$0]  %s14766_s4, 16, %s272_s28, [#allocation15]  }
  0xc5   :  { %s14618_s24 = smov [#allocation17]   ;;  %s14619_s10 = smov [#allocation20]  }
  0xc6   :  { %s291_s7 = sshll.u32 %s14618_s24, 4  ;;  %s317_s11 = sshll.u32 %s14619_s10, 4  ;;  %s292_s7 = int_to_ptr.vmem [resolvable:$true] %s291_s7  ;;  %s318_s11 = int_to_ptr.vmem [resolvable:$true] %s317_s11 }
  0xc7   :  { %s13765_s15 = scalar_lea.vmem %s292_s7, 16  ;;  %s13769_s16 = scalar_lea.vmem %s292_s7, 32 }
  0xc8   :  { %p13766_p6 = scmp.ne.s32.totalorder %s292_s7, %s13765_s15  ;;  %p13770_p7 = scmp.lt.s32.totalorder %s292_s7, %s292_s7 }
  0xc9   :  { %p13771_p8 = scmp.lt.s32.totalorder %s13769_s16, %s13765_s15 }
  0xcb   :  { %p13772_p9 = por %p13771_p8, %p13770_p7 }
  0xcd   :  { %p13773_p10 = pnand %p13772_p9, %p13766_p6 }
  0xcf   :  { %13776 = shalt.err (!%p13773_p10)
}
  0xd0   :  { %294 = dma.hbm_to_vmem [thread:$0]  %s14776_s8, 16, %s292_s7, [#allocation18]  }
  0xd1   :  { %s13785_s6 = scalar_lea.vmem %s318_s11, 16  ;;  %s13789_s18 = scalar_lea.vmem %s318_s11, 32 }
  0xd2   :  { %p13786_p11 = scmp.ne.s32.totalorder %s318_s11, %s13785_s6  ;;  %p13790_p12 = scmp.lt.s32.totalorder %s318_s11, %s318_s11 }
  0xd3   :  { %p13791_p13 = scmp.lt.s32.totalorder %s13789_s18, %s13785_s6 }
  0xd5   :  { %p13792_p0 = por %p13791_p13, %p13790_p12 }
  0xd7   :  { %p13793_p1 = pnand %p13792_p0, %p13786_p11 }
  0xd9   :  { %13796 = shalt.err (!%p13793_p1)
}
  0xda   :  { %320 = dma.hbm_to_vmem [thread:$0]  %s14801_s21, 16, %s318_s11, [#allocation21]  }
  0xdb   :  { %s14620_s4 = smov [#allocation23]   ;;  %s14621_s23 = smov [#allocation26]  }
  0xdc   :  { %s341_s22 = sshll.u32 %s14620_s4, 4  ;;  %s361_s26 = sshll.u32 %s14621_s23, 4  ;;  %s342_s22 = int_to_ptr.vmem [resolvable:$true] %s341_s22  ;;  %s362_s26 = int_to_ptr.vmem [resolvable:$true] %s361_s26 }
  0xdd   :  { %s13805_s28 = scalar_lea.vmem %s342_s22, 32  ;;  %p13810_p3 = scmp.lt.s32.totalorder %s342_s22, %s342_s22 }
  0xde   :  { %p13806_p2 = scmp.ne.s32.totalorder %s342_s22, %s13805_s28  ;;  %p13811_p4 = scmp.lt.s32.totalorder %s13805_s28, %s13805_s28 }
  0xe0   :  { %p13812_p5 = por %p13811_p4, %p13810_p3 }
  0xe2   :  { %p13813_p6 = pnand %p13812_p5, %p13806_p2 }
  0xe4   :  { %13816 = shalt.err (!%p13813_p6)
}
  0xe5   :  { %344 = dma.hbm_to_vmem [thread:$0]  %s14821_s9, 32, %s342_s22, [#allocation24]  }
  0xe6   :  { %s13825_s8 = scalar_lea.vmem %s362_s26, 16  ;;  %s13829_s1 = scalar_lea.vmem %s362_s26, 32 }
  0xe7   :  { %p13826_p7 = scmp.ne.s32.totalorder %s362_s26, %s13825_s8  ;;  %p13830_p8 = scmp.lt.s32.totalorder %s362_s26, %s362_s26 }
  0xe8   :  { %p13831_p9 = scmp.lt.s32.totalorder %s13829_s1, %s13825_s8 }
  0xea   :  { %p13832_p10 = por %p13831_p9, %p13830_p8 }
  0xec   :  { %p13833_p11 = pnand %p13832_p10, %p13826_p7 }
  0xee   :  { %13836 = shalt.err (!%p13833_p11)
}
  0xef   :  { %364 = dma.hbm_to_vmem [thread:$0]  %s14831_s17, 16, %s362_s26, [#allocation27]  }
  0xf0   :  { %s14622_s21 = smov [#allocation29]   ;;  %s14623_s3 = smov [#allocation32]  }
  0xf1   :  { %s385_s2 = sshll.u32 %s14622_s21, 4  ;;  %s405_s0 = sshll.u32 %s14623_s3, 4  ;;  %s386_s2 = int_to_ptr.vmem [resolvable:$true] %s385_s2  ;;  %s406_s0 = int_to_ptr.vmem [resolvable:$true] %s405_s0 }
  0xf2   :  { %s13845_s24 = scalar_lea.vmem %s386_s2, 16  ;;  %s13849_s7 = scalar_lea.vmem %s386_s2, 32 }
  0xf3   :  { %p13846_p12 = scmp.ne.s32.totalorder %s386_s2, %s13845_s24  ;;  %p13850_p13 = scmp.lt.s32.totalorder %s386_s2, %s386_s2 }
  0xf4   :  { %p13851_p0 = scmp.lt.s32.totalorder %s13849_s7, %s13845_s24 }
  0xf6   :  { %p13852_p1 = por %p13851_p0, %p13850_p13 }
  0xf8   :  { %p13853_p2 = pnand %p13852_p1, %p13846_p12 }
  0xfa   :  { %13856 = shalt.err (!%p13853_p2)
}
  0xfb   :  { %388 = dma.hbm_to_vmem [thread:$0]  %s14851_s25, 16, %s386_s2, [#allocation30]  }
  0xfc   :  { %s13865_s9 = scalar_lea.vmem %s406_s0, 16  ;;  %s13869_s10 = scalar_lea.vmem %s406_s0, 32 }
  0xfd   :  { %p13866_p3 = scmp.ne.s32.totalorder %s406_s0, %s13865_s9  ;;  %p13870_p4 = scmp.lt.s32.totalorder %s406_s0, %s406_s0 }
  0xfe   :  { %p13871_p5 = scmp.lt.s32.totalorder %s13869_s10, %s13865_s9 }
 0x100   :  { %p13872_p6 = por %p13871_p5, %p13870_p4 }
 0x102   :  { %p13873_p7 = pnand %p13872_p6, %p13866_p3 }
 0x104   :  { %13876 = shalt.err (!%p13873_p7)
}
 0x105   :  { %408 = dma.hbm_to_vmem [thread:$0]  %s14861_s5, 16, %s406_s0, [#allocation33]  }
 0x106   :  { %s14624_s17 = smov [#allocation35]   ;;  %s14625_s15 = smov [#allocation38]  }
 0x107   :  { %s433_s11 = sshll.u32 %s14624_s17, 4  ;;  %s453_s16 = sshll.u32 %s14625_s15, 4  ;;  %s434_s11 = int_to_ptr.vmem [resolvable:$true] %s433_s11  ;;  %s454_s16 = int_to_ptr.vmem [resolvable:$true] %s453_s16 }
 0x108   :  { %s13885_s6 = scalar_lea.vmem %s434_s11, 32  ;;  %p13890_p9 = scmp.lt.s32.totalorder %s434_s11, %s434_s11 }
 0x109   :  { %p13886_p8 = scmp.ne.s32.totalorder %s434_s11, %s13885_s6  ;;  %p13891_p10 = scmp.lt.s32.totalorder %s13885_s6, %s13885_s6 }
 0x10b   :  { %p13892_p11 = por %p13891_p10, %p13890_p9 }
 0x10d   :  { %p13893_p12 = pnand %p13892_p11, %p13886_p8 }
 0x10f   :  { %13896 = shalt.err (!%p13893_p12)
}
 0x110   :  { %436 = dma.hbm_to_vmem [thread:$0]  %s14891_s27, 32, %s434_s11, [#allocation36]  }
 0x111   :  { %s13905_s25 = scalar_lea.vmem %s454_s16, 32  ;;  %p13910_p0 = scmp.lt.s32.totalorder %s454_s16, %s454_s16 }
 0x112   :  { %p13906_p13 = scmp.ne.s32.totalorder %s454_s16, %s13905_s25  ;;  %p13911_p1 = scmp.lt.s32.totalorder %s13905_s25, %s13905_s25 }
 0x114   :  { %p13912_p2 = por %p13911_p1, %p13910_p0 }
 0x116   :  { %p13913_p3 = pnand %p13912_p2, %p13906_p13 }
 0x118   :  { %13916 = shalt.err (!%p13913_p3)
}
 0x119   :  { %456 = dma.hbm_to_vmem [thread:$0]  %s14901_s14, 32, %s454_s16, [#allocation39]  }
 0x11a   :  { %s14626_s5 = smov [#allocation41]   ;;  %s14627_s4 = smov [#allocation44]  }
 0x11b   :  { %s477_s18 = sshll.u32 %s14626_s5, 4  ;;  %s501_s22 = sshll.u32 %s14627_s4, 4  ;;  %s478_s18 = int_to_ptr.vmem [resolvable:$true] %s477_s18  ;;  %s502_s22 = int_to_ptr.vmem [resolvable:$true] %s501_s22 }
 0x11c   :  { %s13925_s23 = scalar_lea.vmem %s478_s18, 16  ;;  %s13929_s26 = scalar_lea.vmem %s478_s18, 32 }
 0x11d   :  { %p13926_p4 = scmp.ne.s32.totalorder %s478_s18, %s13925_s23  ;;  %p13930_p5 = scmp.lt.s32.totalorder %s478_s18, %s478_s18 }
 0x11e   :  { %p13931_p6 = scmp.lt.s32.totalorder %s13929_s26, %s13925_s23 }
 0x120   :  { %p13932_p7 = por %p13931_p6, %p13930_p5 }
 0x122   :  { %p13933_p8 = pnand %p13932_p7, %p13926_p4 }
 0x124   :  { %13936 = shalt.err (!%p13933_p8)
}
 0x125   :  { %480 = dma.hbm_to_vmem [thread:$0]  %s14921_s30, 16, %s478_s18, [#allocation42]  }
 0x126   :  { %s13945_s27 = scalar_lea.vmem %s502_s22, 32  ;;  %p13950_p10 = scmp.lt.s32.totalorder %s502_s22, %s502_s22 }
 0x127   :  { %p13946_p9 = scmp.ne.s32.totalorder %s502_s22, %s13945_s27  ;;  %p13951_p11 = scmp.lt.s32.totalorder %s13945_s27, %s13945_s27 }
 0x129   :  { %p13952_p12 = por %p13951_p11, %p13950_p10 }
 0x12b   :  { %p13953_p13 = pnand %p13952_p12, %p13946_p9 }
 0x12d   :  { %13956 = shalt.err (!%p13953_p13)
}
 0x12e   :  { %504 = dma.hbm_to_vmem [thread:$0]  %s14941_s19, 32, %s502_s22, [#allocation45]  }
 0x12f   :  { %s14628_s14 = smov [#allocation47]   ;;  %s14629_s8 = smov [#allocation50]  }
 0x130   :  { %s521_s28 = sshll.u32 %s14628_s14, 4  ;;  %s545_s1 = sshll.u32 %s14629_s8, 4  ;;  %s522_s28 = int_to_ptr.vmem [resolvable:$true] %s521_s28  ;;  %s546_s1 = int_to_ptr.vmem [resolvable:$true] %s545_s1 }
 0x131   :  { %s13965_s21 = scalar_lea.vmem %s522_s28, 16  ;;  %s13969_s2 = scalar_lea.vmem %s522_s28, 32 }
 0x132   :  { %p13966_p0 = scmp.ne.s32.totalorder %s522_s28, %s13965_s21  ;;  %p13970_p1 = scmp.lt.s32.totalorder %s522_s28, %s522_s28 }
 0x133   :  { %p13971_p2 = scmp.lt.s32.totalorder %s13969_s2, %s13965_s21 }
 0x135   :  { %p13972_p3 = por %p13971_p2, %p13970_p1 }
 0x137   :  { %p13973_p4 = pnand %p13972_p3, %p13966_p0 }
 0x139   :  { %13976 = shalt.err (!%p13973_p4)
}
 0x13a   :  { %s16599_s30 = sld [smem:[#allocation127_spill]]  ;;  %s13985_s3 = scalar_lea.vmem %s546_s1, 16 }
 0x13b   :  { %p13986_p5 = scmp.ne.s32.totalorder %s546_s1, %s13985_s3  ;;  %s13989_s0 = scalar_lea.vmem %s546_s1, 32 }
 0x13c   :  { %p13990_p6 = scmp.lt.s32.totalorder %s546_s1, %s546_s1  ;;  %p13991_p7 = scmp.lt.s32.totalorder %s13989_s0, %s13985_s3 }
 0x13e   :  { %p13992_p8 = por %p13991_p7, %p13990_p6 }
 0x140   :  { %524 = dma.hbm_to_vmem [thread:$0]  %s16599_s30, 16, %s522_s28, [#allocation48]  }
 0x141   :  { %p13993_p9 = pnand %p13992_p8, %p13986_p5 }
 0x143   :  { %13996 = shalt.err (!%p13993_p9)
}
 0x144   :  { %s16600_s19 = sld [smem:[#allocation131_spill]]  ;;  %s14630_s24 = smov [#allocation53]  }
 0x145   :  { %s571_s7 = sshll.u32 %s14630_s24, 4  ;;  %s14631_s9 = smov [#allocation2]   ;;  %s572_s7 = int_to_ptr.vmem [resolvable:$true] %s571_s7 }
 0x146   :  { %s193_s10 = sshll.u32 %s14631_s9, 4  ;;  %s14005_s17 = scalar_lea.vmem %s572_s7, 16  ;;  %s194_s10 = int_to_ptr.vmem [resolvable:$true] %s193_s10 }
 0x147   :  { %p14006_p10 = scmp.ne.s32.totalorder %s572_s7, %s14005_s17  ;;  %s14009_s11 = scalar_lea.vmem %s572_s7, 32 }
 0x148   :  { %p14010_p11 = scmp.lt.s32.totalorder %s572_s7, %s572_s7  ;;  %p14011_p12 = scmp.lt.s32.totalorder %s14009_s11, %s14005_s17 }
 0x14a   :  { %548 = dma.hbm_to_vmem [thread:$0]  %s16600_s19, 16, %s546_s1, [#allocation51]  }
 0x14b   :  { %p14012_p13 = por %p14011_p12, %p14010_p11 }
 0x14d   :  { %p14013_p0 = pnand %p14012_p13, %p14006_p10 }
 0x14f   :  { %14016 = shalt.err (!%p14013_p0)
}
 0x150   :  { %s16601_s15 = sld [smem:[#allocation136_spill]]  ;;  %s14025_s16 = scalar_lea.vmem %s194_s10, 16 }
 0x151   :  { %p14026_p1 = scmp.ne.s32.totalorder %s194_s10, %s14025_s16  ;;  %s14029_s6 = scalar_lea.vmem %s194_s10, 32 }
 0x152   :  { %p14030_p2 = scmp.lt.s32.totalorder %s194_s10, %s194_s10  ;;  %p14031_p3 = scmp.lt.s32.totalorder %s14029_s6, %s14025_s16 }
 0x154   :  { %p14032_p4 = por %p14031_p3, %p14030_p2 }
 0x156   :  { %574 = dma.hbm_to_vmem [thread:$0]  %s16601_s15, 16, %s572_s7, [#allocation54]  }
 0x157   :  { %p14033_p5 = pnand %p14032_p4, %p14026_p1 }
 0x159   :  { %14036 = shalt.err (!%p14033_p5)
}
 0x15a   :  { %s16602_s25 = sld [smem:[#allocation93_spill]]  ;;  %s14632_s5 = smov [#allocation7]  }
 0x15b   :  { %s217_s18 = sshll.u32 %s14632_s5, 4  ;;  %s14633_s4 = smov [#allocation10]   ;;  %s218_s18 = int_to_ptr.vmem [resolvable:$true] %s217_s18 }
 0x15c   :  { %s237_s22 = sshll.u32 %s14633_s4, 4  ;;  %s14045_s23 = scalar_lea.vmem %s218_s18, 32  ;;  %s238_s22 = int_to_ptr.vmem [resolvable:$true] %s237_s22 }
 0x15d   :  { %p14046_p6 = scmp.ne.s32.totalorder %s218_s18, %s14045_s23  ;;  %p14050_p7 = scmp.lt.s32.totalorder %s218_s18, %s218_s18 }
 0x15e   :  { %p14051_p8 = scmp.lt.s32.totalorder %s14045_s23, %s14045_s23 }
 0x160   :  { %196 = dma.hbm_to_vmem [thread:$0]  %s16602_s25, 16, %s194_s10, [#allocation3]  }
 0x161   :  { %p14052_p9 = por %p14051_p8, %p14050_p7 }
 0x163   :  { %p14053_p10 = pnand %p14052_p9, %p14046_p6 }
 0x165   :  { %14056 = shalt.err (!%p14053_p10)
}
 0x166   :  { %s16603_s26 = sld [smem:[#allocation96_spill]]  ;;  %s14065_s27 = scalar_lea.vmem %s238_s22, 32 }
 0x167   :  { %p14066_p11 = scmp.ne.s32.totalorder %s238_s22, %s14065_s27  ;;  %p14070_p12 = scmp.lt.s32.totalorder %s238_s22, %s238_s22 }
 0x168   :  { %p14071_p13 = scmp.lt.s32.totalorder %s14065_s27, %s14065_s27 }
 0x16a   :  { %p14072_p0 = por %p14071_p13, %p14070_p12 }
 0x16c   :  { %220 = dma.hbm_to_vmem [thread:$0]  %s16603_s26, 32, %s218_s18, [#allocation6]  }
 0x16d   :  { %p14073_p1 = pnand %p14072_p0, %p14066_p11 }
 0x16f   :  { %14076 = shalt.err (!%p14073_p1)
}
 0x170   :  { %s16604_s14 = sld [smem:[#allocation97_spill]]  ;;  %s14634_s28 = smov [#allocation13]  }
 0x171   :  { %s257_s8 = sshll.u32 %s14634_s28, 4  ;;  %s14635_s1 = smov [#allocation16]   ;;  %s258_s8 = int_to_ptr.vmem [resolvable:$true] %s257_s8 }
 0x172   :  { %s281_s21 = sshll.u32 %s14635_s1, 4  ;;  %s14085_s2 = scalar_lea.vmem %s258_s8, 16  ;;  %s282_s21 = int_to_ptr.vmem [resolvable:$true] %s281_s21 }
 0x173   :  { %p14086_p2 = scmp.ne.s32.totalorder %s258_s8, %s14085_s2  ;;  %s14089_s30 = scalar_lea.vmem %s258_s8, 32 }
 0x174   :  { %p14090_p3 = scmp.lt.s32.totalorder %s258_s8, %s258_s8  ;;  %p14091_p4 = scmp.lt.s32.totalorder %s14089_s30, %s14085_s2 }
 0x176   :  { %240 = dma.hbm_to_vmem [thread:$0]  %s16604_s14, 32, %s238_s22, [#allocation9]  }
 0x177   :  { %p14092_p5 = por %p14091_p4, %p14090_p3 }
 0x179   :  { %p14093_p6 = pnand %p14092_p5, %p14086_p2 }
 0x17b   :  { %14096 = shalt.err (!%p14093_p6)
}
 0x17c   :  { %s16605_s3 = sld [smem:[#allocation98_spill]]  ;;  %s14105_s0 = scalar_lea.vmem %s282_s21, 16 }
 0x17d   :  { %p14106_p7 = scmp.ne.s32.totalorder %s282_s21, %s14105_s0  ;;  %s14109_s19 = scalar_lea.vmem %s282_s21, 32 }
 0x17e   :  { %p14110_p8 = scmp.lt.s32.totalorder %s282_s21, %s282_s21  ;;  %p14111_p9 = scmp.lt.s32.totalorder %s14109_s19, %s14105_s0 }
 0x180   :  { %p14112_p10 = por %p14111_p9, %p14110_p8 }
 0x182   :  { %260 = dma.hbm_to_vmem [thread:$0]  %s16605_s3, 16, %s258_s8, [#allocation12]  }
 0x183   :  { %p14113_p11 = pnand %p14112_p10, %p14106_p7 }
 0x185   :  { %14116 = shalt.err (!%p14113_p11)
}
 0x186   :  { %s16606_s24 = sld [smem:[#allocation101_spill]]  ;;  %s14636_s7 = smov [#allocation19]  }
 0x187   :  { %s307_s9 = sshll.u32 %s14636_s7, 4  ;;  %s14637_s10 = smov [#allocation22]   ;;  %s308_s9 = int_to_ptr.vmem [resolvable:$true] %s307_s9 }
 0x188   :  { %s331_s17 = sshll.u32 %s14637_s10, 4  ;;  %s14125_s11 = scalar_lea.vmem %s308_s9, 16  ;;  %s332_s17 = int_to_ptr.vmem [resolvable:$true] %s331_s17 }
 0x189   :  { %p14126_p12 = scmp.ne.s32.totalorder %s308_s9, %s14125_s11  ;;  %s14129_s15 = scalar_lea.vmem %s308_s9, 32 }
 0x18a   :  { %p14130_p13 = scmp.lt.s32.totalorder %s308_s9, %s308_s9  ;;  %p14131_p0 = scmp.lt.s32.totalorder %s14129_s15, %s14125_s11 }
 0x18c   :  { %284 = dma.hbm_to_vmem [thread:$0]  %s16606_s24, 16, %s282_s21, [#allocation15]  }
 0x18d   :  { %p14132_p1 = por %p14131_p0, %p14130_p13 }
 0x18f   :  { %p14133_p2 = pnand %p14132_p1, %p14126_p12 }
 0x191   :  { %14136 = shalt.err (!%p14133_p2)
}
 0x192   :  { %s16607_s16 = sld [smem:[#allocation105_spill]]  ;;  %s14145_s6 = scalar_lea.vmem %s332_s17, 32 }
 0x193   :  { %p14146_p3 = scmp.ne.s32.totalorder %s332_s17, %s14145_s6  ;;  %p14150_p4 = scmp.lt.s32.totalorder %s332_s17, %s332_s17 }
 0x194   :  { %p14151_p5 = scmp.lt.s32.totalorder %s14145_s6, %s14145_s6 }
 0x196   :  { %p14152_p6 = por %p14151_p5, %p14150_p4 }
 0x198   :  { %310 = dma.hbm_to_vmem [thread:$0]  %s16607_s16, 16, %s308_s9, [#allocation18]  }
 0x199   :  { %p14153_p7 = pnand %p14152_p6, %p14146_p3 }
 0x19b   :  { %14156 = shalt.err (!%p14153_p7)
}
 0x19c   :  { %s16608_s25 = sld [smem:[#allocation108_spill]]  ;;  %s14638_s5 = smov [#allocation25]  }
 0x19d   :  { %s351_s18 = sshll.u32 %s14638_s5, 4  ;;  %s14639_s4 = smov [#allocation28]   ;;  %s352_s18 = int_to_ptr.vmem [resolvable:$true] %s351_s18 }
 0x19e   :  { %s371_s22 = sshll.u32 %s14639_s4, 4  ;;  %s14165_s23 = scalar_lea.vmem %s352_s18, 32  ;;  %s372_s22 = int_to_ptr.vmem [resolvable:$true] %s371_s22 }
 0x19f   :  { %p14166_p8 = scmp.ne.s32.totalorder %s352_s18, %s14165_s23  ;;  %p14170_p9 = scmp.lt.s32.totalorder %s352_s18, %s352_s18 }
 0x1a0   :  { %p14171_p10 = scmp.lt.s32.totalorder %s14165_s23, %s14165_s23 }
 0x1a2   :  { %334 = dma.hbm_to_vmem [thread:$0]  %s16608_s25, 32, %s332_s17, [#allocation21]  }
 0x1a3   :  { %p14172_p11 = por %p14171_p10, %p14170_p9 }
 0x1a5   :  { %p14173_p12 = pnand %p14172_p11, %p14166_p8 }
 0x1a7   :  { %14176 = shalt.err (!%p14173_p12)
}
 0x1a8   :  { %s16609_s26 = sld [smem:[#allocation109_spill]]  ;;  %s14185_s27 = scalar_lea.vmem %s372_s22, 16 }
 0x1a9   :  { %p14186_p13 = scmp.ne.s32.totalorder %s372_s22, %s14185_s27  ;;  %s14189_s14 = scalar_lea.vmem %s372_s22, 32 }
 0x1aa   :  { %p14190_p0 = scmp.lt.s32.totalorder %s372_s22, %s372_s22  ;;  %p14191_p1 = scmp.lt.s32.totalorder %s14189_s14, %s14185_s27 }
 0x1ac   :  { %p14192_p2 = por %p14191_p1, %p14190_p0 }
 0x1ae   :  { %354 = dma.hbm_to_vmem [thread:$0]  %s16609_s26, 32, %s352_s18, [#allocation24]  }
 0x1af   :  { %p14193_p3 = pnand %p14192_p2, %p14186_p13 }
 0x1b1   :  { %14196 = shalt.err (!%p14193_p3)
}
 0x1b2   :  { %s16610_s28 = sld [smem:[#allocation110_spill]]  ;;  %s14640_s8 = smov [#allocation31]  }
 0x1b3   :  { %s395_s1 = sshll.u32 %s14640_s8, 4  ;;  %s14641_s21 = smov [#allocation34]   ;;  %s396_s1 = int_to_ptr.vmem [resolvable:$true] %s395_s1 }
 0x1b4   :  { %s423_s2 = sshll.u32 %s14641_s21, 4  ;;  %s14205_s30 = scalar_lea.vmem %s396_s1, 16  ;;  %s424_s2 = int_to_ptr.vmem [resolvable:$true] %s423_s2 }
 0x1b5   :  { %p14206_p4 = scmp.ne.s32.totalorder %s396_s1, %s14205_s30  ;;  %s14209_s3 = scalar_lea.vmem %s396_s1, 32 }
 0x1b6   :  { %p14210_p5 = scmp.lt.s32.totalorder %s396_s1, %s396_s1  ;;  %p14211_p6 = scmp.lt.s32.totalorder %s14209_s3, %s14205_s30 }
 0x1b8   :  { %374 = dma.hbm_to_vmem [thread:$0]  %s16610_s28, 16, %s372_s22, [#allocation27]  }
 0x1b9   :  { %p14212_p7 = por %p14211_p6, %p14210_p5 }
 0x1bb   :  { %p14213_p8 = pnand %p14212_p7, %p14206_p4 }
 0x1bd   :  { %14216 = shalt.err (!%p14213_p8)
}
 0x1be   :  { %s16611_s0 = sld [smem:[#allocation113_spill]]  ;;  %s14225_s19 = scalar_lea.vmem %s424_s2, 16 }
 0x1bf   :  { %p14226_p9 = scmp.ne.s32.totalorder %s424_s2, %s14225_s19  ;;  %s14229_s24 = scalar_lea.vmem %s424_s2, 32 }
 0x1c0   :  { %p14230_p10 = scmp.lt.s32.totalorder %s424_s2, %s424_s2  ;;  %p14231_p11 = scmp.lt.s32.totalorder %s14229_s24, %s14225_s19 }
 0x1c2   :  { %p14232_p12 = por %p14231_p11, %p14230_p10 }
 0x1c4   :  { %398 = dma.hbm_to_vmem [thread:$0]  %s16611_s0, 16, %s396_s1, [#allocation30]  }
 0x1c5   :  { %p14233_p13 = pnand %p14232_p12, %p14226_p9 }
 0x1c7   :  { %14236 = shalt.err (!%p14233_p13)
}
 0x1c8   :  { %s16612_s7 = sld [smem:[#allocation118_spill]]  ;;  %s14642_s9 = smov [#allocation37]  }
 0x1c9   :  { %s443_s10 = sshll.u32 %s14642_s9, 4  ;;  %s14643_s17 = smov [#allocation40]   ;;  %s444_s10 = int_to_ptr.vmem [resolvable:$true] %s443_s10 }
 0x1ca   :  { %s467_s11 = sshll.u32 %s14643_s17, 4  ;;  %s14245_s15 = scalar_lea.vmem %s444_s10, 32  ;;  %s468_s11 = int_to_ptr.vmem [resolvable:$true] %s467_s11 }
 0x1cb   :  { %p14246_p0 = scmp.ne.s32.totalorder %s444_s10, %s14245_s15  ;;  %p14250_p1 = scmp.lt.s32.totalorder %s444_s10, %s444_s10 }
 0x1cc   :  { %p14251_p2 = scmp.lt.s32.totalorder %s14245_s15, %s14245_s15 }
 0x1ce   :  { %426 = dma.hbm_to_vmem [thread:$0]  %s16612_s7, 16, %s424_s2, [#allocation33]  }
 0x1cf   :  { %p14252_p3 = por %p14251_p2, %p14250_p1 }
 0x1d1   :  { %p14253_p4 = pnand %p14252_p3, %p14246_p0 }
 0x1d3   :  { %14256 = shalt.err (!%p14253_p4)
}
 0x1d4   :  { %s16613_s16 = sld [smem:[#allocation119_spill]]  ;;  %s14265_s6 = scalar_lea.vmem %s468_s11, 16 }
 0x1d5   :  { %p14266_p5 = scmp.ne.s32.totalorder %s468_s11, %s14265_s6  ;;  %s14269_s25 = scalar_lea.vmem %s468_s11, 32 }
 0x1d6   :  { %p14270_p6 = scmp.lt.s32.totalorder %s468_s11, %s468_s11  ;;  %p14271_p7 = scmp.lt.s32.totalorder %s14269_s25, %s14265_s6 }
 0x1d8   :  { %p14272_p8 = por %p14271_p7, %p14270_p6 }
 0x1da   :  { %446 = dma.hbm_to_vmem [thread:$0]  %s16613_s16, 32, %s444_s10, [#allocation36]  }
 0x1db   :  { %p14273_p9 = pnand %p14272_p8, %p14266_p5 }
 0x1dd   :  { %14276 = shalt.err (!%p14273_p9)
}
 0x1de   :  { %s16614_s5 = sld [smem:[#allocation122_spill]]  ;;  %s14644_s18 = smov [#allocation43]  }
 0x1df   :  { %s491_s4 = sshll.u32 %s14644_s18, 4  ;;  %s14645_s22 = smov [#allocation46]   ;;  %s492_s4 = int_to_ptr.vmem [resolvable:$true] %s491_s4 }
 0x1e0   :  { %s511_s23 = sshll.u32 %s14645_s22, 4  ;;  %s14285_s26 = scalar_lea.vmem %s492_s4, 32  ;;  %s512_s23 = int_to_ptr.vmem [resolvable:$true] %s511_s23 }
 0x1e1   :  { %p14286_p10 = scmp.ne.s32.totalorder %s492_s4, %s14285_s26  ;;  %p14290_p11 = scmp.lt.s32.totalorder %s492_s4, %s492_s4 }
 0x1e2   :  { %p14291_p12 = scmp.lt.s32.totalorder %s14285_s26, %s14285_s26 }
 0x1e4   :  { %470 = dma.hbm_to_vmem [thread:$0]  %s16614_s5, 16, %s468_s11, [#allocation39]  }
 0x1e5   :  { %p14292_p13 = por %p14291_p12, %p14290_p11 }
 0x1e7   :  { %p14293_p0 = pnand %p14292_p13, %p14286_p10 }
 0x1e9   :  { %14296 = shalt.err (!%p14293_p0)
}
 0x1ea   :  { %s16615_s27 = sld [smem:[#allocation125_spill]]  ;;  %s14305_s14 = scalar_lea.vmem %s512_s23, 16 }
 0x1eb   :  { %p14306_p1 = scmp.ne.s32.totalorder %s512_s23, %s14305_s14  ;;  %s14309_s28 = scalar_lea.vmem %s512_s23, 32 }
 0x1ec   :  { %p14310_p2 = scmp.lt.s32.totalorder %s512_s23, %s512_s23  ;;  %p14311_p3 = scmp.lt.s32.totalorder %s14309_s28, %s14305_s14 }
 0x1ee   :  { %p14312_p4 = por %p14311_p3, %p14310_p2 }
 0x1f0   :  { %494 = dma.hbm_to_vmem [thread:$0]  %s16615_s27, 32, %s492_s4, [#allocation42]  }
 0x1f1   :  { %p14313_p5 = pnand %p14312_p4, %p14306_p1 }
 0x1f3   :  { %14316 = shalt.err (!%p14313_p5)
}
 0x1f4   :  { %s16616_s8 = sld [smem:[#allocation126_spill]]  ;;  %s14646_s1 = smov [#allocation49]  }
 0x1f5   :  { %s535_s21 = sshll.u32 %s14646_s1, 4  ;;  %s14647_s2 = smov [#allocation52]   ;;  %s536_s21 = int_to_ptr.vmem [resolvable:$true] %s535_s21 }
 0x1f6   :  { %s561_s30 = sshll.u32 %s14647_s2, 4  ;;  %s14325_s3 = scalar_lea.vmem %s536_s21, 16  ;;  %s562_s30 = int_to_ptr.vmem [resolvable:$true] %s561_s30 }
 0x1f7   :  { %p14326_p6 = scmp.ne.s32.totalorder %s536_s21, %s14325_s3  ;;  %s14329_s0 = scalar_lea.vmem %s536_s21, 32 }
 0x1f8   :  { %p14330_p7 = scmp.lt.s32.totalorder %s536_s21, %s536_s21  ;;  %p14331_p8 = scmp.lt.s32.totalorder %s14329_s0, %s14325_s3 }
 0x1fa   :  { %514 = dma.hbm_to_vmem [thread:$0]  %s16616_s8, 16, %s512_s23, [#allocation45]  }
 0x1fb   :  { %p14332_p9 = por %p14331_p8, %p14330_p7 }
 0x1fd   :  { %p14333_p10 = pnand %p14332_p9, %p14326_p6 }
 0x1ff   :  { %14336 = shalt.err (!%p14333_p10)
}
 0x200   :  { %s16617_s19 = sld [smem:[#allocation130_spill]]  ;;  %s14345_s24 = scalar_lea.vmem %s562_s30, 32 }
 0x201   :  { %p14346_p11 = scmp.ne.s32.totalorder %s562_s30, %s14345_s24  ;;  %p14350_p12 = scmp.lt.s32.totalorder %s562_s30, %s562_s30 }
 0x202   :  { %p14351_p13 = scmp.lt.s32.totalorder %s14345_s24, %s14345_s24 }
 0x204   :  { %p14352_p0 = por %p14351_p13, %p14350_p12 }
 0x206   :  { %538 = dma.hbm_to_vmem [thread:$0]  %s16617_s19, 16, %s536_s21, [#allocation48]  }
 0x207   :  { %p14353_p1 = pnand %p14352_p0, %p14346_p11 }
 0x209   :  { %14356 = shalt.err (!%p14353_p1)
}
 0x20a   :  { %s16618_s7 = sld [smem:[#allocation135_spill]]  ;;  %s14648_s9 = smov [#allocation55]  }
 0x20b   :  { %s581_s10 = sshll.u32 %s14648_s9, 4  ;;  %s14649_s17 = smov [#allocation56]   ;;  %s582_s10 = int_to_ptr.vmem [resolvable:$true] %s581_s10 }
 0x20c   :  { %s597_s11 = sshll.u32 %s14649_s17, 4  ;;  %s14365_s15 = scalar_lea.vmem %s582_s10, 16  ;;  %s598_s11 = int_to_ptr.vmem [resolvable:$true] %s597_s11 }
 0x20d   :  { %p14366_p2 = scmp.ne.s32.totalorder %s582_s10, %s14365_s15  ;;  %s14369_s16 = scalar_lea.vmem %s582_s10, 32 }
 0x20e   :  { %p14370_p3 = scmp.lt.s32.totalorder %s582_s10, %s582_s10  ;;  %p14371_p4 = scmp.lt.s32.totalorder %s14369_s16, %s14365_s15 }
 0x210   :  { %564 = dma.hbm_to_vmem [thread:$0]  %s16618_s7, 32, %s562_s30, [#allocation51]  }
 0x211   :  { %p14372_p5 = por %p14371_p4, %p14370_p3 }
 0x213   :  { %p14373_p6 = pnand %p14372_p5, %p14366_p2 }
 0x215   :  { %14376 = shalt.err (!%p14373_p6)
}
 0x216   :  { %s16619_s6 = sld [smem:[#allocation137_spill]]  ;;  %s14385_s25 = scalar_lea.vmem %s598_s11, 16 }
 0x217   :  { %p14386_p7 = scmp.ne.s32.totalorder %s598_s11, %s14385_s25  ;;  %s14389_s5 = scalar_lea.vmem %s598_s11, 32 }
 0x218   :  { %p14390_p8 = scmp.lt.s32.totalorder %s598_s11, %s598_s11  ;;  %p14391_p9 = scmp.lt.s32.totalorder %s14389_s5, %s14385_s25 }
 0x21a   :  { %p14392_p10 = por %p14391_p9, %p14390_p8 }
 0x21c   :  { %584 = dma.hbm_to_vmem [thread:$0]  %s16619_s6, 16, %s582_s10, [#allocation54]  }
 0x21d   :  { %p14393_p11 = pnand %p14392_p10, %p14386_p7 }
 0x21f   :  { %14396 = shalt.err (!%p14393_p11)
}
 0x220   :  { %s16620_s18 = sld [smem:[#allocation141_spill]] }
 0x226   :  { %600 = dma.hbm_to_vmem [thread:$0]  %s16620_s18, 16, %s598_s11, [#allocation57]  }
 0x227   :  { %14497 = dma.done.wait [#allocation3], 16  }
 0x228   :  { %14498 = vsyncadd [#allocation3], 4294967280 }
 0x229   :  { %14499 = dma.done.wait [#allocation6], 48  }
 0x22a   :  { %14500 = vsyncadd [#allocation6], 4294967248 }
 0x22b   :  { %14501 = dma.done.wait [#allocation9], 64  }
 0x22c   :  { %14502 = vsyncadd [#allocation9], 4294967232 }
 0x22d   :  { %14503 = dma.done.wait [#allocation12], 32  }
 0x22e   :  { %14504 = vsyncadd [#allocation12], 4294967264 }
 0x22f   :  { %14505 = dma.done.wait [#allocation15], 32  }
 0x230   :  { %14506 = vsyncadd [#allocation15], 4294967264 }
 0x231   :  { %14507 = dma.done.wait [#allocation18], 32  }
 0x232   :  { %14508 = vsyncadd [#allocation18], 4294967264 }
 0x233   :  { %14509 = dma.done.wait [#allocation21], 48  }
 0x234   :  { %14510 = vsyncadd [#allocation21], 4294967248 }
 0x235   :  { %14511 = dma.done.wait [#allocation24], 64  }
 0x236   :  { %14512 = vsyncadd [#allocation24], 4294967232 }
 0x237   :  { %14513 = dma.done.wait [#allocation27], 32  }
 0x238   :  { %14514 = vsyncadd [#allocation27], 4294967264 }
 0x239   :  { %14515 = dma.done.wait [#allocation30], 32  }
 0x23a   :  { %14516 = vsyncadd [#allocation30], 4294967264 }
 0x23b   :  { %14517 = dma.done.wait [#allocation33], 32  }
 0x23c   :  { %14518 = vsyncadd [#allocation33], 4294967264 }
 0x23d   :  { %14519 = dma.done.wait [#allocation36], 64  }
 0x23e   :  { %14520 = vsyncadd [#allocation36], 4294967232 }
 0x23f   :  { %14521 = dma.done.wait [#allocation39], 48  }
 0x240   :  { %14522 = vsyncadd [#allocation39], 4294967248 }
 0x241   :  { %14523 = dma.done.wait [#allocation42], 48  }
 0x242   :  { %14524 = vsyncadd [#allocation42], 4294967248 }
 0x243   :  { %14525 = dma.done.wait [#allocation45], 48  }
 0x244   :  { %14526 = vsyncadd [#allocation45], 4294967248 }
 0x245   :  { %14527 = dma.done.wait [#allocation48], 32  }
 0x246   :  { %14528 = vsyncadd [#allocation48], 4294967264 }
 0x247   :  { %14529 = dma.done.wait [#allocation51], 48  }
 0x248   :  { %14530 = vsyncadd [#allocation51], 4294967248 }
 0x249   :  { %14531 = dma.done.wait [#allocation54], 32  }
 0x24a   :  { %14532 = vsyncadd [#allocation54], 4294967264 }
 0x24b   :  { %14533 = dma.done.wait [#allocation57], 16  }
 0x24c   :  { %14534 = vsyncadd [#allocation57], 4294967280  ;;  %s16621_s4 = sld [smem:[#allocation87_spill]]  ;;  %vm722_vm0 = vcmask 392192   ;;  %v750_v25 = vlaneseq  ;;  %v721_v29 = vld [vmem:[#allocation35] sm:$0x3] }
 0x24d   :  { %s16622_s22 = sld [smem:[#allocation121_spill]]  ;;  %v11925_v41 = vld [vmem:[#allocation34] ss:$0 sm:$0xff]  ;;  %vm859_vm1 = vcmask 261120   ;;  %vm14651_vm2 = vmmov 0   ;;  %s14652_s14 = smov 96  }
 0x24e   :  { %v751_v27 = vshrl.u32 %v750_v25, 7  ;;  %s16623_s23 = sld [smem:[#allocation120_spill]]  ;;  %vm1048_vm3 = vcmask 64512   ;;  %s14653_s28 = smov 64   ;;  %vm2393_vm4 = vcmask 195584   ;;  %vm2390_vm5 = vcmask 130048  }
 0x24f   :  { %s16624_s26 = sld [smem:[#allocation129_spill]]  ;;  %s14654_s8 = smov 88   ;;  %vm2642_vm8 = vcmask 523264   ;;  %vm4594_vm10 = vcmask 326656  }
 0x250   :  { %v15097_v28 = vsub.s32 0, %v751_v27  ;;  %v15099_v30 = vsub.s32 1, %v751_v27  ;;  %s16625_s27 = sld [smem:[#allocation89_spill]]  ;;  %s14655_s1 = smov 120  }
 0x251   :  { %s14656_s21 = smov 56   ;;  %s14657_s2 = smov 80  }
 0x252   :  { %v719_v0 = vld [vmem:[%s16621_s4] sm:$0xff]  ;;  %v720_v1 = vld [vmem:[%s16621_s4 + $0x8] sm:$0xff]  ;;  %v753_v31 = vrot.slane %v721_v29, %v15097_v28  ;;  %v759_v34 = vrot.slane %v721_v29, %v15099_v30  ;;  %s14658_s30 = smov 112   ;;  %s14659_s3 = smov 48  }
 0x253   :  { %v723_v2 = vsel %vm722_vm0, %v719_v0, 0.0  ;;  %v726_v3 = vsel %vm722_vm0, %v720_v1, 0.0  ;;  %v767_v14 = vld [vmem:[%s16622_s22 + $0x28] sm:$0xff]  ;;  %v766_v15 = vld [vmem:[%s16622_s22 + $0x20] sm:$0xff]  ;;  %v765_v16 = vld [vmem:[%s16622_s22 + $0x18] sm:$0xff]  ;;  %s14660_s0 = smov 72  }
 0x254   :  { %724 = vadd.xlane.f32.xlu0 %v723_v2  ;;  %12506 = vmatprep.subr.mxu0 %v767_v14  ;;  %v764_v17 = vld [vmem:[%s16622_s22 + $0x10] sm:$0xff]  ;;  %v763_v18 = vld [vmem:[%s16622_s22 + $0x8] sm:$0xff]  ;;  %v762_v19 = vld [vmem:[%s16622_s22] sm:$0xff]  ;;  %s14661_s19 = smov 104   ;;  %s14662_s24 = smov 40  }
 0x255   :  { %12507 = vmatpush3.msra.mxu0 %v767_v14  ;;  %v858_v2 = vld [vmem:[#allocation37] sm:$0x3]  ;;  %s14663_s7 = smov 8   ;;  %s14664_s9 = smov 16  }
 0x256   :  { %12508 = vmatprep.subr.mxu0 %v766_v15  ;;  %s16626_s10 = sld [smem:[#allocation128_spill]]  ;;  %s14665_s17 = smov 24  }
 0x257   :  { %12509 = vmatpush3.msra.mxu0 %v766_v15  ;;  %s16627_s11 = sld [smem:[#allocation123_spill]] }
 0x258   :  { %727 = vadd.xlane.f32.xlu0 %v726_v3  ;;  %12510 = vmatprep.subr.mxu0 %v765_v16  ;;  %v890_v3 = vrot.slane %v858_v2, %v15097_v28  ;;  %s16628_s15 = sld [smem:[#allocation124_spill]] }
 0x259   :  { %12511 = vmatpush3.msra.mxu0 %v765_v16  ;;  %s16629_s16 = sld [smem:[#allocation139_spill]] }
 0x25a   :  { %12512 = vmatprep.subr.mxu0 %v764_v17  ;;  %s16630_s6 = sld [smem:[#allocation138_spill]] }
 0x25b   :  { %12513 = vmatpush3.msra.mxu0 %v764_v17  ;;  %s16631_s25 = sld [smem:[#allocation88_spill]] }
 0x25c   :  { %12514 = vmatprep.subr.mxu0 %v763_v18  ;;  %s16632_s5 = sld [smem:[#allocation132_spill]] }
 0x25d   :  { %12515 = vmatpush3.msra.mxu0 %v763_v18  ;;  %s16633_s18 = sld [smem:[#allocation92_spill]] }
 0x25e   :  { %12516 = vmatprep.subr.mxu0 %v762_v19  ;;  %s16634_s4 = sld [smem:[#allocation133_spill]] }
 0x25f   :  { %12517 = vmatpush3.msra.mxu0 %v762_v19  ;;  %s16635_s22 = sld [smem:[#allocation134_spill]] }
 0x2dd   :  { %v725_v4 = vpop.xlane.xlu0 %724 }
 0x2de   :  { %v730_v5 = vmul.f32 0.020833334, %v725_v4 }
 0x2e0   :  { %v732_v6 = vsub.f32 %v719_v0, %v730_v5 }
 0x2e1   :  { %v728_v7 = vpop.xlane.xlu0 %727 }
 0x2e2   :  { %v731_v8 = vmul.f32 0.020833334, %v728_v7  ;;  %v734_v9 = vmul.f32 %v732_v6, %v732_v6 }
 0x2e4   :  { %v733_v10 = vsub.f32 %v720_v1, %v731_v8  ;;  %v736_v11 = vsel %vm722_vm0, %v734_v9, 0.0 }
 0x2e5   :  { %737 = vadd.xlane.f32.xlu1 %v736_v11 }
 0x2e6   :  { %v735_v12 = vmul.f32 %v733_v10, %v733_v10 }
 0x2e8   :  { %v739_v13 = vsel %vm722_vm0, %v735_v12, 0.0 }
 0x2e9   :  { %740 = vadd.xlane.f32.xlu1 %v739_v13 }
 0x36e   :  { %v738_v20 = vpop.xlane.xlu1 %737 }
 0x36f   :  { %v742_v21 = vmul.f32 0.020833334, %v738_v20 }
 0x371   :  { %v744_v22 = vadd.f32 1e-05, %v742_v21 }
 0x372   :  { %v741_v23 = vpop.xlane.xlu1 %740 }
 0x373   :  { %13433 = vrsqrt.f32 %v744_v22  ;;  %v743_v24 = vmul.f32 0.020833334, %v741_v23 }
 0x375   :  { %v745_v26 = vadd.f32 1e-05, %v743_v24 }
 0x377   :  { %13435 = vrsqrt.f32 %v745_v26 }
 0x380   :  { %v13434_v32 = vpop.eup %13433 }
 0x381   :  { %v748_v33 = vmul.f32 %v13434_v32, %v732_v6  ;;  %v896_v6 = vrot.slane %v858_v2, %v15099_v30  ;;  %v943_v32 = vld [vmem:[%s16624_s26 + $0x10] sm:$0xff] }
 0x383   :  { %v754_v35 = vmul.f32 %v753_v31, %v748_v33  ;;  %v942_v33 = vld [vmem:[%s16624_s26 + $0x8] sm:$0xff] }
 0x384   :  { %v13436_v36 = vpop.eup %13435 }
 0x385   :  { %v749_v37 = vmul.f32 %v13436_v36, %v733_v10  ;;  %v760_v38 = vadd.f32 %v759_v34, %v754_v35  ;;  %v899_v10 = vld [vmem:[%s16623_s23] sm:$0xff]  ;;  %s16636_s23 = sld [smem:[#allocation100_spill]] }
 0x387   :  { %v755_v39 = vmul.f32 %v753_v31, %v749_v37  ;;  %12518 = vmatprep.mubr.msk.f32.mxu0 %vm722_vm0, %v760_v38  ;;  %v944_v31 = vld [vmem:[%s16624_s26 + $0x18] sm:$0xff] }
 0x388   :  { %12521 = vmatprep.subr.mxu1 %v944_v31 }
 0x389   :  { %v761_v40 = vadd.f32 %v759_v34, %v755_v39  ;;  %12522 = vmatpush3.msra.mxu1 %v944_v31  ;;  %v941_v34 = vld [vmem:[%s16624_s26] sm:$0xff]  ;;  %s16637_s26 = sld [smem:[#allocation117_spill]] }
 0x38a   :  { %12523 = vmatprep.subr.mxu1 %v943_v32 }
 0x38b   :  { %12519 = vmatmul.mubr.msk.f32.vlgmr.msra.gmra.mxu0 %vm722_vm0, %v761_v40  ;;  %12524 = vmatpush3.msra.mxu1 %v943_v32 }
 0x38c   :  { %12525 = vmatprep.subr.mxu1 %v942_v33 }
 0x38d   :  { %12526 = vmatpush3.msra.mxu1 %v942_v33 }
 0x38e   :  { %12527 = vmatprep.subr.mxu1 %v941_v34 }
 0x38f   :  { %12528 = vmatpush3.msra.mxu1 %v941_v34 }
 0x44b   :  { %v12520_v42 = vpop.f32.mrf.mxu0 }
 0x44c   :  { %v853_v43 = vadd.f32 %v12520_v42, %v11925_v41 }
 0x44d   :  { %v847_v44 = vpop.f32.mrf.mxu0 }
 0x44e   :  { %v857_v45 = vmax.f32 %v853_v43, 0.0  ;;  %v848_v46 = vadd.f32 %v11925_v41, %v847_v44  ;;  %v902_v41 = vld [vmem:[#allocation38] sm:$0x3] }
 0x44f   :  { %v932_v43 = vrot.slane %v902_v41, %v15097_v28 }
 0x450   :  { %v856_v47 = vmax.f32 %v848_v46, 0.0  ;;  %v863_v48 = vsel %vm859_vm1, %v857_v45, 0.0 }
 0x451   :  { %864 = vadd.xlane.f32.xlu1 %v863_v48  ;;  %v938_v48 = vrot.slane %v902_v41, %v15099_v30 }
 0x452   :  { %v860_v49 = vsel %vm859_vm1, %v856_v47, 0.0 }
 0x453   :  { %861 = vadd.xlane.f32.xlu0 %v860_v49 }
 0x4da   :  { %v865_v50 = vpop.xlane.xlu1 %864 }
 0x4db   :  { %v868_v51 = vmul.f32 0.03125, %v865_v50 }
 0x4dc   :  { %v862_v52 = vpop.xlane.xlu0 %861 }
 0x4dd   :  { %v870_v53 = vsub.f32 %v857_v45, %v868_v51  ;;  %v867_v54 = vmul.f32 0.03125, %v862_v52  ;;  %v14650_v52 = vmov 0.0  }
 0x4de   :  { %12532 = vmatprep.subr.mxu1 %v14650_v52  ;;  %12547 = vmatprep.subr.mxu0 %v14650_v52 }
 0x4df   :  { %v869_v55 = vsub.f32 %v856_v47, %v867_v54  ;;  %v872_v56 = vmul.f32 %v870_v53, %v870_v53  ;;  %12549 = vmatprep.mubr.msk.f32.mxu0 %vm14651_vm2, %v14650_v52 }
 0x4e1   :  { %v876_v57 = vsel %vm859_vm1, %v872_v56, 0.0  ;;  %v871_v58 = vmul.f32 %v869_v55, %v869_v55 }
 0x4e2   :  { %877 = vadd.xlane.f32.xlu1 %v876_v57 }
 0x4e3   :  { %v873_v59 = vsel %vm859_vm1, %v871_v58, 0.0 }
 0x4e4   :  { %874 = vadd.xlane.f32.xlu0 %v873_v59 }
 0x56b   :  { %v878_v60 = vpop.xlane.xlu1 %877 }
 0x56c   :  { %v880_v61 = vmul.f32 0.03125, %v878_v60  ;;  %v709_v60 = vld [vmem:[%s16625_s27] sm:$0x1] }
 0x56d   :  { %v875_v62 = vpop.xlane.xlu0 %874 }
 0x56e   :  { %v882_v63 = vadd.f32 1e-05, %v880_v61  ;;  %v879_v0 = vmul.f32 0.03125, %v875_v62  ;;  %v711_v61 = vmul.f32 -1e+09, %v709_v60 }
 0x56f   :  { %v710_v62 = vld [vmem:[%s16625_s27 + $0x1] sm:$0x1]  ;;  %s16638_s27 = sld [smem:[#allocation90_spill]] }
 0x570   :  { %13437 = vrsqrt.f32 %v882_v63  ;;  %v881_v1 = vadd.f32 1e-05, %v879_v0  ;;  %v15159_v63 = vrot.slane %v711_v61, %v15097_v28  ;;  %v712_v0 = vmul.f32 -1e+09, %v710_v62 }
 0x572   :  { %13439 = vrsqrt.f32 %v881_v1 }
 0x57d   :  { %v13438_v4 = vpop.eup %13437 }
 0x57e   :  { %v886_v5 = vmul.f32 %v13438_v4, %v870_v53  ;;  %v11928_v53 = vld [vmem:[#allocation47] ss:$0 sm:$0xff] }
 0x57f   :  { %v13440_v7 = vpop.eup %13439 }
 0x580   :  { %v892_v8 = vmul.f32 %v890_v3, %v886_v5  ;;  %v885_v9 = vmul.f32 %v13440_v7, %v869_v55 }
 0x582   :  { %v898_v11 = vadd.f32 %v896_v6, %v892_v8  ;;  %v891_v12 = vmul.f32 %v890_v3, %v885_v9  ;;  %v15163_v3 = vrot.slane %v712_v0, %v15097_v28 }
 0x584   :  { %v901_v13 = vadd.f32 %v899_v10, %v898_v11  ;;  %v897_v14 = vadd.f32 %v896_v6, %v891_v12 }
 0x586   :  { %v906_v15 = vsel %vm859_vm1, %v901_v13, 0.0  ;;  %v900_v16 = vadd.f32 %v899_v10, %v897_v14 }
 0x587   :  { %907 = vadd.xlane.f32.xlu1 %v906_v15 }
 0x588   :  { %v903_v17 = vsel %vm859_vm1, %v900_v16, 0.0 }
 0x589   :  { %904 = vadd.xlane.f32.xlu0 %v903_v17 }
 0x610   :  { %v908_v18 = vpop.xlane.xlu1 %907 }
 0x611   :  { %v910_v19 = vmul.f32 0.03125, %v908_v18 }
 0x612   :  { %v905_v20 = vpop.xlane.xlu0 %904 }
 0x613   :  { %v912_v21 = vsub.f32 %v901_v13, %v910_v19  ;;  %v909_v22 = vmul.f32 0.03125, %v905_v20 }
 0x615   :  { %v911_v23 = vsub.f32 %v900_v16, %v909_v22  ;;  %v914_v24 = vmul.f32 %v912_v21, %v912_v21 }
 0x617   :  { %v918_v26 = vsel %vm859_vm1, %v914_v24, 0.0  ;;  %v913_v27 = vmul.f32 %v911_v23, %v911_v23 }
 0x618   :  { %919 = vadd.xlane.f32.xlu1 %v918_v26 }
 0x619   :  { %v915_v29 = vsel %vm859_vm1, %v913_v27, 0.0 }
 0x61a   :  { %916 = vadd.xlane.f32.xlu0 %v915_v29 }
 0x6a1   :  { %v920_v35 = vpop.xlane.xlu1 %919 }
 0x6a2   :  { %v922_v36 = vmul.f32 0.03125, %v920_v35 }
 0x6a3   :  { %v917_v37 = vpop.xlane.xlu0 %916 }
 0x6a4   :  { %v924_v38 = vadd.f32 1e-05, %v922_v36  ;;  %v921_v39 = vmul.f32 0.03125, %v917_v37 }
 0x6a6   :  { %13441 = vrsqrt.f32 %v924_v38  ;;  %v923_v40 = vadd.f32 1e-05, %v921_v39 }
 0x6a8   :  { %13443 = vrsqrt.f32 %v923_v40 }
 0x6b3   :  { %v13442_v42 = vpop.eup %13441 }
 0x6b4   :  { %v928_v44 = vmul.f32 %v13442_v42, %v912_v21 }
 0x6b5   :  { %v13444_v45 = vpop.eup %13443 }
 0x6b6   :  { %v927_v46 = vmul.f32 %v13444_v45, %v911_v23  ;;  %v934_v47 = vmul.f32 %v932_v43, %v928_v44 }
 0x6b8   :  { %v933_v49 = vmul.f32 %v932_v43, %v927_v46  ;;  %v15124_v51 = vadd.f32 %v938_v48, %v934_v47 }
 0x6ba   :  { %v15122_v50 = vadd.f32 %v938_v48, %v933_v49 }
 0x6bc   :  { %12529 = vmatprep.mubr.msk.f32.mxu1 %vm859_vm1, %v15122_v50 }
 0x6bd   :  { %12530 = vmatmul.mubr.msk.f32.vlgmr.msra.gmra.mxu1 %vm859_vm1, %v15124_v51 }
 0x6be   :  { %12534 = vmatprep.mubr.msk.f32.mxu1 %vm14651_vm2, %v14650_v52 }
 0x77d   :  { %v12531_v54 = vpop.f32.mrf.mxu1 }
 0x77e   :  { %v15136_v55 = vadd.f32 %v12531_v54, %v11928_v53 }
 0x77f   :  { %v1024_v56 = vpop.f32.mrf.mxu1 }
 0x780   :  { %v15138_v57 = vadd.f32 %v11928_v53, %v1024_v56  ;;  %1124 = vrot.lane.b32.xlu1 %v15136_v55, %s14652_s14 }
 0x782   :  { %1046 = vrot.lane.b32.xlu0 %v15138_v57, %s14652_s14 }
 0x7f2   :  { %v1125_v59 = vpop.permute.xlu1 %1124 }
 0x7f4   :  { %v1047_v58 = vpop.permute.xlu0 %1046 }
 0x7f5   :  { %12533 = vmatpush3.xpose.msk.msra.mxu1 %vm1048_vm3, %v1047_v58 }
 0x7f6   :  { %12537 = vmatprep.subr.mxu1 %v14650_v52 }
 0x7f8   :  { %12535 = vmatmul.mubr.msk.f32.vlgmr.msra.gmra.mxu1 %vm1048_vm3, %v15138_v57 }
 0x7f9   :  { %12538 = vmatpush3.xpose.msk.msra.mxu1 %vm1048_vm3, %v1125_v59  ;;  %12539 = vmatprep.mubr.msk.f32.mxu1 %vm14651_vm2, %v14650_v52 }
 0x7fa   :  { %12542 = vmatprep.subr.mxu1 %v14650_v52 }
 0x7fc   :  { %12540 = vmatmul.mubr.msk.f32.vlgmr.msra.gmra.mxu1 %vm1048_vm3, %v15136_v55 }
 0x7fd   :  { %12544 = vmatprep.mubr.msk.f32.mxu1 %vm14651_vm2, %v14650_v52 }
 0x8b8   :  { %v1119_v1 = vpop.f32.mrf.mxu1 }
 0x8b9   :  { %v1120_v2 = vadd.f32 %v1119_v1, %v15159_v63 }
 0x8ba   :  { %v12536_v4 = vpop.f32.mrf.mxu1 }
 0x8bb   :  { %v1200_v5 = vsel %vm1048_vm3, %v1120_v2, -inf }
 0x8bc   :  { %v1196_v6 = vpop.f32.mrf.mxu1  ;;  %1201 = vmax.xlane.f32.xlu1 %v1200_v5 }
 0x8bd   :  { %v1197_v7 = vadd.f32 %v1196_v6, %v15163_v3 }
 0x8be   :  { %v12541_v8 = vpop.f32.mrf.mxu1 }
 0x8bf   :  { %v1203_v9 = vsel %vm1048_vm3, %v1197_v7, -inf }
 0x8c0   :  { %1204 = vmax.xlane.f32.xlu0 %v1203_v9 }
 0x8cd   :  { %1298 = vrot.lane.b32.xlu1 %v15136_v55, %s14653_s28 }
 0x8d1   :  { %1376 = vrot.lane.b32.xlu1 %v15138_v57, %s14654_s8 }
 0x8d5   :  { %1454 = vrot.lane.b32.xlu1 %v15136_v55, %s14654_s8 }
 0x945   :  { %v1202_v10 = vpop.xlane.xlu1 %1201 }
 0x946   :  { %v1206_v11 = vsub.f32 %v1120_v2, %v1202_v10 }
 0x948   :  { %v1208_v12 = vmul.f32 1.442695, %v1206_v11 }
 0x949   :  { %v1205_v13 = vpop.xlane.xlu0 %1204  ;;  %v1299_v14 = vpop.permute.xlu1 %1298 }
 0x94a   :  { %13445 = vpow2.f32 %v1208_v12  ;;  %v1207_v15 = vsub.f32 %v1197_v7, %v1205_v13  ;;  %12548 = vmatpush3.msra.mxu0 %v1299_v14 }
 0x94b   :  { %12557 = vmatprep.subr.mxu0 %v14650_v52 }
 0x94c   :  { %v1210_v16 = vmul.f32 1.442695, %v1207_v15 }
 0x94d   :  { %v1377_v21 = vpop.permute.xlu1 %1376 }
 0x94e   :  { %13447 = vpow2.f32 %v1210_v16 }
 0x951   :  { %v1455_v22 = vpop.permute.xlu1 %1454 }
 0x957   :  { %v13446_v17 = vpop.eup %13445 }
 0x958   :  { %v1212_v18 = vsel %vm1048_vm3, %v13446_v17, 0.0 }
 0x959   :  { %1213 = vadd.xlane.f32.xlu0 %v1212_v18 }
 0x95b   :  { %v13448_v19 = vpop.eup %13447 }
 0x95c   :  { %v1215_v20 = vsel %vm1048_vm3, %v13448_v19, 0.0 }
 0x95d   :  { %1216 = vadd.xlane.f32.xlu1 %v1215_v20 }
 0x96e   :  { %1452 = vrot.lane.b32.xlu1 %v15136_v55, %s14655_s1 }
 0x96f   :  { %1222 = vrot.lane.b32.xlu0 %v15138_v57, %s14653_s28 }
 0x973   :  { %1374 = vrot.lane.b32.xlu0 %v15138_v57, %s14655_s1 }
 0x9e2   :  { %v1214_v23 = vpop.xlane.xlu0 %1213 }
 0x9e3   :  { %13449 = vrcp.f32 %v1214_v23 }
 0x9e6   :  { %v1223_v24 = vpop.permute.xlu0 %1222  ;;  %v1217_v26 = vpop.xlane.xlu1 %1216 }
 0x9e7   :  { %13451 = vrcp.f32 %v1217_v26  ;;  %12543 = vmatpush3.msra.mxu1 %v1223_v24 }
 0x9e8   :  { %12552 = vmatprep.subr.mxu1 %v14650_v52 }
 0x9ea   :  { %v1375_v33 = vpop.permute.xlu0 %1374  ;;  %v1453_v34 = vpop.permute.xlu1 %1452 }
 0x9f0   :  { %v13450_v27 = vpop.eup %13449 }
 0x9f1   :  { %v1219_v29 = vmul.f32 %v13450_v27, %v13446_v17 }
 0x9f3   :  { %12545 = vmatmul.mubr.msk.f32.vlgmr.msra.gmra.mxu1 %vm1048_vm3, %v1219_v29 }
 0x9f4   :  { %v13452_v31 = vpop.eup %13451  ;;  %12553 = vmatpush3.xpose.msk.msra.mxu1 %vm1048_vm3, %v1377_v21  ;;  %12554 = vmatprep.mubr.msk.f32.mxu1 %vm14651_vm2, %v14650_v52 }
 0x9f5   :  { %v1221_v32 = vmul.f32 %v13452_v31, %v13448_v19  ;;  %12562 = vmatprep.subr.mxu1 %v14650_v52 }
 0x9f7   :  { %12550 = vmatmul.mubr.msk.f32.vlgmr.msra.gmra.mxu0 %vm1048_vm3, %v1221_v32  ;;  %12555 = vmatmul.mubr.msk.f32.vlgmr.msra.gmra.mxu1 %vm1048_vm3, %v1375_v33 }
 0x9f8   :  { %12558 = vmatpush3.xpose.msk.msra.mxu0 %vm1048_vm3, %v1455_v22  ;;  %12559 = vmatprep.mubr.msk.f32.mxu0 %vm14651_vm2, %v14650_v52 }
 0x9f9   :  { %12567 = vmatprep.subr.mxu0 %v14650_v52  ;;  %12564 = vmatprep.mubr.msk.f32.mxu1 %vm14651_vm2, %v14650_v52 }
 0x9fb   :  { %12560 = vmatmul.mubr.msk.f32.vlgmr.msra.gmra.mxu0 %vm1048_vm3, %v1453_v34 }
 0x9fc   :  { %12569 = vmatprep.mubr.msk.f32.mxu0 %vm14651_vm2, %v14650_v52 }
 0xab3   :  { %v15200_v35 = vpop.f32.mrf.mxu1 }
 0xab5   :  { %v12546_v36 = vpop.f32.mrf.mxu1 }
 0xab7   :  { %v15202_v37 = vpop.f32.mrf.mxu0  ;;  %v1448_v38 = vpop.f32.mrf.mxu1 }
 0xab8   :  { %v1449_v39 = vadd.f32 %v1448_v38, %v15159_v63 }
 0xab9   :  { %v12551_v40 = vpop.f32.mrf.mxu0  ;;  %v12556_v41 = vpop.f32.mrf.mxu1 }
 0xaba   :  { %v1530_v42 = vsel %vm1048_vm3, %v1449_v39, -inf }
 0xabb   :  { %1531 = vmax.xlane.f32.xlu0 %v1530_v42  ;;  %v1526_v43 = vpop.f32.mrf.mxu0 }
 0xabc   :  { %v1527_v44 = vadd.f32 %v1526_v43, %v15163_v3 }
 0xabd   :  { %v12561_v45 = vpop.f32.mrf.mxu0 }
 0xabe   :  { %v1533_v46 = vsel %vm1048_vm3, %v1527_v44, -inf }
 0xabf   :  { %1534 = vmax.xlane.f32.xlu1 %v1533_v46 }
 0xad0   :  { %1628 = vrot.lane.b32.xlu1 %v15136_v55, %s14656_s21 }
 0xad1   :  { %1552 = vrot.lane.b32.xlu0 %v15138_v57, %s14656_s21 }
 0xad4   :  { %1706 = vrot.lane.b32.xlu1 %v15138_v57, %s14657_s2 }
 0xad8   :  { %1784 = vrot.lane.b32.xlu1 %v15136_v55, %s14657_s2 }
 0xadc   :  { %1782 = vrot.lane.b32.xlu1 %v15136_v55, %s14658_s30 }
 0xb44   :  { %v1532_v47 = vpop.xlane.xlu0 %1531 }
 0xb45   :  { %v1536_v48 = vsub.f32 %v1449_v39, %v1532_v47 }
 0xb47   :  { %v1538_v49 = vmul.f32 1.442695, %v1536_v48 }
 0xb48   :  { %v1553_v53 = vpop.permute.xlu0 %1552  ;;  %v1535_v54 = vpop.xlane.xlu1 %1534 }
 0xb49   :  { %13453 = vpow2.f32 %v1538_v49  ;;  %v1537_v56 = vsub.f32 %v1527_v44, %v1535_v54  ;;  %12563 = vmatpush3.msra.mxu1 %v1553_v53 }
 0xb4a   :  { %12572 = vmatprep.subr.mxu1 %v14650_v52 }
 0xb4b   :  { %v1540_v58 = vmul.f32 1.442695, %v1537_v56 }
 0xb4c   :  { %v1629_v59 = vpop.permute.xlu1 %1628 }
 0xb4d   :  { %13455 = vpow2.f32 %v1540_v58  ;;  %12568 = vmatpush3.msra.mxu0 %v1629_v59 }
 0xb4e   :  { %12577 = vmatprep.subr.mxu0 %v14650_v52 }
 0xb50   :  { %v1707_v4 = vpop.permute.xlu1 %1706 }
 0xb54   :  { %v1785_v8 = vpop.permute.xlu1 %1784 }
 0xb56   :  { %v13454_v60 = vpop.eup %13453 }
 0xb57   :  { %v1542_v61 = vsel %vm1048_vm3, %v13454_v60, 0.0 }
 0xb58   :  { %1543 = vadd.xlane.f32.xlu0 %v1542_v61  ;;  %v1783_v11 = vpop.permute.xlu1 %1782 }
 0xb5a   :  { %v13456_v62 = vpop.eup %13455 }
 0xb5b   :  { %v1545_v0 = vsel %vm1048_vm3, %v13456_v62, 0.0 }
 0xb5c   :  { %1546 = vadd.xlane.f32.xlu0 %v1545_v0 }
 0xb72   :  { %1704 = vrot.lane.b32.xlu0 %v15138_v57, %s14658_s30 }
 0xbe1   :  { %v1544_v1 = vpop.xlane.xlu0 %1543 }
 0xbe2   :  { %13457 = vrcp.f32 %v1544_v1 }
 0xbe5   :  { %v1547_v2 = vpop.xlane.xlu0 %1546 }
 0xbe6   :  { %13459 = vrcp.f32 %v1547_v2 }
 0xbe9   :  { %v1705_v10 = vpop.permute.xlu0 %1704 }
 0xbef   :  { %v13458_v5 = vpop.eup %13457 }
 0xbf0   :  { %v1549_v6 = vmul.f32 %v13458_v5, %v13454_v60 }
 0xbf2   :  { %12565 = vmatmul.mubr.msk.f32.vlgmr.msra.gmra.mxu1 %vm1048_vm3, %v1549_v6 }
 0xbf3   :  { %v13460_v7 = vpop.eup %13459  ;;  %12573 = vmatpush3.xpose.msk.msra.mxu1 %vm1048_vm3, %v1707_v4  ;;  %12574 = vmatprep.mubr.msk.f32.mxu1 %vm14651_vm2, %v14650_v52 }
 0xbf4   :  { %v1551_v9 = vmul.f32 %v13460_v7, %v13456_v62  ;;  %12582 = vmatprep.subr.mxu1 %v14650_v52 }
 0xbf6   :  { %12570 = vmatmul.mubr.msk.f32.vlgmr.msra.gmra.mxu0 %vm1048_vm3, %v1551_v9  ;;  %12575 = vmatmul.mubr.msk.f32.vlgmr.msra.gmra.mxu1 %vm1048_vm3, %v1705_v10 }
 0xbf7   :  { %12578 = vmatpush3.xpose.msk.msra.mxu0 %vm1048_vm3, %v1785_v8  ;;  %12579 = vmatprep.mubr.msk.f32.mxu0 %vm14651_vm2, %v14650_v52 }
 0xbf8   :  { %12587 = vmatprep.subr.mxu0 %v14650_v52  ;;  %12584 = vmatprep.mubr.msk.f32.mxu1 %vm14651_vm2, %v14650_v52 }
 0xbfa   :  { %12580 = vmatmul.mubr.msk.f32.vlgmr.msra.gmra.mxu0 %vm1048_vm3, %v1783_v11 }
 0xbfb   :  { %12589 = vmatprep.mubr.msk.f32.mxu0 %vm14651_vm2, %v14650_v52 }
 0xcb2   :  { %v15240_v12 = vpop.f32.mrf.mxu1 }
 0xcb4   :  { %v12566_v13 = vpop.f32.mrf.mxu1 }
 0xcb6   :  { %v15242_v14 = vpop.f32.mrf.mxu0  ;;  %v1778_v15 = vpop.f32.mrf.mxu1 }
 0xcb7   :  { %v1779_v16 = vadd.f32 %v1778_v15, %v15159_v63 }
 0xcb8   :  { %v12571_v17 = vpop.f32.mrf.mxu0  ;;  %v12576_v18 = vpop.f32.mrf.mxu1 }
 0xcb9   :  { %v1860_v19 = vsel %vm1048_vm3, %v1779_v16, -inf }
 0xcba   :  { %1861 = vmax.xlane.f32.xlu0 %v1860_v19  ;;  %v1856_v20 = vpop.f32.mrf.mxu0 }
 0xcbb   :  { %v1857_v21 = vadd.f32 %v1856_v20, %v15163_v3 }
 0xcbc   :  { %v12581_v22 = vpop.f32.mrf.mxu0 }
 0xcbd   :  { %v1863_v23 = vsel %vm1048_vm3, %v1857_v21, -inf }
 0xcbe   :  { %1864 = vmax.xlane.f32.xlu1 %v1863_v23  ;;  %v2399_v23 = vld [vmem:[%s16626_s10 + $0x18] sm:$0xff] }
 0xccf   :  { %1958 = vrot.lane.b32.xlu1 %v15136_v55, %s14659_s3 }
 0xcd0   :  { %1882 = vrot.lane.b32.xlu0 %v15138_v57, %s14659_s3 }
 0xcd3   :  { %2036 = vrot.lane.b32.xlu1 %v15138_v57, %s14660_s0 }
 0xcd7   :  { %2114 = vrot.lane.b32.xlu1 %v15136_v55, %s14660_s0 }
 0xcdb   :  { %2112 = vrot.lane.b32.xlu1 %v15136_v55, %s14661_s19 }
 0xd43   :  { %v1862_v24 = vpop.xlane.xlu0 %1861 }
 0xd44   :  { %v1866_v26 = vsub.f32 %v1779_v16, %v1862_v24  ;;  %v2397_v24 = vld [vmem:[%s16626_s10 + $0x8] sm:$0xff] }
 0xd46   :  { %v1868_v27 = vmul.f32 1.442695, %v1866_v26  ;;  %v2396_v26 = vld [vmem:[%s16626_s10] sm:$0xff] }
 0xd47   :  { %v1883_v29 = vpop.permute.xlu0 %1882  ;;  %v1865_v31 = vpop.xlane.xlu1 %1864 }
 0xd48   :  { %13461 = vpow2.f32 %v1868_v27  ;;  %v1867_v32 = vsub.f32 %v1857_v21, %v1865_v31  ;;  %12583 = vmatpush3.msra.mxu1 %v1883_v29 }
 0xd49   :  { %12592 = vmatprep.subr.mxu1 %v14650_v52 }
 0xd4a   :  { %v1870_v33 = vmul.f32 1.442695, %v1867_v32 }
 0xd4b   :  { %v1959_v34 = vpop.permute.xlu1 %1958 }
 0xd4c   :  { %13463 = vpow2.f32 %v1870_v33  ;;  %12588 = vmatpush3.msra.mxu0 %v1959_v34 }
 0xd4d   :  { %12597 = vmatprep.subr.mxu0 %v14650_v52 }
 0xd4f   :  { %v2037_v43 = vpop.permute.xlu1 %2036 }
 0xd53   :  { %v2115_v47 = vpop.permute.xlu1 %2114 }
 0xd55   :  { %v13462_v36 = vpop.eup %13461 }
 0xd56   :  { %v1872_v38 = vsel %vm1048_vm3, %v13462_v36, 0.0 }
 0xd57   :  { %1873 = vadd.xlane.f32.xlu0 %v1872_v38  ;;  %v2113_v53 = vpop.permute.xlu1 %2112 }
 0xd59   :  { %v13464_v39 = vpop.eup %13463 }
 0xd5a   :  { %v1875_v40 = vsel %vm1048_vm3, %v13464_v39, 0.0 }
 0xd5b   :  { %1876 = vadd.xlane.f32.xlu0 %v1875_v40 }
 0xd71   :  { %2034 = vrot.lane.b32.xlu0 %v15138_v57, %s14661_s19 }
 0xde0   :  { %v1874_v41 = vpop.xlane.xlu0 %1873 }
 0xde1   :  { %13465 = vrcp.f32 %v1874_v41 }
 0xde4   :  { %v1877_v42 = vpop.xlane.xlu0 %1876 }
 0xde5   :  { %13467 = vrcp.f32 %v1877_v42 }
 0xde8   :  { %v2035_v49 = vpop.permute.xlu0 %2034 }
 0xdee   :  { %v13466_v44 = vpop.eup %13465 }
 0xdef   :  { %v1879_v45 = vmul.f32 %v13466_v44, %v13462_v36 }
 0xdf1   :  { %12585 = vmatmul.mubr.msk.f32.vlgmr.msra.gmra.mxu1 %vm1048_vm3, %v1879_v45 }
 0xdf2   :  { %v13468_v46 = vpop.eup %13467  ;;  %12593 = vmatpush3.xpose.msk.msra.mxu1 %vm1048_vm3, %v2037_v43  ;;  %12594 = vmatprep.mubr.msk.f32.mxu1 %vm14651_vm2, %v14650_v52 }
 0xdf3   :  { %v1881_v48 = vmul.f32 %v13468_v46, %v13464_v39  ;;  %12602 = vmatprep.subr.mxu1 %v14650_v52 }
 0xdf5   :  { %12590 = vmatmul.mubr.msk.f32.vlgmr.msra.gmra.mxu0 %vm1048_vm3, %v1881_v48  ;;  %12595 = vmatmul.mubr.msk.f32.vlgmr.msra.gmra.mxu1 %vm1048_vm3, %v2035_v49 }
 0xdf6   :  { %12598 = vmatpush3.xpose.msk.msra.mxu0 %vm1048_vm3, %v2115_v47  ;;  %12599 = vmatprep.mubr.msk.f32.mxu0 %vm14651_vm2, %v14650_v52 }
 0xdf7   :  { %12607 = vmatprep.subr.mxu0 %v14650_v52  ;;  %12604 = vmatprep.mubr.msk.f32.mxu1 %vm14651_vm2, %v14650_v52 }
 0xdf9   :  { %12600 = vmatmul.mubr.msk.f32.vlgmr.msra.gmra.mxu0 %vm1048_vm3, %v2113_v53 }
 0xdfa   :  { %12609 = vmatprep.mubr.msk.f32.mxu0 %vm14651_vm2, %v14650_v52 }
 0xeb1   :  { %v1954_v54 = vpop.f32.mrf.mxu1 }
 0xeb3   :  { %v12586_v56 = vpop.f32.mrf.mxu1 }
 0xeb5   :  { %v2030_v58 = vpop.f32.mrf.mxu0  ;;  %v2108_v59 = vpop.f32.mrf.mxu1 }
 0xeb6   :  { %v2109_v60 = vadd.f32 %v2108_v59, %v15159_v63 }
 0xeb7   :  { %v12591_v61 = vpop.f32.mrf.mxu0  ;;  %v12596_v62 = vpop.f32.mrf.mxu1 }
 0xeb8   :  { %v2190_v0 = vsel %vm1048_vm3, %v2109_v60, -inf }
 0xeb9   :  { %2191 = vmax.xlane.f32.xlu0 %v2190_v0  ;;  %v2186_v1 = vpop.f32.mrf.mxu0 }
 0xeba   :  { %v2187_v2 = vadd.f32 %v2186_v1, %v15163_v3 }
 0xebb   :  { %v12601_v4 = vpop.f32.mrf.mxu0 }
 0xebc   :  { %v2193_v5 = vsel %vm1048_vm3, %v2187_v2, -inf }
 0xebd   :  { %2194 = vmax.xlane.f32.xlu1 %v2193_v5  ;;  %v2532_v5 = vld [vmem:[%s16627_s11 + $0x18] sm:$0xff] }
 0xece   :  { %2288 = vrot.lane.b32.xlu1 %v15136_v55, %s14662_s24 }
 0xed2   :  { %2366 = vrot.lane.b32.xlu1 %v15240_v12, %s14663_s7 }
 0xed6   :  { %2368 = vrot.lane.b32.xlu1 %v15242_v14, %s14663_s7 }
 0xeda   :  { %2376 = vrot.lane.b32.xlu1 %v2030_v58, %s14664_s9 }
 0xf42   :  { %v2192_v6 = vpop.xlane.xlu0 %2191 }
 0xf43   :  { %v2196_v7 = vsub.f32 %v2109_v60, %v2192_v6  ;;  %v2531_v6 = vld [vmem:[%s16627_s11 + $0x10] sm:$0xff] }
 0xf45   :  { %v2198_v8 = vmul.f32 1.442695, %v2196_v7  ;;  %v2530_v7 = vld [vmem:[%s16627_s11 + $0x8] sm:$0xff] }
 0xf46   :  { %v2195_v9 = vpop.xlane.xlu1 %2194 }
 0xf47   :  { %13469 = vpow2.f32 %v2198_v8  ;;  %v2197_v10 = vsub.f32 %v2187_v2, %v2195_v9  ;;  %v2529_v8 = vld [vmem:[%s16627_s11] sm:$0xff]  ;;  %v2634_v9 = vld [vmem:[%s16628_s15 + $0x38] sm:$0xff]  ;;  %s16640_s11 = sld [smem:[#allocation102_spill]] }
 0xf49   :  { %v2200_v11 = vmul.f32 1.442695, %v2197_v10  ;;  %v2633_v10 = vld [vmem:[%s16628_s15 + $0x30] sm:$0xff] }
 0xf4a   :  { %v2289_v13 = vpop.permute.xlu1 %2288 }
 0xf4b   :  { %13471 = vpow2.f32 %v2200_v11  ;;  %12608 = vmatpush3.msra.mxu0 %v2289_v13  ;;  %v2632_v11 = vld [vmem:[%s16628_s15 + $0x28] sm:$0xff]  ;;  %v2631_v13 = vld [vmem:[%s16628_s15 + $0x20] sm:$0xff] }
 0xf4c   :  { %12623 = vmatprep.subr.mxu0 %v2532_v5 }
 0xf4e   :  { %v2367_v33 = vpop.permute.xlu1 %2366 }
 0xf4f   :  { %v2388_v38 = vsel %vm1048_vm3, %v15200_v35, %v2367_v33  ;;  %v11955_v35 = vld [vmem:[#allocation46] ss:$0 sm:$0xff]  ;;  %v2628_v33 = vld [vmem:[%s16628_s15 + $0x8] sm:$0xff] }
 0xf52   :  { %v2369_v34 = vpop.permute.xlu1 %2368 }
 0xf53   :  { %v2389_v43 = vsel %vm1048_vm3, %v15202_v37, %v2369_v34  ;;  %v2627_v34 = vld [vmem:[%s16628_s15] sm:$0xff] }
 0xf54   :  { %v13470_v55 = vpop.eup %13469 }
 0xf55   :  { %v2202_v15 = vsel %vm1048_vm3, %v13470_v55, 0.0 }
 0xf56   :  { %2203 = vadd.xlane.f32.xlu0 %v2202_v15  ;;  %v2377_v39 = vpop.permute.xlu1 %2376 }
 0xf57   :  { %v2392_v44 = vsel %vm2390_vm5, %v2389_v43, %v2377_v39 }
 0xf58   :  { %v13472_v12 = vpop.eup %13471 }
 0xf59   :  { %v2205_v14 = vsel %vm1048_vm3, %v13472_v12, 0.0 }
 0xf5a   :  { %2206 = vadd.xlane.f32.xlu0 %v2205_v14 }
 0xf70   :  { %2212 = vrot.lane.b32.xlu0 %v15138_v57, %s14662_s24  ;;  %v2398_v57 = vld [vmem:[%s16626_s10 + $0x10] sm:$0xff]  ;;  %s16639_s10 = sld [smem:[#allocation99_spill]] }
 0xf74   :  { %2374 = vrot.lane.b32.xlu0 %v1954_v54, %s14664_s9 }
 0xfdf   :  { %v2204_v16 = vpop.xlane.xlu0 %2203 }
 0xfe0   :  { %13473 = vrcp.f32 %v2204_v16 }
 0xfe3   :  { %v2207_v17 = vpop.xlane.xlu0 %2206 }
 0xfe4   :  { %13475 = vrcp.f32 %v2207_v17 }
 0xfe7   :  { %v2213_v18 = vpop.permute.xlu0 %2212 }
 0xfe8   :  { %12603 = vmatpush3.msra.mxu1 %v2213_v18  ;;  %v2490_v18 = vld [vmem:[#allocation43] sm:$0x3] }
 0xfe9   :  { %12612 = vmatprep.subr.mxu1 %v2399_v23 }
 0xfeb   :  { %v2375_v36 = vpop.permute.xlu0 %2374 }
 0xfec   :  { %v2391_v40 = vsel %vm2390_vm5, %v2388_v38, %v2375_v36  ;;  %v11958_v36 = vld [vmem:[#allocation40] ss:$0 sm:$0xff] }
 0xfed   :  { %v13474_v19 = vpop.eup %13473 }
 0xfee   :  { %v2209_v20 = vmul.f32 %v13474_v19, %v13470_v55  ;;  %v2520_v19 = vrot.slane %v2490_v18, %v15097_v28 }
 0xff0   :  { %12605 = vmatmul.mubr.msk.f32.vlgmr.msra.gmra.mxu1 %vm1048_vm3, %v2209_v20 }
 0xff1   :  { %v13476_v21 = vpop.eup %13475  ;;  %12613 = vmatpush3.msra.mxu1 %v2399_v23 }
 0xff2   :  { %v2211_v22 = vmul.f32 %v13476_v21, %v13472_v12  ;;  %12614 = vmatprep.subr.mxu1 %v2398_v57 }
 0xff3   :  { %12615 = vmatpush3.msra.mxu1 %v2398_v57 }
 0xff4   :  { %12610 = vmatmul.mubr.msk.f32.vlgmr.msra.gmra.mxu0 %vm1048_vm3, %v2211_v22  ;;  %12616 = vmatprep.subr.mxu1 %v2397_v24  ;;  %v2526_v22 = vrot.slane %v2490_v18, %v15099_v30 }
 0xff5   :  { %12617 = vmatpush3.msra.mxu1 %v2397_v24  ;;  %12624 = vmatpush3.msra.mxu0 %v2532_v5  ;;  %v2767_v5 = vld [vmem:[%s16629_s16 + $0x10] sm:$0xff] }
 0xff6   :  { %12618 = vmatprep.subr.mxu1 %v2396_v26  ;;  %12625 = vmatprep.subr.mxu0 %v2531_v6 }
 0xff7   :  { %12619 = vmatpush3.msra.mxu1 %v2396_v26  ;;  %12626 = vmatpush3.msra.mxu0 %v2531_v6  ;;  %v2766_v6 = vld [vmem:[%s16629_s16 + $0x8] sm:$0xff] }
 0xff8   :  { %12627 = vmatprep.subr.mxu0 %v2530_v7  ;;  %12634 = vmatprep.subr.mxu1 %v2634_v9 }
 0xff9   :  { %12628 = vmatpush3.msra.mxu0 %v2530_v7  ;;  %v2765_v7 = vld [vmem:[%s16629_s16] sm:$0xff] }
 0xffa   :  { %12629 = vmatprep.subr.mxu0 %v2529_v8 }
 0xffb   :  { %12630 = vmatpush3.msra.mxu0 %v2529_v8 }
0x10b0   :  { %v2284_v27 = vpop.f32.mrf.mxu1 }
0x10b1   :  { %2382 = vrot.lane.b32.xlu0 %v2284_v27, %s14665_s17 }
0x10b2   :  { %v12606_v29 = vpop.f32.mrf.mxu1 }
0x10b4   :  { %v2360_v31 = vpop.f32.mrf.mxu0 }
0x10b5   :  { %2384 = vrot.lane.b32.xlu1 %v2360_v31, %s14665_s17  ;;  %v2630_v31 = vld [vmem:[%s16628_s15 + $0x18] sm:$0xff] }
0x10b6   :  { %v12611_v32 = vpop.f32.mrf.mxu0 }
0x10b7   :  { %v2629_v32 = vld [vmem:[%s16628_s15 + $0x10] sm:$0xff]  ;;  %s16641_s15 = sld [smem:[#allocation104_spill]] }
0x1123   :  { %v2383_v41 = vpop.permute.xlu0 %2382 }
0x1124   :  { %v2394_v42 = vsel %vm2393_vm4, %v2391_v40, %v2383_v41 }
0x1125   :  { %12620 = vmatprep.mubr.msk.f32.mxu1 %vm859_vm1, %v2394_v42 }
0x1127   :  { %v2385_v45 = vpop.permute.xlu1 %2384 }
0x1128   :  { %v2395_v46 = vsel %vm2393_vm4, %v2392_v44, %v2385_v45 }
0x1129   :  { %12621 = vmatmul.mubr.msk.f32.vlgmr.msra.gmra.mxu1 %vm859_vm1, %v2395_v46  ;;  %v11961_v46 = vld [vmem:[#allocation41] ss:$0 sm:$0xff] }
0x112a   :  { %12635 = vmatpush3.msra.mxu1 %v2634_v9 }
0x112b   :  { %12636 = vmatprep.subr.mxu1 %v2633_v10 }
0x112c   :  { %12637 = vmatpush3.msra.mxu1 %v2633_v10 }
0x112d   :  { %12638 = vmatprep.subr.mxu1 %v2632_v11 }
0x112e   :  { %12639 = vmatpush3.msra.mxu1 %v2632_v11 }
0x112f   :  { %12640 = vmatprep.subr.mxu1 %v2631_v13 }
0x1130   :  { %12641 = vmatpush3.msra.mxu1 %v2631_v13 }
0x1131   :  { %12642 = vmatprep.subr.mxu1 %v2630_v31 }
0x1132   :  { %12643 = vmatpush3.msra.mxu1 %v2630_v31 }
0x1133   :  { %12644 = vmatprep.subr.mxu1 %v2629_v32 }
0x1134   :  { %12645 = vmatpush3.msra.mxu1 %v2629_v32 }
0x1135   :  { %12646 = vmatprep.subr.mxu1 %v2628_v33 }
0x1136   :  { %12647 = vmatpush3.msra.mxu1 %v2628_v33 }
0x1137   :  { %12648 = vmatprep.subr.mxu1 %v2627_v34 }
0x1138   :  { %12649 = vmatpush3.msra.mxu1 %v2627_v34 }
0x1139   :  { %12674 = vmatprep.subr.mxu1 %v14650_v52 }
0x11e9   :  { %v12622_v47 = vpop.f32.mrf.mxu1 }
0x11ea   :  { %v2485_v48 = vadd.f32 %v12622_v47, %v11955_v35 }
0x11eb   :  { %v2479_v49 = vpop.f32.mrf.mxu1 }
0x11ec   :  { %v2480_v53 = vadd.f32 %v11955_v35, %v2479_v49  ;;  %v2489_v54 = vadd.f32 %v2485_v48, %v15124_v51 }
0x11ee   :  { %v2494_v56 = vsel %vm859_vm1, %v2489_v54, 0.0  ;;  %v2488_v58 = vadd.f32 %v2480_v53, %v15122_v50 }
0x11ef   :  { %2495 = vadd.xlane.f32.xlu1 %v2494_v56 }
0x11f0   :  { %v2491_v37 = vsel %vm859_vm1, %v2488_v58, 0.0 }
0x11f1   :  { %2492 = vadd.xlane.f32.xlu0 %v2491_v37 }
0x1278   :  { %v2496_v59 = vpop.xlane.xlu1 %2495 }
0x1279   :  { %v2498_v60 = vmul.f32 0.03125, %v2496_v59 }
0x127a   :  { %v2493_v61 = vpop.xlane.xlu0 %2492 }
0x127b   :  { %v2497_v62 = vmul.f32 0.03125, %v2493_v61  ;;  %v2500_v0 = vsub.f32 %v2489_v54, %v2498_v60 }
0x127d   :  { %v2499_v1 = vsub.f32 %v2488_v58, %v2497_v62  ;;  %v2502_v4 = vmul.f32 %v2500_v0, %v2500_v0 }
0x127f   :  { %v2501_v2 = vmul.f32 %v2499_v1, %v2499_v1  ;;  %v2506_v50 = vsel %vm859_vm1, %v2502_v4, 0.0 }
0x1281   :  { %v2503_v51 = vsel %vm859_vm1, %v2501_v2, 0.0 }
0x1282   :  { %2504 = vadd.xlane.f32.xlu0 %v2503_v51 }
0x1286   :  { %2507 = vadd.xlane.f32.xlu0 %v2506_v50  ;;  %v2768_v50 = vld [vmem:[%s16629_s16 + $0x18] sm:$0xff]  ;;  %s16642_s16 = sld [smem:[#allocation91_spill]] }
0x1287   :  { %12653 = vmatprep.subr.mxu0 %v2768_v50 }
0x130b   :  { %v2505_v55 = vpop.xlane.xlu0 %2504 }
0x130c   :  { %v2509_v15 = vmul.f32 0.03125, %v2505_v55 }
0x130e   :  { %v2511_v12 = vadd.f32 1e-05, %v2509_v15  ;;  %v2726_v15 = vld [vmem:[#allocation44] sm:$0x3] }
0x130f   :  { %v2508_v14 = vpop.xlane.xlu0 %2507 }
0x1310   :  { %13477 = vrsqrt.f32 %v2511_v12  ;;  %v2510_v16 = vmul.f32 0.03125, %v2508_v14  ;;  %v2756_v14 = vrot.slane %v2726_v15, %v15097_v28 }
0x1312   :  { %v2512_v17 = vadd.f32 1e-05, %v2510_v16 }
0x1314   :  { %13479 = vrsqrt.f32 %v2512_v17 }
0x131d   :  { %v13478_v20 = vpop.eup %13477 }
0x131e   :  { %v2515_v21 = vmul.f32 %v13478_v20, %v2499_v1  ;;  %v2762_v20 = vrot.slane %v2726_v15, %v15099_v30 }
0x1320   :  { %v2521_v23 = vmul.f32 %v2520_v19, %v2515_v21 }
0x1321   :  { %v13480_v57 = vpop.eup %13479 }
0x1322   :  { %v2516_v24 = vmul.f32 %v13480_v57, %v2500_v0  ;;  %v2527_v26 = vadd.f32 %v2526_v22, %v2521_v23  ;;  %v11964_v57 = vld [vmem:[#allocation55] ss:$0 sm:$0xff] }
0x1324   :  { %v2522_v27 = vmul.f32 %v2520_v19, %v2516_v24  ;;  %12631 = vmatprep.mubr.msk.f32.mxu0 %vm859_vm1, %v2527_v26 }
0x1326   :  { %v2528_v29 = vadd.f32 %v2526_v22, %v2522_v27 }
0x1328   :  { %12632 = vmatmul.mubr.msk.f32.vlgmr.msra.gmra.mxu0 %vm859_vm1, %v2528_v29 }
0x1329   :  { %12654 = vmatpush3.msra.mxu0 %v2768_v50 }
0x132a   :  { %12655 = vmatprep.subr.mxu0 %v2767_v5 }
0x132b   :  { %12656 = vmatpush3.msra.mxu0 %v2767_v5 }
0x132c   :  { %12657 = vmatprep.subr.mxu0 %v2766_v6 }
0x132d   :  { %12658 = vmatpush3.msra.mxu0 %v2766_v6 }
0x132e   :  { %12659 = vmatprep.subr.mxu0 %v2765_v7 }
0x132f   :  { %12660 = vmatpush3.msra.mxu0 %v2765_v7 }
0x1330   :  { %12664 = vmatprep.subr.mxu0 %v14650_v52 }
0x13e8   :  { %v12633_v38 = vpop.f32.mrf.mxu0 }
0x13e9   :  { %v2618_v39 = vadd.f32 %v12633_v38, %v11958_v36 }
0x13ea   :  { %v2612_v40 = vpop.f32.mrf.mxu0 }
0x13eb   :  { %v2613_v41 = vadd.f32 %v11958_v36, %v2612_v40  ;;  %v2624_v42 = vmul.f32 0.2, %v2618_v39  ;;  %vm2622_vm6 = vcmp.gt.f32.partialorder %v2618_v39, 0.0 }
0x13ed   :  { %vm2621_vm7 = vcmp.gt.f32.partialorder %v2613_v41, 0.0  ;;  %v2623_v43 = vmul.f32 0.2, %v2613_v41  ;;  %v2626_v45 = vsel %vm2622_vm6, %v2618_v39, %v2624_v42 }
0x13ef   :  { %v2625_v44 = vsel %vm2621_vm7, %v2613_v41, %v2623_v43 }
0x13f0   :  { %12650 = vmatprep.mubr.msk.f32.mxu1 %vm2642_vm8, %v2625_v44 }
0x13f1   :  { %12651 = vmatmul.mubr.msk.f32.vlgmr.msra.gmra.mxu1 %vm2642_vm8, %v2626_v45 }
0x13f2   :  { %12676 = vmatprep.mubr.msk.f32.mxu1 %vm14651_vm2, %v14650_v52 }
0x14b1   :  { %v12652_v35 = vpop.f32.mrf.mxu1 }
0x14b2   :  { %v2721_v47 = vadd.f32 %v12652_v35, %v11961_v46 }
0x14b3   :  { %v2715_v48 = vpop.f32.mrf.mxu1 }
0x14b4   :  { %v2716_v49 = vadd.f32 %v11961_v46, %v2715_v48  ;;  %v2725_v53 = vadd.f32 %v2721_v47, %v2528_v29 }
0x14b6   :  { %v2730_v54 = vsel %vm859_vm1, %v2725_v53, 0.0  ;;  %v2724_v56 = vadd.f32 %v2716_v49, %v2527_v26 }
0x14b7   :  { %2731 = vadd.xlane.f32.xlu1 %v2730_v54 }
0x14b8   :  { %v2727_v58 = vsel %vm859_vm1, %v2724_v56, 0.0 }
0x14b9   :  { %2728 = vadd.xlane.f32.xlu0 %v2727_v58 }
0x1540   :  { %v2732_v37 = vpop.xlane.xlu1 %2731 }
0x1541   :  { %v2734_v59 = vmul.f32 0.03125, %v2732_v37 }
0x1542   :  { %v2729_v60 = vpop.xlane.xlu0 %2728 }
0x1543   :  { %v2736_v61 = vsub.f32 %v2725_v53, %v2734_v59  ;;  %v2733_v62 = vmul.f32 0.03125, %v2729_v60 }
0x1545   :  { %v2735_v0 = vsub.f32 %v2724_v56, %v2733_v62  ;;  %v2738_v1 = vmul.f32 %v2736_v61, %v2736_v61 }
0x1547   :  { %v2742_v2 = vsel %vm859_vm1, %v2738_v1, 0.0  ;;  %v2737_v51 = vmul.f32 %v2735_v0, %v2735_v0 }
0x1548   :  { %2743 = vadd.xlane.f32.xlu1 %v2742_v2 }
0x1549   :  { %v2739_v4 = vsel %vm859_vm1, %v2737_v51, 0.0 }
0x154a   :  { %2740 = vadd.xlane.f32.xlu0 %v2739_v4 }
0x15d1   :  { %v2744_v8 = vpop.xlane.xlu1 %2743 }
0x15d2   :  { %v2746_v9 = vmul.f32 0.03125, %v2744_v8 }
0x15d3   :  { %v2741_v10 = vpop.xlane.xlu0 %2740 }
0x15d4   :  { %v2748_v11 = vadd.f32 1e-05, %v2746_v9  ;;  %v2745_v13 = vmul.f32 0.03125, %v2741_v10 }
0x15d6   :  { %13481 = vrsqrt.f32 %v2748_v11  ;;  %v2747_v55 = vadd.f32 1e-05, %v2745_v13 }
0x15d8   :  { %13483 = vrsqrt.f32 %v2747_v55 }
0x15e3   :  { %v13482_v12 = vpop.eup %13481 }
0x15e4   :  { %v2752_v16 = vmul.f32 %v13482_v12, %v2736_v61 }
0x15e5   :  { %v13484_v17 = vpop.eup %13483 }
0x15e6   :  { %v2751_v18 = vmul.f32 %v13484_v17, %v2735_v0  ;;  %v2758_v19 = vmul.f32 %v2756_v14, %v2752_v16 }
0x15e8   :  { %v2757_v21 = vmul.f32 %v2756_v14, %v2751_v18  ;;  %v15354_v23 = vadd.f32 %v2762_v20, %v2758_v19 }
0x15ea   :  { %v15352_v22 = vadd.f32 %v2762_v20, %v2757_v21 }
0x15ec   :  { %12661 = vmatprep.mubr.msk.f32.mxu0 %vm859_vm1, %v15352_v22 }
0x15ed   :  { %12662 = vmatmul.mubr.msk.f32.vlgmr.msra.gmra.mxu0 %vm859_vm1, %v15354_v23 }
0x15ee   :  { %12666 = vmatprep.mubr.msk.f32.mxu0 %vm14651_vm2, %v14650_v52 }
0x16ad   :  { %v12663_v24 = vpop.f32.mrf.mxu0 }
0x16ae   :  { %v15362_v26 = vadd.f32 %v12663_v24, %v11964_v57 }
0x16af   :  { %v2848_v27 = vpop.f32.mrf.mxu0 }
0x16b0   :  { %v15364_v29 = vadd.f32 %v11964_v57, %v2848_v27  ;;  %2935 = vrot.lane.b32.xlu1 %v15362_v26, %s14652_s14 }
0x16b2   :  { %2858 = vrot.lane.b32.xlu0 %v15364_v29, %s14652_s14 }
0x1722   :  { %v2936_v32 = vpop.permute.xlu1 %2935 }
0x1724   :  { %v2859_v31 = vpop.permute.xlu0 %2858 }
0x1725   :  { %12665 = vmatpush3.xpose.msk.msra.mxu0 %vm1048_vm3, %v2859_v31 }
0x1726   :  { %12669 = vmatprep.subr.mxu0 %v14650_v52 }
0x1728   :  { %12667 = vmatmul.mubr.msk.f32.vlgmr.msra.gmra.mxu0 %vm1048_vm3, %v15364_v29 }
0x1729   :  { %12670 = vmatpush3.xpose.msk.msra.mxu0 %vm1048_vm3, %v2936_v32  ;;  %12671 = vmatprep.mubr.msk.f32.mxu0 %vm14651_vm2, %v14650_v52 }
0x172a   :  { %12679 = vmatprep.subr.mxu0 %v14650_v52 }
0x172c   :  { %12672 = vmatmul.mubr.msk.f32.vlgmr.msra.gmra.mxu0 %vm1048_vm3, %v15362_v26 }
0x172d   :  { %12681 = vmatprep.mubr.msk.f32.mxu0 %vm14651_vm2, %v14650_v52 }
0x17e8   :  { %v2930_v33 = vpop.f32.mrf.mxu0 }
0x17e9   :  { %v2931_v34 = vadd.f32 %v2930_v33, %v15159_v63 }
0x17ea   :  { %v12668_v36 = vpop.f32.mrf.mxu0 }
0x17eb   :  { %v3011_v38 = vsel %vm1048_vm3, %v2931_v34, -inf }
0x17ec   :  { %3012 = vmax.xlane.f32.xlu1 %v3011_v38  ;;  %v3007_v39 = vpop.f32.mrf.mxu0 }
0x17ed   :  { %v3008_v40 = vadd.f32 %v3007_v39, %v15163_v3 }
0x17ee   :  { %v12673_v41 = vpop.f32.mrf.mxu0 }
0x17ef   :  { %v3014_v42 = vsel %vm1048_vm3, %v3008_v40, -inf }
0x17f0   :  { %3015 = vmax.xlane.f32.xlu0 %v3014_v42 }
0x17fd   :  { %3109 = vrot.lane.b32.xlu1 %v15362_v26, %s14653_s28 }
0x1801   :  { %3187 = vrot.lane.b32.xlu1 %v15364_v29, %s14654_s8 }
0x1805   :  { %3265 = vrot.lane.b32.xlu1 %v15362_v26, %s14654_s8 }
0x1875   :  { %v3013_v43 = vpop.xlane.xlu1 %3012 }
0x1876   :  { %v3017_v44 = vsub.f32 %v2931_v34, %v3013_v43 }
0x1878   :  { %v3019_v45 = vmul.f32 1.442695, %v3017_v44 }
0x1879   :  { %v3110_v46 = vpop.permute.xlu1 %3109  ;;  %v3016_v35 = vpop.xlane.xlu0 %3015 }
0x187a   :  { %13485 = vpow2.f32 %v3019_v45  ;;  %v3018_v47 = vsub.f32 %v3008_v40, %v3016_v35  ;;  %12680 = vmatpush3.msra.mxu0 %v3110_v46 }
0x187b   :  { %12689 = vmatprep.subr.mxu0 %v14650_v52 }
0x187c   :  { %v3021_v48 = vmul.f32 1.442695, %v3018_v47 }
0x187d   :  { %v3188_v58 = vpop.permute.xlu1 %3187 }
0x187e   :  { %13487 = vpow2.f32 %v3021_v48 }
0x1881   :  { %v3266_v37 = vpop.permute.xlu1 %3265 }
0x1887   :  { %v13486_v49 = vpop.eup %13485 }
0x1888   :  { %v3023_v53 = vsel %vm1048_vm3, %v13486_v49, 0.0 }
0x1889   :  { %3024 = vadd.xlane.f32.xlu0 %v3023_v53 }
0x188b   :  { %v13488_v54 = vpop.eup %13487 }
0x188c   :  { %v3026_v56 = vsel %vm1048_vm3, %v13488_v54, 0.0 }
0x188d   :  { %3027 = vadd.xlane.f32.xlu1 %v3026_v56 }
0x189e   :  { %3263 = vrot.lane.b32.xlu1 %v15362_v26, %s14655_s1 }
0x189f   :  { %3033 = vrot.lane.b32.xlu0 %v15364_v29, %s14653_s28 }
0x18a3   :  { %3185 = vrot.lane.b32.xlu0 %v15364_v29, %s14655_s1 }
0x1912   :  { %v3025_v59 = vpop.xlane.xlu0 %3024 }
0x1913   :  { %13489 = vrcp.f32 %v3025_v59 }
0x1916   :  { %v3028_v60 = vpop.xlane.xlu1 %3027  ;;  %v3034_v61 = vpop.permute.xlu0 %3033 }
0x1917   :  { %13491 = vrcp.f32 %v3028_v60  ;;  %12675 = vmatpush3.msra.mxu1 %v3034_v61 }
0x1918   :  { %12684 = vmatprep.subr.mxu1 %v14650_v52 }
0x191a   :  { %v3186_v51 = vpop.permute.xlu0 %3185  ;;  %v3264_v4 = vpop.permute.xlu1 %3263 }
0x1920   :  { %v13490_v62 = vpop.eup %13489 }
0x1921   :  { %v3030_v0 = vmul.f32 %v13490_v62, %v13486_v49 }
0x1923   :  { %12677 = vmatmul.mubr.msk.f32.vlgmr.msra.gmra.mxu1 %vm1048_vm3, %v3030_v0 }
0x1924   :  { %v13492_v1 = vpop.eup %13491  ;;  %12685 = vmatpush3.xpose.msk.msra.mxu1 %vm1048_vm3, %v3188_v58  ;;  %12686 = vmatprep.mubr.msk.f32.mxu1 %vm14651_vm2, %v14650_v52 }
0x1925   :  { %v3032_v2 = vmul.f32 %v13492_v1, %v13488_v54  ;;  %12694 = vmatprep.subr.mxu1 %v14650_v52 }
0x1927   :  { %12682 = vmatmul.mubr.msk.f32.vlgmr.msra.gmra.mxu0 %vm1048_vm3, %v3032_v2  ;;  %12687 = vmatmul.mubr.msk.f32.vlgmr.msra.gmra.mxu1 %vm1048_vm3, %v3186_v51 }
0x1928   :  { %12690 = vmatpush3.xpose.msk.msra.mxu0 %vm1048_vm3, %v3266_v37  ;;  %12691 = vmatprep.mubr.msk.f32.mxu0 %vm14651_vm2, %v14650_v52 }
0x1929   :  { %12699 = vmatprep.subr.mxu0 %v14650_v52  ;;  %12696 = vmatprep.mubr.msk.f32.mxu1 %vm14651_vm2, %v14650_v52 }
0x192b   :  { %12692 = vmatmul.mubr.msk.f32.vlgmr.msra.gmra.mxu0 %vm1048_vm3, %v3264_v4 }
0x192c   :  { %12701 = vmatprep.mubr.msk.f32.mxu0 %vm14651_vm2, %v14650_v52 }
0x19e3   :  { %v15418_v50 = vpop.f32.mrf.mxu1 }
0x19e5   :  { %v12678_v5 = vpop.f32.mrf.mxu1 }
0x19e7   :  { %v15420_v6 = vpop.f32.mrf.mxu0  ;;  %v3259_v7 = vpop.f32.mrf.mxu1 }
0x19e8   :  { %v3260_v8 = vadd.f32 %v3259_v7, %v15159_v63 }
0x19e9   :  { %v12683_v9 = vpop.f32.mrf.mxu0  ;;  %v12688_v10 = vpop.f32.mrf.mxu1 }
0x19ea   :  { %v3341_v11 = vsel %vm1048_vm3, %v3260_v8, -inf }
0x19eb   :  { %3342 = vmax.xlane.f32.xlu0 %v3341_v11  ;;  %v3337_v13 = vpop.f32.mrf.mxu0 }
0x19ec   :  { %v3338_v55 = vadd.f32 %v3337_v13, %v15163_v3 }
0x19ed   :  { %v12693_v15 = vpop.f32.mrf.mxu0 }
0x19ee   :  { %v3344_v12 = vsel %vm1048_vm3, %v3338_v55, -inf }
0x19ef   :  { %3345 = vmax.xlane.f32.xlu1 %v3344_v12 }
0x1a00   :  { %3439 = vrot.lane.b32.xlu1 %v15362_v26, %s14656_s21 }
0x1a01   :  { %3363 = vrot.lane.b32.xlu0 %v15364_v29, %s14656_s21 }
0x1a04   :  { %3517 = vrot.lane.b32.xlu1 %v15364_v29, %s14657_s2 }
0x1a08   :  { %3595 = vrot.lane.b32.xlu1 %v15362_v26, %s14657_s2 }
0x1a0c   :  { %3593 = vrot.lane.b32.xlu1 %v15362_v26, %s14658_s30 }
0x1a74   :  { %v3343_v14 = vpop.xlane.xlu0 %3342 }
0x1a75   :  { %v3347_v16 = vsub.f32 %v3260_v8, %v3343_v14 }
0x1a77   :  { %v3349_v17 = vmul.f32 1.442695, %v3347_v16 }
0x1a78   :  { %v3364_v18 = vpop.permute.xlu0 %3363  ;;  %v3346_v19 = vpop.xlane.xlu1 %3345 }
0x1a79   :  { %13493 = vpow2.f32 %v3349_v17  ;;  %v3348_v20 = vsub.f32 %v3338_v55, %v3346_v19  ;;  %12695 = vmatpush3.msra.mxu1 %v3364_v18 }
0x1a7a   :  { %12704 = vmatprep.subr.mxu1 %v14650_v52 }
0x1a7b   :  { %v3351_v21 = vmul.f32 1.442695, %v3348_v20 }
0x1a7c   :  { %v3440_v57 = vpop.permute.xlu1 %3439 }
0x1a7d   :  { %13495 = vpow2.f32 %v3351_v21  ;;  %12700 = vmatpush3.msra.mxu0 %v3440_v57 }
0x1a7e   :  { %12709 = vmatprep.subr.mxu0 %v14650_v52 }
0x1a80   :  { %v3518_v36 = vpop.permute.xlu1 %3517 }
0x1a84   :  { %v3596_v41 = vpop.permute.xlu1 %3595 }
0x1a86   :  { %v13494_v24 = vpop.eup %13493 }
0x1a87   :  { %v3353_v27 = vsel %vm1048_vm3, %v13494_v24, 0.0 }
0x1a88   :  { %3354 = vadd.xlane.f32.xlu0 %v3353_v27  ;;  %v3594_v44 = vpop.permute.xlu1 %3593 }
0x1a8a   :  { %v13496_v31 = vpop.eup %13495 }
0x1a8b   :  { %v3356_v32 = vsel %vm1048_vm3, %v13496_v31, 0.0 }
0x1a8c   :  { %3357 = vadd.xlane.f32.xlu0 %v3356_v32 }
0x1aa2   :  { %3515 = vrot.lane.b32.xlu0 %v15364_v29, %s14658_s30 }
0x1b11   :  { %v3355_v33 = vpop.xlane.xlu0 %3354 }
0x1b12   :  { %13497 = vrcp.f32 %v3355_v33 }
0x1b15   :  { %v3358_v34 = vpop.xlane.xlu0 %3357 }
0x1b16   :  { %13499 = vrcp.f32 %v3358_v34 }
0x1b19   :  { %v3516_v43 = vpop.permute.xlu0 %3515 }
0x1b1f   :  { %v13498_v38 = vpop.eup %13497 }
0x1b20   :  { %v3360_v39 = vmul.f32 %v13498_v38, %v13494_v24 }
0x1b22   :  { %12697 = vmatmul.mubr.msk.f32.vlgmr.msra.gmra.mxu1 %vm1048_vm3, %v3360_v39 }
0x1b23   :  { %v13500_v40 = vpop.eup %13499  ;;  %12705 = vmatpush3.xpose.msk.msra.mxu1 %vm1048_vm3, %v3518_v36  ;;  %12706 = vmatprep.mubr.msk.f32.mxu1 %vm14651_vm2, %v14650_v52 }
0x1b24   :  { %v3362_v42 = vmul.f32 %v13500_v40, %v13496_v31  ;;  %12714 = vmatprep.subr.mxu1 %v14650_v52 }
0x1b26   :  { %12702 = vmatmul.mubr.msk.f32.vlgmr.msra.gmra.mxu0 %vm1048_vm3, %v3362_v42  ;;  %12707 = vmatmul.mubr.msk.f32.vlgmr.msra.gmra.mxu1 %vm1048_vm3, %v3516_v43 }
0x1b27   :  { %12710 = vmatpush3.xpose.msk.msra.mxu0 %vm1048_vm3, %v3596_v41  ;;  %12711 = vmatprep.mubr.msk.f32.mxu0 %vm14651_vm2, %v14650_v52 }
0x1b28   :  { %12719 = vmatprep.subr.mxu0 %v14650_v52  ;;  %12716 = vmatprep.mubr.msk.f32.mxu1 %vm14651_vm2, %v14650_v52 }
0x1b2a   :  { %12712 = vmatmul.mubr.msk.f32.vlgmr.msra.gmra.mxu0 %vm1048_vm3, %v3594_v44 }
0x1b2b   :  { %12721 = vmatprep.mubr.msk.f32.mxu0 %vm14651_vm2, %v14650_v52 }
0x1be2   :  { %v15458_v45 = vpop.f32.mrf.mxu1 }
0x1be4   :  { %v12698_v46 = vpop.f32.mrf.mxu1 }
0x1be6   :  { %v15460_v35 = vpop.f32.mrf.mxu0  ;;  %v3589_v47 = vpop.f32.mrf.mxu1 }
0x1be7   :  { %v3590_v48 = vadd.f32 %v3589_v47, %v15159_v63 }
0x1be8   :  { %v12703_v49 = vpop.f32.mrf.mxu0  ;;  %v12708_v53 = vpop.f32.mrf.mxu1 }
0x1be9   :  { %v3671_v54 = vsel %vm1048_vm3, %v3590_v48, -inf }
0x1bea   :  { %3672 = vmax.xlane.f32.xlu0 %v3671_v54  ;;  %v3667_v56 = vpop.f32.mrf.mxu0 }
0x1beb   :  { %v3668_v58 = vadd.f32 %v3667_v56, %v15163_v3 }
0x1bec   :  { %v12713_v37 = vpop.f32.mrf.mxu0 }
0x1bed   :  { %v3674_v59 = vsel %vm1048_vm3, %v3668_v58, -inf  ;;  %v4206_v37 = vld [vmem:[%s16630_s6 + $0x8] sm:$0xff] }
0x1bee   :  { %3675 = vmax.xlane.f32.xlu1 %v3674_v59  ;;  %v4205_v59 = vld [vmem:[%s16630_s6] sm:$0xff] }
0x1bff   :  { %3769 = vrot.lane.b32.xlu1 %v15362_v26, %s14659_s3 }
0x1c00   :  { %3693 = vrot.lane.b32.xlu0 %v15364_v29, %s14659_s3 }
0x1c03   :  { %3847 = vrot.lane.b32.xlu1 %v15364_v29, %s14660_s0 }
0x1c07   :  { %3925 = vrot.lane.b32.xlu1 %v15362_v26, %s14660_s0 }
0x1c0b   :  { %3923 = vrot.lane.b32.xlu1 %v15362_v26, %s14661_s19 }
0x1c73   :  { %v3673_v60 = vpop.xlane.xlu0 %3672 }
0x1c74   :  { %v3677_v61 = vsub.f32 %v3590_v48, %v3673_v60 }
0x1c76   :  { %v3679_v62 = vmul.f32 1.442695, %v3677_v61 }
0x1c77   :  { %v3694_v0 = vpop.permute.xlu0 %3693  ;;  %v3676_v1 = vpop.xlane.xlu1 %3675 }
0x1c78   :  { %13501 = vpow2.f32 %v3679_v62  ;;  %v3678_v2 = vsub.f32 %v3668_v58, %v3676_v1  ;;  %12715 = vmatpush3.msra.mxu1 %v3694_v0  ;;  %v4208_v58 = vld [vmem:[%s16630_s6 + $0x18] sm:$0xff] }
0x1c79   :  { %12724 = vmatprep.subr.mxu1 %v14650_v52 }
0x1c7a   :  { %v3681_v51 = vmul.f32 1.442695, %v3678_v2 }
0x1c7b   :  { %v3770_v4 = vpop.permute.xlu1 %3769 }
0x1c7c   :  { %13503 = vpow2.f32 %v3681_v51  ;;  %12720 = vmatpush3.msra.mxu0 %v3770_v4 }
0x1c7d   :  { %12729 = vmatprep.subr.mxu0 %v14650_v52 }
0x1c7f   :  { %v3848_v13 = vpop.permute.xlu1 %3847 }
0x1c83   :  { %v3926_v14 = vpop.permute.xlu1 %3925 }
0x1c85   :  { %v13502_v5 = vpop.eup %13501 }
0x1c86   :  { %v3683_v7 = vsel %vm1048_vm3, %v13502_v5, 0.0 }
0x1c87   :  { %3684 = vadd.xlane.f32.xlu0 %v3683_v7  ;;  %v3924_v18 = vpop.permute.xlu1 %3923 }
0x1c89   :  { %v13504_v8 = vpop.eup %13503 }
0x1c8a   :  { %v3686_v9 = vsel %vm1048_vm3, %v13504_v8, 0.0 }
0x1c8b   :  { %3687 = vadd.xlane.f32.xlu0 %v3686_v9 }
0x1ca1   :  { %3845 = vrot.lane.b32.xlu0 %v15364_v29, %s14661_s19 }
0x1d10   :  { %v3685_v10 = vpop.xlane.xlu0 %3684 }
0x1d11   :  { %13505 = vrcp.f32 %v3685_v10 }
0x1d14   :  { %v3688_v11 = vpop.xlane.xlu0 %3687 }
0x1d15   :  { %13507 = vrcp.f32 %v3688_v11 }
0x1d18   :  { %v3846_v17 = vpop.permute.xlu0 %3845 }
0x1d1e   :  { %v13506_v55 = vpop.eup %13505 }
0x1d1f   :  { %v3690_v15 = vmul.f32 %v13506_v55, %v13502_v5 }
0x1d21   :  { %12717 = vmatmul.mubr.msk.f32.vlgmr.msra.gmra.mxu1 %vm1048_vm3, %v3690_v15 }
0x1d22   :  { %v13508_v12 = vpop.eup %13507  ;;  %12725 = vmatpush3.xpose.msk.msra.mxu1 %vm1048_vm3, %v3848_v13  ;;  %12726 = vmatprep.mubr.msk.f32.mxu1 %vm14651_vm2, %v14650_v52 }
0x1d23   :  { %v3692_v16 = vmul.f32 %v13508_v12, %v13504_v8  ;;  %12734 = vmatprep.subr.mxu1 %v14650_v52 }
0x1d25   :  { %12722 = vmatmul.mubr.msk.f32.vlgmr.msra.gmra.mxu0 %vm1048_vm3, %v3692_v16  ;;  %12727 = vmatmul.mubr.msk.f32.vlgmr.msra.gmra.mxu1 %vm1048_vm3, %v3846_v17 }
0x1d26   :  { %12730 = vmatpush3.xpose.msk.msra.mxu0 %vm1048_vm3, %v3926_v14  ;;  %12731 = vmatprep.mubr.msk.f32.mxu0 %vm14651_vm2, %v14650_v52 }
0x1d27   :  { %12739 = vmatprep.subr.mxu0 %v14650_v52  ;;  %12736 = vmatprep.mubr.msk.f32.mxu1 %vm14651_vm2, %v14650_v52 }
0x1d29   :  { %12732 = vmatmul.mubr.msk.f32.vlgmr.msra.gmra.mxu0 %vm1048_vm3, %v3924_v18 }
0x1d2a   :  { %12741 = vmatprep.mubr.msk.f32.mxu0 %vm14651_vm2, %v14650_v52 }
0x1de1   :  { %v3765_v19 = vpop.f32.mrf.mxu1 }
0x1de3   :  { %v12718_v20 = vpop.f32.mrf.mxu1 }
0x1de4   :  { %v14666_v20 = vmov 0  }
0x1de5   :  { %v3841_v21 = vpop.f32.mrf.mxu0  ;;  %v3919_v57 = vpop.f32.mrf.mxu1  ;;  %13431 = vset.pattern.permute.xlu0 %v14666_v20  ;;  %13432 = vset.pattern.permute.xlu1 %v14666_v20 }
0x1de6   :  { %v3920_v24 = vadd.f32 %v3919_v57, %v15159_v63 }
0x1de7   :  { %v12723_v27 = vpop.f32.mrf.mxu0  ;;  %v12728_v31 = vpop.f32.mrf.mxu1 }
0x1de8   :  { %v4001_v32 = vsel %vm1048_vm3, %v3920_v24, -inf }
0x1de9   :  { %4002 = vmax.xlane.f32.xlu0 %v4001_v32  ;;  %v3997_v33 = vpop.f32.mrf.mxu0 }
0x1dea   :  { %v3998_v34 = vadd.f32 %v3997_v33, %v15163_v3 }
0x1deb   :  { %v12733_v36 = vpop.f32.mrf.mxu0 }
0x1dec   :  { %v4004_v38 = vsel %vm1048_vm3, %v3998_v34, -inf }
0x1ded   :  { %4005 = vmax.xlane.f32.xlu1 %v4004_v38  ;;  %v4341_v38 = vld [vmem:[%s16632_s5 + $0x18] sm:$0xff] }
0x1dfe   :  { %4099 = vrot.lane.b32.xlu1 %v15362_v26, %s14662_s24 }
0x1e02   :  { %4177 = vrot.lane.b32.xlu1 %v15458_v45, %s14663_s7 }
0x1e06   :  { %4179 = vrot.lane.b32.xlu1 %v15460_v35, %s14663_s7 }
0x1e0a   :  { %4187 = vrot.lane.b32.xlu1 %v3841_v21, %s14664_s9  ;;  %v4574_v21 = vld [vmem:[%s16631_s25 + $0x8] sm:$0xff] }
0x1e72   :  { %v4003_v63 = vpop.xlane.xlu0 %4002 }
0x1e73   :  { %v4007_v39 = vsub.f32 %v3920_v24, %v4003_v63  ;;  %v4340_v63 = vld [vmem:[%s16632_s5 + $0x10] sm:$0xff] }
0x1e75   :  { %v4009_v40 = vmul.f32 1.442695, %v4007_v39  ;;  %v4339_v39 = vld [vmem:[%s16632_s5 + $0x8] sm:$0xff] }
0x1e76   :  { %v4006_v41 = vpop.xlane.xlu1 %4005 }
0x1e77   :  { %13509 = vpow2.f32 %v4009_v40  ;;  %v4008_v3 = vsub.f32 %v3998_v34, %v4006_v41  ;;  %v4573_v40 = vld [vmem:[%s16631_s25] sm:$0xff]  ;;  %s16644_s25 = sld [smem:[#allocation94_spill]] }
0x1e78   :  { %v4338_v41 = vld [vmem:[%s16632_s5] sm:$0xff]  ;;  %s16645_s5 = sld [smem:[#allocation95_spill]] }
0x1e79   :  { %v4011_v42 = vmul.f32 1.442695, %v4008_v3  ;;  %v4593_v3 = vld [vmem:[%s16633_s18 + $0x20] sm:$0xff] }
0x1e7a   :  { %v4100_v43 = vpop.permute.xlu1 %4099 }
0x1e7b   :  { %13511 = vpow2.f32 %v4011_v42  ;;  %12740 = vmatpush3.msra.mxu0 %v4100_v43  ;;  %v4443_v42 = vld [vmem:[%s16634_s4 + $0x38] sm:$0xff]  ;;  %v4442_v43 = vld [vmem:[%s16634_s4 + $0x30] sm:$0xff] }
0x1e7c   :  { %12755 = vmatprep.subr.mxu0 %v4341_v38 }
0x1e7e   :  { %v4178_v1 = vpop.permute.xlu1 %4177 }
0x1e7f   :  { %v4199_v4 = vsel %vm1048_vm3, %v15418_v50, %v4178_v1  ;;  %v11991_v50 = vld [vmem:[#allocation53] ss:$0 sm:$0xff] }
0x1e82   :  { %v4180_v2 = vpop.permute.xlu1 %4179 }
0x1e83   :  { %v4200_v10 = vsel %vm1048_vm3, %v15420_v6, %v4180_v2 }
0x1e84   :  { %v13510_v44 = vpop.eup %13509 }
0x1e85   :  { %v4013_v26 = vsel %vm1048_vm3, %v13510_v44, 0.0 }
0x1e86   :  { %4014 = vadd.xlane.f32.xlu0 %v4013_v26  ;;  %v4188_v5 = vpop.permute.xlu1 %4187  ;;  %v4440_v26 = vld [vmem:[%s16634_s4 + $0x20] sm:$0xff] }
0x1e87   :  { %v4202_v11 = vsel %vm2390_vm5, %v4200_v10, %v4188_v5  ;;  %v4439_v10 = vld [vmem:[%s16634_s4 + $0x18] sm:$0xff] }
0x1e88   :  { %v13512_v45 = vpop.eup %13511 }
0x1e89   :  { %v4016_v46 = vsel %vm1048_vm3, %v13512_v45, 0.0 }
0x1e8a   :  { %4017 = vadd.xlane.f32.xlu0 %v4016_v46 }
0x1ea0   :  { %4023 = vrot.lane.b32.xlu0 %v15364_v29, %s14662_s24  ;;  %v4207_v29 = vld [vmem:[%s16630_s6 + $0x10] sm:$0xff]  ;;  %s16643_s6 = sld [smem:[#allocation103_spill]] }
0x1ea4   :  { %4185 = vrot.lane.b32.xlu0 %v3765_v19, %s14664_s9 }
0x1f0f   :  { %v4015_v35 = vpop.xlane.xlu0 %4014 }
0x1f10   :  { %13513 = vrcp.f32 %v4015_v35 }
0x1f13   :  { %v4018_v47 = vpop.xlane.xlu0 %4017 }
0x1f14   :  { %13515 = vrcp.f32 %v4018_v47 }
0x1f17   :  { %v4024_v48 = vpop.permute.xlu0 %4023 }
0x1f18   :  { %12735 = vmatpush3.msra.mxu1 %v4024_v48 }
0x1f19   :  { %12744 = vmatprep.subr.mxu1 %v4208_v58 }
0x1f1b   :  { %v4186_v51 = vpop.permute.xlu0 %4185 }
0x1f1c   :  { %v4201_v7 = vsel %vm2390_vm5, %v4199_v4, %v4186_v51  ;;  %v4592_v4 = vld [vmem:[%s16633_s18 + $0x18] sm:$0xff] }
0x1f1d   :  { %v13514_v49 = vpop.eup %13513 }
0x1f1e   :  { %v4020_v53 = vmul.f32 %v13514_v49, %v13510_v44  ;;  %v4441_v44 = vld [vmem:[%s16634_s4 + $0x28] sm:$0xff] }
0x1f20   :  { %12737 = vmatmul.mubr.msk.f32.vlgmr.msra.gmra.mxu1 %vm1048_vm3, %v4020_v53  ;;  %v4299_v53 = vld [vmem:[%s16635_s22] sm:$0x3] }
0x1f21   :  { %v13516_v54 = vpop.eup %13515  ;;  %12745 = vmatpush3.msra.mxu1 %v4208_v58 }
0x1f22   :  { %v4022_v56 = vmul.f32 %v13516_v54, %v13512_v45  ;;  %12746 = vmatprep.subr.mxu1 %v4207_v29  ;;  %v4329_v54 = vrot.slane %v4299_v53, %v15097_v28 }
0x1f23   :  { %12747 = vmatpush3.msra.mxu1 %v4207_v29  ;;  %v4335_v29 = vrot.slane %v4299_v53, %v15099_v30 }
0x1f24   :  { %12742 = vmatmul.mubr.msk.f32.vlgmr.msra.gmra.mxu0 %vm1048_vm3, %v4022_v56  ;;  %12748 = vmatprep.subr.mxu1 %v4206_v37 }
0x1f25   :  { %12749 = vmatpush3.msra.mxu1 %v4206_v37  ;;  %12756 = vmatpush3.msra.mxu0 %v4341_v38  ;;  %v4576_v37 = vand.u32 127, %v750_v25  ;;  %v4591_v25 = vld [vmem:[%s16633_s18 + $0x10] sm:$0xff]  ;;  %v12004_v38 = vld [vmem:[#allocation13] ss:$0 sm:$0xff] }
0x1f26   :  { %12750 = vmatprep.subr.mxu1 %v4205_v59  ;;  %12757 = vmatprep.subr.mxu0 %v4340_v63 }
0x1f27   :  { %12751 = vmatpush3.msra.mxu1 %v4205_v59  ;;  %12758 = vmatpush3.msra.mxu0 %v4340_v63 }
0x1f28   :  { %12759 = vmatprep.subr.mxu0 %v4339_v39  ;;  %12766 = vmatprep.subr.mxu1 %v4443_v42 }
0x1f29   :  { %12760 = vmatpush3.msra.mxu0 %v4339_v39 }
0x1f2a   :  { %12761 = vmatprep.subr.mxu0 %v4338_v41 }
0x1f2b   :  { %12762 = vmatpush3.msra.mxu0 %v4338_v41 }
0x1f2c   :  { %12785 = vmatprep.subr.mxu0 %v4593_v3 }
0x1fe0   :  { %v4095_v60 = vpop.f32.mrf.mxu1 }
0x1fe1   :  { %4193 = vrot.lane.b32.xlu0 %v4095_v60, %s14665_s17 }
0x1fe2   :  { %v12738_v61 = vpop.f32.mrf.mxu1 }
0x1fe4   :  { %v4171_v62 = vpop.f32.mrf.mxu0 }
0x1fe5   :  { %4195 = vrot.lane.b32.xlu1 %v4171_v62, %s14665_s17 }
0x1fe6   :  { %v12743_v0 = vpop.f32.mrf.mxu0 }
0x2053   :  { %v4194_v8 = vpop.permute.xlu0 %4193 }
0x2054   :  { %v4203_v9 = vsel %vm2393_vm4, %v4201_v7, %v4194_v8  ;;  %v4590_v7 = vld [vmem:[%s16633_s18 + $0x8] sm:$0xff]  ;;  %v4589_v8 = vld [vmem:[%s16633_s18] sm:$0xff]  ;;  %s16646_s18 = sld [smem:[#allocation112_spill]] }
0x2055   :  { %12752 = vmatprep.mubr.msk.f32.mxu1 %vm859_vm1, %v4203_v9 }
0x2057   :  { %v4196_v13 = vpop.permute.xlu1 %4195 }
0x2058   :  { %v4204_v55 = vsel %vm2393_vm4, %v4202_v11, %v4196_v13  ;;  %v4438_v11 = vld [vmem:[%s16634_s4 + $0x10] sm:$0xff]  ;;  %v4437_v13 = vld [vmem:[%s16634_s4 + $0x8] sm:$0xff] }
0x2059   :  { %12753 = vmatmul.mubr.msk.f32.vlgmr.msra.gmra.mxu1 %vm859_vm1, %v4204_v55  ;;  %v4436_v55 = vld [vmem:[%s16634_s4] sm:$0xff] }
0x205a   :  { %12767 = vmatpush3.msra.mxu1 %v4443_v42 }
0x205b   :  { %12768 = vmatprep.subr.mxu1 %v4442_v43 }
0x205c   :  { %12769 = vmatpush3.msra.mxu1 %v4442_v43  ;;  %v713_v43 = vld [vmem:[%s16638_s27] sm:$0xff] }
0x205d   :  { %12770 = vmatprep.subr.mxu1 %v4441_v44 }
0x205e   :  { %12771 = vmatpush3.msra.mxu1 %v4441_v44  ;;  %v15617_v44 = vmul.f32 -1e+09, %v713_v43 }
0x205f   :  { %12772 = vmatprep.subr.mxu1 %v4440_v26 }
0x2060   :  { %12773 = vmatpush3.msra.mxu1 %v4440_v26 }
0x2061   :  { %12774 = vmatprep.subr.mxu1 %v4439_v10 }
0x2062   :  { %12775 = vmatpush3.msra.mxu1 %v4439_v10 }
0x2063   :  { %12776 = vmatprep.subr.mxu1 %v4438_v11 }
0x2064   :  { %12777 = vmatpush3.msra.mxu1 %v4438_v11 }
0x2065   :  { %12778 = vmatprep.subr.mxu1 %v4437_v13 }
0x2066   :  { %12779 = vmatpush3.msra.mxu1 %v4437_v13 }
0x2067   :  { %12780 = vmatprep.subr.mxu1 %v4436_v55 }
0x2068   :  { %12781 = vmatpush3.msra.mxu1 %v4436_v55 }
0x2069   :  { %12809 = vmatprep.subr.mxu1 %v14650_v52 }
0x2119   :  { %v12754_v15 = vpop.f32.mrf.mxu1 }
0x211a   :  { %v4294_v12 = vadd.f32 %v12754_v15, %v11991_v50  ;;  %v4683_v15 = vld [vmem:[%s16636_s23 + $0x10] sm:$0xff] }
0x211b   :  { %v4288_v14 = vpop.f32.mrf.mxu1 }
0x211c   :  { %v4298_v16 = vadd.f32 %v4294_v12, %v15354_v23  ;;  %v4289_v17 = vadd.f32 %v11991_v50, %v4288_v14  ;;  %v4684_v50 = vld [vmem:[%s16636_s23 + $0x18] sm:$0xff]  ;;  %v4682_v12 = vld [vmem:[%s16636_s23 + $0x8] sm:$0xff]  ;;  %v4681_v14 = vld [vmem:[%s16636_s23] sm:$0xff] }
0x211e   :  { %v4297_v18 = vadd.f32 %v4289_v17, %v15352_v22  ;;  %v4303_v19 = vsel %vm859_vm1, %v4298_v16, 0.0 }
0x211f   :  { %4304 = vadd.xlane.f32.xlu1 %v4303_v19 }
0x2120   :  { %v4300_v6 = vsel %vm859_vm1, %v4297_v18, 0.0 }
0x2121   :  { %4301 = vadd.xlane.f32.xlu0 %v4300_v6 }
0x2130   :  { %4581 = vperm.xlu1 %13432, %v4574_v21  }
0x21a8   :  { %v4305_v57 = vpop.xlane.xlu1 %4304 }
0x21a9   :  { %v4307_v24 = vmul.f32 0.03125, %v4305_v57 }
0x21aa   :  { %v4302_v23 = vpop.xlane.xlu0 %4301 }
0x21ab   :  { %v4306_v27 = vmul.f32 0.03125, %v4302_v23  ;;  %v4309_v22 = vsub.f32 %v4298_v16, %v4307_v24  ;;  %v11994_v16 = vld [vmem:[#allocation49] ss:$0 sm:$0xff] }
0x21ac   :  { %v4582_v5 = vpop.permute.xlu1 %4581 }
0x21ad   :  { %v4308_v31 = vsub.f32 %v4297_v18, %v4306_v27  ;;  %v4311_v34 = vmul.f32 %v4309_v22, %v4309_v22  ;;  %vm4584_vm11 = vcmp.eq.s32.totalorder %v4576_v37, %v4582_v5 }
0x21ae   :  { %v12001_v9 = vsel %vm4584_vm11, 1.0, %v14650_v52 }
0x21af   :  { %v4310_v32 = vmul.f32 %v4308_v31, %v4308_v31  ;;  %v4315_v36 = vsel %vm859_vm1, %v4311_v34, 0.0 }
0x21b1   :  { %v4312_v33 = vsel %vm859_vm1, %v4310_v32, 0.0 }
0x21b2   :  { %4313 = vadd.xlane.f32.xlu0 %v4312_v33 }
0x21b6   :  { %4316 = vadd.xlane.f32.xlu0 %v4315_v36 }
0x21cc   :  { %4578 = vperm.xlu0 %13431, %v4573_v40  }
0x223b   :  { %v4314_v45 = vpop.xlane.xlu0 %4313 }
0x223c   :  { %v4318_v46 = vmul.f32 0.03125, %v4314_v45 }
0x223e   :  { %v4320_v35 = vadd.f32 1e-05, %v4318_v46 }
0x223f   :  { %v4317_v47 = vpop.xlane.xlu0 %4316 }
0x2240   :  { %13517 = vrsqrt.f32 %v4320_v35  ;;  %v4319_v48 = vmul.f32 0.03125, %v4317_v47 }
0x2242   :  { %v4321_v49 = vadd.f32 1e-05, %v4319_v48 }
0x2244   :  { %13519 = vrsqrt.f32 %v4321_v49 }
0x2247   :  { %v4579_v60 = vpop.permute.xlu0 %4578 }
0x2248   :  { %vm4583_vm9 = vcmp.eq.s32.totalorder %v4576_v37, %v4579_v60 }
0x2249   :  { %v12000_v51 = vsel %vm4583_vm9, 1.0, %v14650_v52 }
0x224d   :  { %v13518_v56 = vpop.eup %13517 }
0x224e   :  { %v4324_v58 = vmul.f32 %v13518_v56, %v4308_v31  ;;  %v4678_v31 = vld [vmem:[%s16637_s26] sm:$0xff] }
0x2250   :  { %v4330_v59 = vmul.f32 %v4329_v54, %v4324_v58 }
0x2251   :  { %v13520_v61 = vpop.eup %13519 }
0x2252   :  { %v4325_v62 = vmul.f32 %v13520_v61, %v4309_v22  ;;  %v15553_v0 = vadd.f32 %v4335_v29, %v4330_v59 }
0x2254   :  { %v4331_v1 = vmul.f32 %v4329_v54, %v4325_v62  ;;  %12763 = vmatprep.mubr.msk.f32.mxu0 %vm859_vm1, %v15553_v0 }
0x2256   :  { %v15557_v2 = vadd.f32 %v4335_v29, %v4331_v1 }
0x2258   :  { %12764 = vmatmul.mubr.msk.f32.vlgmr.msra.gmra.mxu0 %vm859_vm1, %v15557_v2 }
0x2259   :  { %12786 = vmatpush3.msra.mxu0 %v4593_v3  ;;  %12795 = vmatprep.mubr.msk.f32.mxu0 %vm4594_vm10, %v12000_v51 }
0x225a   :  { %12787 = vmatprep.subr.mxu0 %v4592_v4 }
0x225b   :  { %12788 = vmatpush3.msra.mxu0 %v4592_v4 }
0x225c   :  { %12789 = vmatprep.subr.mxu0 %v4591_v25 }
0x225d   :  { %12790 = vmatpush3.msra.mxu0 %v4591_v25 }
0x225e   :  { %12791 = vmatprep.subr.mxu0 %v4590_v7 }
0x225f   :  { %12792 = vmatpush3.msra.mxu0 %v4590_v7 }
0x2260   :  { %12793 = vmatprep.subr.mxu0 %v4589_v8 }
0x2261   :  { %12794 = vmatpush3.msra.mxu0 %v4589_v8 }
0x2262   :  { %12796 = vmatmul.mubr.msk.f32.vlgmr.msra.gmra.mxu0 %vm4594_vm10, %v12001_v9  ;;  %12798 = vmatprep.subr.mxu0 %v4684_v50 }
0x2263   :  { %12799 = vmatpush3.msra.mxu0 %v4684_v50 }
0x2264   :  { %12800 = vmatprep.subr.mxu0 %v4683_v15 }
0x2265   :  { %12801 = vmatpush3.msra.mxu0 %v4683_v15 }
0x2266   :  { %12802 = vmatprep.subr.mxu0 %v4682_v12 }
0x2267   :  { %12803 = vmatpush3.msra.mxu0 %v4682_v12 }
0x2268   :  { %12804 = vmatprep.subr.mxu0 %v4681_v14 }
0x2269   :  { %12805 = vmatpush3.msra.mxu0 %v4681_v14 }
0x226a   :  { %12819 = vmatprep.subr.mxu0 %v14650_v52 }
0x2318   :  { %v12765_v17 = vpop.f32.mrf.mxu0 }
0x2319   :  { %v4427_v18 = vadd.f32 %v12765_v17, %v11994_v16 }
0x231a   :  { %v4421_v19 = vpop.f32.mrf.mxu0 }
0x231b   :  { %v4422_v6 = vadd.f32 %v11994_v16, %v4421_v19  ;;  %v4433_v20 = vmul.f32 0.2, %v4427_v18  ;;  %vm4431_vm12 = vcmp.gt.f32.partialorder %v4427_v18, 0.0 }
0x231d   :  { %vm4430_vm13 = vcmp.gt.f32.partialorder %v4422_v6, 0.0  ;;  %v4432_v21 = vmul.f32 0.2, %v4422_v6  ;;  %v4435_v24 = vsel %vm4431_vm12, %v4427_v18, %v4433_v20 }
0x231f   :  { %v4434_v57 = vsel %vm4430_vm13, %v4422_v6, %v4432_v21 }
0x2320   :  { %12782 = vmatprep.mubr.msk.f32.mxu1 %vm2642_vm8, %v4434_v57 }
0x2321   :  { %12783 = vmatmul.mubr.msk.f32.vlgmr.msra.gmra.mxu1 %vm2642_vm8, %v4435_v24 }
0x2322   :  { %v12797_v23 = vpop.f32.mrf.mxu0  ;;  %12811 = vmatprep.mubr.msk.f32.mxu1 %vm14651_vm2, %v14650_v52 }
0x2323   :  { %v4677_v27 = vmul.f32 5.656854, %v12797_v23 }
0x2324   :  { %v4667_v22 = vpop.f32.mrf.mxu0 }
0x2325   :  { %v4676_v32 = vmul.f32 5.656854, %v4667_v22  ;;  %v15586_v34 = vadd.f32 %v4678_v31, %v4677_v27 }
0x2327   :  { %v15584_v33 = vadd.f32 %v4678_v31, %v4676_v32 }
0x2329   :  { %12806 = vmatprep.mubr.msk.f32.mxu0 %vm859_vm1, %v15584_v33 }
0x232a   :  { %12807 = vmatmul.mubr.msk.f32.vlgmr.msra.gmra.mxu0 %vm859_vm1, %v15586_v34 }
0x232b   :  { %12821 = vmatprep.mubr.msk.f32.mxu0 %vm14651_vm2, %v14650_v52 }
0x23e1   :  { %v15614_v42 = vpop.f32.mrf.mxu1 }
0x23e3   :  { %v15619_v26 = vpop.f32.mrf.mxu1 }
0x23ea   :  { %v12808_v36 = vpop.f32.mrf.mxu0 }
0x23eb   :  { %v15598_v40 = vadd.f32 %v12808_v36, %v12004_v38 }
0x23ec   :  { %v4764_v63 = vpop.f32.mrf.mxu0 }
0x23ed   :  { %v15594_v39 = vadd.f32 %v12004_v38, %v4764_v63 }
0x23ef   :  { %4774 = vrot.lane.b32.xlu1 %v15594_v39, %s14652_s14 }
0x23f3   :  { %4851 = vrot.lane.b32.xlu1 %v15598_v40, %s14652_s14 }
0x2461   :  { %v4775_v41 = vpop.permute.xlu1 %4774 }
0x2462   :  { %12810 = vmatpush3.xpose.msk.msra.mxu1 %vm1048_vm3, %v4775_v41 }
0x2463   :  { %12814 = vmatprep.subr.mxu1 %v14650_v52 }
0x2465   :  { %v4852_v3 = vpop.permute.xlu1 %4851  ;;  %12812 = vmatmul.mubr.msk.f32.vlgmr.msra.gmra.mxu1 %vm1048_vm3, %v15594_v39 }
0x2466   :  { %12815 = vmatpush3.xpose.msk.msra.mxu1 %vm1048_vm3, %v4852_v3  ;;  %12816 = vmatprep.mubr.msk.f32.mxu1 %vm14651_vm2, %v14650_v52 }
0x2467   :  { %12824 = vmatprep.subr.mxu1 %v14650_v52 }
0x2469   :  { %12817 = vmatmul.mubr.msk.f32.vlgmr.msra.gmra.mxu1 %vm1048_vm3, %v15598_v40 }
0x246a   :  { %12826 = vmatprep.mubr.msk.f32.mxu1 %vm14651_vm2, %v14650_v52 }
0x2525   :  { %v4846_v45 = vpop.f32.mrf.mxu1 }
0x2526   :  { %v4847_v46 = vadd.f32 %v4846_v45, %v15617_v44 }
0x2527   :  { %v12813_v35 = vpop.f32.mrf.mxu1 }
0x2528   :  { %v4927_v47 = vsel %vm1048_vm3, %v4847_v46, -inf }
0x2529   :  { %4928 = vmax.xlane.f32.xlu1 %v4927_v47  ;;  %v4923_v48 = vpop.f32.mrf.mxu1 }
0x252a   :  { %v4924_v49 = vadd.f32 %v4923_v48, %v15617_v44 }
0x252b   :  { %v12818_v53 = vpop.f32.mrf.mxu1 }
0x252c   :  { %v4930_v54 = vsel %vm1048_vm3, %v4924_v49, -inf }
0x252d   :  { %4931 = vmax.xlane.f32.xlu0 %v4930_v54 }
0x253a   :  { %4949 = vrot.lane.b32.xlu1 %v15594_v39, %s14653_s28 }
0x253e   :  { %5103 = vrot.lane.b32.xlu1 %v15594_v39, %s14654_s8 }
0x2542   :  { %5181 = vrot.lane.b32.xlu1 %v15598_v40, %s14654_s8 }
0x2543   :  { %5025 = vrot.lane.b32.xlu0 %v15598_v40, %s14653_s28 }
0x2547   :  { %5179 = vrot.lane.b32.xlu0 %v15598_v40, %s14655_s1 }
0x25b2   :  { %v4929_v56 = vpop.xlane.xlu1 %4928 }
0x25b3   :  { %v4933_v58 = vsub.f32 %v4847_v46, %v4929_v56 }
0x25b5   :  { %v4935_v29 = vmul.f32 1.442695, %v4933_v58 }
0x25b6   :  { %v4950_v37 = vpop.permute.xlu1 %4949  ;;  %v4932_v59 = vpop.xlane.xlu0 %4931 }
0x25b7   :  { %13521 = vpow2.f32 %v4935_v29  ;;  %v4934_v60 = vsub.f32 %v4924_v49, %v4932_v59  ;;  %12820 = vmatpush3.msra.mxu0 %v4950_v37 }
0x25b8   :  { %12829 = vmatprep.subr.mxu0 %v14650_v52 }
0x25b9   :  { %v4937_v61 = vmul.f32 1.442695, %v4934_v60 }
0x25ba   :  { %v5026_v62 = vpop.permute.xlu0 %5025  ;;  %v5104_v5 = vpop.permute.xlu1 %5103 }
0x25bb   :  { %13523 = vpow2.f32 %v4937_v61  ;;  %12825 = vmatpush3.msra.mxu1 %v5026_v62 }
0x25bc   :  { %12834 = vmatprep.subr.mxu1 %v14650_v52 }
0x25be   :  { %v5182_v7 = vpop.permute.xlu1 %5181  ;;  %v5180_v15 = vpop.permute.xlu0 %5179 }
0x25c4   :  { %v13522_v1 = vpop.eup %13521 }
0x25c5   :  { %v4939_v51 = vsel %vm1048_vm3, %v13522_v1, 0.0 }
0x25c6   :  { %4940 = vadd.xlane.f32.xlu1 %v4939_v51 }
0x25c8   :  { %v13524_v4 = vpop.eup %13523 }
0x25c9   :  { %v4942_v25 = vsel %vm1048_vm3, %v13524_v4, 0.0 }
0x25ca   :  { %4943 = vadd.xlane.f32.xlu1 %v4942_v25 }
0x25db   :  { %5101 = vrot.lane.b32.xlu1 %v15594_v39, %s14655_s1 }
0x264f   :  { %v4941_v8 = vpop.xlane.xlu1 %4940 }
0x2650   :  { %13525 = vrcp.f32 %v4941_v8 }
0x2653   :  { %v4944_v9 = vpop.xlane.xlu1 %4943 }
0x2654   :  { %13527 = vrcp.f32 %v4944_v9 }
0x2657   :  { %v5102_v50 = vpop.permute.xlu1 %5101 }
0x265d   :  { %v13526_v10 = vpop.eup %13525 }
0x265e   :  { %v4946_v11 = vmul.f32 %v13526_v10, %v13522_v1 }
0x2660   :  { %12822 = vmatmul.mubr.msk.f32.vlgmr.msra.gmra.mxu0 %vm1048_vm3, %v4946_v11  ;;  %8164 = vst.msk [vmem:[#allocation59] sm:$0xff] %vm1048_vm3, %v4946_v11 }
0x2661   :  { %v13528_v13 = vpop.eup %13527  ;;  %12830 = vmatpush3.xpose.msk.msra.mxu0 %vm1048_vm3, %v5104_v5  ;;  %12831 = vmatprep.mubr.msk.f32.mxu0 %vm14651_vm2, %v14650_v52 }
0x2662   :  { %v4948_v55 = vmul.f32 %v13528_v13, %v13524_v4  ;;  %12839 = vmatprep.subr.mxu0 %v14650_v52 }
0x2664   :  { %12827 = vmatmul.mubr.msk.f32.vlgmr.msra.gmra.mxu1 %vm1048_vm3, %v4948_v55  ;;  %8168 = vst.msk [vmem:[#allocation59 + $0x20] sm:$0xff] %vm1048_vm3, %v4948_v55  ;;  %12832 = vmatmul.mubr.msk.f32.vlgmr.msra.gmra.mxu0 %vm1048_vm3, %v5102_v50 }
0x2665   :  { %12835 = vmatpush3.xpose.msk.msra.mxu1 %vm1048_vm3, %v5182_v7  ;;  %12836 = vmatprep.mubr.msk.f32.mxu1 %vm14651_vm2, %v14650_v52 }
0x2666   :  { %12844 = vmatprep.subr.mxu1 %v14650_v52  ;;  %12841 = vmatprep.mubr.msk.f32.mxu0 %vm14651_vm2, %v14650_v52 }
0x2668   :  { %12837 = vmatmul.mubr.msk.f32.vlgmr.msra.gmra.mxu1 %vm1048_vm3, %v5180_v15 }
0x2669   :  { %12846 = vmatprep.mubr.msk.f32.mxu1 %vm14651_vm2, %v14650_v52 }
0x2720   :  { %v15659_v12 = vpop.f32.mrf.mxu0 }
0x2722   :  { %v12823_v14 = vpop.f32.mrf.mxu0 }
0x2724   :  { %v15661_v16 = vpop.f32.mrf.mxu1  ;;  %v5175_v17 = vpop.f32.mrf.mxu0 }
0x2725   :  { %v5176_v18 = vadd.f32 %v5175_v17, %v15617_v44 }
0x2726   :  { %v12828_v19 = vpop.f32.mrf.mxu1  ;;  %v12833_v6 = vpop.f32.mrf.mxu0 }
0x2727   :  { %v5257_v20 = vsel %vm1048_vm3, %v5176_v18, -inf }
0x2728   :  { %5258 = vmax.xlane.f32.xlu1 %v5257_v20  ;;  %v5253_v21 = vpop.f32.mrf.mxu1 }
0x2729   :  { %v5254_v57 = vadd.f32 %v5253_v21, %v15617_v44 }
0x272a   :  { %v12838_v24 = vpop.f32.mrf.mxu1 }
0x272b   :  { %v5260_v23 = vsel %vm1048_vm3, %v5254_v57, -inf }
0x272c   :  { %5261 = vmax.xlane.f32.xlu0 %v5260_v23 }
0x2739   :  { %5355 = vrot.lane.b32.xlu1 %v15598_v40, %s14656_s21 }
0x273d   :  { %5433 = vrot.lane.b32.xlu1 %v15594_v39, %s14657_s2 }
0x2742   :  { %5279 = vrot.lane.b32.xlu0 %v15594_v39, %s14656_s21 }
0x27b1   :  { %v5259_v27 = vpop.xlane.xlu1 %5258 }
0x27b2   :  { %v5263_v22 = vsub.f32 %v5176_v18, %v5259_v27 }
0x27b4   :  { %v5265_v31 = vmul.f32 1.442695, %v5263_v22 }
0x27b5   :  { %v5356_v32 = vpop.permute.xlu1 %5355  ;;  %v5262_v36 = vpop.xlane.xlu0 %5261 }
0x27b6   :  { %13529 = vpow2.f32 %v5265_v31  ;;  %v5264_v38 = vsub.f32 %v5254_v57, %v5262_v36  ;;  %12845 = vmatpush3.msra.mxu1 %v5356_v32 }
0x27b7   :  { %12854 = vmatprep.subr.mxu1 %v14650_v52 }
0x27b8   :  { %v5267_v63 = vmul.f32 1.442695, %v5264_v38 }
0x27b9   :  { %v5280_v41 = vpop.permute.xlu0 %5279  ;;  %v5434_v35 = vpop.permute.xlu1 %5433 }
0x27ba   :  { %13531 = vpow2.f32 %v5267_v63  ;;  %12840 = vmatpush3.msra.mxu0 %v5280_v41 }
0x27bb   :  { %12849 = vmatprep.subr.mxu0 %v14650_v52 }
0x27c3   :  { %v13530_v3 = vpop.eup %13529 }
0x27c4   :  { %v5269_v43 = vsel %vm1048_vm3, %v13530_v3, 0.0 }
0x27c5   :  { %5270 = vadd.xlane.f32.xlu0 %v5269_v43 }
0x27c7   :  { %v13532_v45 = vpop.eup %13531 }
0x27c8   :  { %v5272_v46 = vsel %vm1048_vm3, %v13532_v45, 0.0 }
0x27c9   :  { %5273 = vadd.xlane.f32.xlu1 %v5272_v46 }
0x27da   :  { %5431 = vrot.lane.b32.xlu1 %v15594_v39, %s14658_s30 }
0x27db   :  { %5511 = vrot.lane.b32.xlu0 %v15598_v40, %s14657_s2 }
0x27df   :  { %5509 = vrot.lane.b32.xlu0 %v15598_v40, %s14658_s30 }
0x284e   :  { %v5271_v47 = vpop.xlane.xlu0 %5270 }
0x284f   :  { %13533 = vrcp.f32 %v5271_v47 }
0x2852   :  { %v5274_v48 = vpop.xlane.xlu1 %5273  ;;  %v5512_v56 = vpop.permute.xlu0 %5511 }
0x2853   :  { %13535 = vrcp.f32 %v5274_v48 }
0x2856   :  { %v5432_v29 = vpop.permute.xlu1 %5431  ;;  %v5510_v37 = vpop.permute.xlu0 %5509 }
0x285c   :  { %v13534_v49 = vpop.eup %13533 }
0x285d   :  { %v5276_v53 = vmul.f32 %v13534_v49, %v13530_v3 }
0x285f   :  { %12842 = vmatmul.mubr.msk.f32.vlgmr.msra.gmra.mxu0 %vm1048_vm3, %v5276_v53  ;;  %8165 = vst.msk [vmem:[#allocation59 + $0x8] sm:$0xff] %vm1048_vm3, %v5276_v53 }
0x2860   :  { %v13536_v54 = vpop.eup %13535  ;;  %12850 = vmatpush3.xpose.msk.msra.mxu0 %vm1048_vm3, %v5434_v35  ;;  %12851 = vmatprep.mubr.msk.f32.mxu0 %vm14651_vm2, %v14650_v52 }
0x2861   :  { %v5278_v58 = vmul.f32 %v13536_v54, %v13532_v45  ;;  %12859 = vmatprep.subr.mxu0 %v14650_v52 }
0x2863   :  { %12847 = vmatmul.mubr.msk.f32.vlgmr.msra.gmra.mxu1 %vm1048_vm3, %v5278_v58  ;;  %8169 = vst.msk [vmem:[#allocation59 + $0x28] sm:$0xff] %vm1048_vm3, %v5278_v58  ;;  %12852 = vmatmul.mubr.msk.f32.vlgmr.msra.gmra.mxu0 %vm1048_vm3, %v5432_v29 }
0x2864   :  { %12855 = vmatpush3.xpose.msk.msra.mxu1 %vm1048_vm3, %v5512_v56  ;;  %12856 = vmatprep.mubr.msk.f32.mxu1 %vm14651_vm2, %v14650_v52 }
0x2865   :  { %12864 = vmatprep.subr.mxu1 %v14650_v52  ;;  %12861 = vmatprep.mubr.msk.f32.mxu0 %vm14651_vm2, %v14650_v52 }
0x2867   :  { %12857 = vmatmul.mubr.msk.f32.vlgmr.msra.gmra.mxu1 %vm1048_vm3, %v5510_v37 }
0x2868   :  { %12866 = vmatprep.mubr.msk.f32.mxu1 %vm14651_vm2, %v14650_v52 }
0x291f   :  { %v15701_v59 = vpop.f32.mrf.mxu0 }
0x2921   :  { %v12843_v60 = vpop.f32.mrf.mxu0 }
0x2923   :  { %v15703_v61 = vpop.f32.mrf.mxu1  ;;  %v5505_v62 = vpop.f32.mrf.mxu0 }
0x2924   :  { %v5506_v1 = vadd.f32 %v5505_v62, %v15617_v44 }
0x2925   :  { %v12848_v51 = vpop.f32.mrf.mxu1  ;;  %v12853_v4 = vpop.f32.mrf.mxu0 }
0x2926   :  { %v5587_v25 = vsel %vm1048_vm3, %v5506_v1, -inf }
0x2927   :  { %5588 = vmax.xlane.f32.xlu1 %v5587_v25  ;;  %v5583_v5 = vpop.f32.mrf.mxu1 }
0x2928   :  { %v5584_v7 = vadd.f32 %v5583_v5, %v15617_v44 }
0x2929   :  { %v12858_v8 = vpop.f32.mrf.mxu1 }
0x292a   :  { %v5590_v9 = vsel %vm1048_vm3, %v5584_v7, -inf }
0x292b   :  { %5591 = vmax.xlane.f32.xlu0 %v5590_v9 }
0x2938   :  { %5685 = vrot.lane.b32.xlu1 %v15598_v40, %s14659_s3 }
0x293c   :  { %5763 = vrot.lane.b32.xlu1 %v15594_v39, %s14660_s0 }
0x2941   :  { %5609 = vrot.lane.b32.xlu0 %v15594_v39, %s14659_s3 }
0x29b0   :  { %v5589_v10 = vpop.xlane.xlu1 %5588 }
0x29b1   :  { %v5593_v11 = vsub.f32 %v5506_v1, %v5589_v10  ;;  %v6124_v10 = vld [vmem:[%s16639_s10 + $0x18] sm:$0xff] }
0x29b3   :  { %v5595_v13 = vmul.f32 1.442695, %v5593_v11  ;;  %v6123_v11 = vld [vmem:[%s16639_s10 + $0x10] sm:$0xff] }
0x29b4   :  { %v5686_v55 = vpop.permute.xlu1 %5685  ;;  %v5592_v50 = vpop.xlane.xlu0 %5591 }
0x29b5   :  { %13537 = vpow2.f32 %v5595_v13  ;;  %v5594_v15 = vsub.f32 %v5584_v7, %v5592_v50  ;;  %12865 = vmatpush3.msra.mxu1 %v5686_v55  ;;  %v6122_v13 = vld [vmem:[%s16639_s10 + $0x8] sm:$0xff]  ;;  %v6121_v55 = vld [vmem:[%s16639_s10] sm:$0xff] }
0x29b6   :  { %12874 = vmatprep.subr.mxu1 %v14650_v52 }
0x29b7   :  { %v5597_v14 = vmul.f32 1.442695, %v5594_v15 }
0x29b8   :  { %v5610_v17 = vpop.permute.xlu0 %5609  ;;  %v5764_v21 = vpop.permute.xlu1 %5763 }
0x29b9   :  { %13539 = vpow2.f32 %v5597_v14  ;;  %12860 = vmatpush3.msra.mxu0 %v5610_v17 }
0x29ba   :  { %12869 = vmatprep.subr.mxu0 %v14650_v52 }
0x29c2   :  { %v13538_v18 = vpop.eup %13537 }
0x29c3   :  { %v5599_v19 = vsel %vm1048_vm3, %v13538_v18, 0.0 }
0x29c4   :  { %5600 = vadd.xlane.f32.xlu0 %v5599_v19 }
0x29c6   :  { %v13540_v6 = vpop.eup %13539 }
0x29c7   :  { %v5602_v20 = vsel %vm1048_vm3, %v13540_v6, 0.0 }
0x29c8   :  { %5603 = vadd.xlane.f32.xlu1 %v5602_v20 }
0x29d9   :  { %5761 = vrot.lane.b32.xlu1 %v15594_v39, %s14661_s19 }
0x29da   :  { %5841 = vrot.lane.b32.xlu0 %v15598_v40, %s14660_s0 }
0x29de   :  { %5839 = vrot.lane.b32.xlu0 %v15598_v40, %s14661_s19 }
0x2a4d   :  { %v5601_v57 = vpop.xlane.xlu0 %5600 }
0x2a4e   :  { %13541 = vrcp.f32 %v5601_v57 }
0x2a51   :  { %v5604_v24 = vpop.xlane.xlu1 %5603  ;;  %v5842_v31 = vpop.permute.xlu0 %5841 }
0x2a52   :  { %13543 = vrcp.f32 %v5604_v24 }
0x2a55   :  { %v5762_v36 = vpop.permute.xlu1 %5761  ;;  %v5840_v38 = vpop.permute.xlu0 %5839 }
0x2a5b   :  { %v13542_v23 = vpop.eup %13541 }
0x2a5c   :  { %v5606_v27 = vmul.f32 %v13542_v23, %v13538_v18  ;;  %v11997_v18 = vld [vmem:[#allocation50] ss:$0 sm:$0xff] }
0x2a5d   :  { %v4529_v19 = vadd.f32 %v15614_v42, %v11997_v18 }
0x2a5e   :  { %12862 = vmatmul.mubr.msk.f32.vlgmr.msra.gmra.mxu0 %vm1048_vm3, %v5606_v27  ;;  %8166 = vst.msk [vmem:[#allocation59 + $0x10] sm:$0xff] %vm1048_vm3, %v5606_v27 }
0x2a5f   :  { %v13544_v22 = vpop.eup %13543  ;;  %12870 = vmatpush3.xpose.msk.msra.mxu0 %vm1048_vm3, %v5764_v21  ;;  %12871 = vmatprep.mubr.msk.f32.mxu0 %vm14651_vm2, %v14650_v52  ;;  %v4533_v20 = vadd.f32 %v4529_v19, %v15557_v2 }
0x2a60   :  { %v5608_v32 = vmul.f32 %v13544_v22, %v13540_v6  ;;  %12879 = vmatprep.subr.mxu0 %v14650_v52  ;;  %v4524_v6 = vadd.f32 %v11997_v18, %v15619_v26 }
0x2a61   :  { %v4538_v57 = vsel %vm859_vm1, %v4533_v20, 0.0 }
0x2a62   :  { %12867 = vmatmul.mubr.msk.f32.vlgmr.msra.gmra.mxu1 %vm1048_vm3, %v5608_v32  ;;  %8170 = vst.msk [vmem:[#allocation59 + $0x30] sm:$0xff] %vm1048_vm3, %v5608_v32  ;;  %12872 = vmatmul.mubr.msk.f32.vlgmr.msra.gmra.mxu0 %vm1048_vm3, %v5762_v36  ;;  %v4532_v21 = vadd.f32 %v4524_v6, %v15553_v0 }
0x2a63   :  { %12875 = vmatpush3.xpose.msk.msra.mxu1 %vm1048_vm3, %v5842_v31  ;;  %12876 = vmatprep.mubr.msk.f32.mxu1 %vm14651_vm2, %v14650_v52 }
0x2a64   :  { %12884 = vmatprep.subr.mxu1 %v14650_v52  ;;  %12881 = vmatprep.mubr.msk.f32.mxu0 %vm14651_vm2, %v14650_v52  ;;  %v4535_v24 = vsel %vm859_vm1, %v4532_v21, 0.0 }
0x2a66   :  { %12877 = vmatmul.mubr.msk.f32.vlgmr.msra.gmra.mxu1 %vm1048_vm3, %v5840_v38 }
0x2a67   :  { %12886 = vmatprep.mubr.msk.f32.mxu1 %vm14651_vm2, %v14650_v52 }
0x2b1e   :  { %v5681_v63 = vpop.f32.mrf.mxu0 }
0x2b20   :  { %v12863_v41 = vpop.f32.mrf.mxu0 }
0x2b22   :  { %v5757_v3 = vpop.f32.mrf.mxu1  ;;  %v5835_v43 = vpop.f32.mrf.mxu0 }
0x2b23   :  { %v5836_v45 = vadd.f32 %v5835_v43, %v15617_v44  ;;  %v12031_v43 = vld [vmem:[#allocation11] ss:$0 sm:$0xff] }
0x2b24   :  { %v12868_v46 = vpop.f32.mrf.mxu1  ;;  %v12873_v35 = vpop.f32.mrf.mxu0 }
0x2b25   :  { %v5917_v47 = vsel %vm1048_vm3, %v5836_v45, -inf }
0x2b26   :  { %5918 = vmax.xlane.f32.xlu1 %v5917_v47  ;;  %v5913_v48 = vpop.f32.mrf.mxu1 }
0x2b27   :  { %v5914_v49 = vadd.f32 %v5913_v48, %v15617_v44 }
0x2b28   :  { %v12878_v53 = vpop.f32.mrf.mxu1 }
0x2b29   :  { %v5920_v54 = vsel %vm1048_vm3, %v5914_v49, -inf }
0x2b2a   :  { %5921 = vmax.xlane.f32.xlu0 %v5920_v54 }
0x2baf   :  { %v5919_v56 = vpop.xlane.xlu1 %5918 }
0x2bb0   :  { %v5923_v58 = vsub.f32 %v5836_v45, %v5919_v56 }
0x2bb2   :  { %v5925_v29 = vmul.f32 1.442695, %v5923_v58 }
0x2bb3   :  { %v5922_v37 = vpop.xlane.xlu0 %5921 }
0x2bb4   :  { %13545 = vpow2.f32 %v5925_v29  ;;  %v5924_v60 = vsub.f32 %v5914_v49, %v5922_v37 }
0x2bb6   :  { %v5927_v62 = vmul.f32 1.442695, %v5924_v60 }
0x2bb8   :  { %13547 = vpow2.f32 %v5927_v62 }
0x2bc1   :  { %v13546_v1 = vpop.eup %13545 }
0x2bc2   :  { %v5929_v51 = vsel %vm1048_vm3, %v13546_v1, 0.0 }
0x2bc3   :  { %5930 = vadd.xlane.f32.xlu0 %v5929_v51  ;;  %v6346_v51 = vld [vmem:[%s16640_s11] sm:$0xff] }
0x2bc5   :  { %v13548_v4 = vpop.eup %13547 }
0x2bc6   :  { %v5932_v25 = vsel %vm1048_vm3, %v13548_v4, 0.0 }
0x2bc7   :  { %5933 = vadd.xlane.f32.xlu1 %v5932_v25 }
0x2bd8   :  { %6015 = vrot.lane.b32.xlu1 %v15598_v40, %s14662_s24 }
0x2bd9   :  { %5939 = vrot.lane.b32.xlu0 %v15594_v39, %s14662_s24 }
0x2bdc   :  { %6093 = vrot.lane.b32.xlu1 %v15701_v59, %s14663_s7 }
0x2bdd   :  { %6095 = vrot.lane.b32.xlu0 %v15703_v61, %s14663_s7 }
0x2be0   :  { %6101 = vrot.lane.b32.xlu1 %v5681_v63, %s14664_s9 }
0x2be1   :  { %6103 = vrot.lane.b32.xlu0 %v5757_v3, %s14664_s9 }
0x2c4c   :  { %v5931_v5 = vpop.xlane.xlu0 %5930 }
0x2c4d   :  { %13549 = vrcp.f32 %v5931_v5 }
0x2c50   :  { %v5934_v7 = vpop.xlane.xlu1 %5933  ;;  %v5940_v8 = vpop.permute.xlu0 %5939 }
0x2c51   :  { %13551 = vrcp.f32 %v5934_v7  ;;  %12880 = vmatpush3.msra.mxu0 %v5940_v8 }
0x2c52   :  { %12889 = vmatprep.subr.mxu0 %v6124_v10 }
0x2c54   :  { %v6016_v40 = vpop.permute.xlu1 %6015  ;;  %v6096_v27 = vpop.permute.xlu0 %6095 }
0x2c55   :  { %12885 = vmatpush3.msra.mxu1 %v6016_v40  ;;  %v6116_v0 = vsel %vm1048_vm3, %v15661_v16, %v6096_v27  ;;  %v6255_v27 = vld [vmem:[%s16641_s15 + $0x8] sm:$0xff] }
0x2c58   :  { %v6094_v23 = vpop.permute.xlu1 %6093  ;;  %v6104_v32 = vpop.permute.xlu0 %6103 }
0x2c59   :  { %v6115_v31 = vsel %vm1048_vm3, %v15659_v12, %v6094_v23  ;;  %v6118_v36 = vsel %vm2390_vm5, %v6116_v0, %v6104_v32 }
0x2c5a   :  { %v13550_v39 = vpop.eup %13549 }
0x2c5b   :  { %v5936_v59 = vmul.f32 %v13550_v39, %v13546_v1  ;;  %v6348_v1 = vld [vmem:[%s16640_s11 + $0x10] sm:$0xff] }
0x2c5c   :  { %v6102_v22 = vpop.permute.xlu1 %6101 }
0x2c5d   :  { %12882 = vmatmul.mubr.msk.f32.vlgmr.msra.gmra.mxu0 %vm1048_vm3, %v5936_v59  ;;  %8167 = vst.msk [vmem:[#allocation59 + $0x18] sm:$0xff] %vm1048_vm3, %v5936_v59  ;;  %v6117_v42 = vsel %vm2390_vm5, %v6115_v31, %v6102_v22  ;;  %v6254_v31 = vld [vmem:[%s16641_s15] sm:$0xff] }
0x2c5e   :  { %v13552_v61 = vpop.eup %13551  ;;  %12890 = vmatpush3.msra.mxu0 %v6124_v10 }
0x2c5f   :  { %v5938_v9 = vmul.f32 %v13552_v61, %v13548_v4  ;;  %12891 = vmatprep.subr.mxu0 %v6123_v11 }
0x2c60   :  { %12892 = vmatpush3.msra.mxu0 %v6123_v11 }
0x2c61   :  { %12887 = vmatmul.mubr.msk.f32.vlgmr.msra.gmra.mxu1 %vm1048_vm3, %v5938_v9  ;;  %8171 = vst.msk [vmem:[#allocation59 + $0x38] sm:$0xff] %vm1048_vm3, %v5938_v9  ;;  %12893 = vmatprep.subr.mxu0 %v6122_v13 }
0x2c62   :  { %12894 = vmatpush3.msra.mxu0 %v6122_v13 }
0x2c63   :  { %12895 = vmatprep.subr.mxu0 %v6121_v55 }
0x2c64   :  { %12896 = vmatpush3.msra.mxu0 %v6121_v55 }
0x2d1d   :  { %v6011_v50 = vpop.f32.mrf.mxu0 }
0x2d1e   :  { %6109 = vrot.lane.b32.xlu1 %v6011_v50, %s14665_s17 }
0x2d1f   :  { %v12883_v15 = vpop.f32.mrf.mxu0 }
0x2d21   :  { %v6087_v14 = vpop.f32.mrf.mxu1 }
0x2d22   :  { %6111 = vrot.lane.b32.xlu0 %v6087_v14, %s14665_s17  ;;  %v4534_v14 = vld [vmem:[#allocation52] sm:$0x3] }
0x2d23   :  { %v12888_v17 = vpop.f32.mrf.mxu1  ;;  %v4564_v18 = vrot.slane %v4534_v14, %v15097_v28  ;;  %v4570_v23 = vrot.slane %v4534_v14, %v15099_v30 }
0x2d41   :  { %4539 = vadd.xlane.f32.xlu0 %v4538_v57 }
0x2d42   :  { %4536 = vadd.xlane.f32.xlu1 %v4535_v24 }
0x2d90   :  { %v6110_v26 = vpop.permute.xlu1 %6109 }
0x2d91   :  { %v6119_v2 = vsel %vm2393_vm4, %v6117_v42, %v6110_v26 }
0x2d92   :  { %12897 = vmatprep.mubr.msk.f32.mxu0 %vm859_vm1, %v6119_v2 }
0x2d94   :  { %v6112_v38 = vpop.permute.xlu0 %6111 }
0x2d95   :  { %v6120_v63 = vsel %vm2393_vm4, %v6118_v36, %v6112_v38 }
0x2d96   :  { %12898 = vmatmul.mubr.msk.f32.vlgmr.msra.gmra.mxu0 %vm859_vm1, %v6120_v63 }
0x2dca   :  { %v4540_v41 = vpop.xlane.xlu0 %4539 }
0x2dcb   :  { %v4537_v12 = vpop.xlane.xlu1 %4536  ;;  %v4542_v3 = vmul.f32 0.03125, %v4540_v41  ;;  %v6215_v41 = vld [vmem:[#allocation7] sm:$0x3] }
0x2dcc   :  { %v4541_v45 = vmul.f32 0.03125, %v4537_v12 }
0x2dcd   :  { %v4544_v35 = vsub.f32 %v4533_v20, %v4542_v3  ;;  %v6257_v20 = vld [vmem:[%s16641_s15 + $0x18] sm:$0xff]  ;;  %v6245_v3 = vrot.slane %v6215_v41, %v15097_v28 }
0x2dce   :  { %v4543_v49 = vsub.f32 %v4532_v21, %v4541_v45  ;;  %v6256_v21 = vld [vmem:[%s16641_s15 + $0x10] sm:$0xff]  ;;  %12900 = vmatprep.subr.mxu1 %v6257_v20 }
0x2dcf   :  { %v4546_v58 = vmul.f32 %v4544_v35, %v4544_v35  ;;  %12901 = vmatpush3.msra.mxu1 %v6257_v20 }
0x2dd0   :  { %v4545_v37 = vmul.f32 %v4543_v49, %v4543_v49  ;;  %12902 = vmatprep.subr.mxu1 %v6256_v21 }
0x2dd1   :  { %v4550_v60 = vsel %vm859_vm1, %v4546_v58, 0.0  ;;  %12903 = vmatpush3.msra.mxu1 %v6256_v21 }
0x2dd2   :  { %v4547_v62 = vsel %vm859_vm1, %v4545_v37, 0.0  ;;  %12904 = vmatprep.subr.mxu1 %v6255_v27 }
0x2dd3   :  { %12905 = vmatpush3.msra.mxu1 %v6255_v27 }
0x2dd4   :  { %12906 = vmatprep.subr.mxu1 %v6254_v31 }
0x2dd5   :  { %12907 = vmatpush3.msra.mxu1 %v6254_v31 }
0x2dd6   :  { %12922 = vmatprep.subr.mxu1 %v14650_v52 }
0x2e56   :  { %v12899_v46 = vpop.f32.mrf.mxu0 }
0x2e57   :  { %v6210_v47 = vadd.f32 %v12899_v46, %v12031_v43 }
0x2e58   :  { %v6204_v48 = vpop.f32.mrf.mxu0 }
0x2e59   :  { %v6214_v16 = vadd.f32 %v6210_v47, %v15586_v34  ;;  %v6205_v53 = vadd.f32 %v12031_v43, %v6204_v48  ;;  %v6349_v34 = vld [vmem:[%s16640_s11 + $0x18] sm:$0xff]  ;;  %v6251_v47 = vrot.slane %v6215_v41, %v15099_v30 }
0x2e5a   :  { %12911 = vmatprep.subr.mxu0 %v6349_v34 }
0x2e5b   :  { %v6213_v54 = vadd.f32 %v6205_v53, %v15584_v33  ;;  %v6219_v56 = vsel %vm859_vm1, %v6214_v16, 0.0  ;;  %12912 = vmatpush3.msra.mxu0 %v6349_v34  ;;  %v6347_v33 = vld [vmem:[%s16640_s11 + $0x8] sm:$0xff] }
0x2e5c   :  { %6220 = vadd.xlane.f32.xlu1 %v6219_v56  ;;  %12913 = vmatprep.subr.mxu0 %v6348_v1  ;;  %v12037_v53 = vld [vmem:[#allocation14] ss:$0 sm:$0xff] }
0x2e5d   :  { %v6216_v29 = vsel %vm859_vm1, %v6213_v54, 0.0  ;;  %12914 = vmatpush3.msra.mxu0 %v6348_v1 }
0x2e5e   :  { %6217 = vadd.xlane.f32.xlu0 %v6216_v29  ;;  %12915 = vmatprep.subr.mxu0 %v6347_v33 }
0x2e5f   :  { %12916 = vmatpush3.msra.mxu0 %v6347_v33  ;;  %v715_v33 = vld [vmem:[%s16642_s16] sm:$0x1] }
0x2e60   :  { %4551 = vadd.xlane.f32.xlu1 %v4550_v60  ;;  %12917 = vmatprep.subr.mxu0 %v6346_v51  ;;  %v12034_v60 = vld [vmem:[#allocation17] ss:$0 sm:$0xff] }
0x2e61   :  { %12918 = vmatpush3.msra.mxu0 %v6346_v51  ;;  %v717_v51 = vmul.f32 -1e+09, %v715_v33 }
0x2e62   :  { %4548 = vadd.xlane.f32.xlu0 %v4547_v62  ;;  %12932 = vmatprep.subr.mxu0 %v14650_v52 }
0x2ee5   :  { %v6221_v4 = vpop.xlane.xlu1 %6220 }
0x2ee6   :  { %v6223_v25 = vmul.f32 0.03125, %v6221_v4  ;;  %v716_v4 = vld [vmem:[%s16642_s16 + $0x1] sm:$0x1] }
0x2ee7   :  { %v6218_v5 = vpop.xlane.xlu0 %6217 }
0x2ee8   :  { %v6225_v7 = vsub.f32 %v6214_v16, %v6223_v25  ;;  %v6222_v8 = vmul.f32 0.03125, %v6218_v5  ;;  %v15852_v25 = vrot.slane %v717_v51, %v15097_v28  ;;  %v718_v5 = vmul.f32 -1e+09, %v716_v4 }
0x2ee9   :  { %v4552_v40 = vpop.xlane.xlu1 %4551 }
0x2eea   :  { %v6224_v39 = vsub.f32 %v6213_v54, %v6222_v8  ;;  %v4554_v59 = vmul.f32 0.03125, %v4552_v40  ;;  %v6227_v61 = vmul.f32 %v6225_v7, %v6225_v7  ;;  %v15856_v40 = vrot.slane %v718_v5, %v15097_v28 }
0x2eeb   :  { %v4549_v9 = vpop.xlane.xlu0 %4548 }
0x2eec   :  { %v4556_v10 = vadd.f32 1e-05, %v4554_v59  ;;  %v4553_v11 = vmul.f32 0.03125, %v4549_v9  ;;  %v6231_v13 = vsel %vm859_vm1, %v6227_v61, 0.0  ;;  %v6226_v55 = vmul.f32 %v6224_v39, %v6224_v39 }
0x2eed   :  { %6232 = vadd.xlane.f32.xlu1 %v6231_v13 }
0x2eee   :  { %13553 = vrsqrt.f32 %v4556_v10  ;;  %v4555_v50 = vadd.f32 1e-05, %v4553_v11  ;;  %v6228_v15 = vsel %vm859_vm1, %v6226_v55, 0.0 }
0x2eef   :  { %6229 = vadd.xlane.f32.xlu0 %v6228_v15 }
0x2ef0   :  { %13555 = vrsqrt.f32 %v4555_v50 }
0x2efb   :  { %v13554_v17 = vpop.eup %13553 }
0x2efc   :  { %v4560_v19 = vmul.f32 %v13554_v17, %v4544_v35 }
0x2efd   :  { %v13556_v6 = vpop.eup %13555 }
0x2efe   :  { %v4559_v57 = vmul.f32 %v13556_v6, %v4543_v49  ;;  %v4566_v24 = vmul.f32 %v4564_v18, %v4560_v19 }
0x2f00   :  { %v4565_v22 = vmul.f32 %v4564_v18, %v4559_v57  ;;  %v15806_v42 = vadd.f32 %v4570_v23, %v4566_v24 }
0x2f02   :  { %v15804_v32 = vadd.f32 %v4570_v23, %v4565_v22 }
0x2f04   :  { %12919 = vmatprep.mubr.msk.f32.mxu0 %vm859_vm1, %v15804_v32 }
0x2f05   :  { %12920 = vmatmul.mubr.msk.f32.vlgmr.msra.gmra.mxu0 %vm859_vm1, %v15806_v42 }
0x2f06   :  { %12934 = vmatprep.mubr.msk.f32.mxu0 %vm14651_vm2, %v14650_v52 }
0x2f76   :  { %v6233_v26 = vpop.xlane.xlu1 %6232 }
0x2f77   :  { %v6235_v2 = vmul.f32 0.03125, %v6233_v26 }
0x2f78   :  { %v6230_v0 = vpop.xlane.xlu0 %6229 }
0x2f79   :  { %v6237_v36 = vadd.f32 1e-05, %v6235_v2  ;;  %v6234_v38 = vmul.f32 0.03125, %v6230_v0 }
0x2f7b   :  { %13557 = vrsqrt.f32 %v6237_v36  ;;  %v6236_v63 = vadd.f32 1e-05, %v6234_v38 }
0x2f7d   :  { %13559 = vrsqrt.f32 %v6236_v63 }
0x2f88   :  { %v13558_v12 = vpop.eup %13557 }
0x2f89   :  { %v6241_v43 = vmul.f32 %v13558_v12, %v6225_v7 }
0x2f8a   :  { %v13560_v45 = vpop.eup %13559 }
0x2f8b   :  { %v6240_v46 = vmul.f32 %v13560_v45, %v6224_v39  ;;  %v6247_v35 = vmul.f32 %v6245_v3, %v6241_v43 }
0x2f8d   :  { %v6246_v48 = vmul.f32 %v6245_v3, %v6240_v46  ;;  %v15819_v16 = vadd.f32 %v6251_v47, %v6247_v35 }
0x2f8f   :  { %v15817_v49 = vadd.f32 %v6251_v47, %v6246_v48 }
0x2f91   :  { %12908 = vmatprep.mubr.msk.f32.mxu1 %vm859_vm1, %v15817_v49 }
0x2f92   :  { %12909 = vmatmul.mubr.msk.f32.vlgmr.msra.gmra.mxu1 %vm859_vm1, %v15819_v16 }
0x2f93   :  { %12924 = vmatprep.mubr.msk.f32.mxu1 %vm14651_vm2, %v14650_v52 }
0x2fc5   :  { %v12921_v54 = vpop.f32.mrf.mxu0 }
0x2fc6   :  { %v15827_v56 = vadd.f32 %v12921_v54, %v12037_v53 }
0x2fc7   :  { %v6429_v58 = vpop.f32.mrf.mxu0 }
0x2fc8   :  { %v15829_v29 = vadd.f32 %v12037_v53, %v6429_v58 }
0x2fca   :  { %12923 = vmatpush3.xpose.msk.msra.mxu1 %vm1048_vm3, %v15829_v29 }
0x2fcb   :  { %12927 = vmatprep.subr.mxu1 %v14650_v52 }
0x3052   :  { %v12910_v37 = vpop.f32.mrf.mxu1 }
0x3053   :  { %v15842_v1 = vadd.f32 %v12910_v37, %v12034_v60 }
0x3054   :  { %v6337_v62 = vpop.f32.mrf.mxu1 }
0x3055   :  { %v15834_v34 = vadd.f32 %v12034_v60, %v6337_v62 }
0x3057   :  { %12925 = vmatmul.mubr.msk.f32.vlgmr.msra.gmra.mxu1 %vm1048_vm3, %v15834_v34 }
0x3058   :  { %12928 = vmatpush3.xpose.msk.msra.mxu1 %vm1048_vm3, %v15827_v56  ;;  %12929 = vmatprep.mubr.msk.f32.mxu1 %vm14651_vm2, %v14650_v52 }
0x3059   :  { %12937 = vmatprep.subr.mxu1 %v14650_v52 }
0x305b   :  { %12930 = vmatmul.mubr.msk.f32.vlgmr.msra.gmra.mxu1 %vm1048_vm3, %v15842_v1 }
0x305c   :  { %12939 = vmatprep.mubr.msk.f32.mxu1 %vm14651_vm2, %v14650_v52 }
0x3117   :  { %v6522_v7 = vpop.f32.mrf.mxu1 }
0x3118   :  { %v6523_v8 = vadd.f32 %v6522_v7, %v15852_v25 }
0x3119   :  { %v12926_v39 = vpop.f32.mrf.mxu1 }
0x311a   :  { %v6602_v59 = vsel %vm1048_vm3, %v6523_v8, -inf }
0x311b   :  { %6603 = vmax.xlane.f32.xlu0 %v6602_v59  ;;  %v6598_v61 = vpop.f32.mrf.mxu1 }
0x311c   :  { %v6599_v9 = vadd.f32 %v6598_v61, %v15856_v40 }
0x311d   :  { %v12931_v10 = vpop.f32.mrf.mxu1 }
0x311e   :  { %v6605_v11 = vsel %vm1048_vm3, %v6599_v9, -inf }
0x311f   :  { %6606 = vmax.xlane.f32.xlu1 %v6605_v11 }
0x3130   :  { %6700 = vrot.lane.b32.xlu1 %v15827_v56, %s14652_s14 }
0x3131   :  { %6624 = vrot.lane.b32.xlu0 %v15829_v29, %s14652_s14 }
0x3134   :  { %6778 = vrot.lane.b32.xlu1 %v15829_v29, %s14655_s1 }
0x31a4   :  { %v6604_v13 = vpop.xlane.xlu0 %6603 }
0x31a5   :  { %v6608_v55 = vsub.f32 %v6523_v8, %v6604_v13 }
0x31a7   :  { %v6610_v50 = vmul.f32 1.442695, %v6608_v55 }
0x31a8   :  { %v6625_v15 = vpop.permute.xlu0 %6624  ;;  %v6607_v14 = vpop.xlane.xlu1 %6606 }
0x31a9   :  { %13561 = vpow2.f32 %v6610_v50  ;;  %v6609_v17 = vsub.f32 %v6599_v9, %v6607_v14  ;;  %12933 = vmatpush3.msra.mxu0 %v6625_v15 }
0x31aa   :  { %12942 = vmatprep.subr.mxu0 %v14650_v52 }
0x31ab   :  { %v6612_v18 = vmul.f32 1.442695, %v6609_v17 }
0x31ac   :  { %v6701_v19 = vpop.permute.xlu1 %6700 }
0x31ad   :  { %13563 = vpow2.f32 %v6612_v18  ;;  %12938 = vmatpush3.msra.mxu1 %v6701_v19 }
0x31ae   :  { %12947 = vmatprep.subr.mxu1 %v14650_v52 }
0x31b0   :  { %v6779_v24 = vpop.permute.xlu1 %6778 }
0x31b6   :  { %v13562_v6 = vpop.eup %13561 }
0x31b7   :  { %v6614_v20 = vsel %vm1048_vm3, %v13562_v6, 0.0 }
0x31b8   :  { %6615 = vadd.xlane.f32.xlu0 %v6614_v20 }
0x31ba   :  { %v13564_v21 = vpop.eup %13563 }
0x31bb   :  { %v6617_v57 = vsel %vm1048_vm3, %v13564_v21, 0.0 }
0x31bc   :  { %6618 = vadd.xlane.f32.xlu1 %v6617_v57 }
0x31cd   :  { %6776 = vrot.lane.b32.xlu1 %v15834_v34, %s14655_s1 }
0x31ce   :  { %6856 = vrot.lane.b32.xlu0 %v15827_v56, %s14655_s1 }
0x31d2   :  { %6854 = vrot.lane.b32.xlu0 %v15842_v1, %s14655_s1 }
0x3241   :  { %v6616_v23 = vpop.xlane.xlu0 %6615 }
0x3242   :  { %13565 = vrcp.f32 %v6616_v23 }
0x3245   :  { %v6619_v27 = vpop.xlane.xlu1 %6618  ;;  %v6857_v2 = vpop.permute.xlu0 %6856 }
0x3246   :  { %13567 = vrcp.f32 %v6619_v27 }
0x3249   :  { %v6777_v36 = vpop.permute.xlu1 %6776  ;;  %v6855_v38 = vpop.permute.xlu0 %6854 }
0x324f   :  { %v13566_v22 = vpop.eup %13565 }
0x3250   :  { %v6621_v31 = vmul.f32 %v13566_v22, %v13562_v6 }
0x3252   :  { %12935 = vmatmul.mubr.msk.f32.vlgmr.msra.gmra.mxu0 %vm1048_vm3, %v6621_v31  ;;  %8172 = vst.msk [vmem:[#allocation61] sm:$0xff] %vm1048_vm3, %v6621_v31 }
0x3253   :  { %v13568_v26 = vpop.eup %13567  ;;  %12943 = vmatpush3.xpose.msk.msra.mxu0 %vm1048_vm3, %v6779_v24  ;;  %12944 = vmatprep.mubr.msk.f32.mxu0 %vm14651_vm2, %v14650_v52 }
0x3254   :  { %v6623_v0 = vmul.f32 %v13568_v26, %v13564_v21  ;;  %12952 = vmatprep.subr.mxu0 %v14650_v52 }
0x3256   :  { %12940 = vmatmul.mubr.msk.f32.vlgmr.msra.gmra.mxu1 %vm1048_vm3, %v6623_v0  ;;  %8176 = vst.msk [vmem:[#allocation61 + $0x20] sm:$0xff] %vm1048_vm3, %v6623_v0  ;;  %12945 = vmatmul.mubr.msk.f32.vlgmr.msra.gmra.mxu0 %vm1048_vm3, %v6777_v36 }
0x3257   :  { %12948 = vmatpush3.xpose.msk.msra.mxu1 %vm1048_vm3, %v6857_v2  ;;  %12949 = vmatprep.mubr.msk.f32.mxu1 %vm14651_vm2, %v14650_v52 }
0x3258   :  { %12957 = vmatprep.subr.mxu1 %v14650_v52  ;;  %12954 = vmatprep.mubr.msk.f32.mxu0 %vm14651_vm2, %v14650_v52 }
0x325a   :  { %12950 = vmatmul.mubr.msk.f32.vlgmr.msra.gmra.mxu1 %vm1048_vm3, %v6855_v38 }
0x325b   :  { %12959 = vmatprep.mubr.msk.f32.mxu1 %vm14651_vm2, %v14650_v52 }
0x3312   :  { %v15895_v63 = vpop.f32.mrf.mxu0 }
0x3314   :  { %v12936_v41 = vpop.f32.mrf.mxu0 }
0x3316   :  { %v15897_v12 = vpop.f32.mrf.mxu1  ;;  %v6850_v3 = vpop.f32.mrf.mxu0 }
0x3317   :  { %v6851_v43 = vadd.f32 %v6850_v3, %v15852_v25 }
0x3318   :  { %v12941_v45 = vpop.f32.mrf.mxu1  ;;  %v12946_v46 = vpop.f32.mrf.mxu0 }
0x3319   :  { %v6932_v35 = vsel %vm1048_vm3, %v6851_v43, -inf }
0x331a   :  { %6933 = vmax.xlane.f32.xlu1 %v6932_v35  ;;  %v6928_v47 = vpop.f32.mrf.mxu1 }
0x331b   :  { %v6929_v48 = vadd.f32 %v6928_v47, %v15856_v40 }
0x331c   :  { %v12951_v53 = vpop.f32.mrf.mxu1 }
0x331d   :  { %v6935_v54 = vsel %vm1048_vm3, %v6929_v48, -inf }
0x331e   :  { %6936 = vmax.xlane.f32.xlu0 %v6935_v54 }
0x332b   :  { %7030 = vrot.lane.b32.xlu1 %v15827_v56, %s14654_s8 }
0x332f   :  { %7108 = vrot.lane.b32.xlu1 %v15829_v29, %s14658_s30 }
0x3334   :  { %6954 = vrot.lane.b32.xlu0 %v15829_v29, %s14654_s8 }
0x33a3   :  { %v6934_v58 = vpop.xlane.xlu1 %6933 }
0x33a4   :  { %v6938_v37 = vsub.f32 %v6851_v43, %v6934_v58 }
0x33a6   :  { %v6940_v60 = vmul.f32 1.442695, %v6938_v37 }
0x33a7   :  { %v7031_v62 = vpop.permute.xlu1 %7030  ;;  %v6937_v33 = vpop.xlane.xlu0 %6936 }
0x33a8   :  { %13569 = vpow2.f32 %v6940_v60  ;;  %v6939_v51 = vsub.f32 %v6929_v48, %v6937_v33  ;;  %12958 = vmatpush3.msra.mxu1 %v7031_v62 }
0x33a9   :  { %12967 = vmatprep.subr.mxu1 %v14650_v52 }
0x33aa   :  { %v6942_v4 = vmul.f32 1.442695, %v6939_v51 }
0x33ab   :  { %v6955_v5 = vpop.permute.xlu0 %6954  ;;  %v7109_v61 = vpop.permute.xlu1 %7108 }
0x33ac   :  { %13571 = vpow2.f32 %v6942_v4  ;;  %12953 = vmatpush3.msra.mxu0 %v6955_v5 }
0x33ad   :  { %12962 = vmatprep.subr.mxu0 %v14650_v52 }
0x33b5   :  { %v13570_v7 = vpop.eup %13569 }
0x33b6   :  { %v6944_v8 = vsel %vm1048_vm3, %v13570_v7, 0.0 }
0x33b7   :  { %6945 = vadd.xlane.f32.xlu0 %v6944_v8 }
0x33b9   :  { %v13572_v39 = vpop.eup %13571 }
0x33ba   :  { %v6947_v59 = vsel %vm1048_vm3, %v13572_v39, 0.0 }
0x33bb   :  { %6948 = vadd.xlane.f32.xlu1 %v6947_v59 }
0x33cc   :  { %7106 = vrot.lane.b32.xlu1 %v15834_v34, %s14658_s30 }
0x33cd   :  { %7186 = vrot.lane.b32.xlu0 %v15827_v56, %s14658_s30 }
0x33d1   :  { %7184 = vrot.lane.b32.xlu0 %v15842_v1, %s14658_s30 }
0x3440   :  { %v6946_v9 = vpop.xlane.xlu0 %6945 }
0x3441   :  { %13573 = vrcp.f32 %v6946_v9 }
0x3444   :  { %v6949_v10 = vpop.xlane.xlu1 %6948  ;;  %v7187_v50 = vpop.permute.xlu0 %7186 }
0x3445   :  { %13575 = vrcp.f32 %v6949_v10 }
0x3448   :  { %v7107_v14 = vpop.permute.xlu1 %7106  ;;  %v7185_v17 = vpop.permute.xlu0 %7184 }
0x344e   :  { %v13574_v11 = vpop.eup %13573 }
0x344f   :  { %v6951_v13 = vmul.f32 %v13574_v11, %v13570_v7 }
0x3451   :  { %12955 = vmatmul.mubr.msk.f32.vlgmr.msra.gmra.mxu0 %vm1048_vm3, %v6951_v13  ;;  %8173 = vst.msk [vmem:[#allocation61 + $0x8] sm:$0xff] %vm1048_vm3, %v6951_v13 }
0x3452   :  { %v13576_v55 = vpop.eup %13575  ;;  %12963 = vmatpush3.xpose.msk.msra.mxu0 %vm1048_vm3, %v7109_v61  ;;  %12964 = vmatprep.mubr.msk.f32.mxu0 %vm14651_vm2, %v14650_v52 }
0x3453   :  { %v6953_v15 = vmul.f32 %v13576_v55, %v13572_v39  ;;  %12972 = vmatprep.subr.mxu0 %v14650_v52 }
0x3455   :  { %12960 = vmatmul.mubr.msk.f32.vlgmr.msra.gmra.mxu1 %vm1048_vm3, %v6953_v15  ;;  %8177 = vst.msk [vmem:[#allocation61 + $0x28] sm:$0xff] %vm1048_vm3, %v6953_v15  ;;  %12965 = vmatmul.mubr.msk.f32.vlgmr.msra.gmra.mxu0 %vm1048_vm3, %v7107_v14 }
0x3456   :  { %12968 = vmatpush3.xpose.msk.msra.mxu1 %vm1048_vm3, %v7187_v50  ;;  %12969 = vmatprep.mubr.msk.f32.mxu1 %vm14651_vm2, %v14650_v52 }
0x3457   :  { %12977 = vmatprep.subr.mxu1 %v14650_v52  ;;  %12974 = vmatprep.mubr.msk.f32.mxu0 %vm14651_vm2, %v14650_v52 }
0x3459   :  { %12970 = vmatmul.mubr.msk.f32.vlgmr.msra.gmra.mxu1 %vm1048_vm3, %v7185_v17 }
0x345a   :  { %12979 = vmatprep.mubr.msk.f32.mxu1 %vm14651_vm2, %v14650_v52 }
0x3511   :  { %v15937_v18 = vpop.f32.mrf.mxu0 }
0x3513   :  { %v12956_v19 = vpop.f32.mrf.mxu0 }
0x3515   :  { %v15939_v6 = vpop.f32.mrf.mxu1  ;;  %v7180_v20 = vpop.f32.mrf.mxu0 }
0x3516   :  { %v7181_v21 = vadd.f32 %v7180_v20, %v15852_v25 }
0x3517   :  { %v12961_v57 = vpop.f32.mrf.mxu1  ;;  %v12966_v24 = vpop.f32.mrf.mxu0 }
0x3518   :  { %v7262_v23 = vsel %vm1048_vm3, %v7181_v21, -inf }
0x3519   :  { %7263 = vmax.xlane.f32.xlu1 %v7262_v23  ;;  %v7258_v27 = vpop.f32.mrf.mxu1 }
0x351a   :  { %v7259_v22 = vadd.f32 %v7258_v27, %v15856_v40 }
0x351b   :  { %v12971_v31 = vpop.f32.mrf.mxu1 }
0x351c   :  { %v7265_v26 = vsel %vm1048_vm3, %v7259_v22, -inf }
0x351d   :  { %7266 = vmax.xlane.f32.xlu0 %v7265_v26 }
0x352a   :  { %7360 = vrot.lane.b32.xlu1 %v15827_v56, %s14657_s2 }
0x352e   :  { %7438 = vrot.lane.b32.xlu1 %v15829_v29, %s14661_s19 }
0x3533   :  { %7284 = vrot.lane.b32.xlu0 %v15829_v29, %s14657_s2 }
0x35a2   :  { %v7264_v2 = vpop.xlane.xlu1 %7263 }
0x35a3   :  { %v7268_v0 = vsub.f32 %v7181_v21, %v7264_v2  ;;  %v7799_v2 = vld [vmem:[%s16643_s6 + $0x18] sm:$0xff] }
0x35a5   :  { %v7270_v36 = vmul.f32 1.442695, %v7268_v0  ;;  %v7798_v0 = vld [vmem:[%s16643_s6 + $0x10] sm:$0xff] }
0x35a6   :  { %v7361_v38 = vpop.permute.xlu1 %7360  ;;  %v7267_v41 = vpop.xlane.xlu0 %7266 }
0x35a7   :  { %13577 = vpow2.f32 %v7270_v36  ;;  %v7269_v3 = vsub.f32 %v7259_v22, %v7267_v41  ;;  %12978 = vmatpush3.msra.mxu1 %v7361_v38  ;;  %v7797_v36 = vld [vmem:[%s16643_s6 + $0x8] sm:$0xff]  ;;  %v7796_v38 = vld [vmem:[%s16643_s6] sm:$0xff] }
0x35a8   :  { %12987 = vmatprep.subr.mxu1 %v14650_v52 }
0x35a9   :  { %v7272_v43 = vmul.f32 1.442695, %v7269_v3 }
0x35aa   :  { %v7285_v45 = vpop.permute.xlu0 %7284  ;;  %v7439_v53 = vpop.permute.xlu1 %7438 }
0x35ab   :  { %13579 = vpow2.f32 %v7272_v43  ;;  %12973 = vmatpush3.msra.mxu0 %v7285_v45 }
0x35ac   :  { %12982 = vmatprep.subr.mxu0 %v14650_v52 }
0x35b4   :  { %v13578_v46 = vpop.eup %13577 }
0x35b5   :  { %v7274_v35 = vsel %vm1048_vm3, %v13578_v46, 0.0 }
0x35b6   :  { %7275 = vadd.xlane.f32.xlu0 %v7274_v35 }
0x35b8   :  { %v13580_v47 = vpop.eup %13579 }
0x35b9   :  { %v7277_v48 = vsel %vm1048_vm3, %v13580_v47, 0.0 }
0x35ba   :  { %7278 = vadd.xlane.f32.xlu1 %v7277_v48 }
0x35cb   :  { %7436 = vrot.lane.b32.xlu1 %v15834_v34, %s14661_s19 }
0x35cc   :  { %7516 = vrot.lane.b32.xlu0 %v15827_v56, %s14661_s19 }
0x35d0   :  { %7514 = vrot.lane.b32.xlu0 %v15842_v1, %s14661_s19 }
0x363f   :  { %v7276_v54 = vpop.xlane.xlu0 %7275 }
0x3640   :  { %13581 = vrcp.f32 %v7276_v54 }
0x3643   :  { %v7279_v58 = vpop.xlane.xlu1 %7278  ;;  %v7517_v33 = vpop.permute.xlu0 %7516 }
0x3644   :  { %13583 = vrcp.f32 %v7279_v58 }
0x3647   :  { %v7437_v1 = vpop.permute.xlu1 %7436  ;;  %v7515_v51 = vpop.permute.xlu0 %7514 }
0x364d   :  { %v13582_v37 = vpop.eup %13581 }
0x364e   :  { %v7281_v60 = vmul.f32 %v13582_v37, %v13578_v46 }
0x3650   :  { %12975 = vmatmul.mubr.msk.f32.vlgmr.msra.gmra.mxu0 %vm1048_vm3, %v7281_v60  ;;  %8174 = vst.msk [vmem:[#allocation61 + $0x10] sm:$0xff] %vm1048_vm3, %v7281_v60 }
0x3651   :  { %v13584_v62 = vpop.eup %13583  ;;  %12983 = vmatpush3.xpose.msk.msra.mxu0 %vm1048_vm3, %v7439_v53  ;;  %12984 = vmatprep.mubr.msk.f32.mxu0 %vm14651_vm2, %v14650_v52 }
0x3652   :  { %v7283_v34 = vmul.f32 %v13584_v62, %v13580_v47  ;;  %12992 = vmatprep.subr.mxu0 %v14650_v52 }
0x3654   :  { %12980 = vmatmul.mubr.msk.f32.vlgmr.msra.gmra.mxu1 %vm1048_vm3, %v7283_v34  ;;  %8178 = vst.msk [vmem:[#allocation61 + $0x30] sm:$0xff] %vm1048_vm3, %v7283_v34  ;;  %12985 = vmatmul.mubr.msk.f32.vlgmr.msra.gmra.mxu0 %vm1048_vm3, %v7437_v1  ;;  %v12064_v1 = vld [vmem:[#allocation16] ss:$0 sm:$0xff] }
0x3655   :  { %12988 = vmatpush3.xpose.msk.msra.mxu1 %vm1048_vm3, %v7517_v33  ;;  %12989 = vmatprep.mubr.msk.f32.mxu1 %vm14651_vm2, %v14650_v52 }
0x3656   :  { %12997 = vmatprep.subr.mxu1 %v14650_v52  ;;  %12994 = vmatprep.mubr.msk.f32.mxu0 %vm14651_vm2, %v14650_v52 }
0x3658   :  { %12990 = vmatmul.mubr.msk.f32.vlgmr.msra.gmra.mxu1 %vm1048_vm3, %v7515_v51 }
0x3659   :  { %12999 = vmatprep.mubr.msk.f32.mxu1 %vm14651_vm2, %v14650_v52 }
0x3710   :  { %v7356_v4 = vpop.f32.mrf.mxu0 }
0x3712   :  { %v12976_v5 = vpop.f32.mrf.mxu0 }
0x3714   :  { %v7432_v7 = vpop.f32.mrf.mxu1  ;;  %v7510_v8 = vpop.f32.mrf.mxu0 }
0x3715   :  { %v7511_v39 = vadd.f32 %v7510_v8, %v15852_v25 }
0x3716   :  { %v12981_v59 = vpop.f32.mrf.mxu1  ;;  %v12986_v61 = vpop.f32.mrf.mxu0 }
0x3717   :  { %v7592_v9 = vsel %vm1048_vm3, %v7511_v39, -inf }
0x3718   :  { %7593 = vmax.xlane.f32.xlu1 %v7592_v9  ;;  %v7588_v10 = vpop.f32.mrf.mxu1 }
0x3719   :  { %v7589_v11 = vadd.f32 %v7588_v10, %v15856_v40 }
0x371a   :  { %v12991_v13 = vpop.f32.mrf.mxu1 }
0x371b   :  { %v7595_v55 = vsel %vm1048_vm3, %v7589_v11, -inf }
0x371c   :  { %7596 = vmax.xlane.f32.xlu0 %v7595_v55 }
0x37a1   :  { %v7594_v50 = vpop.xlane.xlu1 %7593 }
0x37a2   :  { %v7598_v15 = vsub.f32 %v7511_v39, %v7594_v50 }
0x37a4   :  { %v7600_v14 = vmul.f32 1.442695, %v7598_v15  ;;  %v7932_v15 = vld [vmem:[%s16644_s25 + $0x18] sm:$0xff] }
0x37a5   :  { %v7597_v17 = vpop.xlane.xlu0 %7596 }
0x37a6   :  { %13585 = vpow2.f32 %v7600_v14  ;;  %v7599_v19 = vsub.f32 %v7589_v11, %v7597_v17  ;;  %v7931_v14 = vld [vmem:[%s16644_s25 + $0x10] sm:$0xff]  ;;  %v7930_v17 = vld [vmem:[%s16644_s25 + $0x8] sm:$0xff] }
0x37a8   :  { %v7602_v20 = vmul.f32 1.442695, %v7599_v19  ;;  %v7929_v19 = vld [vmem:[%s16644_s25] sm:$0xff] }
0x37aa   :  { %13587 = vpow2.f32 %v7602_v20  ;;  %v8034_v20 = vld [vmem:[%s16645_s5 + $0x38] sm:$0xff] }
0x37b3   :  { %v13586_v21 = vpop.eup %13585 }
0x37b4   :  { %v7604_v57 = vsel %vm1048_vm3, %v13586_v21, 0.0 }
0x37b5   :  { %7605 = vadd.xlane.f32.xlu0 %v7604_v57  ;;  %v8032_v57 = vld [vmem:[%s16645_s5 + $0x28] sm:$0xff] }
0x37b7   :  { %v13588_v24 = vpop.eup %13587 }
0x37b8   :  { %v7607_v23 = vsel %vm1048_vm3, %v13588_v24, 0.0 }
0x37b9   :  { %7608 = vadd.xlane.f32.xlu1 %v7607_v23 }
0x37ca   :  { %7690 = vrot.lane.b32.xlu1 %v15827_v56, %s14660_s0 }
0x37cb   :  { %7614 = vrot.lane.b32.xlu0 %v15829_v29, %s14660_s0 }
0x37ce   :  { %7768 = vrot.lane.b32.xlu1 %v15937_v18, %s14663_s7 }
0x37cf   :  { %7770 = vrot.lane.b32.xlu0 %v15939_v6, %s14663_s7 }
0x37d2   :  { %7776 = vrot.lane.b32.xlu1 %v7356_v4, %s14664_s9 }
0x37d3   :  { %7778 = vrot.lane.b32.xlu0 %v7432_v7, %s14664_s9 }
0x383e   :  { %v7606_v27 = vpop.xlane.xlu0 %7605 }
0x383f   :  { %13589 = vrcp.f32 %v7606_v27 }
0x3842   :  { %v7609_v22 = vpop.xlane.xlu1 %7608  ;;  %v7615_v31 = vpop.permute.xlu0 %7614 }
0x3843   :  { %13591 = vrcp.f32 %v7609_v22  ;;  %12993 = vmatpush3.msra.mxu0 %v7615_v31 }
0x3844   :  { %13002 = vmatprep.subr.mxu0 %v7799_v2 }
0x3846   :  { %v7691_v56 = vpop.permute.xlu1 %7690  ;;  %v7771_v35 = vpop.permute.xlu0 %7770 }
0x3847   :  { %12998 = vmatpush3.msra.mxu1 %v7691_v56  ;;  %v7791_v60 = vsel %vm1048_vm3, %v15897_v12, %v7771_v35  ;;  %v8029_v35 = vld [vmem:[%s16645_s5 + $0x10] sm:$0xff] }
0x3848   :  { %13013 = vmatprep.subr.mxu1 %v7932_v15 }
0x384a   :  { %v7769_v46 = vpop.permute.xlu1 %7768  ;;  %v7779_v53 = vpop.permute.xlu0 %7778 }
0x384b   :  { %v7790_v48 = vsel %vm1048_vm3, %v15895_v63, %v7769_v46  ;;  %v7793_v62 = vsel %vm2390_vm5, %v7791_v60, %v7779_v53  ;;  %v8030_v46 = vld [vmem:[%s16645_s5 + $0x18] sm:$0xff]  ;;  %v12067_v53 = vld [vmem:[#allocation2] ss:$0 sm:$0xff] }
0x384c   :  { %v13590_v29 = vpop.eup %13589 }
0x384d   :  { %v7611_v18 = vmul.f32 %v13590_v29, %v13586_v21  ;;  %v8033_v21 = vld [vmem:[%s16645_s5 + $0x30] sm:$0xff] }
0x384e   :  { %v7777_v47 = vpop.permute.xlu1 %7776 }
0x384f   :  { %12995 = vmatmul.mubr.msk.f32.vlgmr.msra.gmra.mxu0 %vm1048_vm3, %v7611_v18  ;;  %8175 = vst.msk [vmem:[#allocation61 + $0x18] sm:$0xff] %vm1048_vm3, %v7611_v18  ;;  %v7792_v54 = vsel %vm2390_vm5, %v7790_v48, %v7777_v47  ;;  %v7890_v18 = vld [vmem:[#allocation8] sm:$0x3]  ;;  %v8028_v47 = vld [vmem:[%s16645_s5 + $0x8] sm:$0xff] }
0x3850   :  { %v13592_v6 = vpop.eup %13591  ;;  %13003 = vmatpush3.msra.mxu0 %v7799_v2  ;;  %v8027_v48 = vld [vmem:[%s16645_s5] sm:$0xff] }
0x3851   :  { %v7613_v26 = vmul.f32 %v13592_v6, %v13588_v24  ;;  %13004 = vmatprep.subr.mxu0 %v7798_v0  ;;  %v8031_v24 = vld [vmem:[%s16645_s5 + $0x20] sm:$0xff] }
0x3852   :  { %13005 = vmatpush3.msra.mxu0 %v7798_v0 }
0x3853   :  { %13000 = vmatmul.mubr.msk.f32.vlgmr.msra.gmra.mxu1 %vm1048_vm3, %v7613_v26  ;;  %8179 = vst.msk [vmem:[#allocation61 + $0x38] sm:$0xff] %vm1048_vm3, %v7613_v26  ;;  %13006 = vmatprep.subr.mxu0 %v7797_v36  ;;  %v7920_v26 = vrot.slane %v7890_v18, %v15097_v28 }
0x3854   :  { %13007 = vmatpush3.msra.mxu0 %v7797_v36  ;;  %13014 = vmatpush3.msra.mxu1 %v7932_v15 }
0x3855   :  { %13008 = vmatprep.subr.mxu0 %v7796_v38  ;;  %13015 = vmatprep.subr.mxu1 %v7931_v14 }
0x3856   :  { %13009 = vmatpush3.msra.mxu0 %v7796_v38  ;;  %13016 = vmatpush3.msra.mxu1 %v7931_v14  ;;  %v8183_v14 = vld [vmem:[%s16646_s18 + $0x18] sm:$0xff] }
0x3857   :  { %13017 = vmatprep.subr.mxu1 %v7930_v17  ;;  %13024 = vmatprep.subr.mxu0 %v8034_v20 }
0x3858   :  { %13018 = vmatpush3.msra.mxu1 %v7930_v17  ;;  %v8182_v17 = vld [vmem:[%s16646_s18 + $0x10] sm:$0xff] }
0x3859   :  { %13019 = vmatprep.subr.mxu1 %v7929_v19 }
0x385a   :  { %13020 = vmatpush3.msra.mxu1 %v7929_v19  ;;  %v8181_v19 = vld [vmem:[%s16646_s18 + $0x8] sm:$0xff] }
0x385b   :  { %13043 = vmatprep.subr.mxu1 %v8183_v14 }
0x390f   :  { %v7686_v41 = vpop.f32.mrf.mxu0 }
0x3910   :  { %7784 = vrot.lane.b32.xlu1 %v7686_v41, %s14665_s17  ;;  %v7926_v41 = vrot.slane %v7890_v18, %v15099_v30 }
0x3911   :  { %v12996_v3 = vpop.f32.mrf.mxu0 }
0x3913   :  { %v7762_v43 = vpop.f32.mrf.mxu1 }
0x3914   :  { %7786 = vrot.lane.b32.xlu0 %v7762_v43, %s14665_s17 }
0x3915   :  { %v13001_v45 = vpop.f32.mrf.mxu1 }
0x3982   :  { %v7785_v58 = vpop.permute.xlu1 %7784 }
0x3983   :  { %v7794_v37 = vsel %vm2393_vm4, %v7792_v54, %v7785_v58 }
0x3984   :  { %13010 = vmatprep.mubr.msk.f32.mxu0 %vm859_vm1, %v7794_v37 }
0x3986   :  { %v7787_v33 = vpop.permute.xlu0 %7786 }
0x3987   :  { %v7795_v34 = vsel %vm2393_vm4, %v7793_v62, %v7787_v33 }
0x3988   :  { %13011 = vmatmul.mubr.msk.f32.vlgmr.msra.gmra.mxu0 %vm859_vm1, %v7795_v34 }
0x3989   :  { %13025 = vmatpush3.msra.mxu0 %v8034_v20  ;;  %v8180_v20 = vld [vmem:[%s16646_s18] sm:$0xff] }
0x398a   :  { %13026 = vmatprep.subr.mxu0 %v8033_v21 }
0x398b   :  { %13027 = vmatpush3.msra.mxu0 %v8033_v21 }
0x398c   :  { %13028 = vmatprep.subr.mxu0 %v8032_v57 }
0x398d   :  { %13029 = vmatpush3.msra.mxu0 %v8032_v57 }
0x398e   :  { %13030 = vmatprep.subr.mxu0 %v8031_v24 }
0x398f   :  { %13031 = vmatpush3.msra.mxu0 %v8031_v24 }
0x3990   :  { %13032 = vmatprep.subr.mxu0 %v8030_v46 }
0x3991   :  { %13033 = vmatpush3.msra.mxu0 %v8030_v46 }
0x3992   :  { %13034 = vmatprep.subr.mxu0 %v8029_v35 }
0x3993   :  { %13035 = vmatpush3.msra.mxu0 %v8029_v35 }
0x3994   :  { %13036 = vmatprep.subr.mxu0 %v8028_v47 }
0x3995   :  { %13037 = vmatpush3.msra.mxu0 %v8028_v47 }
0x3996   :  { %13038 = vmatprep.subr.mxu0 %v8027_v48 }
0x3997   :  { %13039 = vmatpush3.msra.mxu0 %v8027_v48 }
0x3998   :  { %13064 = vmatprep.subr.mxu0 %v14650_v52 }
0x3a48   :  { %v13012_v63 = vpop.f32.mrf.mxu0 }
0x3a49   :  { %v7885_v51 = vadd.f32 %v13012_v63, %v12064_v1  ;;  %v12070_v63 = vld [vmem:[#allocation5] ss:$0 sm:$0xff] }
0x3a4a   :  { %v7879_v4 = vpop.f32.mrf.mxu0 }
0x3a4b   :  { %v7889_v5 = vadd.f32 %v7885_v51, %v15819_v16  ;;  %v7880_v7 = vadd.f32 %v12064_v1, %v7879_v4 }
0x3a4d   :  { %v7888_v8 = vadd.f32 %v7880_v7, %v15817_v49  ;;  %v7894_v39 = vsel %vm859_vm1, %v7889_v5, 0.0 }
0x3a4e   :  { %7895 = vadd.xlane.f32.xlu0 %v7894_v39 }
0x3a4f   :  { %v7891_v12 = vsel %vm859_vm1, %v7888_v8, 0.0 }
0x3a50   :  { %7892 = vadd.xlane.f32.xlu1 %v7891_v12 }
0x3ad7   :  { %v7896_v59 = vpop.xlane.xlu0 %7895 }
0x3ad8   :  { %v7898_v61 = vmul.f32 0.03125, %v7896_v59 }
0x3ad9   :  { %v7893_v9 = vpop.xlane.xlu1 %7892 }
0x3ada   :  { %v7900_v10 = vsub.f32 %v7889_v5, %v7898_v61  ;;  %v7897_v11 = vmul.f32 0.03125, %v7893_v9 }
0x3adc   :  { %v7899_v13 = vsub.f32 %v7888_v8, %v7897_v11  ;;  %v7902_v16 = vmul.f32 %v7900_v10, %v7900_v10 }
0x3ade   :  { %v7906_v55 = vsel %vm859_vm1, %v7902_v16, 0.0  ;;  %v7901_v49 = vmul.f32 %v7899_v13, %v7899_v13 }
0x3adf   :  { %7907 = vadd.xlane.f32.xlu1 %v7906_v55 }
0x3ae0   :  { %v7903_v50 = vsel %vm859_vm1, %v7901_v49, 0.0 }
0x3ae1   :  { %7904 = vadd.xlane.f32.xlu0 %v7903_v50 }
0x3b68   :  { %v7908_v23 = vpop.xlane.xlu1 %7907 }
0x3b69   :  { %v7910_v27 = vmul.f32 0.03125, %v7908_v23 }
0x3b6a   :  { %v7905_v22 = vpop.xlane.xlu0 %7904 }
0x3b6b   :  { %v7912_v31 = vadd.f32 1e-05, %v7910_v27  ;;  %v7909_v56 = vmul.f32 0.03125, %v7905_v22 }
0x3b6d   :  { %13593 = vrsqrt.f32 %v7912_v31  ;;  %v7911_v29 = vadd.f32 1e-05, %v7909_v56  ;;  %v8125_v31 = vld [vmem:[#allocation10] sm:$0x3] }
0x3b6f   :  { %13595 = vrsqrt.f32 %v7911_v29  ;;  %v8155_v29 = vrot.slane %v8125_v31, %v15097_v28 }
0x3b7a   :  { %v13594_v6 = vpop.eup %13593 }
0x3b7b   :  { %v7916_v2 = vmul.f32 %v13594_v6, %v7900_v10 }
0x3b7c   :  { %v13596_v0 = vpop.eup %13595 }
0x3b7d   :  { %v7915_v36 = vmul.f32 %v13596_v0, %v7899_v13  ;;  %v7922_v38 = vmul.f32 %v7920_v26, %v7916_v2  ;;  %v8161_v0 = vrot.slane %v8125_v31, %v15099_v30 }
0x3b7f   :  { %v7921_v3 = vmul.f32 %v7920_v26, %v7915_v36  ;;  %v7928_v45 = vadd.f32 %v7926_v41, %v7922_v38 }
0x3b81   :  { %v7927_v43 = vadd.f32 %v7926_v41, %v7921_v3  ;;  %v12073_v3 = vld [vmem:[#allocation28] ss:$0 sm:$0xff] }
0x3b83   :  { %13021 = vmatprep.mubr.msk.f32.mxu1 %vm859_vm1, %v7927_v43 }
0x3b84   :  { %13022 = vmatmul.mubr.msk.f32.vlgmr.msra.gmra.mxu1 %vm859_vm1, %v7928_v45 }
0x3b85   :  { %13044 = vmatpush3.msra.mxu1 %v8183_v14 }
0x3b86   :  { %13045 = vmatprep.subr.mxu1 %v8182_v17 }
0x3b87   :  { %13046 = vmatpush3.msra.mxu1 %v8182_v17 }
0x3b88   :  { %13047 = vmatprep.subr.mxu1 %v8181_v19 }
0x3b89   :  { %13048 = vmatpush3.msra.mxu1 %v8181_v19 }
0x3b8a   :  { %13049 = vmatprep.subr.mxu1 %v8180_v20 }
0x3b8b   :  { %13050 = vmatpush3.msra.mxu1 %v8180_v20 }
0x3b8c   :  { %13054 = vmatprep.subr.mxu1 %v14650_v52 }
0x3c44   :  { %v13023_v54 = vpop.f32.mrf.mxu1 }
0x3c45   :  { %v8018_v58 = vadd.f32 %v13023_v54, %v12067_v53 }
0x3c46   :  { %v8012_v37 = vpop.f32.mrf.mxu1 }
0x3c47   :  { %v8013_v60 = vadd.f32 %v12067_v53, %v8012_v37  ;;  %v8024_v62 = vmul.f32 0.2, %v8018_v58  ;;  %vm8022_vm14 = vcmp.gt.f32.partialorder %v8018_v58, 0.0 }
0x3c49   :  { %vm8021_vm15 = vcmp.gt.f32.partialorder %v8013_v60, 0.0  ;;  %v8023_v33 = vmul.f32 0.2, %v8013_v60  ;;  %v8026_v1 = vsel %vm8022_vm14, %v8018_v58, %v8024_v62 }
0x3c4b   :  { %v8025_v34 = vsel %vm8021_vm15, %v8013_v60, %v8023_v33 }
0x3c4c   :  { %13040 = vmatprep.mubr.msk.f32.mxu0 %vm2642_vm8, %v8025_v34 }
0x3c4d   :  { %13041 = vmatmul.mubr.msk.f32.vlgmr.msra.gmra.mxu0 %vm2642_vm8, %v8026_v1 }
0x3c4e   :  { %13066 = vmatprep.mubr.msk.f32.mxu0 %vm14651_vm2, %v14650_v52 }
0x3d0d   :  { %v13042_v51 = vpop.f32.mrf.mxu0 }
0x3d0e   :  { %v8120_v4 = vadd.f32 %v13042_v51, %v12070_v63 }
0x3d0f   :  { %v8114_v5 = vpop.f32.mrf.mxu0 }
0x3d10   :  { %v8124_v7 = vadd.f32 %v8120_v4, %v7928_v45  ;;  %v8115_v8 = vadd.f32 %v12070_v63, %v8114_v5 }
0x3d12   :  { %v8123_v39 = vadd.f32 %v8115_v8, %v7927_v43  ;;  %v8129_v12 = vsel %vm859_vm1, %v8124_v7, 0.0 }
0x3d13   :  { %8130 = vadd.xlane.f32.xlu1 %v8129_v12 }
0x3d14   :  { %v8126_v59 = vsel %vm859_vm1, %v8123_v39, 0.0 }
0x3d15   :  { %8127 = vadd.xlane.f32.xlu0 %v8126_v59 }
0x3d9c   :  { %v8131_v61 = vpop.xlane.xlu1 %8130 }
0x3d9d   :  { %v8133_v9 = vmul.f32 0.03125, %v8131_v61 }
0x3d9e   :  { %v8128_v10 = vpop.xlane.xlu0 %8127 }
0x3d9f   :  { %v8135_v11 = vsub.f32 %v8124_v7, %v8133_v9  ;;  %v8132_v13 = vmul.f32 0.03125, %v8128_v10 }
0x3da1   :  { %v8134_v16 = vsub.f32 %v8123_v39, %v8132_v13  ;;  %v8137_v55 = vmul.f32 %v8135_v11, %v8135_v11 }
0x3da3   :  { %v8141_v49 = vsel %vm859_vm1, %v8137_v55, 0.0  ;;  %v8136_v50 = vmul.f32 %v8134_v16, %v8134_v16 }
0x3da4   :  { %8142 = vadd.xlane.f32.xlu1 %v8141_v49 }
0x3da5   :  { %v8138_v15 = vsel %vm859_vm1, %v8136_v50, 0.0 }
0x3da6   :  { %8139 = vadd.xlane.f32.xlu0 %v8138_v15 }
0x3e2d   :  { %v8143_v21 = vpop.xlane.xlu1 %8142 }
0x3e2e   :  { %v8145_v57 = vmul.f32 0.03125, %v8143_v21 }
0x3e2f   :  { %v8140_v24 = vpop.xlane.xlu0 %8139 }
0x3e30   :  { %v8147_v23 = vadd.f32 1e-05, %v8145_v57  ;;  %v8144_v27 = vmul.f32 0.03125, %v8140_v24 }
0x3e32   :  { %13597 = vrsqrt.f32 %v8147_v23  ;;  %v8146_v22 = vadd.f32 1e-05, %v8144_v27 }
0x3e34   :  { %13599 = vrsqrt.f32 %v8146_v22 }
0x3e3f   :  { %v13598_v56 = vpop.eup %13597 }
0x3e40   :  { %v8151_v18 = vmul.f32 %v13598_v56, %v8135_v11 }
0x3e41   :  { %v13600_v6 = vpop.eup %13599 }
0x3e42   :  { %v8150_v26 = vmul.f32 %v13600_v6, %v8134_v16  ;;  %v8157_v2 = vmul.f32 %v8155_v29, %v8151_v18 }
0x3e44   :  { %v8156_v36 = vmul.f32 %v8155_v29, %v8150_v26  ;;  %v16055_v41 = vadd.f32 %v8161_v0, %v8157_v2 }
0x3e46   :  { %v16053_v38 = vadd.f32 %v8161_v0, %v8156_v36 }
0x3e48   :  { %13051 = vmatprep.mubr.msk.f32.mxu1 %vm859_vm1, %v16053_v38 }
0x3e49   :  { %13052 = vmatmul.mubr.msk.f32.vlgmr.msra.gmra.mxu1 %vm859_vm1, %v16055_v41 }
0x3e4a   :  { %13056 = vmatprep.mubr.msk.f32.mxu1 %vm14651_vm2, %v14650_v52 }
0x3f09   :  { %v13053_v43 = vpop.f32.mrf.mxu1 }
0x3f0a   :  { %v16063_v45 = vadd.f32 %v13053_v43, %v12073_v3 }
0x3f0b   :  { %v8263_v46 = vpop.f32.mrf.mxu1 }
0x3f0c   :  { %v16065_v35 = vadd.f32 %v12073_v3, %v8263_v46  ;;  %8350 = vrot.lane.b32.xlu1 %v16063_v45, %s14652_s14 }
0x3f0e   :  { %8273 = vrot.lane.b32.xlu0 %v16065_v35, %s14652_s14 }
0x3f7e   :  { %v8351_v48 = vpop.permute.xlu1 %8350 }
0x3f80   :  { %v8274_v47 = vpop.permute.xlu0 %8273 }
0x3f81   :  { %13055 = vmatpush3.xpose.msk.msra.mxu1 %vm1048_vm3, %v8274_v47 }
0x3f82   :  { %13059 = vmatprep.subr.mxu1 %v14650_v52 }
0x3f84   :  { %13057 = vmatmul.mubr.msk.f32.vlgmr.msra.gmra.mxu1 %vm1048_vm3, %v16065_v35 }
0x3f85   :  { %13060 = vmatpush3.xpose.msk.msra.mxu1 %vm1048_vm3, %v8351_v48  ;;  %13061 = vmatprep.mubr.msk.f32.mxu1 %vm14651_vm2, %v14650_v52 }
0x3f86   :  { %13069 = vmatprep.subr.mxu1 %v14650_v52 }
0x3f88   :  { %13062 = vmatmul.mubr.msk.f32.vlgmr.msra.gmra.mxu1 %vm1048_vm3, %v16063_v45 }
0x3f89   :  { %13071 = vmatprep.mubr.msk.f32.mxu1 %vm14651_vm2, %v14650_v52 }
0x4044   :  { %v8345_v53 = vpop.f32.mrf.mxu1 }
0x4045   :  { %v8346_v54 = vadd.f32 %v8345_v53, %v15617_v44 }
0x4046   :  { %v13058_v58 = vpop.f32.mrf.mxu1 }
0x4047   :  { %v8426_v37 = vsel %vm1048_vm3, %v8346_v54, -inf }
0x4048   :  { %8427 = vmax.xlane.f32.xlu1 %v8426_v37  ;;  %v8422_v60 = vpop.f32.mrf.mxu1 }
0x4049   :  { %v8423_v62 = vadd.f32 %v8422_v60, %v15617_v44 }
0x404a   :  { %v13063_v33 = vpop.f32.mrf.mxu1 }
0x404b   :  { %v8429_v34 = vsel %vm1048_vm3, %v8423_v62, -inf }
0x404c   :  { %8430 = vmax.xlane.f32.xlu0 %v8429_v34 }
0x4059   :  { %8524 = vrot.lane.b32.xlu1 %v16063_v45, %s14653_s28 }
0x405d   :  { %8602 = vrot.lane.b32.xlu1 %v16065_v35, %s14654_s8 }
0x4062   :  { %8448 = vrot.lane.b32.xlu0 %v16065_v35, %s14653_s28  ;;  %s16647_s28 = sld [smem:[#allocation111_spill]] }
0x40d1   :  { %v8428_v1 = vpop.xlane.xlu1 %8427 }
0x40d2   :  { %v8432_v63 = vsub.f32 %v8346_v54, %v8428_v1 }
0x40d4   :  { %v8434_v51 = vmul.f32 1.442695, %v8432_v63 }
0x40d5   :  { %v8525_v4 = vpop.permute.xlu1 %8524  ;;  %v8431_v5 = vpop.xlane.xlu0 %8430 }
0x40d6   :  { %13601 = vpow2.f32 %v8434_v51  ;;  %v8433_v7 = vsub.f32 %v8423_v62, %v8431_v5  ;;  %13070 = vmatpush3.msra.mxu1 %v8525_v4 }
0x40d7   :  { %13079 = vmatprep.subr.mxu1 %v14650_v52 }
0x40d8   :  { %v8436_v8 = vmul.f32 1.442695, %v8433_v7 }
0x40d9   :  { %v8449_v39 = vpop.permute.xlu0 %8448  ;;  %v8603_v10 = vpop.permute.xlu1 %8602 }
0x40da   :  { %13603 = vpow2.f32 %v8436_v8  ;;  %13065 = vmatpush3.msra.mxu0 %v8449_v39 }
0x40db   :  { %13074 = vmatprep.subr.mxu0 %v14650_v52 }
0x40e3   :  { %v13602_v12 = vpop.eup %13601 }
0x40e4   :  { %v8438_v59 = vsel %vm1048_vm3, %v13602_v12, 0.0 }
0x40e5   :  { %8439 = vadd.xlane.f32.xlu0 %v8438_v59 }
0x40e7   :  { %v13604_v61 = vpop.eup %13603 }
0x40e8   :  { %v8441_v9 = vsel %vm1048_vm3, %v13604_v61, 0.0 }
0x40e9   :  { %8442 = vadd.xlane.f32.xlu1 %v8441_v9 }
0x40fa   :  { %8600 = vrot.lane.b32.xlu1 %v16065_v35, %s14655_s1 }
0x40fb   :  { %8680 = vrot.lane.b32.xlu0 %v16063_v45, %s14654_s8 }
0x40ff   :  { %8678 = vrot.lane.b32.xlu0 %v16063_v45, %s14655_s1 }
0x416e   :  { %v8440_v11 = vpop.xlane.xlu0 %8439 }
0x416f   :  { %13605 = vrcp.f32 %v8440_v11 }
0x4172   :  { %v8443_v13 = vpop.xlane.xlu1 %8442  ;;  %v8681_v50 = vpop.permute.xlu0 %8680 }
0x4173   :  { %13607 = vrcp.f32 %v8443_v13 }
0x4176   :  { %v8601_v14 = vpop.permute.xlu1 %8600  ;;  %v8679_v17 = vpop.permute.xlu0 %8678 }
0x417c   :  { %v13606_v16 = vpop.eup %13605 }
0x417d   :  { %v8445_v55 = vmul.f32 %v13606_v16, %v13602_v12 }
0x417f   :  { %13067 = vmatmul.mubr.msk.f32.vlgmr.msra.gmra.mxu0 %vm1048_vm3, %v8445_v55  ;;  %11645 = vst.msk [vmem:[#allocation62] sm:$0xff] %vm1048_vm3, %v8445_v55 }
0x4180   :  { %v13608_v49 = vpop.eup %13607  ;;  %13075 = vmatpush3.xpose.msk.msra.mxu0 %vm1048_vm3, %v8603_v10  ;;  %13076 = vmatprep.mubr.msk.f32.mxu0 %vm14651_vm2, %v14650_v52 }
0x4181   :  { %v8447_v15 = vmul.f32 %v13608_v49, %v13604_v61  ;;  %13084 = vmatprep.subr.mxu0 %v14650_v52 }
0x4183   :  { %13072 = vmatmul.mubr.msk.f32.vlgmr.msra.gmra.mxu1 %vm1048_vm3, %v8447_v15  ;;  %11649 = vst.msk [vmem:[#allocation62 + $0x20] sm:$0xff] %vm1048_vm3, %v8447_v15  ;;  %13077 = vmatmul.mubr.msk.f32.vlgmr.msra.gmra.mxu0 %vm1048_vm3, %v8601_v14 }
0x4184   :  { %13080 = vmatpush3.xpose.msk.msra.mxu1 %vm1048_vm3, %v8681_v50  ;;  %13081 = vmatprep.mubr.msk.f32.mxu1 %vm14651_vm2, %v14650_v52 }
0x4185   :  { %13089 = vmatprep.subr.mxu1 %v14650_v52  ;;  %13086 = vmatprep.mubr.msk.f32.mxu0 %vm14651_vm2, %v14650_v52 }
0x4187   :  { %13082 = vmatmul.mubr.msk.f32.vlgmr.msra.gmra.mxu1 %vm1048_vm3, %v8679_v17 }
0x4188   :  { %13091 = vmatprep.mubr.msk.f32.mxu1 %vm14651_vm2, %v14650_v52 }
0x423f   :  { %v16121_v19 = vpop.f32.mrf.mxu0 }
0x4241   :  { %v13068_v20 = vpop.f32.mrf.mxu0 }
0x4243   :  { %v16123_v21 = vpop.f32.mrf.mxu1  ;;  %v8674_v57 = vpop.f32.mrf.mxu0 }
0x4244   :  { %v8675_v24 = vadd.f32 %v8674_v57, %v15617_v44 }
0x4245   :  { %v13073_v23 = vpop.f32.mrf.mxu1  ;;  %v13078_v27 = vpop.f32.mrf.mxu0 }
0x4246   :  { %v8756_v22 = vsel %vm1048_vm3, %v8675_v24, -inf }
0x4247   :  { %8757 = vmax.xlane.f32.xlu1 %v8756_v22  ;;  %v8752_v31 = vpop.f32.mrf.mxu1 }
0x4248   :  { %v8753_v56 = vadd.f32 %v8752_v31, %v15617_v44 }
0x4249   :  { %v13083_v29 = vpop.f32.mrf.mxu1 }
0x424a   :  { %v8759_v18 = vsel %vm1048_vm3, %v8753_v56, -inf }
0x424b   :  { %8760 = vmax.xlane.f32.xlu0 %v8759_v18 }
0x4258   :  { %8854 = vrot.lane.b32.xlu1 %v16063_v45, %s14656_s21 }
0x425c   :  { %8932 = vrot.lane.b32.xlu1 %v16065_v35, %s14657_s2 }
0x4261   :  { %8778 = vrot.lane.b32.xlu0 %v16065_v35, %s14656_s21  ;;  %s16648_s21 = sld [smem:[#allocation114_spill]] }
0x42d0   :  { %v8758_v6 = vpop.xlane.xlu1 %8757 }
0x42d1   :  { %v8762_v26 = vsub.f32 %v8675_v24, %v8758_v6 }
0x42d3   :  { %v8764_v2 = vmul.f32 1.442695, %v8762_v26 }
0x42d4   :  { %v8855_v0 = vpop.permute.xlu1 %8854  ;;  %v8761_v36 = vpop.xlane.xlu0 %8760 }
0x42d5   :  { %13609 = vpow2.f32 %v8764_v2  ;;  %v8763_v3 = vsub.f32 %v8753_v56, %v8761_v36  ;;  %13090 = vmatpush3.msra.mxu1 %v8855_v0 }
0x42d6   :  { %13099 = vmatprep.subr.mxu1 %v14650_v52 }
0x42d7   :  { %v8766_v43 = vmul.f32 1.442695, %v8763_v3 }
0x42d8   :  { %v8779_v46 = vpop.permute.xlu0 %8778  ;;  %v8933_v58 = vpop.permute.xlu1 %8932 }
0x42d9   :  { %13611 = vpow2.f32 %v8766_v43  ;;  %13085 = vmatpush3.msra.mxu0 %v8779_v46 }
0x42da   :  { %13094 = vmatprep.subr.mxu0 %v14650_v52 }
0x42e2   :  { %v13610_v47 = vpop.eup %13609 }
0x42e3   :  { %v8768_v48 = vsel %vm1048_vm3, %v13610_v47, 0.0 }
0x42e4   :  { %8769 = vadd.xlane.f32.xlu0 %v8768_v48 }
0x42e6   :  { %v13612_v53 = vpop.eup %13611 }
0x42e7   :  { %v8771_v54 = vsel %vm1048_vm3, %v13612_v53, 0.0 }
0x42e8   :  { %8772 = vadd.xlane.f32.xlu1 %v8771_v54 }
0x42f9   :  { %8930 = vrot.lane.b32.xlu1 %v16065_v35, %s14658_s30 }
0x42fa   :  { %9010 = vrot.lane.b32.xlu0 %v16063_v45, %s14657_s2 }
0x42fe   :  { %9008 = vrot.lane.b32.xlu0 %v16063_v45, %s14658_s30 }
0x436d   :  { %v8770_v37 = vpop.xlane.xlu0 %8769 }
0x436e   :  { %13613 = vrcp.f32 %v8770_v37 }
0x4371   :  { %v8773_v60 = vpop.xlane.xlu1 %8772  ;;  %v9011_v1 = vpop.permute.xlu0 %9010 }
0x4372   :  { %13615 = vrcp.f32 %v8773_v60 }
0x4375   :  { %v8931_v51 = vpop.permute.xlu1 %8930  ;;  %v9009_v4 = vpop.permute.xlu0 %9008 }
0x437b   :  { %v13614_v62 = vpop.eup %13613 }
0x437c   :  { %v8775_v33 = vmul.f32 %v13614_v62, %v13610_v47 }
0x437e   :  { %13087 = vmatmul.mubr.msk.f32.vlgmr.msra.gmra.mxu0 %vm1048_vm3, %v8775_v33  ;;  %11646 = vst.msk [vmem:[#allocation62 + $0x8] sm:$0xff] %vm1048_vm3, %v8775_v33 }
0x437f   :  { %v13616_v34 = vpop.eup %13615  ;;  %13095 = vmatpush3.xpose.msk.msra.mxu0 %vm1048_vm3, %v8933_v58  ;;  %13096 = vmatprep.mubr.msk.f32.mxu0 %vm14651_vm2, %v14650_v52 }
0x4380   :  { %v8777_v63 = vmul.f32 %v13616_v34, %v13612_v53  ;;  %13104 = vmatprep.subr.mxu0 %v14650_v52 }
0x4382   :  { %13092 = vmatmul.mubr.msk.f32.vlgmr.msra.gmra.mxu1 %vm1048_vm3, %v8777_v63  ;;  %11650 = vst.msk [vmem:[#allocation62 + $0x28] sm:$0xff] %vm1048_vm3, %v8777_v63  ;;  %13097 = vmatmul.mubr.msk.f32.vlgmr.msra.gmra.mxu0 %vm1048_vm3, %v8931_v51 }
0x4383   :  { %13100 = vmatpush3.xpose.msk.msra.mxu1 %vm1048_vm3, %v9011_v1  ;;  %13101 = vmatprep.mubr.msk.f32.mxu1 %vm14651_vm2, %v14650_v52 }
0x4384   :  { %13109 = vmatprep.subr.mxu1 %v14650_v52  ;;  %13106 = vmatprep.mubr.msk.f32.mxu0 %vm14651_vm2, %v14650_v52 }
0x4386   :  { %13102 = vmatmul.mubr.msk.f32.vlgmr.msra.gmra.mxu1 %vm1048_vm3, %v9009_v4 }
0x4387   :  { %13111 = vmatprep.mubr.msk.f32.mxu1 %vm14651_vm2, %v14650_v52 }
0x443e   :  { %v16163_v5 = vpop.f32.mrf.mxu0 }
0x4440   :  { %v13088_v7 = vpop.f32.mrf.mxu0 }
0x4442   :  { %v16165_v8 = vpop.f32.mrf.mxu1  ;;  %v9004_v39 = vpop.f32.mrf.mxu0 }
0x4443   :  { %v9005_v12 = vadd.f32 %v9004_v39, %v15617_v44 }
0x4444   :  { %v13093_v59 = vpop.f32.mrf.mxu1  ;;  %v13098_v61 = vpop.f32.mrf.mxu0 }
0x4445   :  { %v9086_v9 = vsel %vm1048_vm3, %v9005_v12, -inf }
0x4446   :  { %9087 = vmax.xlane.f32.xlu1 %v9086_v9  ;;  %v9082_v10 = vpop.f32.mrf.mxu1 }
0x4447   :  { %v9083_v11 = vadd.f32 %v9082_v10, %v15617_v44 }
0x4448   :  { %v13103_v13 = vpop.f32.mrf.mxu1 }
0x4449   :  { %v9089_v16 = vsel %vm1048_vm3, %v9083_v11, -inf }
0x444a   :  { %9090 = vmax.xlane.f32.xlu0 %v9089_v16  ;;  %v9623_v16 = vld [vmem:[%s16647_s28 + $0x18] sm:$0xff] }
0x4457   :  { %9184 = vrot.lane.b32.xlu1 %v16063_v45, %s14659_s3 }
0x445b   :  { %9262 = vrot.lane.b32.xlu1 %v16065_v35, %s14660_s0 }
0x4460   :  { %9108 = vrot.lane.b32.xlu0 %v16065_v35, %s14659_s3  ;;  %s16649_s3 = sld [smem:[#allocation116_spill]] }
0x44cf   :  { %v9088_v55 = vpop.xlane.xlu1 %9087 }
0x44d0   :  { %v9092_v49 = vsub.f32 %v9005_v12, %v9088_v55  ;;  %v9622_v55 = vld [vmem:[%s16647_s28 + $0x10] sm:$0xff] }
0x44d2   :  { %v9094_v50 = vmul.f32 1.442695, %v9092_v49  ;;  %v9621_v49 = vld [vmem:[%s16647_s28 + $0x8] sm:$0xff] }
0x44d3   :  { %v9185_v15 = vpop.permute.xlu1 %9184  ;;  %v9091_v14 = vpop.xlane.xlu0 %9090 }
0x44d4   :  { %13617 = vpow2.f32 %v9094_v50  ;;  %v9093_v17 = vsub.f32 %v9083_v11, %v9091_v14  ;;  %13110 = vmatpush3.msra.mxu1 %v9185_v15  ;;  %v9620_v50 = vld [vmem:[%s16647_s28] sm:$0xff]  ;;  %v9848_v15 = vld [vmem:[%s16648_s21 + $0x18] sm:$0xff] }
0x44d5   :  { %13119 = vmatprep.subr.mxu1 %v14650_v52 }
0x44d6   :  { %v9096_v20 = vmul.f32 1.442695, %v9093_v17 }
0x44d7   :  { %v9109_v57 = vpop.permute.xlu0 %9108  ;;  %v9263_v31 = vpop.permute.xlu1 %9262 }
0x44d8   :  { %13619 = vpow2.f32 %v9096_v20  ;;  %13105 = vmatpush3.msra.mxu0 %v9109_v57 }
0x44d9   :  { %13114 = vmatprep.subr.mxu0 %v14650_v52 }
0x44e1   :  { %v13618_v24 = vpop.eup %13617 }
0x44e2   :  { %v9098_v23 = vsel %vm1048_vm3, %v13618_v24, 0.0 }
0x44e3   :  { %9099 = vadd.xlane.f32.xlu0 %v9098_v23 }
0x44e5   :  { %v13620_v27 = vpop.eup %13619 }
0x44e6   :  { %v9101_v22 = vsel %vm1048_vm3, %v13620_v27, 0.0 }
0x44e7   :  { %9102 = vadd.xlane.f32.xlu1 %v9101_v22 }
0x44f8   :  { %9260 = vrot.lane.b32.xlu1 %v16065_v35, %s14661_s19 }
0x44f9   :  { %9340 = vrot.lane.b32.xlu0 %v16063_v45, %s14660_s0 }
0x44fd   :  { %9338 = vrot.lane.b32.xlu0 %v16063_v45, %s14661_s19 }
0x456c   :  { %v9100_v56 = vpop.xlane.xlu0 %9099 }
0x456d   :  { %13621 = vrcp.f32 %v9100_v56 }
0x4570   :  { %v9103_v29 = vpop.xlane.xlu1 %9102  ;;  %v9341_v2 = vpop.permute.xlu0 %9340 }
0x4571   :  { %13623 = vrcp.f32 %v9103_v29 }
0x4574   :  { %v9261_v36 = vpop.permute.xlu1 %9260  ;;  %v9339_v3 = vpop.permute.xlu0 %9338 }
0x457a   :  { %v13622_v18 = vpop.eup %13621 }
0x457b   :  { %v9105_v6 = vmul.f32 %v13622_v18, %v13618_v24 }
0x457d   :  { %13107 = vmatmul.mubr.msk.f32.vlgmr.msra.gmra.mxu0 %vm1048_vm3, %v9105_v6  ;;  %11647 = vst.msk [vmem:[#allocation62 + $0x10] sm:$0xff] %vm1048_vm3, %v9105_v6 }
0x457e   :  { %v13624_v26 = vpop.eup %13623  ;;  %13115 = vmatpush3.xpose.msk.msra.mxu0 %vm1048_vm3, %v9263_v31  ;;  %13116 = vmatprep.mubr.msk.f32.mxu0 %vm14651_vm2, %v14650_v52 }
0x457f   :  { %v9107_v0 = vmul.f32 %v13624_v26, %v13620_v27  ;;  %13124 = vmatprep.subr.mxu0 %v14650_v52 }
0x4581   :  { %13112 = vmatmul.mubr.msk.f32.vlgmr.msra.gmra.mxu1 %vm1048_vm3, %v9107_v0  ;;  %11651 = vst.msk [vmem:[#allocation62 + $0x30] sm:$0xff] %vm1048_vm3, %v9107_v0  ;;  %13117 = vmatmul.mubr.msk.f32.vlgmr.msra.gmra.mxu0 %vm1048_vm3, %v9261_v36  ;;  %v9847_v36 = vld [vmem:[%s16648_s21 + $0x10] sm:$0xff] }
0x4582   :  { %13120 = vmatpush3.xpose.msk.msra.mxu1 %vm1048_vm3, %v9341_v2  ;;  %13121 = vmatprep.mubr.msk.f32.mxu1 %vm14651_vm2, %v14650_v52 }
0x4583   :  { %13129 = vmatprep.subr.mxu1 %v14650_v52  ;;  %13126 = vmatprep.mubr.msk.f32.mxu0 %vm14651_vm2, %v14650_v52 }
0x4585   :  { %13122 = vmatmul.mubr.msk.f32.vlgmr.msra.gmra.mxu1 %vm1048_vm3, %v9339_v3  ;;  %v9845_v3 = vld [vmem:[%s16648_s21] sm:$0xff] }
0x4586   :  { %13131 = vmatprep.mubr.msk.f32.mxu1 %vm14651_vm2, %v14650_v52 }
0x463d   :  { %v9180_v43 = vpop.f32.mrf.mxu0 }
0x463f   :  { %v13108_v46 = vpop.f32.mrf.mxu0 }
0x4641   :  { %v9256_v47 = vpop.f32.mrf.mxu1  ;;  %v9334_v48 = vpop.f32.mrf.mxu0 }
0x4642   :  { %v9335_v53 = vadd.f32 %v9334_v48, %v15617_v44 }
0x4643   :  { %v13113_v54 = vpop.f32.mrf.mxu1  ;;  %v13118_v58 = vpop.f32.mrf.mxu0 }
0x4644   :  { %v9416_v37 = vsel %vm1048_vm3, %v9335_v53, -inf  ;;  %v12106_v58 = vld [vmem:[#allocation29] ss:$0 sm:$0xff] }
0x4645   :  { %9417 = vmax.xlane.f32.xlu1 %v9416_v37  ;;  %v9412_v60 = vpop.f32.mrf.mxu1 }
0x4646   :  { %v9413_v62 = vadd.f32 %v9412_v60, %v15617_v44 }
0x4647   :  { %v13123_v33 = vpop.f32.mrf.mxu1 }
0x4648   :  { %v9419_v34 = vsel %vm1048_vm3, %v9413_v62, -inf }
0x4649   :  { %9420 = vmax.xlane.f32.xlu0 %v9419_v34 }
0x46ce   :  { %v9418_v1 = vpop.xlane.xlu1 %9417 }
0x46cf   :  { %v9422_v63 = vsub.f32 %v9335_v53, %v9418_v1 }
0x46d1   :  { %v9424_v51 = vmul.f32 1.442695, %v9422_v63 }
0x46d2   :  { %v9421_v4 = vpop.xlane.xlu0 %9420 }
0x46d3   :  { %13625 = vpow2.f32 %v9424_v51  ;;  %v9423_v7 = vsub.f32 %v9413_v62, %v9421_v4 }
0x46d5   :  { %v9426_v39 = vmul.f32 1.442695, %v9423_v7 }
0x46d7   :  { %13627 = vpow2.f32 %v9426_v39  ;;  %v9756_v39 = vld [vmem:[%s16649_s3 + $0x18] sm:$0xff] }
0x46e0   :  { %v13626_v12 = vpop.eup %13625 }
0x46e1   :  { %v9428_v59 = vsel %vm1048_vm3, %v13626_v12, 0.0 }
0x46e2   :  { %9429 = vadd.xlane.f32.xlu0 %v9428_v59  ;;  %v9754_v59 = vld [vmem:[%s16649_s3 + $0x8] sm:$0xff] }
0x46e4   :  { %v13628_v61 = vpop.eup %13627 }
0x46e5   :  { %v9431_v9 = vsel %vm1048_vm3, %v13628_v61, 0.0 }
0x46e6   :  { %9432 = vadd.xlane.f32.xlu1 %v9431_v9 }
0x46f7   :  { %9514 = vrot.lane.b32.xlu1 %v16063_v45, %s14662_s24 }
0x46f8   :  { %9438 = vrot.lane.b32.xlu0 %v16065_v35, %s14662_s24 }
0x46fb   :  { %9592 = vrot.lane.b32.xlu1 %v16163_v5, %s14663_s7 }
0x46fc   :  { %9594 = vrot.lane.b32.xlu0 %v16165_v8, %s14663_s7 }
0x46ff   :  { %9600 = vrot.lane.b32.xlu1 %v9180_v43, %s14664_s9 }
0x4700   :  { %9602 = vrot.lane.b32.xlu0 %v9256_v47, %s14664_s9 }
0x476b   :  { %v9430_v44 = vpop.xlane.xlu0 %9429 }
0x476c   :  { %13629 = vrcp.f32 %v9430_v44 }
0x476f   :  { %v9433_v10 = vpop.xlane.xlu1 %9432  ;;  %v9439_v11 = vpop.permute.xlu0 %9438 }
0x4770   :  { %13631 = vrcp.f32 %v9433_v10  ;;  %13125 = vmatpush3.msra.mxu0 %v9439_v11 }
0x4771   :  { %13134 = vmatprep.subr.mxu0 %v9623_v16 }
0x4773   :  { %v9515_v45 = vpop.permute.xlu1 %9514  ;;  %v9595_v23 = vpop.permute.xlu0 %9594 }
0x4774   :  { %13130 = vmatpush3.msra.mxu1 %v9515_v45  ;;  %v9615_v6 = vsel %vm1048_vm3, %v16123_v21, %v9595_v23  ;;  %v12100_v21 = vld [vmem:[#allocation26] ss:$0 sm:$0xff] }
0x4775   :  { %13145 = vmatprep.subr.mxu1 %v9756_v39 }
0x4777   :  { %v9593_v24 = vpop.permute.xlu1 %9592  ;;  %v9603_v31 = vpop.permute.xlu0 %9602 }
0x4778   :  { %v9614_v22 = vsel %vm1048_vm3, %v16121_v19, %v9593_v24  ;;  %v9617_v26 = vsel %vm2390_vm5, %v9615_v6, %v9603_v31  ;;  %v9846_v19 = vld [vmem:[%s16648_s21 + $0x8] sm:$0xff] }
0x4779   :  { %v13630_v35 = vpop.eup %13629 }
0x477a   :  { %v9435_v5 = vmul.f32 %v13630_v35, %v13626_v12  ;;  %v9755_v12 = vld [vmem:[%s16649_s3 + $0x10] sm:$0xff] }
0x477b   :  { %v9601_v27 = vpop.permute.xlu1 %9600 }
0x477c   :  { %13127 = vmatmul.mubr.msk.f32.vlgmr.msra.gmra.mxu0 %vm1048_vm3, %v9435_v5  ;;  %11648 = vst.msk [vmem:[#allocation62 + $0x18] sm:$0xff] %vm1048_vm3, %v9435_v5  ;;  %v9616_v56 = vsel %vm2390_vm5, %v9614_v22, %v9601_v27  ;;  %v9714_v5 = vld [vmem:[#allocation22] sm:$0x3]  ;;  %v12103_v27 = vld [vmem:[#allocation32] ss:$0 sm:$0xff] }
0x477d   :  { %v13632_v8 = vpop.eup %13631  ;;  %13135 = vmatpush3.msra.mxu0 %v9623_v16 }
0x477e   :  { %v9437_v13 = vmul.f32 %v13632_v8, %v13628_v61  ;;  %13136 = vmatprep.subr.mxu0 %v9622_v55  ;;  %v9753_v61 = vld [vmem:[%s16649_s3] sm:$0xff] }
0x477f   :  { %13137 = vmatpush3.msra.mxu0 %v9622_v55 }
0x4780   :  { %13132 = vmatmul.mubr.msk.f32.vlgmr.msra.gmra.mxu1 %vm1048_vm3, %v9437_v13  ;;  %11652 = vst.msk [vmem:[#allocation62 + $0x38] sm:$0xff] %vm1048_vm3, %v9437_v13  ;;  %13138 = vmatprep.subr.mxu0 %v9621_v49  ;;  %v9744_v13 = vrot.slane %v9714_v5, %v15097_v28 }
0x4781   :  { %13139 = vmatpush3.msra.mxu0 %v9621_v49  ;;  %13146 = vmatpush3.msra.mxu1 %v9756_v39 }
0x4782   :  { %13140 = vmatprep.subr.mxu0 %v9620_v50  ;;  %13147 = vmatprep.subr.mxu1 %v9755_v12 }
0x4783   :  { %13141 = vmatpush3.msra.mxu0 %v9620_v50  ;;  %13148 = vmatpush3.msra.mxu1 %v9755_v12 }
0x4784   :  { %13156 = vmatprep.subr.mxu0 %v9848_v15  ;;  %13149 = vmatprep.subr.mxu1 %v9754_v59 }
0x4785   :  { %13150 = vmatpush3.msra.mxu1 %v9754_v59 }
0x4786   :  { %13151 = vmatprep.subr.mxu1 %v9753_v61 }
0x4787   :  { %13152 = vmatpush3.msra.mxu1 %v9753_v61 }
0x4788   :  { %13167 = vmatprep.subr.mxu1 %v14650_v52 }
0x483c   :  { %v9510_v14 = vpop.f32.mrf.mxu0 }
0x483d   :  { %9608 = vrot.lane.b32.xlu1 %v9510_v14, %s14665_s17 }
0x483e   :  { %v13128_v17 = vpop.f32.mrf.mxu0 }
0x4840   :  { %v9586_v20 = vpop.f32.mrf.mxu1 }
0x4841   :  { %9610 = vrot.lane.b32.xlu0 %v9586_v20, %s14665_s17 }
0x4842   :  { %v13133_v57 = vpop.f32.mrf.mxu1 }
0x48af   :  { %v9609_v29 = vpop.permute.xlu1 %9608 }
0x48b0   :  { %v9618_v18 = vsel %vm2393_vm4, %v9616_v56, %v9609_v29 }
0x48b1   :  { %13142 = vmatprep.mubr.msk.f32.mxu0 %vm859_vm1, %v9618_v18 }
0x48b3   :  { %v9611_v2 = vpop.permute.xlu0 %9610 }
0x48b4   :  { %v9619_v0 = vsel %vm2393_vm4, %v9617_v26, %v9611_v2 }
0x48b5   :  { %13143 = vmatmul.mubr.msk.f32.vlgmr.msra.gmra.mxu0 %vm859_vm1, %v9619_v0 }
0x48b6   :  { %13157 = vmatpush3.msra.mxu0 %v9848_v15  ;;  %13164 = vmatprep.mubr.msk.f32.mxu0 %vm859_vm1, %v15804_v32  ;;  %v9750_v15 = vrot.slane %v9714_v5, %v15099_v30 }
0x48b7   :  { %13158 = vmatprep.subr.mxu0 %v9847_v36 }
0x48b8   :  { %13159 = vmatpush3.msra.mxu0 %v9847_v36 }
0x48b9   :  { %13160 = vmatprep.subr.mxu0 %v9846_v19 }
0x48ba   :  { %13161 = vmatpush3.msra.mxu0 %v9846_v19 }
0x48bb   :  { %13162 = vmatprep.subr.mxu0 %v9845_v3 }
0x48bc   :  { %13163 = vmatpush3.msra.mxu0 %v9845_v3 }
0x48bd   :  { %13165 = vmatmul.mubr.msk.f32.vlgmr.msra.gmra.mxu0 %vm859_vm1, %v15806_v42  ;;  %13177 = vmatprep.subr.mxu0 %v14650_v52 }
0x48be   :  { %13179 = vmatprep.mubr.msk.f32.mxu0 %vm14651_vm2, %v14650_v52 }
0x4975   :  { %v13144_v43 = vpop.f32.mrf.mxu0 }
0x4976   :  { %v9709_v46 = vadd.f32 %v13144_v43, %v12100_v21 }
0x4977   :  { %v9703_v32 = vpop.f32.mrf.mxu0 }
0x4978   :  { %v9713_v47 = vadd.f32 %v9709_v46, %v16055_v41  ;;  %v9704_v48 = vadd.f32 %v12100_v21, %v9703_v32 }
0x497a   :  { %v9712_v53 = vadd.f32 %v9704_v48, %v16053_v38  ;;  %v9718_v54 = vsel %vm859_vm1, %v9713_v47, 0.0 }
0x497b   :  { %9719 = vadd.xlane.f32.xlu0 %v9718_v54 }
0x497c   :  { %v9715_v42 = vsel %vm859_vm1, %v9712_v53, 0.0 }
0x497d   :  { %v13166_v37 = vpop.f32.mrf.mxu0  ;;  %9716 = vadd.xlane.f32.xlu1 %v9715_v42 }
0x497e   :  { %v16256_v60 = vadd.f32 %v13166_v37, %v12106_v58 }
0x497f   :  { %v9922_v17 = vpop.f32.mrf.mxu0 }
0x4980   :  { %v16271_v24 = vadd.f32 %v12106_v58, %v9922_v17 }
0x4a04   :  { %v9720_v62 = vpop.xlane.xlu0 %9719 }
0x4a05   :  { %v9722_v33 = vmul.f32 0.03125, %v9720_v62 }
0x4a06   :  { %v9717_v34 = vpop.xlane.xlu1 %9716 }
0x4a07   :  { %v9724_v41 = vsub.f32 %v9713_v47, %v9722_v33  ;;  %v9721_v1 = vmul.f32 0.03125, %v9717_v34 }
0x4a09   :  { %v9723_v38 = vsub.f32 %v9712_v53, %v9721_v1  ;;  %v9726_v63 = vmul.f32 %v9724_v41, %v9724_v41 }
0x4a0b   :  { %v9730_v51 = vsel %vm859_vm1, %v9726_v63, 0.0  ;;  %v9725_v4 = vmul.f32 %v9723_v38, %v9723_v38 }
0x4a0c   :  { %9731 = vadd.xlane.f32.xlu1 %v9730_v51 }
0x4a0d   :  { %v9727_v7 = vsel %vm859_vm1, %v9725_v4, 0.0 }
0x4a0e   :  { %9728 = vadd.xlane.f32.xlu0 %v9727_v7 }
0x4a95   :  { %v9732_v9 = vpop.xlane.xlu1 %9731 }
0x4a96   :  { %v9734_v44 = vmul.f32 0.03125, %v9732_v9 }
0x4a97   :  { %v9729_v10 = vpop.xlane.xlu0 %9728 }
0x4a98   :  { %v9736_v11 = vadd.f32 1e-05, %v9734_v44  ;;  %v9733_v45 = vmul.f32 0.03125, %v9729_v10 }
0x4a9a   :  { %13633 = vrsqrt.f32 %v9736_v11  ;;  %v9735_v35 = vadd.f32 1e-05, %v9733_v45 }
0x4a9c   :  { %13635 = vrsqrt.f32 %v9735_v35 }
0x4aa7   :  { %v13634_v8 = vpop.eup %13633 }
0x4aa8   :  { %v9740_v16 = vmul.f32 %v13634_v8, %v9724_v41 }
0x4aa9   :  { %v13636_v55 = vpop.eup %13635 }
0x4aaa   :  { %v9739_v49 = vmul.f32 %v13636_v55, %v9723_v38  ;;  %v9746_v50 = vmul.f32 %v9744_v13, %v9740_v16 }
0x4aac   :  { %v9745_v14 = vmul.f32 %v9744_v13, %v9739_v49  ;;  %v16269_v57 = vadd.f32 %v9750_v15, %v9746_v50 }
0x4aae   :  { %v16267_v20 = vadd.f32 %v9750_v15, %v9745_v14 }
0x4ab0   :  { %13153 = vmatprep.mubr.msk.f32.mxu1 %vm859_vm1, %v16267_v20 }
0x4ab1   :  { %13154 = vmatmul.mubr.msk.f32.vlgmr.msra.gmra.mxu1 %vm859_vm1, %v16269_v57 }
0x4ab2   :  { %13168 = vmatpush3.xpose.msk.msra.mxu1 %vm1048_vm3, %v16271_v24  ;;  %13169 = vmatprep.mubr.msk.f32.mxu1 %vm14651_vm2, %v14650_v52 }
0x4ab3   :  { %13172 = vmatprep.subr.mxu1 %v14650_v52 }
0x4b71   :  { %v13155_v23 = vpop.f32.mrf.mxu1 }
0x4b72   :  { %v16290_v56 = vadd.f32 %v13155_v23, %v12103_v27 }
0x4b73   :  { %v9836_v22 = vpop.f32.mrf.mxu1 }
0x4b74   :  { %v16282_v31 = vadd.f32 %v12103_v27, %v9836_v22 }
0x4b76   :  { %13170 = vmatmul.mubr.msk.f32.vlgmr.msra.gmra.mxu1 %vm1048_vm3, %v16282_v31 }
0x4b77   :  { %13173 = vmatpush3.xpose.msk.msra.mxu1 %vm1048_vm3, %v16256_v60  ;;  %13174 = vmatprep.mubr.msk.f32.mxu1 %vm14651_vm2, %v14650_v52 }
0x4b78   :  { %13182 = vmatprep.subr.mxu1 %v14650_v52 }
0x4b7a   :  { %13175 = vmatmul.mubr.msk.f32.vlgmr.msra.gmra.mxu1 %vm1048_vm3, %v16290_v56 }
0x4b7b   :  { %13184 = vmatprep.mubr.msk.f32.mxu1 %vm14651_vm2, %v14650_v52 }
0x4c36   :  { %v10003_v29 = vpop.f32.mrf.mxu1 }
0x4c37   :  { %v10004_v18 = vadd.f32 %v10003_v29, %v15852_v25 }
0x4c38   :  { %v13171_v6 = vpop.f32.mrf.mxu1 }
0x4c39   :  { %v10083_v26 = vsel %vm1048_vm3, %v10004_v18, -inf }
0x4c3a   :  { %10084 = vmax.xlane.f32.xlu0 %v10083_v26  ;;  %v10079_v2 = vpop.f32.mrf.mxu1 }
0x4c3b   :  { %v10080_v0 = vadd.f32 %v10079_v2, %v15856_v40 }
0x4c3c   :  { %v13176_v36 = vpop.f32.mrf.mxu1 }
0x4c3d   :  { %v10086_v19 = vsel %vm1048_vm3, %v10080_v0, -inf }
0x4c3e   :  { %10087 = vmax.xlane.f32.xlu1 %v10086_v19 }
0x4c4f   :  { %10181 = vrot.lane.b32.xlu1 %v16256_v60, %s14652_s14 }
0x4c50   :  { %10105 = vrot.lane.b32.xlu0 %v16271_v24, %s14652_s14  ;;  %s16650_s14 = sld [smem:[#allocation115_spill]] }
0x4c53   :  { %10259 = vrot.lane.b32.xlu1 %v16271_v24, %s14655_s1 }
0x4cc3   :  { %v10085_v3 = vpop.xlane.xlu0 %10084 }
0x4cc4   :  { %v10089_v21 = vsub.f32 %v10004_v18, %v10085_v3 }
0x4cc6   :  { %v10091_v43 = vmul.f32 1.442695, %v10089_v21 }
0x4cc7   :  { %v10106_v46 = vpop.permute.xlu0 %10105  ;;  %v10088_v32 = vpop.xlane.xlu1 %10087 }
0x4cc8   :  { %13637 = vpow2.f32 %v10091_v43  ;;  %v10090_v47 = vsub.f32 %v10080_v0, %v10088_v32  ;;  %13178 = vmatpush3.msra.mxu0 %v10106_v46 }
0x4cc9   :  { %13187 = vmatprep.subr.mxu0 %v14650_v52 }
0x4cca   :  { %v10093_v48 = vmul.f32 1.442695, %v10090_v47 }
0x4ccb   :  { %v10182_v53 = vpop.permute.xlu1 %10181 }
0x4ccc   :  { %13639 = vpow2.f32 %v10093_v48  ;;  %13183 = vmatpush3.msra.mxu1 %v10182_v53 }
0x4ccd   :  { %13192 = vmatprep.subr.mxu1 %v14650_v52 }
0x4ccf   :  { %v10260_v62 = vpop.permute.xlu1 %10259 }
0x4cd5   :  { %v13638_v54 = vpop.eup %13637 }
0x4cd6   :  { %v10095_v58 = vsel %vm1048_vm3, %v13638_v54, 0.0 }
0x4cd7   :  { %10096 = vadd.xlane.f32.xlu0 %v10095_v58 }
0x4cd9   :  { %v13640_v42 = vpop.eup %13639 }
0x4cda   :  { %v10098_v37 = vsel %vm1048_vm3, %v13640_v42, 0.0 }
0x4cdb   :  { %10099 = vadd.xlane.f32.xlu1 %v10098_v37 }
0x4cec   :  { %10257 = vrot.lane.b32.xlu1 %v16282_v31, %s14655_s1 }
0x4ced   :  { %10337 = vrot.lane.b32.xlu0 %v16256_v60, %s14655_s1 }
0x4cf1   :  { %10335 = vrot.lane.b32.xlu0 %v16290_v56, %s14655_s1  ;;  %s16652_s1 = sld [smem:[#allocation107_spill]] }
0x4d60   :  { %v10097_v33 = vpop.xlane.xlu0 %10096 }
0x4d61   :  { %13641 = vrcp.f32 %v10097_v33 }
0x4d64   :  { %v10100_v34 = vpop.xlane.xlu1 %10099  ;;  %v10338_v63 = vpop.permute.xlu0 %10337 }
0x4d65   :  { %13643 = vrcp.f32 %v10100_v34 }
0x4d68   :  { %v10258_v4 = vpop.permute.xlu1 %10257  ;;  %v10336_v7 = vpop.permute.xlu0 %10335 }
0x4d6e   :  { %v13642_v41 = vpop.eup %13641 }
0x4d6f   :  { %v10102_v1 = vmul.f32 %v13642_v41, %v13638_v54 }
0x4d71   :  { %13180 = vmatmul.mubr.msk.f32.vlgmr.msra.gmra.mxu0 %vm1048_vm3, %v10102_v1  ;;  %11653 = vst.msk [vmem:[#allocation64] sm:$0xff] %vm1048_vm3, %v10102_v1 }
0x4d72   :  { %v13644_v38 = vpop.eup %13643  ;;  %13188 = vmatpush3.xpose.msk.msra.mxu0 %vm1048_vm3, %v10260_v62  ;;  %13189 = vmatprep.mubr.msk.f32.mxu0 %vm14651_vm2, %v14650_v52 }
0x4d73   :  { %v10104_v51 = vmul.f32 %v13644_v38, %v13640_v42  ;;  %13197 = vmatprep.subr.mxu0 %v14650_v52 }
0x4d75   :  { %13185 = vmatmul.mubr.msk.f32.vlgmr.msra.gmra.mxu1 %vm1048_vm3, %v10104_v51  ;;  %11657 = vst.msk [vmem:[#allocation64 + $0x20] sm:$0xff] %vm1048_vm3, %v10104_v51  ;;  %13190 = vmatmul.mubr.msk.f32.vlgmr.msra.gmra.mxu0 %vm1048_vm3, %v10258_v4 }
0x4d76   :  { %13193 = vmatpush3.xpose.msk.msra.mxu1 %vm1048_vm3, %v10338_v63  ;;  %13194 = vmatprep.mubr.msk.f32.mxu1 %vm14651_vm2, %v14650_v52 }
0x4d77   :  { %13202 = vmatprep.subr.mxu1 %v14650_v52  ;;  %13199 = vmatprep.mubr.msk.f32.mxu0 %vm14651_vm2, %v14650_v52 }
0x4d79   :  { %13195 = vmatmul.mubr.msk.f32.vlgmr.msra.gmra.mxu1 %vm1048_vm3, %v10336_v7 }
0x4d7a   :  { %13204 = vmatprep.mubr.msk.f32.mxu1 %vm14651_vm2, %v14650_v52 }
0x4e31   :  { %v16335_v39 = vpop.f32.mrf.mxu0 }
0x4e33   :  { %v13181_v12 = vpop.f32.mrf.mxu0 }
0x4e35   :  { %v16337_v59 = vpop.f32.mrf.mxu1  ;;  %v10331_v61 = vpop.f32.mrf.mxu0 }
0x4e36   :  { %v10332_v9 = vadd.f32 %v10331_v61, %v15852_v25 }
0x4e37   :  { %v13186_v44 = vpop.f32.mrf.mxu1  ;;  %v13191_v10 = vpop.f32.mrf.mxu0 }
0x4e38   :  { %v10413_v11 = vsel %vm1048_vm3, %v10332_v9, -inf }
0x4e39   :  { %10414 = vmax.xlane.f32.xlu1 %v10413_v11  ;;  %v10409_v45 = vpop.f32.mrf.mxu1 }
0x4e3a   :  { %v10410_v35 = vadd.f32 %v10409_v45, %v15856_v40 }
0x4e3b   :  { %v13196_v5 = vpop.f32.mrf.mxu1 }
0x4e3c   :  { %v10416_v8 = vsel %vm1048_vm3, %v10410_v35, -inf }
0x4e3d   :  { %10417 = vmax.xlane.f32.xlu0 %v10416_v8 }
0x4e4a   :  { %10511 = vrot.lane.b32.xlu1 %v16256_v60, %s14654_s8 }
0x4e4e   :  { %10589 = vrot.lane.b32.xlu1 %v16271_v24, %s14658_s30 }
0x4e53   :  { %10435 = vrot.lane.b32.xlu0 %v16271_v24, %s14654_s8  ;;  %s16651_s8 = sld [smem:[#allocation106_spill]] }
0x4ec2   :  { %v10415_v13 = vpop.xlane.xlu1 %10414 }
0x4ec3   :  { %v10419_v16 = vsub.f32 %v10332_v9, %v10415_v13 }
0x4ec5   :  { %v10421_v55 = vmul.f32 1.442695, %v10419_v16 }
0x4ec6   :  { %v10512_v49 = vpop.permute.xlu1 %10511  ;;  %v10418_v50 = vpop.xlane.xlu0 %10417 }
0x4ec7   :  { %13645 = vpow2.f32 %v10421_v55  ;;  %v10420_v15 = vsub.f32 %v10410_v35, %v10418_v50  ;;  %13203 = vmatpush3.msra.mxu1 %v10512_v49 }
0x4ec8   :  { %13212 = vmatprep.subr.mxu1 %v14650_v52 }
0x4ec9   :  { %v10423_v14 = vmul.f32 1.442695, %v10420_v15 }
0x4eca   :  { %v10436_v17 = vpop.permute.xlu0 %10435  ;;  %v10590_v18 = vpop.permute.xlu1 %10589 }
0x4ecb   :  { %13647 = vpow2.f32 %v10423_v14  ;;  %13198 = vmatpush3.msra.mxu0 %v10436_v17 }
0x4ecc   :  { %13207 = vmatprep.subr.mxu0 %v14650_v52 }
0x4ed4   :  { %v13646_v23 = vpop.eup %13645 }
0x4ed5   :  { %v10425_v27 = vsel %vm1048_vm3, %v13646_v23, 0.0 }
0x4ed6   :  { %10426 = vadd.xlane.f32.xlu0 %v10425_v27 }
0x4ed8   :  { %v13648_v22 = vpop.eup %13647 }
0x4ed9   :  { %v10428_v29 = vsel %vm1048_vm3, %v13648_v22, 0.0 }
0x4eda   :  { %10429 = vadd.xlane.f32.xlu1 %v10428_v29 }
0x4eeb   :  { %10587 = vrot.lane.b32.xlu1 %v16282_v31, %s14658_s30 }
0x4eec   :  { %10667 = vrot.lane.b32.xlu0 %v16256_v60, %s14658_s30 }
0x4ef0   :  { %10665 = vrot.lane.b32.xlu0 %v16290_v56, %s14658_s30  ;;  %s14667_s30 = smov [#allocation59]  }
0x4f5f   :  { %v10427_v6 = vpop.xlane.xlu0 %10426 }
0x4f60   :  { %13649 = vrcp.f32 %v10427_v6 }
0x4f63   :  { %v10430_v26 = vpop.xlane.xlu1 %10429  ;;  %v10668_v19 = vpop.permute.xlu0 %10667 }
0x4f64   :  { %13651 = vrcp.f32 %v10430_v26 }
0x4f67   :  { %v10588_v21 = vpop.permute.xlu1 %10587  ;;  %v10666_v43 = vpop.permute.xlu0 %10665 }
0x4f6d   :  { %v13650_v2 = vpop.eup %13649 }
0x4f6e   :  { %v10432_v0 = vmul.f32 %v13650_v2, %v13646_v23 }
0x4f70   :  { %13200 = vmatmul.mubr.msk.f32.vlgmr.msra.gmra.mxu0 %vm1048_vm3, %v10432_v0  ;;  %11654 = vst.msk [vmem:[#allocation64 + $0x8] sm:$0xff] %vm1048_vm3, %v10432_v0 }
0x4f71   :  { %v13652_v36 = vpop.eup %13651  ;;  %13208 = vmatpush3.xpose.msk.msra.mxu0 %vm1048_vm3, %v10590_v18  ;;  %13209 = vmatprep.mubr.msk.f32.mxu0 %vm14651_vm2, %v14650_v52 }
0x4f72   :  { %v10434_v3 = vmul.f32 %v13652_v36, %v13648_v22  ;;  %13217 = vmatprep.subr.mxu0 %v14650_v52 }
0x4f74   :  { %11658 = vst.msk [vmem:[#allocation64 + $0x28] sm:$0xff] %vm1048_vm3, %v10434_v3  ;;  %13205 = vmatmul.mubr.msk.f32.vlgmr.msra.gmra.mxu1 %vm1048_vm3, %v10434_v3  ;;  %13210 = vmatmul.mubr.msk.f32.vlgmr.msra.gmra.mxu0 %vm1048_vm3, %v10588_v21 }
0x4f75   :  { %13213 = vmatpush3.xpose.msk.msra.mxu1 %vm1048_vm3, %v10668_v19  ;;  %13214 = vmatprep.mubr.msk.f32.mxu1 %vm14651_vm2, %v14650_v52 }
0x4f76   :  { %13222 = vmatprep.subr.mxu1 %v14650_v52  ;;  %13219 = vmatprep.mubr.msk.f32.mxu0 %vm14651_vm2, %v14650_v52 }
0x4f78   :  { %13215 = vmatmul.mubr.msk.f32.vlgmr.msra.gmra.mxu1 %vm1048_vm3, %v10666_v43 }
0x4f79   :  { %13224 = vmatprep.mubr.msk.f32.mxu1 %vm14651_vm2, %v14650_v52 }
0x5030   :  { %v16377_v46 = vpop.f32.mrf.mxu0 }
0x5032   :  { %v13201_v32 = vpop.f32.mrf.mxu0 }
0x5034   :  { %v16379_v47 = vpop.f32.mrf.mxu1  ;;  %v10661_v48 = vpop.f32.mrf.mxu0 }
0x5035   :  { %v10662_v53 = vadd.f32 %v10661_v48, %v15852_v25 }
0x5036   :  { %v13206_v54 = vpop.f32.mrf.mxu1  ;;  %v13211_v58 = vpop.f32.mrf.mxu0 }
0x5037   :  { %v10743_v42 = vsel %vm1048_vm3, %v10662_v53, -inf  ;;  %v11280_v58 = vld [vmem:[%s16650_s14 + $0x18] sm:$0xff] }
0x5038   :  { %10744 = vmax.xlane.f32.xlu1 %v10743_v42  ;;  %v10739_v37 = vpop.f32.mrf.mxu1  ;;  %v11279_v42 = vld [vmem:[%s16650_s14 + $0x10] sm:$0xff] }
0x5039   :  { %v10740_v62 = vadd.f32 %v10739_v37, %v15856_v40  ;;  %v11278_v37 = vld [vmem:[%s16650_s14 + $0x8] sm:$0xff] }
0x503a   :  { %v13216_v33 = vpop.f32.mrf.mxu1 }
0x503b   :  { %v10746_v34 = vsel %vm1048_vm3, %v10740_v62, -inf }
0x503c   :  { %10747 = vmax.xlane.f32.xlu0 %v10746_v34 }
0x5049   :  { %10841 = vrot.lane.b32.xlu1 %v16256_v60, %s14657_s2 }
0x504d   :  { %10919 = vrot.lane.b32.xlu1 %v16271_v24, %s14661_s19 }
0x5052   :  { %10765 = vrot.lane.b32.xlu0 %v16271_v24, %s14657_s2  ;;  %s16653_s2 = sld [smem:[#allocation140_spill]] }
0x50c1   :  { %v10745_v41 = vpop.xlane.xlu1 %10744 }
0x50c2   :  { %v10749_v1 = vsub.f32 %v10662_v53, %v10745_v41 }
0x50c4   :  { %v10751_v38 = vmul.f32 1.442695, %v10749_v1 }
0x50c5   :  { %v10842_v63 = vpop.permute.xlu1 %10841  ;;  %v10748_v51 = vpop.xlane.xlu0 %10747 }
0x50c6   :  { %13653 = vpow2.f32 %v10751_v38  ;;  %v10750_v4 = vsub.f32 %v10740_v62, %v10748_v51  ;;  %13223 = vmatpush3.msra.mxu1 %v10842_v63  ;;  %v11277_v62 = vld [vmem:[%s16650_s14] sm:$0xff] }
0x50c7   :  { %13232 = vmatprep.subr.mxu1 %v14650_v52 }
0x50c8   :  { %v10753_v7 = vmul.f32 1.442695, %v10750_v4 }
0x50c9   :  { %v10766_v12 = vpop.permute.xlu0 %10765  ;;  %v10920_v11 = vpop.permute.xlu1 %10919 }
0x50ca   :  { %13655 = vpow2.f32 %v10753_v7  ;;  %13218 = vmatpush3.msra.mxu0 %v10766_v12 }
0x50cb   :  { %13227 = vmatprep.subr.mxu0 %v14650_v52 }
0x50d3   :  { %v13654_v61 = vpop.eup %13653 }
0x50d4   :  { %v10755_v9 = vsel %vm1048_vm3, %v13654_v61, 0.0 }
0x50d5   :  { %10756 = vadd.xlane.f32.xlu0 %v10755_v9 }
0x50d7   :  { %v13656_v44 = vpop.eup %13655 }
0x50d8   :  { %v10758_v10 = vsel %vm1048_vm3, %v13656_v44, 0.0 }
0x50d9   :  { %10759 = vadd.xlane.f32.xlu1 %v10758_v10 }
0x50ea   :  { %10917 = vrot.lane.b32.xlu1 %v16282_v31, %s14661_s19 }
0x50eb   :  { %10997 = vrot.lane.b32.xlu0 %v16256_v60, %s14661_s19 }
0x50ef   :  { %10995 = vrot.lane.b32.xlu0 %v16290_v56, %s14661_s19  ;;  %s14668_s19 = smov [#allocation62]  }
0x50f0   :  { %s11796_s24 = sshll.u32 %s14668_s19, 4  ;;  %s11797_s24 = int_to_ptr.vmem [resolvable:$true] %s11796_s24 }
0x515e   :  { %v10757_v45 = vpop.xlane.xlu0 %10756 }
0x515f   :  { %13657 = vrcp.f32 %v10757_v45 }
0x5162   :  { %v10760_v35 = vpop.xlane.xlu1 %10759  ;;  %v10998_v16 = vpop.permute.xlu0 %10997 }
0x5163   :  { %13659 = vrcp.f32 %v10760_v35  ;;  %v12133_v35 = vld [vmem:[#allocation31] ss:$0 sm:$0xff] }
0x5166   :  { %v10918_v56 = vpop.permute.xlu1 %10917  ;;  %v10996_v55 = vpop.permute.xlu0 %10995 }
0x516c   :  { %v13658_v5 = vpop.eup %13657 }
0x516d   :  { %v10762_v8 = vmul.f32 %v13658_v5, %v13654_v61 }
0x516f   :  { %13220 = vmatmul.mubr.msk.f32.vlgmr.msra.gmra.mxu0 %vm1048_vm3, %v10762_v8  ;;  %11655 = vst.msk [vmem:[#allocation64 + $0x10] sm:$0xff] %vm1048_vm3, %v10762_v8 }
0x5170   :  { %v13660_v13 = vpop.eup %13659  ;;  %13228 = vmatpush3.xpose.msk.msra.mxu0 %vm1048_vm3, %v10920_v11  ;;  %13229 = vmatprep.mubr.msk.f32.mxu0 %vm14651_vm2, %v14650_v52 }
0x5171   :  { %v10764_v31 = vmul.f32 %v13660_v13, %v13656_v44  ;;  %13237 = vmatprep.subr.mxu0 %v14650_v52 }
0x5173   :  { %11659 = vst.msk [vmem:[#allocation64 + $0x30] sm:$0xff] %vm1048_vm3, %v10764_v31  ;;  %13225 = vmatmul.mubr.msk.f32.vlgmr.msra.gmra.mxu1 %vm1048_vm3, %v10764_v31  ;;  %13230 = vmatmul.mubr.msk.f32.vlgmr.msra.gmra.mxu0 %vm1048_vm3, %v10918_v56 }
0x5174   :  { %13233 = vmatpush3.xpose.msk.msra.mxu1 %vm1048_vm3, %v10998_v16  ;;  %13234 = vmatprep.mubr.msk.f32.mxu1 %vm14651_vm2, %v14650_v52 }
0x5175   :  { %13242 = vmatprep.subr.mxu1 %v14650_v52  ;;  %13239 = vmatprep.mubr.msk.f32.mxu0 %vm14651_vm2, %v14650_v52 }
0x5177   :  { %13235 = vmatmul.mubr.msk.f32.vlgmr.msra.gmra.mxu1 %vm1048_vm3, %v10996_v55 }
0x5178   :  { %13244 = vmatprep.mubr.msk.f32.mxu1 %vm14651_vm2, %v14650_v52 }
0x522f   :  { %v10837_v49 = vpop.f32.mrf.mxu0 }
0x5231   :  { %v13221_v50 = vpop.f32.mrf.mxu0 }
0x5233   :  { %v10913_v15 = vpop.f32.mrf.mxu1  ;;  %v10991_v14 = vpop.f32.mrf.mxu0 }
0x5234   :  { %v10992_v17 = vadd.f32 %v10991_v14, %v15852_v25 }
0x5235   :  { %v13226_v23 = vpop.f32.mrf.mxu1  ;;  %v13231_v27 = vpop.f32.mrf.mxu0 }
0x5236   :  { %v11073_v22 = vsel %vm1048_vm3, %v10992_v17, -inf }
0x5237   :  { %11074 = vmax.xlane.f32.xlu1 %v11073_v22  ;;  %v11069_v29 = vpop.f32.mrf.mxu1  ;;  %v11413_v22 = vld [vmem:[%s16651_s8 + $0x18] sm:$0xff] }
0x5238   :  { %v11070_v18 = vadd.f32 %v11069_v29, %v15856_v40  ;;  %v11412_v29 = vld [vmem:[%s16651_s8 + $0x10] sm:$0xff] }
0x5239   :  { %v13236_v6 = vpop.f32.mrf.mxu1 }
0x523a   :  { %v11076_v26 = vsel %vm1048_vm3, %v11070_v18, -inf  ;;  %v11410_v6 = vld [vmem:[%s16651_s8] sm:$0xff] }
0x523b   :  { %11077 = vmax.xlane.f32.xlu0 %v11076_v26  ;;  %v11515_v26 = vld [vmem:[%s16652_s1 + $0x38] sm:$0xff] }
0x52c0   :  { %v11075_v2 = vpop.xlane.xlu1 %11074 }
0x52c1   :  { %v11079_v52 = vsub.f32 %v10992_v17, %v11075_v2  ;;  %v11514_v2 = vld [vmem:[%s16652_s1 + $0x30] sm:$0xff] }
0x52c3   :  { %v11081_v0 = vmul.f32 1.442695, %v11079_v52  ;;  %v11513_v52 = vld [vmem:[%s16652_s1 + $0x28] sm:$0xff] }
0x52c4   :  { %v11078_v36 = vpop.xlane.xlu0 %11077 }
0x52c5   :  { %13661 = vpow2.f32 %v11081_v0  ;;  %v11080_v19 = vsub.f32 %v11070_v18, %v11078_v36  ;;  %v11411_v18 = vld [vmem:[%s16651_s8 + $0x8] sm:$0xff]  ;;  %v11512_v0 = vld [vmem:[%s16652_s1 + $0x20] sm:$0xff] }
0x52c7   :  { %v11083_v3 = vmul.f32 1.442695, %v11080_v19 }
0x52c9   :  { %13663 = vpow2.f32 %v11083_v3 }
0x52d2   :  { %v13662_v25 = vpop.eup %13661 }
0x52d3   :  { %v11085_v21 = vsel %vm1048_vm3, %v13662_v25, 0.0 }
0x52d4   :  { %11086 = vadd.xlane.f32.xlu0 %v11085_v21 }
0x52d6   :  { %v13664_v43 = vpop.eup %13663 }
0x52d7   :  { %v11088_v32 = vsel %vm1048_vm3, %v13664_v43, 0.0 }
0x52d8   :  { %11089 = vadd.xlane.f32.xlu1 %v11088_v32  ;;  %v11371_v32 = vld [vmem:[#allocation23] sm:$0x3] }
0x52e9   :  { %11171 = vrot.lane.b32.xlu1 %v16256_v60, %s14660_s0 }
0x52ea   :  { %11095 = vrot.lane.b32.xlu0 %v16271_v24, %s14660_s0  ;;  %s11772_s0 = sshll.u32 %s14667_s30, 4  ;;  %s11773_s0 = int_to_ptr.vmem [resolvable:$true] %s11772_s0 }
0x52eb   :  { %p14402_p13 = scmp.lt.s32.totalorder %s11773_s0, %s11773_s0 }
0x52ed   :  { %11249 = vrot.lane.b32.xlu1 %v16377_v46, %s14663_s7 }
0x52ee   :  { %11251 = vrot.lane.b32.xlu0 %v16379_v47, %s14663_s7 }
0x52f1   :  { %11257 = vrot.lane.b32.xlu1 %v10837_v49, %s14664_s9 }
0x52f2   :  { %11259 = vrot.lane.b32.xlu0 %v10913_v15, %s14664_s9  ;;  %s14397_s9 = scalar_lea.vmem %s11773_s0, 1024 }
0x52f3   :  { %p14398_p12 = scmp.ne.s32.totalorder %s11773_s0, %s14397_s9  ;;  %p14403_p0 = scmp.lt.s32.totalorder %s14397_s9, %s14397_s9 }
0x52f5   :  { %p14404_p1 = por %p14403_p0, %p14402_p13 }
0x52f7   :  { %p14405_p2 = pnand %p14404_p1, %p14398_p12 }
0x535d   :  { %v11087_v40 = vpop.xlane.xlu0 %11086 }
0x535e   :  { %13665 = vrcp.f32 %v11087_v40 }
0x5361   :  { %v11090_v48 = vpop.xlane.xlu1 %11089  ;;  %v11096_v53 = vpop.permute.xlu0 %11095 }
0x5362   :  { %13667 = vrcp.f32 %v11090_v48  ;;  %13238 = vmatpush3.msra.mxu0 %v11096_v53  ;;  %v11401_v48 = vrot.slane %v11371_v32, %v15097_v28 }
0x5363   :  { %13247 = vmatprep.subr.mxu0 %v11280_v58 }
0x5365   :  { %v11172_v60 = vpop.permute.xlu1 %11171  ;;  %v11252_v63 = vpop.permute.xlu0 %11251 }
0x5366   :  { %13243 = vmatpush3.msra.mxu1 %v11172_v60  ;;  %v11272_v44 = vsel %vm1048_vm3, %v16337_v59, %v11252_v63 }
0x5367   :  { %13258 = vmatprep.subr.mxu1 %v11413_v22 }
0x5369   :  { %v11250_v38 = vpop.permute.xlu1 %11249  ;;  %v11260_v7 = vpop.permute.xlu0 %11259 }
0x536a   :  { %v11271_v4 = vsel %vm1048_vm3, %v16335_v39, %v11250_v38  ;;  %v11274_v10 = vsel %vm2390_vm5, %v11272_v44, %v11260_v7 }
0x536b   :  { %v13666_v24 = vpop.eup %13665 }
0x536c   :  { %v11092_v46 = vmul.f32 %v13666_v24, %v13662_v25 }
0x536d   :  { %v11258_v51 = vpop.permute.xlu1 %11257 }
0x536e   :  { %13240 = vmatmul.mubr.msk.f32.vlgmr.msra.gmra.mxu0 %vm1048_vm3, %v11092_v46  ;;  %11656 = vst.msk [vmem:[#allocation64 + $0x18] sm:$0xff] %vm1048_vm3, %v11092_v46  ;;  %v11273_v12 = vsel %vm2390_vm5, %v11271_v4, %v11258_v51 }
0x536f   :  { %v13668_v47 = vpop.eup %13667  ;;  %13248 = vmatpush3.msra.mxu0 %v11280_v58 }
0x5370   :  { %v11094_v54 = vmul.f32 %v13668_v47, %v13664_v43  ;;  %13249 = vmatprep.subr.mxu0 %v11279_v42  ;;  %v11407_v47 = vrot.slane %v11371_v32, %v15099_v30 }
0x5371   :  { %13250 = vmatpush3.msra.mxu0 %v11279_v42 }
0x5372   :  { %11660 = vst.msk [vmem:[#allocation64 + $0x38] sm:$0xff] %vm1048_vm3, %v11094_v54  ;;  %13245 = vmatmul.mubr.msk.f32.vlgmr.msra.gmra.mxu1 %vm1048_vm3, %v11094_v54  ;;  %13251 = vmatprep.subr.mxu0 %v11278_v37 }
0x5373   :  { %13252 = vmatpush3.msra.mxu0 %v11278_v37  ;;  %13259 = vmatpush3.msra.mxu1 %v11413_v22  ;;  %v11511_v37 = vld [vmem:[%s16652_s1 + $0x18] sm:$0xff] }
0x5374   :  { %13253 = vmatprep.subr.mxu0 %v11277_v62  ;;  %13260 = vmatprep.subr.mxu1 %v11412_v29 }
0x5375   :  { %13254 = vmatpush3.msra.mxu0 %v11277_v62  ;;  %13261 = vmatpush3.msra.mxu1 %v11412_v29  ;;  %v11510_v62 = vld [vmem:[%s16652_s1 + $0x10] sm:$0xff] }
0x5376   :  { %13262 = vmatprep.subr.mxu1 %v11411_v18  ;;  %13269 = vmatprep.subr.mxu0 %v11515_v26 }
0x5377   :  { %13263 = vmatpush3.msra.mxu1 %v11411_v18 }
0x5378   :  { %13264 = vmatprep.subr.mxu1 %v11410_v6 }
0x5379   :  { %13265 = vmatpush3.msra.mxu1 %v11410_v6 }
0x542e   :  { %v11167_v33 = vpop.f32.mrf.mxu0 }
0x542f   :  { %11265 = vrot.lane.b32.xlu1 %v11167_v33, %s14665_s17  ;;  %v11509_v33 = vld [vmem:[%s16652_s1 + $0x8] sm:$0xff] }
0x5430   :  { %v13241_v34 = vpop.f32.mrf.mxu0 }
0x5431   :  { %v11508_v34 = vld [vmem:[%s16652_s1] sm:$0xff] }
0x5432   :  { %v11243_v41 = vpop.f32.mrf.mxu1 }
0x5433   :  { %11267 = vrot.lane.b32.xlu0 %v11243_v41, %s14665_s17  ;;  %v12136_v41 = vld [vmem:[#allocation19] ss:$0 sm:$0xff] }
0x5434   :  { %v13246_v1 = vpop.f32.mrf.mxu1 }
0x54a1   :  { %v11266_v61 = vpop.permute.xlu1 %11265 }
0x54a2   :  { %v11275_v9 = vsel %vm2393_vm4, %v11273_v12, %v11266_v61 }
0x54a3   :  { %13255 = vmatprep.mubr.msk.f32.mxu0 %vm859_vm1, %v11275_v9  ;;  %v12139_v9 = vld [vmem:[#allocation20] ss:$0 sm:$0xff] }
0x54a5   :  { %v11268_v11 = vpop.permute.xlu0 %11267 }
0x54a6   :  { %v11276_v45 = vsel %vm2393_vm4, %v11274_v10, %v11268_v11 }
0x54a7   :  { %13256 = vmatmul.mubr.msk.f32.vlgmr.msra.gmra.mxu0 %vm859_vm1, %v11276_v45 }
0x54a8   :  { %13270 = vmatpush3.msra.mxu0 %v11515_v26 }
0x54a9   :  { %13271 = vmatprep.subr.mxu0 %v11514_v2 }
0x54aa   :  { %13272 = vmatpush3.msra.mxu0 %v11514_v2  ;;  %v11606_v2 = vld [vmem:[#allocation25] sm:$0x3] }
0x54ab   :  { %13273 = vmatprep.subr.mxu0 %v11513_v52 }
0x54ac   :  { %13274 = vmatpush3.msra.mxu0 %v11513_v52 }
0x54ad   :  { %13275 = vmatprep.subr.mxu0 %v11512_v0 }
0x54ae   :  { %13276 = vmatpush3.msra.mxu0 %v11512_v0  ;;  %v11636_v0 = vrot.slane %v11606_v2, %v15097_v28 }
0x54af   :  { %13277 = vmatprep.subr.mxu0 %v11511_v37 }
0x54b0   :  { %13278 = vmatpush3.msra.mxu0 %v11511_v37 }
0x54b1   :  { %13279 = vmatprep.subr.mxu0 %v11510_v62 }
0x54b2   :  { %13280 = vmatpush3.msra.mxu0 %v11510_v62 }
0x54b3   :  { %13281 = vmatprep.subr.mxu0 %v11509_v33 }
0x54b4   :  { %13282 = vmatpush3.msra.mxu0 %v11509_v33 }
0x54b5   :  { %13283 = vmatprep.subr.mxu0 %v11508_v34 }
0x54b6   :  { %13284 = vmatpush3.msra.mxu0 %v11508_v34 }
0x5567   :  { %v13257_v39 = vpop.f32.mrf.mxu0 }
0x5568   :  { %v11366_v5 = vadd.f32 %v13257_v39, %v12133_v35 }
0x5569   :  { %v11360_v8 = vpop.f32.mrf.mxu0 }
0x556a   :  { %v11370_v13 = vadd.f32 %v11366_v5, %v16269_v57  ;;  %v11361_v16 = vadd.f32 %v12133_v35, %v11360_v8 }
0x556c   :  { %v11369_v31 = vadd.f32 %v11361_v16, %v16267_v20  ;;  %v11375_v56 = vsel %vm859_vm1, %v11370_v13, 0.0 }
0x556d   :  { %11376 = vadd.xlane.f32.xlu0 %v11375_v56 }
0x556e   :  { %v11372_v59 = vsel %vm859_vm1, %v11369_v31, 0.0 }
0x556f   :  { %11373 = vadd.xlane.f32.xlu1 %v11372_v59 }
0x55f6   :  { %v11377_v55 = vpop.xlane.xlu0 %11376 }
0x55f7   :  { %v11379_v49 = vmul.f32 0.03125, %v11377_v55 }
0x55f8   :  { %v11374_v50 = vpop.xlane.xlu1 %11373 }
0x55f9   :  { %v11381_v15 = vsub.f32 %v11370_v13, %v11379_v49  ;;  %v11378_v14 = vmul.f32 0.03125, %v11374_v50 }
0x55fb   :  { %v11380_v17 = vsub.f32 %v11369_v31, %v11378_v14  ;;  %v11383_v57 = vmul.f32 %v11381_v15, %v11381_v15 }
0x55fd   :  { %v11387_v23 = vsel %vm859_vm1, %v11383_v57, 0.0  ;;  %v11382_v20 = vmul.f32 %v11380_v17, %v11380_v17  ;;  %v11663_v57 = vld [vmem:[%s16653_s2 + $0x10] sm:$0xff] }
0x55fe   :  { %11388 = vadd.xlane.f32.xlu1 %v11387_v23  ;;  %v11662_v23 = vld [vmem:[%s16653_s2 + $0x8] sm:$0xff] }
0x55ff   :  { %v11384_v27 = vsel %vm859_vm1, %v11382_v20, 0.0  ;;  %v11661_v20 = vld [vmem:[%s16653_s2] sm:$0xff] }
0x5600   :  { %11385 = vadd.xlane.f32.xlu0 %v11384_v27 }
0x5687   :  { %v11389_v36 = vpop.xlane.xlu1 %11388 }
0x5688   :  { %v11391_v19 = vmul.f32 0.03125, %v11389_v36 }
0x5689   :  { %v11386_v3 = vpop.xlane.xlu0 %11385 }
0x568a   :  { %v11393_v25 = vadd.f32 1e-05, %v11391_v19  ;;  %v11390_v21 = vmul.f32 0.03125, %v11386_v3 }
0x568c   :  { %13669 = vrsqrt.f32 %v11393_v25  ;;  %v11392_v43 = vadd.f32 1e-05, %v11390_v21  ;;  %v11642_v21 = vrot.slane %v11606_v2, %v15099_v30 }
0x568e   :  { %13671 = vrsqrt.f32 %v11392_v43 }
0x5699   :  { %v13670_v40 = vpop.eup %13669 }
0x569a   :  { %v11397_v53 = vmul.f32 %v13670_v40, %v11381_v15 }
0x569b   :  { %v13672_v60 = vpop.eup %13671 }
0x569c   :  { %v11396_v24 = vmul.f32 %v13672_v60, %v11380_v17  ;;  %v11403_v46 = vmul.f32 %v11401_v48, %v11397_v53  ;;  %v11664_v17 = vld [vmem:[%s16653_s2 + $0x18] sm:$0xff] }
0x569d   :  { %13288 = vmatprep.subr.mxu1 %v11664_v17 }
0x569e   :  { %v11402_v54 = vmul.f32 %v11401_v48, %v11396_v24  ;;  %v11409_v42 = vadd.f32 %v11407_v47, %v11403_v46 }
0x56a0   :  { %v11408_v58 = vadd.f32 %v11407_v47, %v11402_v54 }
0x56a2   :  { %13266 = vmatprep.mubr.msk.f32.mxu1 %vm859_vm1, %v11408_v58 }
0x56a3   :  { %13267 = vmatmul.mubr.msk.f32.vlgmr.msra.gmra.mxu1 %vm859_vm1, %v11409_v42 }
0x56a4   :  { %13289 = vmatpush3.msra.mxu1 %v11664_v17 }
0x56a5   :  { %13290 = vmatprep.subr.mxu1 %v11663_v57 }
0x56a6   :  { %13291 = vmatpush3.msra.mxu1 %v11663_v57 }
0x56a7   :  { %13292 = vmatprep.subr.mxu1 %v11662_v23 }
0x56a8   :  { %13293 = vmatpush3.msra.mxu1 %v11662_v23 }
0x56a9   :  { %13294 = vmatprep.subr.mxu1 %v11661_v20 }
0x56aa   :  { %13295 = vmatpush3.msra.mxu1 %v11661_v20 }
0x5763   :  { %v13268_v1 = vpop.f32.mrf.mxu1 }
0x5764   :  { %v11499_v38 = vadd.f32 %v13268_v1, %v12136_v41 }
0x5765   :  { %v11493_v63 = vpop.f32.mrf.mxu1 }
0x5766   :  { %v11494_v51 = vadd.f32 %v12136_v41, %v11493_v63  ;;  %v11505_v4 = vmul.f32 0.2, %v11499_v38  ;;  %vm11503_vm0 = vcmp.gt.f32.partialorder %v11499_v38, 0.0 }
0x5768   :  { %vm11502_vm2 = vcmp.gt.f32.partialorder %v11494_v51, 0.0  ;;  %v11504_v7 = vmul.f32 0.2, %v11494_v51  ;;  %v11507_v61 = vsel %vm11503_vm0, %v11499_v38, %v11505_v4 }
0x576a   :  { %v11506_v12 = vsel %vm11502_vm2, %v11494_v51, %v11504_v7 }
0x576b   :  { %13285 = vmatprep.mubr.msk.f32.mxu0 %vm2642_vm8, %v11506_v12 }
0x576c   :  { %13286 = vmatmul.mubr.msk.f32.vlgmr.msra.gmra.mxu0 %vm2642_vm8, %v11507_v61 }
0x582c   :  { %v13287_v44 = vpop.f32.mrf.mxu0 }
0x582d   :  { %v11601_v10 = vadd.f32 %v13287_v44, %v12139_v9 }
0x582e   :  { %v11595_v11 = vpop.f32.mrf.mxu0 }
0x582f   :  { %v11605_v45 = vadd.f32 %v11601_v10, %v11409_v42  ;;  %v11596_v35 = vadd.f32 %v12139_v9, %v11595_v11 }
0x5831   :  { %v11604_v39 = vadd.f32 %v11596_v35, %v11408_v58  ;;  %v11610_v5 = vsel %vm859_vm1, %v11605_v45, 0.0 }
0x5832   :  { %11611 = vadd.xlane.f32.xlu1 %v11610_v5 }
0x5833   :  { %v11607_v8 = vsel %vm859_vm1, %v11604_v39, 0.0 }
0x5834   :  { %11608 = vadd.xlane.f32.xlu0 %v11607_v8 }
0x58bb   :  { %v11612_v13 = vpop.xlane.xlu1 %11611 }
0x58bc   :  { %v11614_v16 = vmul.f32 0.03125, %v11612_v13 }
0x58bd   :  { %v11609_v31 = vpop.xlane.xlu0 %11608 }
0x58be   :  { %v11616_v56 = vsub.f32 %v11605_v45, %v11614_v16  ;;  %v11613_v59 = vmul.f32 0.03125, %v11609_v31 }
0x58c0   :  { %v11615_v55 = vsub.f32 %v11604_v39, %v11613_v59  ;;  %v11618_v49 = vmul.f32 %v11616_v56, %v11616_v56 }
0x58c2   :  { %v11622_v50 = vsel %vm859_vm1, %v11618_v49, 0.0  ;;  %v11617_v15 = vmul.f32 %v11615_v55, %v11615_v55 }
0x58c3   :  { %11623 = vadd.xlane.f32.xlu1 %v11622_v50 }
0x58c4   :  { %v11619_v14 = vsel %vm859_vm1, %v11617_v15, 0.0 }
0x58c5   :  { %11620 = vadd.xlane.f32.xlu0 %v11619_v14 }
0x594c   :  { %v11624_v27 = vpop.xlane.xlu1 %11623 }
0x594d   :  { %v11626_v22 = vmul.f32 0.03125, %v11624_v27 }
0x594e   :  { %v11621_v29 = vpop.xlane.xlu0 %11620 }
0x594f   :  { %v11628_v18 = vadd.f32 1e-05, %v11626_v22  ;;  %v11625_v6 = vmul.f32 0.03125, %v11621_v29 }
0x5951   :  { %13673 = vrsqrt.f32 %v11628_v18  ;;  %v11627_v26 = vadd.f32 1e-05, %v11625_v6 }
0x5953   :  { %13675 = vrsqrt.f32 %v11627_v26 }
0x595e   :  { %v13674_v52 = vpop.eup %13673 }
0x595f   :  { %v11632_v36 = vmul.f32 %v13674_v52, %v11616_v56 }
0x5960   :  { %v13676_v19 = vpop.eup %13675 }
0x5961   :  { %v11631_v3 = vmul.f32 %v13676_v19, %v11615_v55  ;;  %v11638_v25 = vmul.f32 %v11636_v0, %v11632_v36 }
0x5963   :  { %v11637_v43 = vmul.f32 %v11636_v0, %v11631_v3  ;;  %v11644_v40 = vadd.f32 %v11642_v21, %v11638_v25 }
0x5965   :  { %v11643_v32 = vadd.f32 %v11642_v21, %v11637_v43 }
0x5967   :  { %13296 = vmatprep.mubr.msk.f32.mxu1 %vm859_vm1, %v11643_v32 }
0x5968   :  { %13297 = vmatmul.mubr.msk.f32.vlgmr.msra.gmra.mxu1 %vm859_vm1, %v11644_v40 }
0x5969   :  { %14408 = shalt.err (!%p14405_p2)
}
0x596a   :  { %s14669_s17 = smov 128   ;;  %s14417_s4 = scalar_lea.vmem %s11797_s24, 1024 }
0x596b   :  { %11778 = dma.vmem_to_hbm [thread:$0]  %s11773_s0, 1024, %s15031_s12, [#allocation60], %s14669_s17, %s14669_s17, %s14663_s7  }
0x596c   :  { %p14418_p3 = scmp.ne.s32.totalorder %s11797_s24, %s14417_s4  ;;  %p14422_p4 = scmp.lt.s32.totalorder %s11797_s24, %s11797_s24 }
0x596d   :  { %p14423_p5 = scmp.lt.s32.totalorder %s14417_s4, %s14417_s4 }
0x596f   :  { %p14424_p6 = por %p14423_p5, %p14422_p4 }
0x5971   :  { %p14425_p7 = pnand %p14424_p6, %p14418_p3 }
0x5973   :  { %14428 = shalt.err (!%p14425_p7)
}
0x5974   :  { %11802 = dma.vmem_to_hbm [thread:$0]  %s11797_s24, 1024, %s15041_s29, [#allocation63], %s14669_s17, %s14669_s17, %s14663_s7  }
0x5975   :  { %s14670_s22 = smov [#allocation61]  }
0x5976   :  { %s11784_s23 = sshll.u32 %s14670_s22, 4  ;;  %s11785_s23 = int_to_ptr.vmem [resolvable:$true] %s11784_s23 }
0x5977   :  { %s14437_s26 = scalar_lea.vmem %s11785_s23, 1024  ;;  %p14442_p9 = scmp.lt.s32.totalorder %s11785_s23, %s11785_s23 }
0x5978   :  { %p14438_p8 = scmp.ne.s32.totalorder %s11785_s23, %s14437_s26  ;;  %p14443_p10 = scmp.lt.s32.totalorder %s14437_s26, %s14437_s26 }
0x597a   :  { %p14444_p11 = por %p14443_p10, %p14442_p9 }
0x597c   :  { %p14445_p12 = pnand %p14444_p11, %p14438_p8 }
0x597e   :  { %14448 = shalt.err (!%p14445_p12)
}
0x597f   :  { %11790 = dma.vmem_to_hbm [thread:$0]  %s11785_s23, 1024, %s15036_s13, [#allocation60], %s14669_s17, %s14669_s17, %s14663_s7  }
0x5980   :  { %s14671_s12 = smov [#allocation64]  }
0x5981   :  { %s11808_s27 = sshll.u32 %s14671_s12, 4  ;;  %s11809_s27 = int_to_ptr.vmem [resolvable:$true] %s11808_s27 }
0x5982   :  { %s14457_s10 = scalar_lea.vmem %s11809_s27, 1024  ;;  %p14462_p0 = scmp.lt.s32.totalorder %s11809_s27, %s11809_s27 }
0x5983   :  { %p14458_p13 = scmp.ne.s32.totalorder %s11809_s27, %s14457_s10  ;;  %p14463_p1 = scmp.lt.s32.totalorder %s14457_s10, %s14457_s10 }
0x5985   :  { %p14464_p2 = por %p14463_p1, %p14462_p0 }
0x5987   :  { %p14465_p3 = pnand %p14464_p2, %p14458_p13 }
0x5989   :  { %14468 = shalt.err (!%p14465_p3)
}
0x598a   :  { %11814 = dma.vmem_to_hbm [thread:$0]  %s11809_s27, 1024, %s15046_s20, [#allocation63], %s14669_s17, %s14669_s17, %s14663_s7   ;;  %v12142_v28 = vld [vmem:[#allocation56] ss:$0 sm:$0xff] }
0x598b   :  { %s14672_s29 = smov [#allocation58]  }
0x598c   :  { %s11760_s11 = sshll.u32 %s14672_s29, 4  ;;  %s11761_s11 = int_to_ptr.vmem [resolvable:$true] %s11760_s11 }
0x598d   :  { %s14477_s13 = scalar_lea.vmem %s11761_s11, 256  ;;  %p14482_p5 = scmp.lt.s32.totalorder %s11761_s11, %s11761_s11 }
0x598e   :  { %p14478_p4 = scmp.ne.s32.totalorder %s11761_s11, %s14477_s13  ;;  %p14483_p6 = scmp.lt.s32.totalorder %s14477_s13, %s14477_s13 }
0x5990   :  { %p14484_p7 = por %p14483_p6, %p14482_p5 }
0x5992   :  { %p14485_p8 = pnand %p14484_p7, %p14478_p4 }
0x5a28   :  { %v13298_v30 = vpop.f32.mrf.mxu1 }
0x5a29   :  { %v11750_v48 = vadd.f32 %v13298_v30, %v12142_v28 }
0x5a2a   :  { %v11744_v53 = vpop.f32.mrf.mxu1 }
0x5a2b   :  { %11754 = vst.msk [vmem:[#allocation58 + $0x8] sm:$0xff] %vm4594_vm10, %v11750_v48  ;;  %v11745_v60 = vadd.f32 %v12142_v28, %v11744_v53 }
0x5a2d   :  { %11753 = vst.msk [vmem:[#allocation58] sm:$0xff] %vm4594_vm10, %v11745_v60 }
0x5a2e   :  { %14488 = shalt.err (!%p14485_p8)
}
0x5a2f   :  { %s16654_s20 = sld [smem:[#allocation142_spill]] }
0x5a35   :  { %11766 = dma.vmem_to_hbm [thread:$0]  %s11761_s11, 256, %s16654_s20, [#allocation4], %s14669_s17, %s14669_s17, %s14663_s7  }
0x5a36   :  { %14535 = dma.done.wait [#allocation4], 256  }
0x5a37   :  { %14536 = vsyncadd [#allocation4], 4294967040 }
0x5a38   :  { %14537 = dma.done.wait [#allocation60], 2048  }
0x5a39   :  { %14538 = vsyncadd [#allocation60], 4294965248 }
0x5a3a   :  { %14539 = dma.done.wait [#allocation63], 2048  }
0x5a3b   :  { %14540 = vsyncadd [#allocation63], 4294965248 }
0x5a3c   :  { %11830 = vsyncpa [#allocation3], 1 }
0x5a3d   :  { %11831 = vsyncpa [#allocation6], 1 }
0x5a3e   :  { %11832 = vsyncpa [#allocation9], 1 }
0x5a3f   :  { %11833 = vsyncpa [#allocation12], 1 }
0x5a40   :  { %11834 = vsyncpa [#allocation15], 1 }
0x5a41   :  { %11835 = vsyncpa [#allocation18], 1 }
0x5a42   :  { %11836 = vsyncpa [#allocation21], 1 }
0x5a43   :  { %11837 = vsyncpa [#allocation24], 1 }
0x5a44   :  { %11838 = vsyncpa [#allocation27], 1 }
0x5a45   :  { %11839 = vsyncpa [#allocation30], 1 }
0x5a46   :  { %11840 = vsyncpa [#allocation33], 1 }
0x5a47   :  { %11841 = vsyncpa [#allocation36], 1 }
0x5a48   :  { %11842 = vsyncpa [#allocation39], 1 }
0x5a49   :  { %11843 = vsyncpa [#allocation42], 1 }
0x5a4a   :  { %11844 = vsyncpa [#allocation45], 1 }
0x5a4b   :  { %11845 = vsyncpa [#allocation48], 1 }
0x5a4c   :  { %11846 = vsyncpa [#allocation51], 1 }
0x5a4d   :  { %11847 = vsyncpa [#allocation54], 1 }
0x5a4e   :  { %11848 = vsyncpa [#allocation57], 1 }
0x5a4f   :  { %11849 = vsyncpa [#allocation4], 1 }
0x5a50   :  { %11850 = vsyncpa [#allocation60], 1 }
0x5a51   :  { %11851 = vsyncpa [#allocation63], 1 }

</bundles_post_ra>
